<compile_context>
chip_gen: v7x
topology: tpu7x:2x2x1
jax: 0.10.0
libtpu: 0.0.40
codegen_flags: <defaults>
</compile_context>

<pallas_src>
import functools

import numpy as np
import jax
import jax.numpy as jnp
from jax.experimental import pallas as pl
from jax.experimental.pallas import tpu as pltpu


# ----------------------------- Pallas kernels ------------------------------

def _head_kernel(x_ref, w_ref, b_ref, o_ref):
    # ReLU( x @ W + b )   (1x1 conv, 3->64; K padded 3->8 with zeros, exact)
    x = x_ref[...].astype(jnp.bfloat16)
    y = jnp.dot(x, w_ref[...], preferred_element_type=jnp.float32) + b_ref[...]
    o_ref[...] = jnp.maximum(y, 0.0).astype(o_ref.dtype)


def _tail_kernel(f4_ref, fh_ref, w_ref, b_ref, o_ref):
    # Sigmoid( (fea_4 + fea_head) @ W + b )   (skip add fused; Cout padded 3->8, sliced outside)
    s = (f4_ref[...] + fh_ref[...]).astype(jnp.bfloat16)
    y = jnp.dot(s, w_ref[...], preferred_element_type=jnp.float32) + b_ref[...]
    o_ref[...] = (1.0 / (1.0 + jnp.exp(-y))).astype(o_ref.dtype)


def _resblock_kernel(f_ref, clo_ref, chi_ref,
                     cft_wa_ref, cft_ba_ref, cft_wb_ref, cft_bb_ref,
                     conv_w_ref, conv_b_ref,
                     o_ref, pad_ref, *, H, W):
    """One full ResBlock_CFT for one image, entirely in VMEM.

    f_ref:   (1, H*W, 64) f32   feature
    clo_ref: (1, H*W, 32) bf16  condition[:, :32]
    chi_ref: (1, H*W, 32) bf16  condition[:, 32:]
    cft_w*/cft_b*: packed CFT 1x1-conv weights, order [scale0, shift0, scale1, shift1]
    conv_w_ref: (18, 64, 64) bf16  two 3x3 convs, taps flattened (conv_idx*9 + kh*3 + kw)
    pad_ref: VMEM scratch (H+2, W+2, 64) f32 (zero-padded image for the 3x3 convs)
    """
    HW = H * W
    fea_in = f_ref[0]            # (HW, 64) f32
    c_lo = clo_ref[0]            # (HW, 32) bf16
    c_hi = chi_ref[0]            # (HW, 32) bf16

    def cft(c_bf16, idx):
        # Conv1x1(32->32) -> LeakyReLU(0.1) -> Conv1x1(32->64)
        h = jnp.dot(c_bf16, cft_wa_ref[idx], preferred_element_type=jnp.float32)
        h = h + cft_ba_ref[pl.ds(idx, 1), :]
        h = jnp.maximum(h, 0.1 * h)                       # LeakyReLU(0.1)
        s = jnp.dot(h.astype(jnp.bfloat16), cft_wb_ref[idx],
                    preferred_element_type=jnp.float32)
        return s + cft_bb_ref[pl.ds(idx, 1), :]           # (HW, 64) f32

    def conv3x3(x_f32, idx):
        # Zero-pad into VMEM scratch, then 9 shifted-slice matmuls (fused im2col).
        pad_ref[...] = jnp.zeros_like(pad_ref)
        pad_ref[pl.ds(1, H), pl.ds(1, W), :] = x_f32.reshape(H, W, 64)
        acc = jnp.zeros((HW, 64), jnp.float32)
        for t in range(9):
            di, dj = divmod(t, 3)
            tap = pad_ref[pl.ds(di, H), pl.ds(dj, W), :]   # (H, W, 64) f32
            acc = acc + jnp.dot(tap.reshape(HW, 64).astype(jnp.bfloat16),
                                conv_w_ref[idx * 9 + t],
                                preferred_element_type=jnp.float32)
        return acc + conv_b_ref[pl.ds(idx, 1), :]

    fea = fea_in * (cft(c_lo, 0) + 1.0) + cft(c_lo, 1)     # CFT0
    fea = jnp.maximum(conv3x3(fea, 0), 0.0)                # conv0 (3x3) + ReLU
    fea = fea * (cft(c_hi, 2) + 1.0) + cft(c_hi, 3)        # CFT1
    fea = conv3x3(fea, 1)                                  # conv1 (3x3)
    o_ref[0] = (fea + fea_in).astype(o_ref.dtype)          # residual


# ------------------------------ kernel wrappers -----------------------------

def _pick_tile(m, cap=256):
    # cap=256 keeps >=2 grid steps for M>=512 (v7x megacore).
    # TODO(synk): masked tail (pl.cdiv grid) for M not divisible by 8.
    for t in (cap, 128, 64, 32, 16, 8):
        if m % t == 0:
            return t
    return m


def head_conv(x8, w, b):
    """x8: (M, 8) f32 (channels 3 zero-padded to 8); w: (8, 64) bf16; b: (1, 64) f32."""
    M = x8.shape[0]
    tm = _pick_tile(M)
    return pl.pallas_call(
        _head_kernel,
        out_shape=jax.ShapeDtypeStruct((M, 64), jnp.float32),
        grid=(M // tm,),
        in_specs=[pl.BlockSpec((tm, 8), lambda i: (i, 0)),
                  pl.BlockSpec((8, 64), lambda i: (0, 0)),
                  pl.BlockSpec((1, 64), lambda i: (0, 0))],
        out_specs=pl.BlockSpec((tm, 64), lambda i: (i, 0)),
        compiler_params=pltpu.CompilerParams(dimension_semantics=("parallel",)),
    )(x8, w, b)


def tail_conv(f4, fh, w, b):
    """f4, fh: (M, 64) f32; w: (64, 8) bf16 (Cout 3 padded to 8); b: (1, 8) f32."""
    M = f4.shape[0]
    tm = _pick_tile(M)
    return pl.pallas_call(
        _tail_kernel,
        out_shape=jax.ShapeDtypeStruct((M, 8), jnp.float32),
        grid=(M // tm,),
        in_specs=[pl.BlockSpec((tm, 64), lambda i: (i, 0)),
                  pl.BlockSpec((tm, 64), lambda i: (i, 0)),
                  pl.BlockSpec((64, 8), lambda i: (0, 0)),
                  pl.BlockSpec((1, 8), lambda i: (0, 0))],
        out_specs=pl.BlockSpec((tm, 8), lambda i: (i, 0)),
        compiler_params=pltpu.CompilerParams(dimension_semantics=("parallel",)),
    )(f4, fh, w, b)


def resblock_cft(fea, c_lo, c_hi, blk, H, W):
    """fea: (N, H*W, 64) f32; c_lo/c_hi: (N, H*W, 32) bf16. One fused kernel per image."""
    N, HW, _ = fea.shape
    kernel = functools.partial(_resblock_kernel, H=H, W=W)
    return pl.pallas_call(
        kernel,
        out_shape=jax.ShapeDtypeStruct((N, HW, 64), jnp.float32),
        grid=(N,),
        in_specs=[
            pl.BlockSpec((1, HW, 64), lambda n: (n, 0, 0)),   # feature
            pl.BlockSpec((1, HW, 32), lambda n: (n, 0, 0)),   # cond low half
            pl.BlockSpec((1, HW, 32), lambda n: (n, 0, 0)),   # cond high half
            pl.BlockSpec((4, 32, 32), lambda n: (0, 0, 0)),   # CFT stage-a weights
            pl.BlockSpec((4, 32), lambda n: (0, 0)),          # CFT stage-a biases
            pl.BlockSpec((4, 32, 64), lambda n: (0, 0, 0)),   # CFT stage-b weights
            pl.BlockSpec((4, 64), lambda n: (0, 0)),          # CFT stage-b biases
            pl.BlockSpec((18, 64, 64), lambda n: (0, 0, 0)),  # 2x 3x3 conv weights
            pl.BlockSpec((2, 64), lambda n: (0, 0)),          # 2x conv biases
        ],
        out_specs=pl.BlockSpec((1, HW, 64), lambda n: (n, 0, 0)),
        scratch_shapes=[pltpu.VMEM((H + 2, W + 2, 64), jnp.float32)],
        compiler_params=pltpu.CompilerParams(dimension_semantics=("parallel",)),
    )(fea, c_lo, c_hi,
      blk['cft_wa'], blk['cft_ba'], blk['cft_wb'], blk['cft_bb'],
      blk['conv_w'], blk['conv_b'])


# ------------------------------- parameters --------------------------------

def _winit(key, shape, fan_in):
    return (jax.random.normal(key, shape, jnp.float32) / np.sqrt(fan_in)).astype(jnp.bfloat16)


def _binit(key, shape):
    return 0.01 * jax.random.normal(key, shape, jnp.float32)


def init_params(key):
    keys = iter(jax.random.split(key, 32))
    # head: Conv2d(3, 64, 1x1); K padded 3->8 with zero rows (exact).
    w_head = jax.random.normal(next(keys), (3, 64), jnp.float32) / np.sqrt(3.0)
    w_head = jnp.pad(w_head, ((0, 5), (0, 0))).astype(jnp.bfloat16)
    # tail: Conv2d(64, 3, 1x1); Cout padded 3->8 with zero cols (sliced after sigmoid).
    w_tail = jax.random.normal(next(keys), (64, 3), jnp.float32) / np.sqrt(64.0)
    w_tail = jnp.pad(w_tail, ((0, 0), (0, 5))).astype(jnp.bfloat16)
    b_tail = jnp.pad(_binit(next(keys), (1, 3)), ((0, 0), (0, 5)))

    params = {
        'head_w': w_head,
        'head_b': _binit(next(keys), (1, 64)),
        'tail_w': w_tail,
        'tail_b': b_tail,
    }
    for i in range(4):
        params[f'block{i}'] = {
            # CFT 1x1 convs, packed order [scale0, shift0, scale1, shift1]
            'cft_wa': _winit(next(keys), (4, 32, 32), 32),
            'cft_ba': _binit(next(keys), (4, 32)),
            'cft_wb': _winit(next(keys), (4, 32, 64), 32),
            'cft_bb': _binit(next(keys), (4, 64)),
            # two 3x3 convs (64->64); taps flattened (conv_idx*9 + kh*3 + kw), (cin, cout)
            'conv_w': _winit(next(keys), (2 * 9, 64, 64), 9 * 64),
            'conv_b': _binit(next(keys), (2, 64)),
        }
    return params


# -------------------------------- forward ----------------------------------

def rendering_net_forward(params, x, condition):
    """x: (N, 3, H, W); condition: (N, 256, H, W) — PyTorch NCHW. Returns (N, 3, H, W)."""
    N, _, H, W = x.shape
    HW = H * W

    x_f = jnp.transpose(x, (0, 2, 3, 1)).reshape(N * HW, 3).astype(jnp.float32)
    x_f = jnp.pad(x_f, ((0, 0), (0, 5)))                    # 3 -> 8 channels (zeros, exact)
    # Condition only feeds MXU matmuls: cast once to bf16 (halves HBM traffic of biggest input).
    cond = jnp.transpose(condition, (0, 2, 3, 1)).reshape(N, HW, 256).astype(jnp.bfloat16)

    fea_head = head_conv(x_f, params['head_w'], params['head_b'])      # (N*HW, 64) f32

    fea = fea_head.reshape(N, HW, 64)
    for i in range(4):
        c_lo = cond[:, :, 64 * i:64 * i + 32]
        c_hi = cond[:, :, 64 * i + 32:64 * i + 64]
        fea = resblock_cft(fea, c_lo, c_hi, params[f'block{i}'], H, W)

    out8 = tail_conv(fea.reshape(N * HW, 64), fea_head,
                     params['tail_w'], params['tail_b'])               # (N*HW, 8)
    out = out8[:, :3].reshape(N, H, W, 3)
    return jnp.transpose(out, (0, 3, 1, 2))                            # NCHW like PyTorch


# ---------------------------------- main ------------------------------------

if __name__ == "__main__":
    key = jax.random.PRNGKey(0)
    kp, kx, kc = jax.random.split(key, 3)
    params = init_params(kp)

    N, H, W = 2, 16, 16
    x = jax.random.uniform(kx, (N, 3, H, W), jnp.float32)
    condition = jax.random.uniform(kc, (N, 256, H, W), jnp.float32)

    fwd = jax.jit(functools.partial(rendering_net_forward, params))
    out = fwd(x, condition)
    out = jax.block_until_ready(out)

    assert out.shape == (N, 3, H, W), out.shape
    assert bool(jnp.all(jnp.isfinite(out)))
    print("KERNEL_OK")
</pallas_src>

<mosaic_0001>
module attributes {stable_mosaic.version = 11 : i64} {
  func.func @_head_kernel(%arg0: i32, %arg1: memref<256x8xf32, #tpu.memory_space<vmem>>, %arg2: memref<8x64xbf16, #tpu.memory_space<vmem>>, %arg3: memref<1x64xf32, #tpu.memory_space<vmem>>, %arg4: memref<256x64xf32, #tpu.memory_space<vmem>>) attributes {dimension_semantics = [#tpu.dimension_semantics<parallel>], iteration_bounds = array<i64: 2>, scalar_prefetch = 0 : i64, scratch_operands = 0 : i64, tpu.core_type = #tpu.core_type<tc>, window_params = [{transform_indices = @transform_0, window_bounds = array<i64: 256, 8>}, {pipeline_mode = #tpu.pipeline_mode<synchronous>, transform_indices = @transform_1, window_bounds = array<i64: 8, 64>}, {pipeline_mode = #tpu.pipeline_mode<synchronous>, transform_indices = @transform_2, window_bounds = array<i64: 1, 64>}, {transform_indices = @transform_3, window_bounds = array<i64: 256, 64>}]} {
    %c0 = arith.constant 0 : index
    %c0_0 = arith.constant 0 : index
    %0 = vector.load %arg1[%c0, %c0_0] : memref<256x8xf32, #tpu.memory_space<vmem>>, vector<256x8xf32>
    %1 = arith.truncf %0 : vector<256x8xf32> to vector<256x8xbf16>
    %c0_1 = arith.constant 0 : index
    %c0_2 = arith.constant 0 : index
    %2 = vector.load %arg2[%c0_1, %c0_2] : memref<8x64xbf16, #tpu.memory_space<vmem>>, vector<8x64xbf16>
    %cst = arith.constant dense<0.000000e+00> : vector<256x64xf32>
    %3 = tpu.matmul %1, %2, %cst {dimension_numbers = #tpu.dot_dimension_numbers<[1], [0], [0], [1], [0, 0, 1, 1], [], []>} : vector<256x8xbf16>, vector<8x64xbf16>, vector<256x64xf32> -> vector<256x64xf32>
    %c0_3 = arith.constant 0 : index
    %c0_4 = arith.constant 0 : index
    %4 = vector.load %arg3[%c0_3, %c0_4] : memref<1x64xf32, #tpu.memory_space<vmem>>, vector<1x64xf32>
    %5 = vector.broadcast %4 : vector<1x64xf32> to vector<256x64xf32>
    %6 = arith.addf %3, %5 : vector<256x64xf32>
    %cst_5 = arith.constant 0.000000e+00 : f32
    %7 = vector.broadcast %cst_5 : f32 to vector<256x64xf32>
    %8 = arith.maximumf %6, %7 : vector<256x64xf32>
    %c0_6 = arith.constant 0 : index
    %c0_7 = arith.constant 0 : index
    %9 = vector.load %arg4[%c0_6, %c0_7] : memref<256x64xf32, #tpu.memory_space<vmem>>, vector<256x64xf32>
    tpu.vector_store %arg4[%c0_6, %c0_7], %8 {strides = array<i32>} : memref<256x64xf32, #tpu.memory_space<vmem>>, vector<256x64xf32>,
    return
  }
  func.func @transform_0(%arg0: i32) -> (i32, i32) {
    %c0_i32 = arith.constant 0 : i32
    %c0_i32_0 = arith.constant 0 : i32
    return %arg0, %c0_i32 : i32, i32
  }
  func.func @transform_1(%arg0: i32) -> (i32, i32) {
    %c0_i32 = arith.constant 0 : i32
    %c0_i32_0 = arith.constant 0 : i32
    %c0_i32_1 = arith.constant 0 : i32
    return %c0_i32, %c0_i32_0 : i32, i32
  }
  func.func @transform_2(%arg0: i32) -> (i32, i32) {
    %c0_i32 = arith.constant 0 : i32
    %c0_i32_0 = arith.constant 0 : i32
    %c0_i32_1 = arith.constant 0 : i32
    return %c0_i32, %c0_i32_0 : i32, i32
  }
  func.func @transform_3(%arg0: i32) -> (i32, i32) {
    %c0_i32 = arith.constant 0 : i32
    %c0_i32_0 = arith.constant 0 : i32
    return %arg0, %c0_i32 : i32, i32
  }
}

module attributes {stable_mosaic.version = 11 : i64} {
  func.func @_resblock_kernel(%arg0: i32, %arg1: memref<1x256x64xf32, #tpu.memory_space<vmem>>, %arg2: memref<1x256x32xbf16, #tpu.memory_space<vmem>>, %arg3: memref<1x256x32xbf16, #tpu.memory_space<vmem>>, %arg4: memref<4x32x32xbf16, #tpu.memory_space<vmem>>, %arg5: memref<4x32xf32, #tpu.memory_space<vmem>>, %arg6: memref<4x32x64xbf16, #tpu.memory_space<vmem>>, %arg7: memref<4x64xf32, #tpu.memory_space<vmem>>, %arg8: memref<18x64x64xbf16, #tpu.memory_space<vmem>>, %arg9: memref<2x64xf32, #tpu.memory_space<vmem>>, %arg10: memref<1x256x64xf32, #tpu.memory_space<vmem>>, %arg11: memref<18x18x64xf32, #tpu.memory_space<vmem>>) attributes {dimension_semantics = [#tpu.dimension_semantics<parallel>], iteration_bounds = array<i64: 2>, scalar_prefetch = 0 : i64, scratch_operands = 1 : i64, tpu.core_type = #tpu.core_type<tc>, window_params = [{transform_indices = @transform_0, window_bounds = array<i64: 1, 256, 64>}, {transform_indices = @transform_1, window_bounds = array<i64: 1, 256, 32>}, {transform_indices = @transform_2, window_bounds = array<i64: 1, 256, 32>}, {pipeline_mode = #tpu.pipeline_mode<synchronous>, transform_indices = @transform_3, window_bounds = array<i64: 4, 32, 32>}, {pipeline_mode = #tpu.pipeline_mode<synchronous>, transform_indices = @transform_4, window_bounds = array<i64: 4, 32>}, {pipeline_mode = #tpu.pipeline_mode<synchronous>, transform_indices = @transform_5, window_bounds = array<i64: 4, 32, 64>}, {pipeline_mode = #tpu.pipeline_mode<synchronous>, transform_indices = @transform_6, window_bounds = array<i64: 4, 64>}, {pipeline_mode = #tpu.pipeline_mode<synchronous>, transform_indices = @transform_7, window_bounds = array<i64: 18, 64, 64>}, {pipeline_mode = #tpu.pipeline_mode<synchronous>, transform_indices = @transform_8, window_bounds = array<i64: 2, 64>}, {transform_indices = @transform_9, window_bounds = array<i64: 1, 256, 64>}]} {
    %c0 = arith.constant 0 : index
    %c0_0 = arith.constant 0 : index
    %c0_1 = arith.constant 0 : index
    %0 = vector.load %arg1[%c0, %c0_0, %c0_1] : memref<1x256x64xf32, #tpu.memory_space<vmem>>, vector<1x256x64xf32>
    %1 = vector.shape_cast %0 : vector<1x256x64xf32> to vector<256x64xf32>
    %c0_2 = arith.constant 0 : index
    %c0_3 = arith.constant 0 : index
    %c0_4 = arith.constant 0 : index
    %2 = vector.load %arg2[%c0_2, %c0_3, %c0_4] : memref<1x256x32xbf16, #tpu.memory_space<vmem>>, vector<1x256x32xbf16>
    %3 = vector.shape_cast %2 : vector<1x256x32xbf16> to vector<256x32xbf16>
    %c0_5 = arith.constant 0 : index
    %c0_6 = arith.constant 0 : index
    %c0_7 = arith.constant 0 : index
    %4 = vector.load %arg3[%c0_5, %c0_6, %c0_7] : memref<1x256x32xbf16, #tpu.memory_space<vmem>>, vector<1x256x32xbf16>
    %5 = vector.shape_cast %4 : vector<1x256x32xbf16> to vector<256x32xbf16>
    %c0_8 = arith.constant 0 : index
    %c0_9 = arith.constant 0 : index
    %c0_10 = arith.constant 0 : index
    %6 = vector.load %arg4[%c0_8, %c0_9, %c0_10] : memref<4x32x32xbf16, #tpu.memory_space<vmem>>, vector<1x32x32xbf16>
    %7 = vector.shape_cast %6 : vector<1x32x32xbf16> to vector<32x32xbf16>
    %cst = arith.constant dense<0.000000e+00> : vector<256x32xf32>
    %8 = tpu.matmul %3, %7, %cst {dimension_numbers = #tpu.dot_dimension_numbers<[1], [0], [0], [1], [0, 0, 1, 1], [], []>} : vector<256x32xbf16>, vector<32x32xbf16>, vector<256x32xf32> -> vector<256x32xf32>
    %c0_11 = arith.constant 0 : index
    %c0_12 = arith.constant 0 : index
    %9 = vector.load %arg5[%c0_11, %c0_12] : memref<4x32xf32, #tpu.memory_space<vmem>>, vector<1x32xf32>
    %10 = vector.broadcast %9 : vector<1x32xf32> to vector<256x32xf32>
    %11 = arith.addf %8, %10 : vector<256x32xf32>
    %cst_13 = arith.constant 1.000000e-01 : f32
    %12 = vector.broadcast %cst_13 : f32 to vector<256x32xf32>
    %13 = arith.mulf %12, %11 : vector<256x32xf32>
    %14 = arith.maximumf %11, %13 : vector<256x32xf32>
    %15 = arith.truncf %14 : vector<256x32xf32> to vector<256x32xbf16>
    %c0_14 = arith.constant 0 : index
    %c0_15 = arith.constant 0 : index
    %c0_16 = arith.constant 0 : index
    %16 = vector.load %arg6[%c0_14, %c0_15, %c0_16] : memref<4x32x64xbf16, #tpu.memory_space<vmem>>, vector<1x32x64xbf16>
    %17 = vector.shape_cast %16 : vector<1x32x64xbf16> to vector<32x64xbf16>
    %cst_17 = arith.constant dense<0.000000e+00> : vector<256x64xf32>
    %18 = tpu.matmul %15, %17, %cst_17 {dimension_numbers = #tpu.dot_dimension_numbers<[1], [0], [0], [1], [0, 0, 1, 1], [], []>} : vector<256x32xbf16>, vector<32x64xbf16>, vector<256x64xf32> -> vector<256x64xf32>
    %c0_18 = arith.constant 0 : index
    %c0_19 = arith.constant 0 : index
    %19 = vector.load %arg7[%c0_18, %c0_19] : memref<4x64xf32, #tpu.memory_space<vmem>>, vector<1x64xf32>
    %20 = vector.broadcast %19 : vector<1x64xf32> to vector<256x64xf32>
    %21 = arith.addf %18, %20 : vector<256x64xf32>
    %cst_20 = arith.constant 1.000000e+00 : f32
    %22 = vector.broadcast %cst_20 : f32 to vector<256x64xf32>
    %23 = arith.addf %21, %22 : vector<256x64xf32>
    %24 = arith.mulf %1, %23 : vector<256x64xf32>
    %c1 = arith.constant 1 : index
    %c0_21 = arith.constant 0 : index
    %c0_22 = arith.constant 0 : index
    %25 = vector.load %arg4[%c1, %c0_21, %c0_22] : memref<4x32x32xbf16, #tpu.memory_space<vmem>>, vector<1x32x32xbf16>
    %26 = vector.shape_cast %25 : vector<1x32x32xbf16> to vector<32x32xbf16>
    %cst_23 = arith.constant dense<0.000000e+00> : vector<256x32xf32>
    %27 = tpu.matmul %3, %26, %cst_23 {dimension_numbers = #tpu.dot_dimension_numbers<[1], [0], [0], [1], [0, 0, 1, 1], [], []>} : vector<256x32xbf16>, vector<32x32xbf16>, vector<256x32xf32> -> vector<256x32xf32>
    %c1_24 = arith.constant 1 : index
    %c0_25 = arith.constant 0 : index
    %28 = vector.load %arg5[%c1_24, %c0_25] : memref<4x32xf32, #tpu.memory_space<vmem>>, vector<1x32xf32>
    %29 = vector.broadcast %28 : vector<1x32xf32> to vector<256x32xf32>
    %30 = arith.addf %27, %29 : vector<256x32xf32>
    %cst_26 = arith.constant 1.000000e-01 : f32
    %31 = vector.broadcast %cst_26 : f32 to vector<256x32xf32>
    %32 = arith.mulf %31, %30 : vector<256x32xf32>
    %33 = arith.maximumf %30, %32 : vector<256x32xf32>
    %34 = arith.truncf %33 : vector<256x32xf32> to vector<256x32xbf16>
    %c1_27 = arith.constant 1 : index
    %c0_28 = arith.constant 0 : index
    %c0_29 = arith.constant 0 : index
    %35 = vector.load %arg6[%c1_27, %c0_28, %c0_29] : memref<4x32x64xbf16, #tpu.memory_space<vmem>>, vector<1x32x64xbf16>
    %36 = vector.shape_cast %35 : vector<1x32x64xbf16> to vector<32x64xbf16>
    %cst_30 = arith.constant dense<0.000000e+00> : vector<256x64xf32>
    %37 = tpu.matmul %34, %36, %cst_30 {dimension_numbers = #tpu.dot_dimension_numbers<[1], [0], [0], [1], [0, 0, 1, 1], [], []>} : vector<256x32xbf16>, vector<32x64xbf16>, vector<256x64xf32> -> vector<256x64xf32>
    %c1_31 = arith.constant 1 : index
    %c0_32 = arith.constant 0 : index
    %38 = vector.load %arg7[%c1_31, %c0_32] : memref<4x64xf32, #tpu.memory_space<vmem>>, vector<1x64xf32>
    %39 = vector.broadcast %38 : vector<1x64xf32> to vector<256x64xf32>
    %40 = arith.addf %37, %39 : vector<256x64xf32>
    %41 = arith.addf %24, %40 : vector<256x64xf32>
    %cst_33 = arith.constant 0.000000e+00 : f32
    %42 = vector.broadcast %cst_33 : f32 to vector<18x18x64xf32>
    %c0_34 = arith.constant 0 : index
    %c0_35 = arith.constant 0 : index
    %c0_36 = arith.constant 0 : index
    %43 = vector.load %arg11[%c0_34, %c0_35, %c0_36] : memref<18x18x64xf32, #tpu.memory_space<vmem>>, vector<18x18x64xf32>
    tpu.vector_store %arg11[%c0_34, %c0_35, %c0_36], %42 {strides = array<i32>} : memref<18x18x64xf32, #tpu.memory_space<vmem>>, vector<18x18x64xf32>,
    %44 = vector.shape_cast %41 : vector<256x64xf32> to vector<16x16x64xf32>
    %c1_37 = arith.constant 1 : index
    %c1_38 = arith.constant 1 : index
    %c0_39 = arith.constant 0 : index
    %45 = vector.load %arg11[%c1_37, %c1_38, %c0_39] : memref<18x18x64xf32, #tpu.memory_space<vmem>>, vector<16x16x64xf32>
    tpu.vector_store %arg11[%c1_37, %c1_38, %c0_39], %44 {strides = array<i32>} : memref<18x18x64xf32, #tpu.memory_space<vmem>>, vector<16x16x64xf32>,
    %cst_40 = arith.constant 0.000000e+00 : f32
    %46 = vector.broadcast %cst_40 : f32 to vector<256x64xf32>
    %c0_41 = arith.constant 0 : index
    %c0_42 = arith.constant 0 : index
    %c0_43 = arith.constant 0 : index
    %47 = vector.load %arg11[%c0_41, %c0_42, %c0_43] : memref<18x18x64xf32, #tpu.memory_space<vmem>>, vector<16x16x64xf32>
    %48 = vector.shape_cast %47 : vector<16x16x64xf32> to vector<256x64xf32>
    %49 = arith.truncf %48 : vector<256x64xf32> to vector<256x64xbf16>
    %c0_44 = arith.constant 0 : index
    %c0_45 = arith.constant 0 : index
    %c0_46 = arith.constant 0 : index
    %50 = vector.load %arg8[%c0_44, %c0_45, %c0_46] : memref<18x64x64xbf16, #tpu.memory_space<vmem>>, vector<1x64x64xbf16>
    %51 = vector.shape_cast %50 : vector<1x64x64xbf16> to vector<64x64xbf16>
    %cst_47 = arith.constant dense<0.000000e+00> : vector<256x64xf32>
    %52 = tpu.matmul %49, %51, %cst_47 {dimension_numbers = #tpu.dot_dimension_numbers<[1], [0], [0], [1], [0, 0, 1, 1], [], []>} : vector<256x64xbf16>, vector<64x64xbf16>, vector<256x64xf32> -> vector<256x64xf32>
    %53 = arith.addf %46, %52 : vector<256x64xf32>
    %c0_48 = arith.constant 0 : index
    %c1_49 = arith.constant 1 : index
    %c0_50 = arith.constant 0 : index
    %54 = vector.load %arg11[%c0_48, %c1_49, %c0_50] : memref<18x18x64xf32, #tpu.memory_space<vmem>>, vector<16x16x64xf32>
    %55 = vector.shape_cast %54 : vector<16x16x64xf32> to vector<256x64xf32>
    %56 = arith.truncf %55 : vector<256x64xf32> to vector<256x64xbf16>
    %c1_51 = arith.constant 1 : index
    %c0_52 = arith.constant 0 : index
    %c0_53 = arith.constant 0 : index
    %57 = vector.load %arg8[%c1_51, %c0_52, %c0_53] : memref<18x64x64xbf16, #tpu.memory_space<vmem>>, vector<1x64x64xbf16>
    %58 = vector.shape_cast %57 : vector<1x64x64xbf16> to vector<64x64xbf16>
    %cst_54 = arith.constant dense<0.000000e+00> : vector<256x64xf32>
    %59 = tpu.matmul %56, %58, %cst_54 {dimension_numbers = #tpu.dot_dimension_numbers<[1], [0], [0], [1], [0, 0, 1, 1], [], []>} : vector<256x64xbf16>, vector<64x64xbf16>, vector<256x64xf32> -> vector<256x64xf32>
    %60 = arith.addf %53, %59 : vector<256x64xf32>
    %c0_55 = arith.constant 0 : index
    %c2 = arith.constant 2 : index
    %c0_56 = arith.constant 0 : index
    %61 = vector.load %arg11[%c0_55, %c2, %c0_56] : memref<18x18x64xf32, #tpu.memory_space<vmem>>, vector<16x16x64xf32>
    %62 = vector.shape_cast %61 : vector<16x16x64xf32> to vector<256x64xf32>
    %63 = arith.truncf %62 : vector<256x64xf32> to vector<256x64xbf16>
    %c2_57 = arith.constant 2 : index
    %c0_58 = arith.constant 0 : index
    %c0_59 = arith.constant 0 : index
    %64 = vector.load %arg8[%c2_57, %c0_58, %c0_59] : memref<18x64x64xbf16, #tpu.memory_space<vmem>>, vector<1x64x64xbf16>
    %65 = vector.shape_cast %64 : vector<1x64x64xbf16> to vector<64x64xbf16>
    %cst_60 = arith.constant dense<0.000000e+00> : vector<256x64xf32>
    %66 = tpu.matmul %63, %65, %cst_60 {dimension_numbers = #tpu.dot_dimension_numbers<[1], [0], [0], [1], [0, 0, 1, 1], [], []>} : vector<256x64xbf16>, vector<64x64xbf16>, vector<256x64xf32> -> vector<256x64xf32>
    %67 = arith.addf %60, %66 : vector<256x64xf32>
    %c1_61 = arith.constant 1 : index
    %c0_62 = arith.constant 0 : index
    %c0_63 = arith.constant 0 : index
    %68 = vector.load %arg11[%c1_61, %c0_62, %c0_63] : memref<18x18x64xf32, #tpu.memory_space<vmem>>, vector<16x16x64xf32>
    %69 = vector.shape_cast %68 : vector<16x16x64xf32> to vector<256x64xf32>
    %70 = arith.truncf %69 : vector<256x64xf32> to vector<256x64xbf16>
    %c3 = arith.constant 3 : index
    %c0_64 = arith.constant 0 : index
    %c0_65 = arith.constant 0 : index
    %71 = vector.load %arg8[%c3, %c0_64, %c0_65] : memref<18x64x64xbf16, #tpu.memory_space<vmem>>, vector<1x64x64xbf16>
    %72 = vector.shape_cast %71 : vector<1x64x64xbf16> to vector<64x64xbf16>
    %cst_66 = arith.constant dense<0.000000e+00> : vector<256x64xf32>
    %73 = tpu.matmul %70, %72, %cst_66 {dimension_numbers = #tpu.dot_dimension_numbers<[1], [0], [0], [1], [0, 0, 1, 1], [], []>} : vector<256x64xbf16>, vector<64x64xbf16>, vector<256x64xf32> -> vector<256x64xf32>
    %74 = arith.addf %67, %73 : vector<256x64xf32>
    %c1_67 = arith.constant 1 : index
    %c1_68 = arith.constant 1 : index
    %c0_69 = arith.constant 0 : index
    %75 = vector.load %arg11[%c1_67, %c1_68, %c0_69] : memref<18x18x64xf32, #tpu.memory_space<vmem>>, vector<16x16x64xf32>
    %76 = vector.shape_cast %75 : vector<16x16x64xf32> to vector<256x64xf32>
    %77 = arith.truncf %76 : vector<256x64xf32> to vector<256x64xbf16>
    %c4 = arith.constant 4 : index
    %c0_70 = arith.constant 0 : index
    %c0_71 = arith.constant 0 : index
    %78 = vector.load %arg8[%c4, %c0_70, %c0_71] : memref<18x64x64xbf16, #tpu.memory_space<vmem>>, vector<1x64x64xbf16>
    %79 = vector.shape_cast %78 : vector<1x64x64xbf16> to vector<64x64xbf16>
    %cst_72 = arith.constant dense<0.000000e+00> : vector<256x64xf32>
    %80 = tpu.matmul %77, %79, %cst_72 {dimension_numbers = #tpu.dot_dimension_numbers<[1], [0], [0], [1], [0, 0, 1, 1], [], []>} : vector<256x64xbf16>, vector<64x64xbf16>, vector<256x64xf32> -> vector<256x64xf32>
    %81 = arith.addf %74, %80 : vector<256x64xf32>
    %c1_73 = arith.constant 1 : index
    %c2_74 = arith.constant 2 : index
    %c0_75 = arith.constant 0 : index
    %82 = vector.load %arg11[%c1_73, %c2_74, %c0_75] : memref<18x18x64xf32, #tpu.memory_space<vmem>>, vector<16x16x64xf32>
    %83 = vector.shape_cast %82 : vector<16x16x64xf32> to vector<256x64xf32>
    %84 = arith.truncf %83 : vector<256x64xf32> to vector<256x64xbf16>
    %c5 = arith.constant 5 : index
    %c0_76 = arith.constant 0 : index
    %c0_77 = arith.constant 0 : index
    %85 = vector.load %arg8[%c5, %c0_76, %c0_77] : memref<18x64x64xbf16, #tpu.memory_space<vmem>>, vector<1x64x64xbf16>
    %86 = vector.shape_cast %85 : vector<1x64x64xbf16> to vector<64x64xbf16>
    %cst_78 = arith.constant dense<0.000000e+00> : vector<256x64xf32>
    %87 = tpu.matmul %84, %86, %cst_78 {dimension_numbers = #tpu.dot_dimension_numbers<[1], [0], [0], [1], [0, 0, 1, 1], [], []>} : vector<256x64xbf16>, vector<64x64xbf16>, vector<256x64xf32> -> vector<256x64xf32>
    %88 = arith.addf %81, %87 : vector<256x64xf32>
    %c2_79 = arith.constant 2 : index
    %c0_80 = arith.constant 0 : index
    %c0_81 = arith.constant 0 : index
    %89 = vector.load %arg11[%c2_79, %c0_80, %c0_81] : memref<18x18x64xf32, #tpu.memory_space<vmem>>, vector<16x16x64xf32>
    %90 = vector.shape_cast %89 : vector<16x16x64xf32> to vector<256x64xf32>
    %91 = arith.truncf %90 : vector<256x64xf32> to vector<256x64xbf16>
    %c6 = arith.constant 6 : index
    %c0_82 = arith.constant 0 : index
    %c0_83 = arith.constant 0 : index
    %92 = vector.load %arg8[%c6, %c0_82, %c0_83] : memref<18x64x64xbf16, #tpu.memory_space<vmem>>, vector<1x64x64xbf16>
    %93 = vector.shape_cast %92 : vector<1x64x64xbf16> to vector<64x64xbf16>
    %cst_84 = arith.constant dense<0.000000e+00> : vector<256x64xf32>
    %94 = tpu.matmul %91, %93, %cst_84 {dimension_numbers = #tpu.dot_dimension_numbers<[1], [0], [0], [1], [0, 0, 1, 1], [], []>} : vector<256x64xbf16>, vector<64x64xbf16>, vector<256x64xf32> -> vector<256x64xf32>
    %95 = arith.addf %88, %94 : vector<256x64xf32>
    %c2_85 = arith.constant 2 : index
    %c1_86 = arith.constant 1 : index
    %c0_87 = arith.constant 0 : index
    %96 = vector.load %arg11[%c2_85, %c1_86, %c0_87] : memref<18x18x64xf32, #tpu.memory_space<vmem>>, vector<16x16x64xf32>
    %97 = vector.shape_cast %96 : vector<16x16x64xf32> to vector<256x64xf32>
    %98 = arith.truncf %97 : vector<256x64xf32> to vector<256x64xbf16>
    %c7 = arith.constant 7 : index
    %c0_88 = arith.constant 0 : index
    %c0_89 = arith.constant 0 : index
    %99 = vector.load %arg8[%c7, %c0_88, %c0_89] : memref<18x64x64xbf16, #tpu.memory_space<vmem>>, vector<1x64x64xbf16>
    %100 = vector.shape_cast %99 : vector<1x64x64xbf16> to vector<64x64xbf16>
    %cst_90 = arith.constant dense<0.000000e+00> : vector<256x64xf32>
    %101 = tpu.matmul %98, %100, %cst_90 {dimension_numbers = #tpu.dot_dimension_numbers<[1], [0], [0], [1], [0, 0, 1, 1], [], []>} : vector<256x64xbf16>, vector<64x64xbf16>, vector<256x64xf32> -> vector<256x64xf32>
    %102 = arith.addf %95, %101 : vector<256x64xf32>
    %c2_91 = arith.constant 2 : index
    %c2_92 = arith.constant 2 : index
    %c0_93 = arith.constant 0 : index
    %103 = vector.load %arg11[%c2_91, %c2_92, %c0_93] : memref<18x18x64xf32, #tpu.memory_space<vmem>>, vector<16x16x64xf32>
    %104 = vector.shape_cast %103 : vector<16x16x64xf32> to vector<256x64xf32>
    %105 = arith.truncf %104 : vector<256x64xf32> to vector<256x64xbf16>
    %c8 = arith.constant 8 : index
    %c0_94 = arith.constant 0 : index
    %c0_95 = arith.constant 0 : index
    %106 = vector.load %arg8[%c8, %c0_94, %c0_95] : memref<18x64x64xbf16, #tpu.memory_space<vmem>>, vector<1x64x64xbf16>
    %107 = vector.shape_cast %106 : vector<1x64x64xbf16> to vector<64x64xbf16>
    %cst_96 = arith.constant dense<0.000000e+00> : vector<256x64xf32>
    %108 = tpu.matmul %105, %107, %cst_96 {dimension_numbers = #tpu.dot_dimension_numbers<[1], [0], [0], [1], [0, 0, 1, 1], [], []>} : vector<256x64xbf16>, vector<64x64xbf16>, vector<256x64xf32> -> vector<256x64xf32>
    %109 = arith.addf %102, %108 : vector<256x64xf32>
    %c0_97 = arith.constant 0 : index
    %c0_98 = arith.constant 0 : index
    %110 = vector.load %arg9[%c0_97, %c0_98] : memref<2x64xf32, #tpu.memory_space<vmem>>, vector<1x64xf32>
    %111 = vector.broadcast %110 : vector<1x64xf32> to vector<256x64xf32>
    %112 = arith.addf %109, %111 : vector<256x64xf32>
    %cst_99 = arith.constant 0.000000e+00 : f32
    %113 = vector.broadcast %cst_99 : f32 to vector<256x64xf32>
    %114 = arith.maximumf %112, %113 : vector<256x64xf32>
    %c2_100 = arith.constant 2 : index
    %c0_101 = arith.constant 0 : index
    %c0_102 = arith.constant 0 : index
    %115 = vector.load %arg4[%c2_100, %c0_101, %c0_102] : memref<4x32x32xbf16, #tpu.memory_space<vmem>>, vector<1x32x32xbf16>
    %116 = vector.shape_cast %115 : vector<1x32x32xbf16> to vector<32x32xbf16>
    %cst_103 = arith.constant dense<0.000000e+00> : vector<256x32xf32>
    %117 = tpu.matmul %5, %116, %cst_103 {dimension_numbers = #tpu.dot_dimension_numbers<[1], [0], [0], [1], [0, 0, 1, 1], [], []>} : vector<256x32xbf16>, vector<32x32xbf16>, vector<256x32xf32> -> vector<256x32xf32>
    %c2_104 = arith.constant 2 : index
    %c0_105 = arith.constant 0 : index
    %118 = vector.load %arg5[%c2_104, %c0_105] : memref<4x32xf32, #tpu.memory_space<vmem>>, vector<1x32xf32>
    %119 = vector.broadcast %118 : vector<1x32xf32> to vector<256x32xf32>
    %120 = arith.addf %117, %119 : vector<256x32xf32>
    %cst_106 = arith.constant 1.000000e-01 : f32
    %121 = vector.broadcast %cst_106 : f32 to vector<256x32xf32>
    %122 = arith.mulf %121, %120 : vector<256x32xf32>
    %123 = arith.maximumf %120, %122 : vector<256x32xf32>
    %124 = arith.truncf %123 : vector<256x32xf32> to vector<256x32xbf16>
    %c2_107 = arith.constant 2 : index
    %c0_108 = arith.constant 0 : index
    %c0_109 = arith.constant 0 : index
    %125 = vector.load %arg6[%c2_107, %c0_108, %c0_109] : memref<4x32x64xbf16, #tpu.memory_space<vmem>>, vector<1x32x64xbf16>
    %126 = vector.shape_cast %125 : vector<1x32x64xbf16> to vector<32x64xbf16>
    %cst_110 = arith.constant dense<0.000000e+00> : vector<256x64xf32>
    %127 = tpu.matmul %124, %126, %cst_110 {dimension_numbers = #tpu.dot_dimension_numbers<[1], [0], [0], [1], [0, 0, 1, 1], [], []>} : vector<256x32xbf16>, vector<32x64xbf16>, vector<256x64xf32> -> vector<256x64xf32>
    %c2_111 = arith.constant 2 : index
    %c0_112 = arith.constant 0 : index
    %128 = vector.load %arg7[%c2_111, %c0_112] : memref<4x64xf32, #tpu.memory_space<vmem>>, vector<1x64xf32>
    %129 = vector.broadcast %128 : vector<1x64xf32> to vector<256x64xf32>
    %130 = arith.addf %127, %129 : vector<256x64xf32>
    %cst_113 = arith.constant 1.000000e+00 : f32
    %131 = vector.broadcast %cst_113 : f32 to vector<256x64xf32>
    %132 = arith.addf %130, %131 : vector<256x64xf32>
    %133 = arith.mulf %114, %132 : vector<256x64xf32>
    %c3_114 = arith.constant 3 : index
    %c0_115 = arith.constant 0 : index
    %c0_116 = arith.constant 0 : index
    %134 = vector.load %arg4[%c3_114, %c0_115, %c0_116] : memref<4x32x32xbf16, #tpu.memory_space<vmem>>, vector<1x32x32xbf16>
    %135 = vector.shape_cast %134 : vector<1x32x32xbf16> to vector<32x32xbf16>
    %cst_117 = arith.constant dense<0.000000e+00> : vector<256x32xf32>
    %136 = tpu.matmul %5, %135, %cst_117 {dimension_numbers = #tpu.dot_dimension_numbers<[1], [0], [0], [1], [0, 0, 1, 1], [], []>} : vector<256x32xbf16>, vector<32x32xbf16>, vector<256x32xf32> -> vector<256x32xf32>
    %c3_118 = arith.constant 3 : index
    %c0_119 = arith.constant 0 : index
    %137 = vector.load %arg5[%c3_118, %c0_119] : memref<4x32xf32, #tpu.memory_space<vmem>>, vector<1x32xf32>
    %138 = vector.broadcast %137 : vector<1x32xf32> to vector<256x32xf32>
    %139 = arith.addf %136, %138 : vector<256x32xf32>
    %cst_120 = arith.constant 1.000000e-01 : f32
    %140 = vector.broadcast %cst_120 : f32 to vector<256x32xf32>
    %141 = arith.mulf %140, %139 : vector<256x32xf32>
    %142 = arith.maximumf %139, %141 : vector<256x32xf32>
    %143 = arith.truncf %142 : vector<256x32xf32> to vector<256x32xbf16>
    %c3_121 = arith.constant 3 : index
    %c0_122 = arith.constant 0 : index
    %c0_123 = arith.constant 0 : index
    %144 = vector.load %arg6[%c3_121, %c0_122, %c0_123] : memref<4x32x64xbf16, #tpu.memory_space<vmem>>, vector<1x32x64xbf16>
    %145 = vector.shape_cast %144 : vector<1x32x64xbf16> to vector<32x64xbf16>
    %cst_124 = arith.constant dense<0.000000e+00> : vector<256x64xf32>
    %146 = tpu.matmul %143, %145, %cst_124 {dimension_numbers = #tpu.dot_dimension_numbers<[1], [0], [0], [1], [0, 0, 1, 1], [], []>} : vector<256x32xbf16>, vector<32x64xbf16>, vector<256x64xf32> -> vector<256x64xf32>
    %c3_125 = arith.constant 3 : index
    %c0_126 = arith.constant 0 : index
    %147 = vector.load %arg7[%c3_125, %c0_126] : memref<4x64xf32, #tpu.memory_space<vmem>>, vector<1x64xf32>
    %148 = vector.broadcast %147 : vector<1x64xf32> to vector<256x64xf32>
    %149 = arith.addf %146, %148 : vector<256x64xf32>
    %150 = arith.addf %133, %149 : vector<256x64xf32>
    %cst_127 = arith.constant 0.000000e+00 : f32
    %151 = vector.broadcast %cst_127 : f32 to vector<18x18x64xf32>
    %c0_128 = arith.constant 0 : index
    %c0_129 = arith.constant 0 : index
    %c0_130 = arith.constant 0 : index
    %152 = vector.load %arg11[%c0_128, %c0_129, %c0_130] : memref<18x18x64xf32, #tpu.memory_space<vmem>>, vector<18x18x64xf32>
    tpu.vector_store %arg11[%c0_128, %c0_129, %c0_130], %151 {strides = array<i32>} : memref<18x18x64xf32, #tpu.memory_space<vmem>>, vector<18x18x64xf32>,
    %153 = vector.shape_cast %150 : vector<256x64xf32> to vector<16x16x64xf32>
    %c1_131 = arith.constant 1 : index
    %c1_132 = arith.constant 1 : index
    %c0_133 = arith.constant 0 : index
    %154 = vector.load %arg11[%c1_131, %c1_132, %c0_133] : memref<18x18x64xf32, #tpu.memory_space<vmem>>, vector<16x16x64xf32>
    tpu.vector_store %arg11[%c1_131, %c1_132, %c0_133], %153 {strides = array<i32>} : memref<18x18x64xf32, #tpu.memory_space<vmem>>, vector<16x16x64xf32>,
    %cst_134 = arith.constant 0.000000e+00 : f32
    %155 = vector.broadcast %cst_134 : f32 to vector<256x64xf32>
    %c0_135 = arith.constant 0 : index
    %c0_136 = arith.constant 0 : index
    %c0_137 = arith.constant 0 : index
    %156 = vector.load %arg11[%c0_135, %c0_136, %c0_137] : memref<18x18x64xf32, #tpu.memory_space<vmem>>, vector<16x16x64xf32>
    %157 = vector.shape_cast %156 : vector<16x16x64xf32> to vector<256x64xf32>
    %158 = arith.truncf %157 : vector<256x64xf32> to vector<256x64xbf16>
    %c9 = arith.constant 9 : index
    %c0_138 = arith.constant 0 : index
    %c0_139 = arith.constant 0 : index
    %159 = vector.load %arg8[%c9, %c0_138, %c0_139] : memref<18x64x64xbf16, #tpu.memory_space<vmem>>, vector<1x64x64xbf16>
    %160 = vector.shape_cast %159 : vector<1x64x64xbf16> to vector<64x64xbf16>
    %cst_140 = arith.constant dense<0.000000e+00> : vector<256x64xf32>
    %161 = tpu.matmul %158, %160, %cst_140 {dimension_numbers = #tpu.dot_dimension_numbers<[1], [0], [0], [1], [0, 0, 1, 1], [], []>} : vector<256x64xbf16>, vector<64x64xbf16>, vector<256x64xf32> -> vector<256x64xf32>
    %162 = arith.addf %155, %161 : vector<256x64xf32>
    %c0_141 = arith.constant 0 : index
    %c1_142 = arith.constant 1 : index
    %c0_143 = arith.constant 0 : index
    %163 = vector.load %arg11[%c0_141, %c1_142, %c0_143] : memref<18x18x64xf32, #tpu.memory_space<vmem>>, vector<16x16x64xf32>
    %164 = vector.shape_cast %163 : vector<16x16x64xf32> to vector<256x64xf32>
    %165 = arith.truncf %164 : vector<256x64xf32> to vector<256x64xbf16>
    %c10 = arith.constant 10 : index
    %c0_144 = arith.constant 0 : index
    %c0_145 = arith.constant 0 : index
    %166 = vector.load %arg8[%c10, %c0_144, %c0_145] : memref<18x64x64xbf16, #tpu.memory_space<vmem>>, vector<1x64x64xbf16>
    %167 = vector.shape_cast %166 : vector<1x64x64xbf16> to vector<64x64xbf16>
    %cst_146 = arith.constant dense<0.000000e+00> : vector<256x64xf32>
    %168 = tpu.matmul %165, %167, %cst_146 {dimension_numbers = #tpu.dot_dimension_numbers<[1], [0], [0], [1], [0, 0, 1, 1], [], []>} : vector<256x64xbf16>, vector<64x64xbf16>, vector<256x64xf32> -> vector<256x64xf32>
    %169 = arith.addf %162, %168 : vector<256x64xf32>
    %c0_147 = arith.constant 0 : index
    %c2_148 = arith.constant 2 : index
    %c0_149 = arith.constant 0 : index
    %170 = vector.load %arg11[%c0_147, %c2_148, %c0_149] : memref<18x18x64xf32, #tpu.memory_space<vmem>>, vector<16x16x64xf32>
    %171 = vector.shape_cast %170 : vector<16x16x64xf32> to vector<256x64xf32>
    %172 = arith.truncf %171 : vector<256x64xf32> to vector<256x64xbf16>
    %c11 = arith.constant 11 : index
    %c0_150 = arith.constant 0 : index
    %c0_151 = arith.constant 0 : index
    %173 = vector.load %arg8[%c11, %c0_150, %c0_151] : memref<18x64x64xbf16, #tpu.memory_space<vmem>>, vector<1x64x64xbf16>
    %174 = vector.shape_cast %173 : vector<1x64x64xbf16> to vector<64x64xbf16>
    %cst_152 = arith.constant dense<0.000000e+00> : vector<256x64xf32>
    %175 = tpu.matmul %172, %174, %cst_152 {dimension_numbers = #tpu.dot_dimension_numbers<[1], [0], [0], [1], [0, 0, 1, 1], [], []>} : vector<256x64xbf16>, vector<64x64xbf16>, vector<256x64xf32> -> vector<256x64xf32>
    %176 = arith.addf %169, %175 : vector<256x64xf32>
    %c1_153 = arith.constant 1 : index
    %c0_154 = arith.constant 0 : index
    %c0_155 = arith.constant 0 : index
    %177 = vector.load %arg11[%c1_153, %c0_154, %c0_155] : memref<18x18x64xf32, #tpu.memory_space<vmem>>, vector<16x16x64xf32>
    %178 = vector.shape_cast %177 : vector<16x16x64xf32> to vector<256x64xf32>
    %179 = arith.truncf %178 : vector<256x64xf32> to vector<256x64xbf16>
    %c12 = arith.constant 12 : index
    %c0_156 = arith.constant 0 : index
    %c0_157 = arith.constant 0 : index
    %180 = vector.load %arg8[%c12, %c0_156, %c0_157] : memref<18x64x64xbf16, #tpu.memory_space<vmem>>, vector<1x64x64xbf16>
    %181 = vector.shape_cast %180 : vector<1x64x64xbf16> to vector<64x64xbf16>
    %cst_158 = arith.constant dense<0.000000e+00> : vector<256x64xf32>
    %182 = tpu.matmul %179, %181, %cst_158 {dimension_numbers = #tpu.dot_dimension_numbers<[1], [0], [0], [1], [0, 0, 1, 1], [], []>} : vector<256x64xbf16>, vector<64x64xbf16>, vector<256x64xf32> -> vector<256x64xf32>
    %183 = arith.addf %176, %182 : vector<256x64xf32>
    %c1_159 = arith.constant 1 : index
    %c1_160 = arith.constant 1 : index
    %c0_161 = arith.constant 0 : index
    %184 = vector.load %arg11[%c1_159, %c1_160, %c0_161] : memref<18x18x64xf32, #tpu.memory_space<vmem>>, vector<16x16x64xf32>
    %185 = vector.shape_cast %184 : vector<16x16x64xf32> to vector<256x64xf32>
    %186 = arith.truncf %185 : vector<256x64xf32> to vector<256x64xbf16>
    %c13 = arith.constant 13 : index
    %c0_162 = arith.constant 0 : index
    %c0_163 = arith.constant 0 : index
    %187 = vector.load %arg8[%c13, %c0_162, %c0_163] : memref<18x64x64xbf16, #tpu.memory_space<vmem>>, vector<1x64x64xbf16>
    %188 = vector.shape_cast %187 : vector<1x64x64xbf16> to vector<64x64xbf16>
    %cst_164 = arith.constant dense<0.000000e+00> : vector<256x64xf32>
    %189 = tpu.matmul %186, %188, %cst_164 {dimension_numbers = #tpu.dot_dimension_numbers<[1], [0], [0], [1], [0, 0, 1, 1], [], []>} : vector<256x64xbf16>, vector<64x64xbf16>, vector<256x64xf32> -> vector<256x64xf32>
    %190 = arith.addf %183, %189 : vector<256x64xf32>
    %c1_165 = arith.constant 1 : index
    %c2_166 = arith.constant 2 : index
    %c0_167 = arith.constant 0 : index
    %191 = vector.load %arg11[%c1_165, %c2_166, %c0_167] : memref<18x18x64xf32, #tpu.memory_space<vmem>>, vector<16x16x64xf32>
    %192 = vector.shape_cast %191 : vector<16x16x64xf32> to vector<256x64xf32>
    %193 = arith.truncf %192 : vector<256x64xf32> to vector<256x64xbf16>
    %c14 = arith.constant 14 : index
    %c0_168 = arith.constant 0 : index
    %c0_169 = arith.constant 0 : index
    %194 = vector.load %arg8[%c14, %c0_168, %c0_169] : memref<18x64x64xbf16, #tpu.memory_space<vmem>>, vector<1x64x64xbf16>
    %195 = vector.shape_cast %194 : vector<1x64x64xbf16> to vector<64x64xbf16>
    %cst_170 = arith.constant dense<0.000000e+00> : vector<256x64xf32>
    %196 = tpu.matmul %193, %195, %cst_170 {dimension_numbers = #tpu.dot_dimension_numbers<[1], [0], [0], [1], [0, 0, 1, 1], [], []>} : vector<256x64xbf16>, vector<64x64xbf16>, vector<256x64xf32> -> vector<256x64xf32>
    %197 = arith.addf %190, %196 : vector<256x64xf32>
    %c2_171 = arith.constant 2 : index
    %c0_172 = arith.constant 0 : index
    %c0_173 = arith.constant 0 : index
    %198 = vector.load %arg11[%c2_171, %c0_172, %c0_173] : memref<18x18x64xf32, #tpu.memory_space<vmem>>, vector<16x16x64xf32>
    %199 = vector.shape_cast %198 : vector<16x16x64xf32> to vector<256x64xf32>
    %200 = arith.truncf %199 : vector<256x64xf32> to vector<256x64xbf16>
    %c15 = arith.constant 15 : index
    %c0_174 = arith.constant 0 : index
    %c0_175 = arith.constant 0 : index
    %201 = vector.load %arg8[%c15, %c0_174, %c0_175] : memref<18x64x64xbf16, #tpu.memory_space<vmem>>, vector<1x64x64xbf16>
    %202 = vector.shape_cast %201 : vector<1x64x64xbf16> to vector<64x64xbf16>
    %cst_176 = arith.constant dense<0.000000e+00> : vector<256x64xf32>
    %203 = tpu.matmul %200, %202, %cst_176 {dimension_numbers = #tpu.dot_dimension_numbers<[1], [0], [0], [1], [0, 0, 1, 1], [], []>} : vector<256x64xbf16>, vector<64x64xbf16>, vector<256x64xf32> -> vector<256x64xf32>
    %204 = arith.addf %197, %203 : vector<256x64xf32>
    %c2_177 = arith.constant 2 : index
    %c1_178 = arith.constant 1 : index
    %c0_179 = arith.constant 0 : index
    %205 = vector.load %arg11[%c2_177, %c1_178, %c0_179] : memref<18x18x64xf32, #tpu.memory_space<vmem>>, vector<16x16x64xf32>
    %206 = vector.shape_cast %205 : vector<16x16x64xf32> to vector<256x64xf32>
    %207 = arith.truncf %206 : vector<256x64xf32> to vector<256x64xbf16>
    %c16 = arith.constant 16 : index
    %c0_180 = arith.constant 0 : index
    %c0_181 = arith.constant 0 : index
    %208 = vector.load %arg8[%c16, %c0_180, %c0_181] : memref<18x64x64xbf16, #tpu.memory_space<vmem>>, vector<1x64x64xbf16>
    %209 = vector.shape_cast %208 : vector<1x64x64xbf16> to vector<64x64xbf16>
    %cst_182 = arith.constant dense<0.000000e+00> : vector<256x64xf32>
    %210 = tpu.matmul %207, %209, %cst_182 {dimension_numbers = #tpu.dot_dimension_numbers<[1], [0], [0], [1], [0, 0, 1, 1], [], []>} : vector<256x64xbf16>, vector<64x64xbf16>, vector<256x64xf32> -> vector<256x64xf32>
    %211 = arith.addf %204, %210 : vector<256x64xf32>
    %c2_183 = arith.constant 2 : index
    %c2_184 = arith.constant 2 : index
    %c0_185 = arith.constant 0 : index
    %212 = vector.load %arg11[%c2_183, %c2_184, %c0_185] : memref<18x18x64xf32, #tpu.memory_space<vmem>>, vector<16x16x64xf32>
    %213 = vector.shape_cast %212 : vector<16x16x64xf32> to vector<256x64xf32>
    %214 = arith.truncf %213 : vector<256x64xf32> to vector<256x64xbf16>
    %c17 = arith.constant 17 : index
    %c0_186 = arith.constant 0 : index
    %c0_187 = arith.constant 0 : index
    %215 = vector.load %arg8[%c17, %c0_186, %c0_187] : memref<18x64x64xbf16, #tpu.memory_space<vmem>>, vector<1x64x64xbf16>
    %216 = vector.shape_cast %215 : vector<1x64x64xbf16> to vector<64x64xbf16>
    %cst_188 = arith.constant dense<0.000000e+00> : vector<256x64xf32>
    %217 = tpu.matmul %214, %216, %cst_188 {dimension_numbers = #tpu.dot_dimension_numbers<[1], [0], [0], [1], [0, 0, 1, 1], [], []>} : vector<256x64xbf16>, vector<64x64xbf16>, vector<256x64xf32> -> vector<256x64xf32>
    %218 = arith.addf %211, %217 : vector<256x64xf32>
    %c1_189 = arith.constant 1 : index
    %c0_190 = arith.constant 0 : index
    %219 = vector.load %arg9[%c1_189, %c0_190] : memref<2x64xf32, #tpu.memory_space<vmem>>, vector<1x64xf32>
    %220 = vector.broadcast %219 : vector<1x64xf32> to vector<256x64xf32>
    %221 = arith.addf %218, %220 : vector<256x64xf32>
    %222 = arith.addf %221, %1 : vector<256x64xf32>
    %c0_191 = arith.constant 0 : index
    %c0_192 = arith.constant 0 : index
    %c0_193 = arith.constant 0 : index
    %223 = vector.load %arg10[%c0_191, %c0_192, %c0_193] : memref<1x256x64xf32, #tpu.memory_space<vmem>>, vector<1x256x64xf32>
    %224 = vector.shape_cast %223 : vector<1x256x64xf32> to vector<256x64xf32>
    %225 = vector.shape_cast %222 : vector<256x64xf32> to vector<1x256x64xf32>
    tpu.vector_store %arg10[%c0_191, %c0_192, %c0_193], %225 {strides = array<i32>} : memref<1x256x64xf32, #tpu.memory_space<vmem>>, vector<1x256x64xf32>,
    return
  }
  func.func @transform_0(%arg0: i32) -> (i32, i32, i32) {
    %c0_i32 = arith.constant 0 : i32
    %c0_i32_0 = arith.constant 0 : i32
    %c0_i32_1 = arith.constant 0 : i32
    return %arg0, %c0_i32, %c0_i32_0 : i32, i32, i32
  }
  func.func @transform_1(%arg0: i32) -> (i32, i32, i32) {
    %c0_i32 = arith.constant 0 : i32
    %c0_i32_0 = arith.constant 0 : i32
    %c0_i32_1 = arith.constant 0 : i32
    return %arg0, %c0_i32, %c0_i32_0 : i32, i32, i32
  }
  func.func @transform_2(%arg0: i32) -> (i32, i32, i32) {
    %c0_i32 = arith.constant 0 : i32
    %c0_i32_0 = arith.constant 0 : i32
    %c0_i32_1 = arith.constant 0 : i32
    return %arg0, %c0_i32, %c0_i32_0 : i32, i32, i32
  }
  func.func @transform_3(%arg0: i32) -> (i32, i32, i32) {
    %c0_i32 = arith.constant 0 : i32
    %c0_i32_0 = arith.constant 0 : i32
    %c0_i32_1 = arith.constant 0 : i32
    %c0_i32_2 = arith.constant 0 : i32
    return %c0_i32, %c0_i32_0, %c0_i32_1 : i32, i32, i32
  }
  func.func @transform_4(%arg0: i32) -> (i32, i32) {
    %c0_i32 = arith.constant 0 : i32
    %c0_i32_0 = arith.constant 0 : i32
    %c0_i32_1 = arith.constant 0 : i32
    return %c0_i32, %c0_i32_0 : i32, i32
  }
  func.func @transform_5(%arg0: i32) -> (i32, i32, i32) {
    %c0_i32 = arith.constant 0 : i32
    %c0_i32_0 = arith.constant 0 : i32
    %c0_i32_1 = arith.constant 0 : i32
    %c0_i32_2 = arith.constant 0 : i32
    return %c0_i32, %c0_i32_0, %c0_i32_1 : i32, i32, i32
  }
  func.func @transform_6(%arg0: i32) -> (i32, i32) {
    %c0_i32 = arith.constant 0 : i32
    %c0_i32_0 = arith.constant 0 : i32
    %c0_i32_1 = arith.constant 0 : i32
    return %c0_i32, %c0_i32_0 : i32, i32
  }
  func.func @transform_7(%arg0: i32) -> (i32, i32, i32) {
    %c0_i32 = arith.constant 0 : i32
    %c0_i32_0 = arith.constant 0 : i32
    %c0_i32_1 = arith.constant 0 : i32
    %c0_i32_2 = arith.constant 0 : i32
    return %c0_i32, %c0_i32_0, %c0_i32_1 : i32, i32, i32
  }
  func.func @transform_8(%arg0: i32) -> (i32, i32) {
    %c0_i32 = arith.constant 0 : i32
    %c0_i32_0 = arith.constant 0 : i32
    %c0_i32_1 = arith.constant 0 : i32
    return %c0_i32, %c0_i32_0 : i32, i32
  }
  func.func @transform_9(%arg0: i32) -> (i32, i32, i32) {
    %c0_i32 = arith.constant 0 : i32
    %c0_i32_0 = arith.constant 0 : i32
    %c0_i32_1 = arith.constant 0 : i32
    return %arg0, %c0_i32, %c0_i32_0 : i32, i32, i32
  }
}

module attributes {stable_mosaic.version = 11 : i64} {
  func.func @_tail_kernel(%arg0: i32, %arg1: memref<256x64xf32, #tpu.memory_space<vmem>>, %arg2: memref<256x64xf32, #tpu.memory_space<vmem>>, %arg3: memref<64x8xbf16, #tpu.memory_space<vmem>>, %arg4: memref<1x8xf32, #tpu.memory_space<vmem>>, %arg5: memref<256x8xf32, #tpu.memory_space<vmem>>) attributes {dimension_semantics = [#tpu.dimension_semantics<parallel>], iteration_bounds = array<i64: 2>, scalar_prefetch = 0 : i64, scratch_operands = 0 : i64, tpu.core_type = #tpu.core_type<tc>, window_params = [{transform_indices = @transform_0, window_bounds = array<i64: 256, 64>}, {transform_indices = @transform_1, window_bounds = array<i64: 256, 64>}, {pipeline_mode = #tpu.pipeline_mode<synchronous>, transform_indices = @transform_2, window_bounds = array<i64: 64, 8>}, {pipeline_mode = #tpu.pipeline_mode<synchronous>, transform_indices = @transform_3, window_bounds = array<i64: 1, 8>}, {transform_indices = @transform_4, window_bounds = array<i64: 256, 8>}]} {
    %c0 = arith.constant 0 : index
    %c0_0 = arith.constant 0 : index
    %0 = vector.load %arg1[%c0, %c0_0] : memref<256x64xf32, #tpu.memory_space<vmem>>, vector<256x64xf32>
    %c0_1 = arith.constant 0 : index
    %c0_2 = arith.constant 0 : index
    %1 = vector.load %arg2[%c0_1, %c0_2] : memref<256x64xf32, #tpu.memory_space<vmem>>, vector<256x64xf32>
    %2 = arith.addf %0, %1 : vector<256x64xf32>
    %3 = arith.truncf %2 : vector<256x64xf32> to vector<256x64xbf16>
    %c0_3 = arith.constant 0 : index
    %c0_4 = arith.constant 0 : index
    %4 = vector.load %arg3[%c0_3, %c0_4] : memref<64x8xbf16, #tpu.memory_space<vmem>>, vector<64x8xbf16>
    %cst = arith.constant dense<0.000000e+00> : vector<256x8xf32>
    %5 = tpu.matmul %3, %4, %cst {dimension_numbers = #tpu.dot_dimension_numbers<[1], [0], [0], [1], [0, 0, 1, 1], [], []>} : vector<256x64xbf16>, vector<64x8xbf16>, vector<256x8xf32> -> vector<256x8xf32>
    %c0_5 = arith.constant 0 : index
    %c0_6 = arith.constant 0 : index
    %6 = vector.load %arg4[%c0_5, %c0_6] : memref<1x8xf32, #tpu.memory_space<vmem>>, vector<1x8xf32>
    %7 = vector.broadcast %6 : vector<1x8xf32> to vector<256x8xf32>
    %8 = arith.addf %5, %7 : vector<256x8xf32>
    %cst_7 = arith.constant 0.000000e+00 : f32
    %9 = vector.broadcast %cst_7 : f32 to vector<256x8xf32>
    %10 = arith.subf %9, %8 : vector<256x8xf32>
    %11 = math.exp %10 : vector<256x8xf32>
    %cst_8 = arith.constant 1.000000e+00 : f32
    %12 = vector.broadcast %cst_8 : f32 to vector<256x8xf32>
    %13 = arith.addf %12, %11 : vector<256x8xf32>
    %cst_9 = arith.constant 1.000000e+00 : f32
    %14 = vector.broadcast %cst_9 : f32 to vector<256x8xf32>
    %15 = arith.divf %14, %13 : vector<256x8xf32>
    %c0_10 = arith.constant 0 : index
    %c0_11 = arith.constant 0 : index
    %16 = vector.load %arg5[%c0_10, %c0_11] : memref<256x8xf32, #tpu.memory_space<vmem>>, vector<256x8xf32>
    tpu.vector_store %arg5[%c0_10, %c0_11], %15 {strides = array<i32>} : memref<256x8xf32, #tpu.memory_space<vmem>>, vector<256x8xf32>,
    return
  }
  func.func @transform_0(%arg0: i32) -> (i32, i32) {
    %c0_i32 = arith.constant 0 : i32
    %c0_i32_0 = arith.constant 0 : i32
    return %arg0, %c0_i32 : i32, i32
  }
  func.func @transform_1(%arg0: i32) -> (i32, i32) {
    %c0_i32 = arith.constant 0 : i32
    %c0_i32_0 = arith.constant 0 : i32
    return %arg0, %c0_i32 : i32, i32
  }
  func.func @transform_2(%arg0: i32) -> (i32, i32) {
    %c0_i32 = arith.constant 0 : i32
    %c0_i32_0 = arith.constant 0 : i32
    %c0_i32_1 = arith.constant 0 : i32
    return %c0_i32, %c0_i32_0 : i32, i32
  }
  func.func @transform_3(%arg0: i32) -> (i32, i32) {
    %c0_i32 = arith.constant 0 : i32
    %c0_i32_0 = arith.constant 0 : i32
    %c0_i32_1 = arith.constant 0 : i32
    return %c0_i32, %c0_i32_0 : i32, i32
  }
  func.func @transform_4(%arg0: i32) -> (i32, i32) {
    %c0_i32 = arith.constant 0 : i32
    %c0_i32_0 = arith.constant 0 : i32
    return %arg0, %c0_i32 : i32, i32
  }
}

</mosaic_0001>

<bundles_post_ra>
// kernel: rendering_net_forward.6
= control target key start
LH: loop header
LB: loop body
LE: loop exit
PB: predicated region body
PF: predicated region fallthrough
CT: control target
= control target key end

     0   :  { %s685_s12 = smov 0   ;;  %s865_s0 = inlined_call_operand.vmem [shape: f32[512,8], index: 0, kind: input, shape index: {}]   ;;  %s866_s1 = inlined_call_operand.vmem [shape: bf16[8,64], index: 1, kind: input, shape index: {}]   ;;  %s867_s2 = inlined_call_operand.vmem [shape: f32[1,64], index: 2, kind: input, shape index: {}]   ;;  %s868_s3 = inlined_call_operand.vmem [shape: f32[512,64], index: 3, kind: output, shape index: {}]  }
   0x1 LB: > { %s566_s13 = sadd.s32 4294967295, %s663_s12   ;;  %p570_p0 = scmp.ge.s32.totalorder %s663_s12, 1  ;;  %s663_s12 = sphi %s685_s12, %s13_s12  }
   0x2   : > { %p138_p1 = scmp.lt.s32.totalorder %s663_s12, 3 }
   0x4   : > { %p139_p2 = pnand %p570_p0, %p138_p1 }
   0x5   : > { %v223_v0 = vld [vmem:[%s866_s1] sm:$0xf] (!%p139_p2)  ;;  %vm280_vm0 = vcmask (!%p139_p2), 1043456   ;;  %s571_s16 = sshll.u32 (!%p139_p2), %s566_s13, 5  ;;  %vm231_vm1 = vcmask (!%p139_p2), 64512   ;;  %vm477_vm2 = vcmask (!%p139_p2), 523264  }
   0x6   : > { %142 = sbr.rel (%p139_p2) target bundleno = 265 (0x109), region = 32  ;;  %647 = vmatprep.subr.msk.bf16.mxu0 (!%p139_p2), %vm280_vm0, %v223_v0  ;;  %648 = vmatprep.subr.msk.bf16.mxu1 (!%p139_p2), %vm280_vm0, %v223_v0  ;;  %v282_v1 = vsel (!%p139_p2), %vm280_vm0, %v223_v0, 0  ;;  %p163_p3 = scmp.lt.s32.totalorder (!%p139_p2), %s571_s16, 63  ;;  %v757_v50 = vld [vmem:[%s867_s2] ss:$0 sm:$0xff] (!%p139_p2) }
   0x7   : > { %612 = vmatpush3.bf16.msra.mxu0 (!%p139_p2), %v282_v1  ;;  %646 = vmatpush3.bf16.msra.mxu1 (!%p139_p2), %v282_v1 }
   0xd   : > { %s870_s16 = smov (!%p163_p3, %s571_s16), 63 }
   0xe   : > { %s572_s17 = sshll.u32 %s870_s16, 3 }
   0xf   : > { %s704_s20 = scalar_lea.vmem %s865_s0, %s572_s17  ;;  %s765_s25 = scalar_lea.vmem %s868_s3, %s572_s17 }
  0x10   : > { %v175_v2 = vld [vmem:[%s704_s20] sm:$0xff]  ;;  %v176_v3 = vld [vmem:[%s704_s20 + $0x8] sm:$0xff]  ;;  %v177_v7 = vld [vmem:[%s704_s20 + $0x10] sm:$0xff] }
  0x11   : > { %v191_v4 = vld [vmem:[%s704_s20 + $0x80] sm:$0xff]  ;;  %v207_v5 = vpack.c.bf16 %v176_v3, %v175_v2  ;;  %v192_v6 = vld [vmem:[%s704_s20 + $0x88] sm:$0xff]  ;;  %v178_v8 = vld [vmem:[%s704_s20 + $0x18] sm:$0xff] }
  0x12   : > { %v215_v9 = vpack.c.bf16 %v192_v6, %v191_v4  ;;  %v208_v10 = vpack.c.bf16 %v178_v8, %v177_v7  ;;  %v193_v11 = vld [vmem:[%s704_s20 + $0x90] sm:$0xff]  ;;  %v194_v12 = vld [vmem:[%s704_s20 + $0x98] sm:$0xff]  ;;  %v179_v13 = vld [vmem:[%s704_s20 + $0x20] sm:$0xff] }
  0x13   : > { %613 = vmatprep.mubr.msk.bf16.mxu0 %vm231_vm1, %v207_v5  ;;  %v216_v14 = vpack.c.bf16 %v194_v12, %v193_v11  ;;  %v180_v15 = vld [vmem:[%s704_s20 + $0x28] sm:$0xff]  ;;  %v195_v16 = vld [vmem:[%s704_s20 + $0xa0] sm:$0xff]  ;;  %v181_v20 = vld [vmem:[%s704_s20 + $0x30] sm:$0xff] }
  0x14   : > { %v196_v17 = vld [vmem:[%s704_s20 + $0xa8] sm:$0xff]  ;;  %629 = vmatprep.mubr.msk.bf16.mxu1 %vm231_vm1, %v215_v9  ;;  %614 = vmatmul.mubr.msk.bf16.vlgmr.msra.gmra.mrb[0].mxu0 %vm231_vm1, %v208_v10  ;;  %v209_v18 = vpack.c.bf16 %v180_v15, %v179_v13  ;;  %v182_v21 = vld [vmem:[%s704_s20 + $0x38] sm:$0xff]  ;;  %v197_v22 = vld [vmem:[%s704_s20 + $0xb0] sm:$0xff] }
  0x15   : > { %v217_v19 = vpack.c.bf16 %v196_v17, %v195_v16  ;;  %630 = vmatmul.mubr.msk.bf16.vlgmr.msra.gmra.mrb[0].mxu1 %vm231_vm1, %v216_v14  ;;  %v198_v23 = vld [vmem:[%s704_s20 + $0xb8] sm:$0xff]  ;;  %v183_v24 = vld [vmem:[%s704_s20 + $0x40] sm:$0xff]  ;;  %v184_v25 = vld [vmem:[%s704_s20 + $0x48] sm:$0xff]  ;;  %v210_v28 = vpack.c.bf16 %v182_v21, %v181_v20 }
  0x16   : > { %617 = vmatprep.mubr.msk.bf16.mxu0 %vm231_vm1, %v209_v18  ;;  %v199_v26 = vld [vmem:[%s704_s20 + $0xc0] sm:$0xff]  ;;  %v200_v27 = vld [vmem:[%s704_s20 + $0xc8] sm:$0xff]  ;;  %v218_v29 = vpack.c.bf16 %v198_v23, %v197_v22  ;;  %v211_v30 = vpack.c.bf16 %v184_v25, %v183_v24  ;;  %v185_v32 = vld [vmem:[%s704_s20 + $0x50] sm:$0xff] }
  0x17   : > { %633 = vmatprep.mubr.msk.bf16.mxu1 %vm231_vm1, %v217_v19  ;;  %v219_v31 = vpack.c.bf16 %v200_v27, %v199_v26  ;;  %v186_v33 = vld [vmem:[%s704_s20 + $0x58] sm:$0xff]  ;;  %v201_v34 = vld [vmem:[%s704_s20 + $0xd0] sm:$0xff]  ;;  %v187_v36 = vld [vmem:[%s704_s20 + $0x60] sm:$0xff] }
  0x18   : > { %v202_v35 = vld [vmem:[%s704_s20 + $0xd8] sm:$0xff]  ;;  %v188_v37 = vld [vmem:[%s704_s20 + $0x68] sm:$0xff]  ;;  %v203_v38 = vld [vmem:[%s704_s20 + $0xe0] sm:$0xff]  ;;  %v212_v40 = vpack.c.bf16 %v186_v33, %v185_v32 }
  0x19   : > { %v204_v39 = vld [vmem:[%s704_s20 + $0xe8] sm:$0xff]  ;;  %v220_v41 = vpack.c.bf16 %v202_v35, %v201_v34  ;;  %v213_v42 = vpack.c.bf16 %v188_v37, %v187_v36  ;;  %v189_v44 = vld [vmem:[%s704_s20 + $0x70] sm:$0xff]  ;;  %v190_v45 = vld [vmem:[%s704_s20 + $0x78] sm:$0xff] }
  0x1a   : > { %v221_v43 = vpack.c.bf16 %v204_v39, %v203_v38  ;;  %v205_v46 = vld [vmem:[%s704_s20 + $0xf0] sm:$0xff]  ;;  %v206_v47 = vld [vmem:[%s704_s20 + $0xf8] sm:$0xff]  ;;  %v214_v48 = vpack.c.bf16 %v190_v45, %v189_v44 }
  0x1b   : > { %v222_v49 = vpack.c.bf16 %v206_v47, %v205_v46 }
  0x1c   : > { %618 = vmatmul.mubr.msk.bf16.gmra.mrb[4].mxu0 %vm231_vm1, %v210_v28 }
  0x1d   : > { %634 = vmatmul.mubr.msk.bf16.gmra.mrb[4].mxu1 %vm231_vm1, %v218_v29  ;;  %621 = vmatprep.mubr.msk.bf16.mxu0 %vm231_vm1, %v211_v30 }
  0x1e   : > { %637 = vmatprep.mubr.msk.bf16.mxu1 %vm231_vm1, %v219_v31 }
  0x24   : > { %622 = vmatmul.mubr.msk.bf16.gmra.mrb[8].mxu0 %vm231_vm1, %v212_v40 }
  0x25   : > { %638 = vmatmul.mubr.msk.bf16.gmra.mrb[8].mxu1 %vm231_vm1, %v220_v41  ;;  %625 = vmatprep.mubr.msk.bf16.mxu0 %vm231_vm1, %v213_v42 }
  0x26   : > { %641 = vmatprep.mubr.msk.bf16.mxu1 %vm231_vm1, %v221_v43 }
  0x2c   : > { %626 = vmatmul.mubr.msk.bf16.gmra.mrb[12].mxu0 %vm231_vm1, %v214_v48 }
  0x2d   : > { %642 = vmatmul.mubr.msk.bf16.gmra.mrb[12].mxu1 %vm231_vm1, %v222_v49 }
  0xe7   : > { %v615_v51 = vpop.f32.mrb[0].mxu0 }
  0xe8   : > { %v327_v52 = vadd.f32 %v615_v51, %v757_v50  ;;  %v631_v53 = vpop.f32.mrb[0].mxu1  ;;  %v318_v54 = vpop.f32.mrb[1].mxu0 }
  0xe9   : > { %v391_v55 = vadd.f32 %v631_v53, %v757_v50  ;;  %v319_v56 = vadd.f32 %v757_v50, %v318_v54  ;;  %v382_v57 = vpop.f32.mrb[1].mxu1  ;;  %v616_v58 = vpop.f32.mrb[2].mxu0 }
  0xea   : > { %v447_v59 = vmax.f32 %v327_v52, 0.0  ;;  %v383_v60 = vadd.f32 %v757_v50, %v382_v57  ;;  %v330_v61 = vadd.f32 %v616_v58, %v757_v50  ;;  %v632_v62 = vpop.f32.mrb[2].mxu1  ;;  %v321_v63 = vpop.f32.mrb[3].mxu0 }
  0xeb   : > { %v463_v0 = vmax.f32 %v391_v55, 0.0  ;;  %v445_v1 = vmax.f32 %v319_v56, 0.0  ;;  %v394_v2 = vadd.f32 %v632_v62, %v757_v50  ;;  %v322_v3 = vadd.f32 %v757_v50, %v321_v63  ;;  %v385_v4 = vpop.f32.mrb[3].mxu1 }
  0xec   : > { %480 = vst.msk [vmem:[%s765_s25 + $0x10] sm:$0xff] %vm477_vm2, %v447_v59  ;;  %v461_v5 = vmax.f32 %v383_v60, 0.0  ;;  %v448_v6 = vmax.f32 %v330_v61, 0.0  ;;  %v386_v7 = vadd.f32 %v757_v50, %v385_v4 }
  0xed   : > { %496 = vst.msk [vmem:[%s765_s25 + $0x90] sm:$0xff] %vm477_vm2, %v463_v0  ;;  %478 = vst.msk [vmem:[%s765_s25] sm:$0xff] %vm477_vm2, %v445_v1  ;;  %v464_v8 = vmax.f32 %v394_v2, 0.0  ;;  %v446_v9 = vmax.f32 %v322_v3, 0.0 }
  0xee   : > { %494 = vst.msk [vmem:[%s765_s25 + $0x80] sm:$0xff] %vm477_vm2, %v461_v5  ;;  %481 = vst.msk [vmem:[%s765_s25 + $0x18] sm:$0xff] %vm477_vm2, %v448_v6  ;;  %v462_v10 = vmax.f32 %v386_v7, 0.0 }
  0xef   : > { %497 = vst.msk [vmem:[%s765_s25 + $0x98] sm:$0xff] %vm477_vm2, %v464_v8  ;;  %479 = vst.msk [vmem:[%s765_s25 + $0x8] sm:$0xff] %vm477_vm2, %v446_v9  ;;  %v619_v11 = vpop.f32.mrb[4].mxu0 }
  0xf0   : > { %495 = vst.msk [vmem:[%s765_s25 + $0x88] sm:$0xff] %vm477_vm2, %v462_v10  ;;  %v343_v12 = vadd.f32 %v619_v11, %v757_v50  ;;  %v635_v13 = vpop.f32.mrb[4].mxu1  ;;  %v334_v14 = vpop.f32.mrb[5].mxu0 }
  0xf1   : > { %v407_v15 = vadd.f32 %v635_v13, %v757_v50  ;;  %v335_v16 = vadd.f32 %v757_v50, %v334_v14  ;;  %v398_v17 = vpop.f32.mrb[5].mxu1  ;;  %v620_v18 = vpop.f32.mrb[6].mxu0 }
  0xf2   : > { %v451_v19 = vmax.f32 %v343_v12, 0.0  ;;  %v399_v20 = vadd.f32 %v757_v50, %v398_v17  ;;  %v346_v21 = vadd.f32 %v620_v18, %v757_v50  ;;  %v636_v22 = vpop.f32.mrb[6].mxu1  ;;  %v337_v23 = vpop.f32.mrb[7].mxu0 }
  0xf3   : > { %v467_v24 = vmax.f32 %v407_v15, 0.0  ;;  %v449_v25 = vmax.f32 %v335_v16, 0.0  ;;  %v410_v26 = vadd.f32 %v636_v22, %v757_v50  ;;  %v338_v27 = vadd.f32 %v757_v50, %v337_v23  ;;  %v401_v28 = vpop.f32.mrb[7].mxu1 }
  0xf4   : > { %484 = vst.msk [vmem:[%s765_s25 + $0x30] sm:$0xff] %vm477_vm2, %v451_v19  ;;  %v465_v29 = vmax.f32 %v399_v20, 0.0  ;;  %v452_v30 = vmax.f32 %v346_v21, 0.0  ;;  %v402_v31 = vadd.f32 %v757_v50, %v401_v28 }
  0xf5   : > { %500 = vst.msk [vmem:[%s765_s25 + $0xb0] sm:$0xff] %vm477_vm2, %v467_v24  ;;  %482 = vst.msk [vmem:[%s765_s25 + $0x20] sm:$0xff] %vm477_vm2, %v449_v25  ;;  %v468_v32 = vmax.f32 %v410_v26, 0.0  ;;  %v450_v33 = vmax.f32 %v338_v27, 0.0 }
  0xf6   : > { %498 = vst.msk [vmem:[%s765_s25 + $0xa0] sm:$0xff] %vm477_vm2, %v465_v29  ;;  %485 = vst.msk [vmem:[%s765_s25 + $0x38] sm:$0xff] %vm477_vm2, %v452_v30  ;;  %v466_v34 = vmax.f32 %v402_v31, 0.0 }
  0xf7   : > { %501 = vst.msk [vmem:[%s765_s25 + $0xb8] sm:$0xff] %vm477_vm2, %v468_v32  ;;  %483 = vst.msk [vmem:[%s765_s25 + $0x28] sm:$0xff] %vm477_vm2, %v450_v33  ;;  %v623_v35 = vpop.f32.mrb[8].mxu0 }
  0xf8   : > { %499 = vst.msk [vmem:[%s765_s25 + $0xa8] sm:$0xff] %vm477_vm2, %v466_v34  ;;  %v359_v36 = vadd.f32 %v623_v35, %v757_v50  ;;  %v639_v37 = vpop.f32.mrb[8].mxu1  ;;  %v350_v38 = vpop.f32.mrb[9].mxu0 }
  0xf9   : > { %v423_v39 = vadd.f32 %v639_v37, %v757_v50  ;;  %v351_v40 = vadd.f32 %v757_v50, %v350_v38  ;;  %v414_v41 = vpop.f32.mrb[9].mxu1  ;;  %v624_v42 = vpop.f32.mrb[10].mxu0 }
  0xfa   : > { %v455_v43 = vmax.f32 %v359_v36, 0.0  ;;  %v415_v44 = vadd.f32 %v757_v50, %v414_v41  ;;  %v362_v45 = vadd.f32 %v624_v42, %v757_v50  ;;  %v640_v46 = vpop.f32.mrb[10].mxu1  ;;  %v353_v47 = vpop.f32.mrb[11].mxu0 }
  0xfb   : > { %v471_v48 = vmax.f32 %v423_v39, 0.0  ;;  %v453_v49 = vmax.f32 %v351_v40, 0.0  ;;  %v426_v51 = vadd.f32 %v640_v46, %v757_v50  ;;  %v354_v52 = vadd.f32 %v757_v50, %v353_v47  ;;  %v417_v53 = vpop.f32.mrb[11].mxu1 }
  0xfc   : > { %488 = vst.msk [vmem:[%s765_s25 + $0x50] sm:$0xff] %vm477_vm2, %v455_v43  ;;  %v469_v54 = vmax.f32 %v415_v44, 0.0  ;;  %v456_v55 = vmax.f32 %v362_v45, 0.0  ;;  %v418_v56 = vadd.f32 %v757_v50, %v417_v53 }
  0xfd   : > { %504 = vst.msk [vmem:[%s765_s25 + $0xd0] sm:$0xff] %vm477_vm2, %v471_v48  ;;  %486 = vst.msk [vmem:[%s765_s25 + $0x40] sm:$0xff] %vm477_vm2, %v453_v49  ;;  %v472_v57 = vmax.f32 %v426_v51, 0.0  ;;  %v454_v58 = vmax.f32 %v354_v52, 0.0 }
  0xfe   : > { %502 = vst.msk [vmem:[%s765_s25 + $0xc0] sm:$0xff] %vm477_vm2, %v469_v54  ;;  %489 = vst.msk [vmem:[%s765_s25 + $0x58] sm:$0xff] %vm477_vm2, %v456_v55  ;;  %v470_v59 = vmax.f32 %v418_v56, 0.0 }
  0xff   : > { %505 = vst.msk [vmem:[%s765_s25 + $0xd8] sm:$0xff] %vm477_vm2, %v472_v57  ;;  %487 = vst.msk [vmem:[%s765_s25 + $0x48] sm:$0xff] %vm477_vm2, %v454_v58  ;;  %v627_v60 = vpop.f32.mrb[12].mxu0 }
 0x100   : > { %503 = vst.msk [vmem:[%s765_s25 + $0xc8] sm:$0xff] %vm477_vm2, %v470_v59  ;;  %v375_v61 = vadd.f32 %v627_v60, %v757_v50  ;;  %v643_v62 = vpop.f32.mrb[12].mxu1  ;;  %v366_v63 = vpop.f32.mrb[13].mxu0 }
 0x101   : > { %v439_v0 = vadd.f32 %v643_v62, %v757_v50  ;;  %v367_v1 = vadd.f32 %v757_v50, %v366_v63  ;;  %v430_v2 = vpop.f32.mrb[13].mxu1  ;;  %v628_v3 = vpop.f32.mrb[14].mxu0 }
 0x102   : > { %v459_v4 = vmax.f32 %v375_v61, 0.0  ;;  %v431_v5 = vadd.f32 %v757_v50, %v430_v2  ;;  %v378_v6 = vadd.f32 %v628_v3, %v757_v50  ;;  %v644_v7 = vpop.f32.mrb[14].mxu1  ;;  %v369_v8 = vpop.f32.mrb[15].mxu0 }
 0x103   : > { %v475_v9 = vmax.f32 %v439_v0, 0.0  ;;  %v457_v10 = vmax.f32 %v367_v1, 0.0  ;;  %v442_v11 = vadd.f32 %v644_v7, %v757_v50  ;;  %v370_v12 = vadd.f32 %v757_v50, %v369_v8  ;;  %v433_v13 = vpop.f32.mrb[15].mxu1 }
 0x104   : > { %492 = vst.msk [vmem:[%s765_s25 + $0x70] sm:$0xff] %vm477_vm2, %v459_v4  ;;  %v473_v14 = vmax.f32 %v431_v5, 0.0  ;;  %v460_v15 = vmax.f32 %v378_v6, 0.0  ;;  %v434_v16 = vadd.f32 %v757_v50, %v433_v13 }
 0x105   : > { %508 = vst.msk [vmem:[%s765_s25 + $0xf0] sm:$0xff] %vm477_vm2, %v475_v9  ;;  %490 = vst.msk [vmem:[%s765_s25 + $0x60] sm:$0xff] %vm477_vm2, %v457_v10  ;;  %v476_v17 = vmax.f32 %v442_v11, 0.0  ;;  %v458_v18 = vmax.f32 %v370_v12, 0.0 }
 0x106   : > { %506 = vst.msk [vmem:[%s765_s25 + $0xe0] sm:$0xff] %vm477_vm2, %v473_v14  ;;  %493 = vst.msk [vmem:[%s765_s25 + $0x78] sm:$0xff] %vm477_vm2, %v460_v15  ;;  %v474_v19 = vmax.f32 %v434_v16, 0.0 }
 0x107   : > { %509 = vst.msk [vmem:[%s765_s25 + $0xf8] sm:$0xff] %vm477_vm2, %v476_v17  ;;  %491 = vst.msk [vmem:[%s765_s25 + $0x68] sm:$0xff] %vm477_vm2, %v458_v18 }
 0x108   : > { %507 = vst.msk [vmem:[%s765_s25 + $0xe8] sm:$0xff] %vm477_vm2, %v474_v19 }
 0x109 PF: > { %s13_s12 = sadd.s32 1, %s663_s12  }
 0x10a   : > { %p10_p4 = scmp.ge.s32.totalorder %s13_s12, 4  }
 0x10c   :  { %12 = sbr.rel (!%p10_p4) target bundleno = 1 (0x1), region = 62 }

// kernel: rendering_net_forward.11
= control target key start
LH: loop header
LB: loop body
LE: loop exit
PB: predicated region body
PF: predicated region fallthrough
CT: control target
= control target key end

     0   :  { %s1153_s15 = smov 0   ;;  %s1395_s0 = inlined_call_operand.vmem [shape: f32[512,64], index: 0, kind: input, shape index: {}]   ;;  %s1396_s1 = inlined_call_operand.vmem [shape: f32[512,64], index: 1, kind: input, shape index: {}]   ;;  %s1397_s2 = inlined_call_operand.vmem [shape: bf16[64,8], index: 2, kind: input, shape index: {}]   ;;  %s1398_s3 = inlined_call_operand.vmem [shape: f32[1,8], index: 3, kind: input, shape index: {}]   ;;  %s1399_s4 = inlined_call_operand.vmem [shape: f32[512,8], index: 4, kind: output, shape index: {}]  }
   0x1 LB: > { %s878_s16 = sadd.s32 4294967295, %s1126_s15   ;;  %p882_p0 = scmp.ge.s32.totalorder %s1126_s15, 1  ;;  %s1126_s15 = sphi %s1153_s15, %s14_s15  }
   0x2   : > { %p174_p1 = scmp.lt.s32.totalorder %s1126_s15, 3 }
   0x4   : > { %p175_p2 = pnand %p882_p0, %p174_p1 }
   0x5   : > { %v988_v0 = vld [vmem:[%s1397_s2] sm:$0xff] (!%p175_p2)   ;;  %s883_s19 = sshll.u32 (!%p175_p2), %s878_s16, 5  ;;  %v989_v1 = vld [vmem:[%s1397_s2 + $0x8] sm:$0xff] (!%p175_p2)   ;;  %v990_v2 = vld [vmem:[%s1397_s2 + $0x10] sm:$0xff] (!%p175_p2)   ;;  %vm375_vm0 = vcmask (!%p175_p2), 523264   ;;  %vm777_vm1 = vcmask (!%p175_p2), 64512  }
   0x6   : > { %178 = sbr.rel (%p175_p2) target bundleno = 326 (0x146), region = 36  ;;  %p206_p3 = scmp.lt.s32.totalorder (!%p175_p2), %s883_s19, 63  ;;  %932 = vmatprep.subr.bf16.mxu0 (!%p175_p2), %v988_v0  ;;  %972 = vmatprep.subr.bf16.mxu1 (!%p175_p2), %v988_v0  ;;  %v991_v3 = vld [vmem:[%s1397_s2 + $0x18] sm:$0xff] (!%p175_p2)  }
   0x7   : > { %933 = vmatpush3.bf16.msra.mxu0 (!%p175_p2), %v988_v0  ;;  %976 = vmatpush3.bf16.msra.mxu1 (!%p175_p2), %v988_v0 }
   0x8   : > { %934 = vmatprep.subr.bf16.mxu0 (!%p175_p2), %v989_v1  ;;  %973 = vmatprep.subr.bf16.mxu1 (!%p175_p2), %v989_v1 }
   0xb   : > { %935 = vmatpush3.bf16.msra.mxu0 (!%p175_p2), %v989_v1  ;;  %977 = vmatpush3.bf16.msra.mxu1 (!%p175_p2), %v989_v1 }
   0xc   : > { %936 = vmatprep.subr.bf16.mxu0 (!%p175_p2), %v990_v2  ;;  %974 = vmatprep.subr.bf16.mxu1 (!%p175_p2), %v990_v2 }
   0xd   : > { %s1401_s19 = smov (!%p206_p3, %s883_s19), 63 }
   0xe   : > { %s1170_s24 = sshll.u32 %s1401_s19, 3 }
   0xf   : > { %s1179_s29 = scalar_lea.vmem %s1395_s0, %s1170_s24  ;;  %s1185_s6 = scalar_lea.vmem %s1396_s1, %s1170_s24  ;;  %937 = vmatpush3.bf16.msra.mxu0 %v990_v2  ;;  %978 = vmatpush3.bf16.msra.mxu1 %v990_v2 }
  0x10   : > { %v224_v4 = vld [vmem:[%s1179_s29] sm:$0xff]  ;;  %v225_v5 = vld [vmem:[%s1179_s29 + $0x8] sm:$0xff]  ;;  %v226_v14 = vld [vmem:[%s1179_s29 + $0x10] sm:$0xff]  ;;  %938 = vmatprep.subr.bf16.mxu0 %v991_v3  ;;  %975 = vmatprep.subr.bf16.mxu1 %v991_v3  ;;  %s1308_s11 = scalar_lea.vmem %s1399_s4, %s1170_s24 }
  0x11   : > { %v256_v6 = vld [vmem:[%s1185_s6] sm:$0xff]  ;;  %v257_v7 = vld [vmem:[%s1185_s6 + $0x8] sm:$0xff]  ;;  %v227_v17 = vld [vmem:[%s1179_s29 + $0x18] sm:$0xff] }
  0x12   : > { %v288_v8 = vadd.f32 %v256_v6, %v224_v4  ;;  %v240_v9 = vld [vmem:[%s1179_s29 + $0x80] sm:$0xff]  ;;  %v241_v10 = vld [vmem:[%s1179_s29 + $0x88] sm:$0xff]  ;;  %v289_v11 = vadd.f32 %v257_v7, %v225_v5  ;;  %v258_v18 = vld [vmem:[%s1185_s6 + $0x10] sm:$0xff] }
  0x13   : > { %v272_v12 = vld [vmem:[%s1185_s6 + $0x80] sm:$0xff]  ;;  %v273_v13 = vld [vmem:[%s1185_s6 + $0x88] sm:$0xff]  ;;  %v259_v19 = vld [vmem:[%s1185_s6 + $0x18] sm:$0xff]  ;;  %v290_v21 = vadd.f32 %v258_v18, %v226_v14  ;;  %939 = vmatpush3.bf16.msra.mxu0 %v991_v3  ;;  %979 = vmatpush3.bf16.msra.mxu1 %v991_v3 }
  0x14   : > { %v304_v15 = vadd.f32 %v272_v12, %v240_v9  ;;  %v305_v16 = vadd.f32 %v273_v13, %v241_v10  ;;  %v320_v20 = vpack.c.bf16 %v289_v11, %v288_v8  ;;  %v291_v22 = vadd.f32 %v259_v19, %v227_v17  ;;  %v242_v23 = vld [vmem:[%s1179_s29 + $0x90] sm:$0xff]  ;;  %v243_v24 = vld [vmem:[%s1179_s29 + $0x98] sm:$0xff]  ;;  %v228_v29 = vld [vmem:[%s1179_s29 + $0x20] sm:$0xff] }
  0x15   : > { %v274_v25 = vld [vmem:[%s1185_s6 + $0x90] sm:$0xff]  ;;  %v275_v27 = vld [vmem:[%s1185_s6 + $0x98] sm:$0xff]  ;;  %v229_v30 = vld [vmem:[%s1179_s29 + $0x28] sm:$0xff] }
  0x16   : > { %v328_v26 = vpack.c.bf16 %v305_v16, %v304_v15  ;;  %v306_v28 = vadd.f32 %v274_v25, %v242_v23  ;;  %940 = vmatprep.mubr.msk.bf16.mxu0 %vm375_vm0, %v320_v20  ;;  %v307_v31 = vadd.f32 %v275_v27, %v243_v24  ;;  %v260_v32 = vld [vmem:[%s1185_s6 + $0x20] sm:$0xff]  ;;  %v261_v33 = vld [vmem:[%s1185_s6 + $0x28] sm:$0xff]  ;;  %v321_v35 = vpack.c.bf16 %v291_v22, %v290_v21  ;;  %v230_v44 = vld [vmem:[%s1179_s29 + $0x30] sm:$0xff] }
  0x17   : > { %v244_v34 = vld [vmem:[%s1179_s29 + $0xa0] sm:$0xff]  ;;  %v292_v36 = vadd.f32 %v260_v32, %v228_v29  ;;  %v293_v37 = vadd.f32 %v261_v33, %v229_v30  ;;  %v245_v38 = vld [vmem:[%s1179_s29 + $0xa8] sm:$0xff]  ;;  %v231_v45 = vld [vmem:[%s1179_s29 + $0x38] sm:$0xff] }
  0x18   : > { %956 = vmatprep.mubr.msk.bf16.mxu1 %vm375_vm0, %v328_v26  ;;  %v276_v39 = vld [vmem:[%s1185_s6 + $0xa0] sm:$0xff]  ;;  %v277_v40 = vld [vmem:[%s1185_s6 + $0xa8] sm:$0xff]  ;;  %v329_v41 = vpack.c.bf16 %v307_v31, %v306_v28  ;;  %v262_v46 = vld [vmem:[%s1185_s6 + $0x30] sm:$0xff]  ;;  %941 = vmatmul.mubr.msk.bf16.vlgmr.msra.gmra.mrb[0].mxu0 %vm375_vm0, %v321_v35 }
  0x19   : > { %v308_v42 = vadd.f32 %v276_v39, %v244_v34  ;;  %v309_v43 = vadd.f32 %v277_v40, %v245_v38  ;;  %v322_v47 = vpack.c.bf16 %v293_v37, %v292_v36  ;;  %v263_v48 = vld [vmem:[%s1185_s6 + $0x38] sm:$0xff]  ;;  %v246_v49 = vld [vmem:[%s1179_s29 + $0xb0] sm:$0xff]  ;;  %v294_v52 = vadd.f32 %v262_v46, %v230_v44  ;;  %v232_v55 = vld [vmem:[%s1179_s29 + $0x40] sm:$0xff] }
  0x1a   : > { %v247_v50 = vld [vmem:[%s1179_s29 + $0xb8] sm:$0xff]  ;;  %v278_v53 = vld [vmem:[%s1185_s6 + $0xb0] sm:$0xff]  ;;  %957 = vmatmul.mubr.msk.bf16.vlgmr.msra.gmra.mrb[0].mxu1 %vm375_vm0, %v329_v41  ;;  %v295_v56 = vadd.f32 %v263_v48, %v231_v45  ;;  %v233_v59 = vld [vmem:[%s1179_s29 + $0x48] sm:$0xff] }
  0x1b   : > { %v330_v51 = vpack.c.bf16 %v309_v43, %v308_v42  ;;  %v279_v54 = vld [vmem:[%s1185_s6 + $0xb8] sm:$0xff]  ;;  %v310_v57 = vadd.f32 %v278_v53, %v246_v49  ;;  %v264_v60 = vld [vmem:[%s1185_s6 + $0x40] sm:$0xff]  ;;  %v265_v61 = vld [vmem:[%s1185_s6 + $0x48] sm:$0xff]  ;;  %944 = vmatprep.mubr.msk.bf16.mxu0 %vm375_vm0, %v322_v47 }
  0x1c   : > { %v311_v58 = vadd.f32 %v279_v54, %v247_v50  ;;  %v296_v62 = vadd.f32 %v264_v60, %v232_v55  ;;  %v297_v63 = vadd.f32 %v265_v61, %v233_v59  ;;  %v248_v0 = vld [vmem:[%s1179_s29 + $0xc0] sm:$0xff]  ;;  %v249_v1 = vld [vmem:[%s1179_s29 + $0xc8] sm:$0xff]  ;;  %v234_v5 = vld [vmem:[%s1179_s29 + $0x50] sm:$0xff]  ;;  %v323_v11 = vpack.c.bf16 %v295_v56, %v294_v52 }
  0x1d   : > { %960 = vmatprep.mubr.msk.bf16.mxu1 %vm375_vm0, %v330_v51  ;;  %v280_v2 = vld [vmem:[%s1185_s6 + $0xc0] sm:$0xff]  ;;  %v281_v3 = vld [vmem:[%s1185_s6 + $0xc8] sm:$0xff]  ;;  %v235_v6 = vld [vmem:[%s1179_s29 + $0x58] sm:$0xff] }
  0x1e   : > { %v312_v4 = vadd.f32 %v280_v2, %v248_v0  ;;  %v313_v7 = vadd.f32 %v281_v3, %v249_v1  ;;  %v266_v8 = vld [vmem:[%s1185_s6 + $0x50] sm:$0xff]  ;;  %v267_v9 = vld [vmem:[%s1185_s6 + $0x58] sm:$0xff]  ;;  %v331_v12 = vpack.c.bf16 %v311_v58, %v310_v57  ;;  %v324_v16 = vpack.c.bf16 %v297_v63, %v296_v62  ;;  %v236_v18 = vld [vmem:[%s1179_s29 + $0x60] sm:$0xff] }
  0x1f   : > { %v250_v10 = vld [vmem:[%s1179_s29 + $0xd0] sm:$0xff]  ;;  %v251_v13 = vld [vmem:[%s1179_s29 + $0xd8] sm:$0xff]  ;;  %v237_v19 = vld [vmem:[%s1179_s29 + $0x68] sm:$0xff]  ;;  %v298_v24 = vadd.f32 %v266_v8, %v234_v5  ;;  %v299_v25 = vadd.f32 %v267_v9, %v235_v6 }
  0x20   : > { %v282_v14 = vld [vmem:[%s1185_s6 + $0xd0] sm:$0xff]  ;;  %v283_v15 = vld [vmem:[%s1185_s6 + $0xd8] sm:$0xff]  ;;  %v332_v17 = vpack.c.bf16 %v313_v7, %v312_v4  ;;  %v268_v20 = vld [vmem:[%s1185_s6 + $0x60] sm:$0xff]  ;;  %945 = vmatmul.mubr.msk.bf16.gmra.mrb[4].mxu0 %vm375_vm0, %v323_v11 }
  0x21   : > { %v269_v21 = vld [vmem:[%s1185_s6 + $0x68] sm:$0xff]  ;;  %v252_v22 = vld [vmem:[%s1179_s29 + $0xe0] sm:$0xff]  ;;  %v314_v28 = vadd.f32 %v282_v14, %v250_v10  ;;  %v315_v29 = vadd.f32 %v283_v15, %v251_v13  ;;  %v300_v30 = vadd.f32 %v268_v20, %v236_v18  ;;  %948 = vmatprep.mubr.msk.bf16.mxu0 %vm375_vm0, %v324_v16  ;;  %v238_v34 = vld [vmem:[%s1179_s29 + $0x70] sm:$0xff]  ;;  %v325_v36 = vpack.c.bf16 %v299_v25, %v298_v24 }
  0x22   : > { %v253_v23 = vld [vmem:[%s1179_s29 + $0xe8] sm:$0xff]  ;;  %v284_v26 = vld [vmem:[%s1185_s6 + $0xe0] sm:$0xff]  ;;  %961 = vmatmul.mubr.msk.bf16.gmra.mrb[4].mxu1 %vm375_vm0, %v331_v12  ;;  %v301_v31 = vadd.f32 %v269_v21, %v237_v19  ;;  %v239_v35 = vld [vmem:[%s1179_s29 + $0x78] sm:$0xff] }
  0x23   : > { %v285_v27 = vld [vmem:[%s1185_s6 + $0xe8] sm:$0xff]  ;;  %964 = vmatprep.mubr.msk.bf16.mxu1 %vm375_vm0, %v332_v17  ;;  %v316_v32 = vadd.f32 %v284_v26, %v252_v22  ;;  %v333_v37 = vpack.c.bf16 %v315_v29, %v314_v28  ;;  %v270_v38 = vld [vmem:[%s1185_s6 + $0x70] sm:$0xff]  ;;  %v271_v39 = vld [vmem:[%s1185_s6 + $0x78] sm:$0xff] }
  0x24   : > { %v317_v33 = vadd.f32 %v285_v27, %v253_v23  ;;  %v254_v40 = vld [vmem:[%s1179_s29 + $0xf0] sm:$0xff]  ;;  %v326_v41 = vpack.c.bf16 %v301_v31, %v300_v30  ;;  %v255_v43 = vld [vmem:[%s1179_s29 + $0xf8] sm:$0xff]  ;;  %v302_v46 = vadd.f32 %v270_v38, %v238_v34  ;;  %v303_v47 = vadd.f32 %v271_v39, %v239_v35  ;;  %v1270_v52 = vld [vmem:[%s1398_s3] ss:$0 sm:$0xff] }
  0x25   : > { %v286_v44 = vld [vmem:[%s1185_s6 + $0xf0] sm:$0xff]  ;;  %v287_v45 = vld [vmem:[%s1185_s6 + $0xf8] sm:$0xff] }
  0x26   : > { %v334_v42 = vpack.c.bf16 %v317_v33, %v316_v32  ;;  %v318_v48 = vadd.f32 %v286_v44, %v254_v40  ;;  %v319_v49 = vadd.f32 %v287_v45, %v255_v43  ;;  %v327_v50 = vpack.c.bf16 %v303_v47, %v302_v46 }
  0x28   : > { %949 = vmatmul.mubr.msk.bf16.gmra.mrb[8].mxu0 %vm375_vm0, %v325_v36  ;;  %v335_v51 = vpack.c.bf16 %v319_v49, %v318_v48 }
  0x29   : > { %952 = vmatprep.mubr.msk.bf16.mxu0 %vm375_vm0, %v326_v41 }
  0x2a   : > { %965 = vmatmul.mubr.msk.bf16.gmra.mrb[8].mxu1 %vm375_vm0, %v333_v37 }
  0x2b   : > { %968 = vmatprep.mubr.msk.bf16.mxu1 %vm375_vm0, %v334_v42 }
  0x30   : > { %953 = vmatmul.mubr.msk.bf16.gmra.mrb[12].mxu0 %vm375_vm0, %v327_v50 }
  0x32   : > { %969 = vmatmul.mubr.msk.bf16.gmra.mrb[12].mxu1 %vm375_vm0, %v335_v51 }
  0xeb   : > { %v942_v53 = vpop.f32.mrb[0].mxu0 }
  0xec   : > { %v467_v55 = vadd.f32 %v942_v53, %v1270_v52  ;;  %v458_v57 = vpop.f32.mrb[1].mxu0 }
  0xed   : > { %v958_v54 = vpop.f32.mrb[0].mxu1  ;;  %v459_v59 = vadd.f32 %v1270_v52, %v458_v57  ;;  %v943_v61 = vpop.f32.mrb[2].mxu0 }
  0xee   : > { %v531_v56 = vadd.f32 %v958_v54, %v1270_v52  ;;  %v522_v58 = vpop.f32.mrb[1].mxu1  ;;  %v587_v63 = vsub.f32 0.0, %v467_v55  ;;  %v470_v1 = vadd.f32 %v943_v61, %v1270_v52  ;;  %v461_v3 = vpop.f32.mrb[3].mxu0 }
  0xef   : > { %v523_v60 = vadd.f32 %v1270_v52, %v522_v58  ;;  %v959_v62 = vpop.f32.mrb[2].mxu1  ;;  %v585_v5 = vsub.f32 0.0, %v459_v59  ;;  %v462_v7 = vadd.f32 %v1270_v52, %v461_v3 }
  0xf0   : > { %v603_v0 = vsub.f32 0.0, %v531_v56  ;;  %v534_v2 = vadd.f32 %v959_v62, %v1270_v52  ;;  %v525_v4 = vpop.f32.mrb[3].mxu1  ;;  %v621_v9 = vmul.f32 1.442695, %v587_v63  ;;  %v588_v11 = vsub.f32 0.0, %v470_v1 }
  0xf1   : > { %v601_v6 = vsub.f32 0.0, %v523_v60  ;;  %v526_v8 = vadd.f32 %v1270_v52, %v525_v4  ;;  %v617_v13 = vmul.f32 1.442695, %v585_v5  ;;  %v586_v15 = vsub.f32 0.0, %v462_v7 }
  0xf2   : > { %v653_v10 = vmul.f32 1.442695, %v603_v0  ;;  %v604_v12 = vsub.f32 0.0, %v534_v2  ;;  %992 = vpow2.f32 %v621_v9  ;;  %v623_v17 = vmul.f32 1.442695, %v588_v11 }
  0xf3   : > { %v649_v14 = vmul.f32 1.442695, %v601_v6  ;;  %v602_v16 = vsub.f32 0.0, %v526_v8  ;;  %v946_v19 = vpop.f32.mrb[4].mxu0  ;;  %v619_v21 = vmul.f32 1.442695, %v586_v15 }
  0xf4   : > { %994 = vpow2.f32 %v653_v10  ;;  %v655_v18 = vmul.f32 1.442695, %v604_v12  ;;  %v483_v22 = vadd.f32 %v946_v19, %v1270_v52  ;;  %v474_v24 = vpop.f32.mrb[5].mxu0 }
  0xf5   : > { %v962_v20 = vpop.f32.mrb[4].mxu1  ;;  %996 = vpow2.f32 %v617_v13  ;;  %v651_v26 = vmul.f32 1.442695, %v602_v16  ;;  %v475_v27 = vadd.f32 %v1270_v52, %v474_v24  ;;  %v947_v29 = vpop.f32.mrb[6].mxu0 }
  0xf6   : > { %v547_v23 = vadd.f32 %v962_v20, %v1270_v52  ;;  %v538_v25 = vpop.f32.mrb[5].mxu1  ;;  %998 = vpow2.f32 %v649_v14  ;;  %v591_v31 = vsub.f32 0.0, %v483_v22  ;;  %v486_v33 = vadd.f32 %v947_v29, %v1270_v52  ;;  %v477_v34 = vpop.f32.mrb[7].mxu0 }
  0xf7   : > { %v539_v28 = vadd.f32 %v1270_v52, %v538_v25  ;;  %v963_v30 = vpop.f32.mrb[6].mxu1  ;;  %1000 = vpow2.f32 %v623_v17  ;;  %v589_v36 = vsub.f32 0.0, %v475_v27  ;;  %v478_v57 = vadd.f32 %v1270_v52, %v477_v34 }
  0xf8   : > { %v607_v32 = vsub.f32 0.0, %v547_v23  ;;  %v541_v35 = vpop.f32.mrb[7].mxu1  ;;  %1002 = vpow2.f32 %v655_v18  ;;  %v629_v38 = vmul.f32 1.442695, %v591_v31  ;;  %v592_v40 = vsub.f32 0.0, %v486_v33 }
  0xf9   : > { %v605_v37 = vsub.f32 0.0, %v539_v28  ;;  %1004 = vpow2.f32 %v619_v21  ;;  %v625_v41 = vmul.f32 1.442695, %v589_v36  ;;  %v550_v47 = vadd.f32 %v963_v30, %v1270_v52 }
  0xfa   : > { %v661_v39 = vmul.f32 1.442695, %v607_v32  ;;  %1006 = vpow2.f32 %v651_v26  ;;  %v631_v43 = vmul.f32 1.442695, %v592_v40  ;;  %v542_v3 = vadd.f32 %v1270_v52, %v541_v35 }
  0xfb   : > { %v657_v42 = vmul.f32 1.442695, %v605_v37  ;;  %1008 = vpow2.f32 %v629_v38  ;;  %v950_v44 = vpop.f32.mrb[8].mxu0  ;;  %v608_v0 = vsub.f32 0.0, %v550_v47  ;;  %v590_v6 = vsub.f32 0.0, %v478_v57 }
  0xfc   : > { %1010 = vpow2.f32 %v661_v39  ;;  %v993_v46 = vpop.eup %992  ;;  %v490_v48 = vpop.f32.mrb[9].mxu0  ;;  %v499_v9 = vadd.f32 %v950_v44, %v1270_v52  ;;  %v606_v20 = vsub.f32 0.0, %v542_v3 }
  0xfd   : > { %v966_v45 = vpop.f32.mrb[8].mxu1  ;;  %1012 = vpow2.f32 %v625_v41  ;;  %v683_v51 = vadd.f32 1.0, %v993_v46  ;;  %v951_v53 = vpop.f32.mrb[10].mxu0  ;;  %v663_v14 = vmul.f32 1.442695, %v608_v0  ;;  %v491_v21 = vadd.f32 %v1270_v52, %v490_v48 }
  0xfe   : > { %v554_v49 = vpop.f32.mrb[9].mxu1  ;;  %v995_v50 = vpop.eup %994  ;;  %1014 = vpow2.f32 %v657_v42  ;;  %v563_v15 = vadd.f32 %v966_v45, %v1270_v52  ;;  %v627_v26 = vmul.f32 1.442695, %v590_v6  ;;  %v595_v32 = vsub.f32 0.0, %v499_v9 }
  0xff   : > { %v967_v54 = vpop.f32.mrb[10].mxu1  ;;  %v997_v55 = vpop.eup %996  ;;  %v699_v56 = vadd.f32 1.0, %v995_v50  ;;  %1016 = vpow2.f32 %v631_v43  ;;  %v555_v27 = vadd.f32 %v1270_v52, %v554_v49  ;;  %v502_v33 = vadd.f32 %v951_v53, %v1270_v52 }
 0x100   : > { %v493_v58 = vpop.f32.mrb[11].mxu0  ;;  %v999_v59 = vpop.eup %998  ;;  %1018 = vrcp.f32 %v683_v51  ;;  %v681_v60 = vadd.f32 1.0, %v997_v55  ;;  %v611_v36 = vsub.f32 0.0, %v563_v15  ;;  %v566_v37 = vadd.f32 %v967_v54, %v1270_v52 }
 0x101   : > { %v557_v61 = vpop.f32.mrb[11].mxu1  ;;  %v1001_v62 = vpop.eup %1000  ;;  %1020 = vrcp.f32 %v699_v56  ;;  %v697_v63 = vadd.f32 1.0, %v999_v59  ;;  %v593_v40 = vsub.f32 0.0, %v491_v21  ;;  %v494_v41 = vadd.f32 %v1270_v52, %v493_v58 }
 0x102   : > { %v1003_v1 = vpop.eup %1002  ;;  %1022 = vrcp.f32 %v681_v60  ;;  %v684_v2 = vadd.f32 1.0, %v1001_v62  ;;  %v659_v43 = vmul.f32 1.442695, %v606_v20  ;;  %v609_v44 = vsub.f32 0.0, %v555_v27 }
 0x103   : > { %v1005_v4 = vpop.eup %1004  ;;  %1024 = vrcp.f32 %v697_v63  ;;  %v700_v5 = vadd.f32 1.0, %v1003_v1  ;;  %v954_v10 = vpop.f32.mrb[12].mxu0  ;;  %v558_v45 = vadd.f32 %v1270_v52, %v557_v61  ;;  %v637_v47 = vmul.f32 1.442695, %v595_v32 }
 0x104   : > { %v1007_v7 = vpop.eup %1006  ;;  %1026 = vrcp.f32 %v684_v2  ;;  %v682_v8 = vadd.f32 1.0, %v1005_v4  ;;  %v1290_v16 = vpop.f32.mrb[13].mxu0  ;;  %v596_v48 = vsub.f32 0.0, %v502_v33  ;;  %v515_v49 = vadd.f32 %v954_v10, %v1270_v52 }
 0x105   : > { %v970_v11 = vpop.f32.mrb[12].mxu1  ;;  %v1009_v12 = vpop.eup %1008  ;;  %1028 = vrcp.f32 %v700_v5  ;;  %v698_v13 = vadd.f32 1.0, %v1007_v7  ;;  %v669_v51 = vmul.f32 1.442695, %v611_v36  ;;  %v612_v53 = vsub.f32 0.0, %v566_v37 }
 0x106   : > { %v1292_v17 = vpop.f32.mrb[13].mxu1  ;;  %v1011_v18 = vpop.eup %1010  ;;  %1030 = vrcp.f32 %v682_v8  ;;  %v687_v19 = vadd.f32 1.0, %v1009_v12  ;;  %v579_v54 = vadd.f32 %v970_v11, %v1270_v52  ;;  %v633_v56 = vmul.f32 1.442695, %v593_v40 }
 0x107   : > { %v1295_v22 = vpop.f32.mrb[14].mxu0  ;;  %v1297_v23 = vpop.f32.mrb[14].mxu1  ;;  %1032 = vrcp.f32 %v698_v13  ;;  %v703_v25 = vadd.f32 1.0, %v1011_v18  ;;  %v594_v57 = vsub.f32 0.0, %v494_v41  ;;  %v665_v59 = vmul.f32 1.442695, %v609_v44 }
 0x108   : > { %v1013_v24 = vpop.eup %1012  ;;  %v1300_v28 = vpop.f32.mrb[15].mxu0  ;;  %1034 = vrcp.f32 %v687_v19  ;;  %v610_v60 = vsub.f32 0.0, %v558_v45  ;;  %v639_v62 = vmul.f32 1.442695, %v596_v48  ;;  %v599_v63 = vsub.f32 0.0, %v515_v49 }
 0x109   : > { %v1302_v29 = vpop.f32.mrb[15].mxu1  ;;  %v1015_v30 = vpop.eup %1014  ;;  %v685_v31 = vadd.f32 1.0, %v1013_v24  ;;  %1036 = vrcp.f32 %v703_v25  ;;  %v671_v1 = vmul.f32 1.442695, %v612_v53  ;;  %v615_v2 = vsub.f32 0.0, %v579_v54 }
 0x10a   : > { %v1017_v34 = vpop.eup %1016  ;;  %v701_v35 = vadd.f32 1.0, %v1015_v30  ;;  %v635_v4 = vmul.f32 1.442695, %v594_v57  ;;  %v667_v6 = vmul.f32 1.442695, %v610_v60  ;;  %v507_v25 = vadd.f32 %v1270_v52, %v1290_v16 }
 0x10b   : > { %v1019_v38 = vpop.eup %1018  ;;  %1038 = vrcp.f32 %v685_v31  ;;  %v688_v39 = vadd.f32 1.0, %v1017_v34  ;;  %v645_v8 = vmul.f32 1.442695, %v599_v63  ;;  %v677_v10 = vmul.f32 1.442695, %v615_v2 }
 0x10c   : > { %v1021_v42 = vpop.eup %1020  ;;  %780 = vst.msk [vmem:[%s1308_s11 + $0x10] sm:$0xff] %vm777_vm1, %v1019_v38  ;;  %1040 = vrcp.f32 %v701_v35  ;;  %v571_v30 = vadd.f32 %v1270_v52, %v1292_v17  ;;  %v518_v33 = vadd.f32 %v1295_v22, %v1270_v52  ;;  %v582_v36 = vadd.f32 %v1297_v23, %v1270_v52 }
 0x10d   : > { %v1023_v46 = vpop.eup %1022  ;;  %796 = vst.msk [vmem:[%s1308_s11 + $0x90] sm:$0xff] %vm777_vm1, %v1021_v42  ;;  %1042 = vrcp.f32 %v688_v39  ;;  %v597_v38 = vsub.f32 0.0, %v507_v25  ;;  %v510_v39 = vadd.f32 %v1270_v52, %v1300_v28  ;;  %v574_v22 = vadd.f32 %v1270_v52, %v1302_v29 }
 0x10e   : > { %v1025_v50 = vpop.eup %1024  ;;  %778 = vst.msk [vmem:[%s1308_s11] sm:$0xff] %vm777_vm1, %v1023_v46  ;;  %1044 = vpow2.f32 %v663_v14  ;;  %v613_v41 = vsub.f32 0.0, %v571_v30  ;;  %v600_v44 = vsub.f32 0.0, %v518_v33  ;;  %v616_v46 = vsub.f32 0.0, %v582_v36 }
 0x10f   : > { %v1027_v55 = vpop.eup %1026  ;;  %794 = vst.msk [vmem:[%s1308_s11 + $0x80] sm:$0xff] %vm777_vm1, %v1025_v50  ;;  %1046 = vpow2.f32 %v627_v26  ;;  %v641_v48 = vmul.f32 1.442695, %v597_v38  ;;  %v598_v49 = vsub.f32 0.0, %v510_v39  ;;  %v614_v29 = vsub.f32 0.0, %v574_v22 }
 0x110   : > { %v1029_v58 = vpop.eup %1028  ;;  %781 = vst.msk [vmem:[%s1308_s11 + $0x18] sm:$0xff] %vm777_vm1, %v1027_v55  ;;  %1048 = vpow2.f32 %v659_v43  ;;  %v673_v52 = vmul.f32 1.442695, %v613_v41  ;;  %v647_v54 = vmul.f32 1.442695, %v600_v44 }
 0x111   : > { %v1031_v61 = vpop.eup %1030  ;;  %797 = vst.msk [vmem:[%s1308_s11 + $0x98] sm:$0xff] %vm777_vm1, %v1029_v58  ;;  %1050 = vpow2.f32 %v637_v47  ;;  %v643_v58 = vmul.f32 1.442695, %v598_v49  ;;  %v675_v60 = vmul.f32 1.442695, %v614_v29 }
 0x112   : > { %v1033_v0 = vpop.eup %1032  ;;  %779 = vst.msk [vmem:[%s1308_s11 + $0x8] sm:$0xff] %vm777_vm1, %v1031_v61  ;;  %1052 = vpow2.f32 %v669_v51 }
 0x113   : > { %v1035_v3 = vpop.eup %1034  ;;  %795 = vst.msk [vmem:[%s1308_s11 + $0x88] sm:$0xff] %vm777_vm1, %v1033_v0  ;;  %1054 = vpow2.f32 %v633_v56  ;;  %v679_v56 = vmul.f32 1.442695, %v616_v46 }
 0x114   : > { %v1037_v5 = vpop.eup %1036  ;;  %784 = vst.msk [vmem:[%s1308_s11 + $0x30] sm:$0xff] %vm777_vm1, %v1035_v3  ;;  %1056 = vpow2.f32 %v665_v59 }
 0x115   : > { %v1039_v7 = vpop.eup %1038  ;;  %800 = vst.msk [vmem:[%s1308_s11 + $0xb0] sm:$0xff] %vm777_vm1, %v1037_v5  ;;  %1058 = vpow2.f32 %v639_v62 }
 0x116   : > { %v1041_v9 = vpop.eup %1040  ;;  %782 = vst.msk [vmem:[%s1308_s11 + $0x20] sm:$0xff] %vm777_vm1, %v1039_v7  ;;  %1060 = vpow2.f32 %v671_v1 }
 0x117   : > { %v1043_v11 = vpop.eup %1042  ;;  %798 = vst.msk [vmem:[%s1308_s11 + $0xa0] sm:$0xff] %vm777_vm1, %v1041_v9  ;;  %1062 = vpow2.f32 %v635_v4 }
 0x118   : > { %v1045_v12 = vpop.eup %1044  ;;  %785 = vst.msk [vmem:[%s1308_s11 + $0x38] sm:$0xff] %vm777_vm1, %v1043_v11  ;;  %1064 = vpow2.f32 %v667_v6 }
 0x119   : > { %v1047_v13 = vpop.eup %1046  ;;  %v704_v14 = vadd.f32 1.0, %v1045_v12  ;;  %1066 = vpow2.f32 %v645_v8 }
 0x11a   : > { %v1049_v15 = vpop.eup %1048  ;;  %v686_v18 = vadd.f32 1.0, %v1047_v13  ;;  %1068 = vpow2.f32 %v677_v10 }
 0x11b   : > { %v1051_v19 = vpop.eup %1050  ;;  %1070 = vrcp.f32 %v704_v14  ;;  %v702_v20 = vadd.f32 1.0, %v1049_v15 }
 0x11c   : > { %v1053_v21 = vpop.eup %1052  ;;  %1072 = vrcp.f32 %v686_v18  ;;  %v691_v24 = vadd.f32 1.0, %v1051_v19 }
 0x11d   : > { %v1055_v26 = vpop.eup %1054  ;;  %1074 = vrcp.f32 %v702_v20  ;;  %v707_v27 = vadd.f32 1.0, %v1053_v21 }
 0x11e   : > { %v1057_v31 = vpop.eup %1056  ;;  %1076 = vrcp.f32 %v691_v24  ;;  %v689_v32 = vadd.f32 1.0, %v1055_v26 }
 0x11f   : > { %v1059_v34 = vpop.eup %1058  ;;  %1078 = vrcp.f32 %v707_v27  ;;  %v705_v35 = vadd.f32 1.0, %v1057_v31 }
 0x120   : > { %v1061_v37 = vpop.eup %1060  ;;  %1080 = vrcp.f32 %v689_v32  ;;  %v692_v16 = vadd.f32 1.0, %v1059_v34 }
 0x121   : > { %v1063_v17 = vpop.eup %1062  ;;  %1082 = vrcp.f32 %v705_v35  ;;  %v708_v40 = vadd.f32 1.0, %v1061_v37 }
 0x122   : > { %v1065_v42 = vpop.eup %1064  ;;  %1084 = vrcp.f32 %v692_v16  ;;  %v690_v43 = vadd.f32 1.0, %v1063_v17 }
 0x123   : > { %v1067_v23 = vpop.eup %1066  ;;  %1086 = vrcp.f32 %v708_v40  ;;  %v706_v45 = vadd.f32 1.0, %v1065_v42 }
 0x124   : > { %v1069_v47 = vpop.eup %1068  ;;  %1088 = vrcp.f32 %v690_v43  ;;  %v695_v28 = vadd.f32 1.0, %v1067_v23 }
 0x125   : > { %v1071_v50 = vpop.eup %1070  ;;  %1090 = vrcp.f32 %v706_v45  ;;  %v711_v51 = vadd.f32 1.0, %v1069_v47 }
 0x126   : > { %v1073_v53 = vpop.eup %1072  ;;  %801 = vst.msk [vmem:[%s1308_s11 + $0xb8] sm:$0xff] %vm777_vm1, %v1071_v50  ;;  %1092 = vrcp.f32 %v695_v28 }
 0x127   : > { %v1075_v55 = vpop.eup %1074  ;;  %783 = vst.msk [vmem:[%s1308_s11 + $0x28] sm:$0xff] %vm777_vm1, %v1073_v53  ;;  %1094 = vrcp.f32 %v711_v51 }
 0x128   : > { %v1077_v57 = vpop.eup %1076  ;;  %799 = vst.msk [vmem:[%s1308_s11 + $0xa8] sm:$0xff] %vm777_vm1, %v1075_v55  ;;  %1096 = vpow2.f32 %v641_v48 }
 0x129   : > { %v1079_v59 = vpop.eup %1078  ;;  %788 = vst.msk [vmem:[%s1308_s11 + $0x50] sm:$0xff] %vm777_vm1, %v1077_v57  ;;  %1098 = vpow2.f32 %v673_v52 }
 0x12a   : > { %v1081_v61 = vpop.eup %1080  ;;  %804 = vst.msk [vmem:[%s1308_s11 + $0xd0] sm:$0xff] %vm777_vm1, %v1079_v59  ;;  %1100 = vpow2.f32 %v647_v54 }
 0x12b   : > { %v1083_v62 = vpop.eup %1082  ;;  %786 = vst.msk [vmem:[%s1308_s11 + $0x40] sm:$0xff] %vm777_vm1, %v1081_v61  ;;  %1102 = vpow2.f32 %v679_v56 }
 0x12c   : > { %v1085_v63 = vpop.eup %1084  ;;  %802 = vst.msk [vmem:[%s1308_s11 + $0xc0] sm:$0xff] %vm777_vm1, %v1083_v62  ;;  %1104 = vpow2.f32 %v643_v58 }
 0x12d   : > { %v1087_v0 = vpop.eup %1086  ;;  %789 = vst.msk [vmem:[%s1308_s11 + $0x58] sm:$0xff] %vm777_vm1, %v1085_v63  ;;  %1106 = vpow2.f32 %v675_v60 }
 0x12e   : > { %v1089_v1 = vpop.eup %1088  ;;  %805 = vst.msk [vmem:[%s1308_s11 + $0xd8] sm:$0xff] %vm777_vm1, %v1087_v0 }
 0x12f   : > { %v1091_v2 = vpop.eup %1090  ;;  %787 = vst.msk [vmem:[%s1308_s11 + $0x48] sm:$0xff] %vm777_vm1, %v1089_v1 }
 0x130   : > { %v1093_v3 = vpop.eup %1092  ;;  %803 = vst.msk [vmem:[%s1308_s11 + $0xc8] sm:$0xff] %vm777_vm1, %v1091_v2 }
 0x131   : > { %v1095_v4 = vpop.eup %1094  ;;  %792 = vst.msk [vmem:[%s1308_s11 + $0x70] sm:$0xff] %vm777_vm1, %v1093_v3 }
 0x132   : > { %v1097_v5 = vpop.eup %1096  ;;  %808 = vst.msk [vmem:[%s1308_s11 + $0xf0] sm:$0xff] %vm777_vm1, %v1095_v4 }
 0x133   : > { %v1099_v6 = vpop.eup %1098  ;;  %v693_v7 = vadd.f32 1.0, %v1097_v5 }
 0x134   : > { %v1101_v8 = vpop.eup %1100  ;;  %v709_v9 = vadd.f32 1.0, %v1099_v6 }
 0x135   : > { %v1103_v10 = vpop.eup %1102  ;;  %1108 = vrcp.f32 %v693_v7  ;;  %v696_v11 = vadd.f32 1.0, %v1101_v8 }
 0x136   : > { %v1105_v12 = vpop.eup %1104  ;;  %1110 = vrcp.f32 %v709_v9  ;;  %v712_v13 = vadd.f32 1.0, %v1103_v10 }
 0x137   : > { %v1107_v14 = vpop.eup %1106  ;;  %1112 = vrcp.f32 %v696_v11  ;;  %v694_v15 = vadd.f32 1.0, %v1105_v12 }
 0x138   : > { %1114 = vrcp.f32 %v712_v13  ;;  %v710_v18 = vadd.f32 1.0, %v1107_v14 }
 0x139   : > { %1116 = vrcp.f32 %v694_v15 }
 0x13a   : > { %1118 = vrcp.f32 %v710_v18 }
 0x13f   : > { %v1109_v19 = vpop.eup %1108 }
 0x140   : > { %v1111_v20 = vpop.eup %1110  ;;  %790 = vst.msk [vmem:[%s1308_s11 + $0x60] sm:$0xff] %vm777_vm1, %v1109_v19 }
 0x141   : > { %v1113_v21 = vpop.eup %1112  ;;  %806 = vst.msk [vmem:[%s1308_s11 + $0xe0] sm:$0xff] %vm777_vm1, %v1111_v20 }
 0x142   : > { %v1115_v24 = vpop.eup %1114  ;;  %793 = vst.msk [vmem:[%s1308_s11 + $0x78] sm:$0xff] %vm777_vm1, %v1113_v21 }
 0x143   : > { %v1117_v25 = vpop.eup %1116  ;;  %809 = vst.msk [vmem:[%s1308_s11 + $0xf8] sm:$0xff] %vm777_vm1, %v1115_v24 }
 0x144   : > { %v1119_v26 = vpop.eup %1118  ;;  %791 = vst.msk [vmem:[%s1308_s11 + $0x68] sm:$0xff] %vm777_vm1, %v1117_v25 }
 0x145   : > { %807 = vst.msk [vmem:[%s1308_s11 + $0xe8] sm:$0xff] %vm777_vm1, %v1119_v26 }
 0x146 PF: > { %s14_s15 = sadd.s32 1, %s1126_s15  }
 0x147   : > { %p11_p4 = scmp.ge.s32.totalorder %s14_s15, 4  }
 0x149   :  { %13 = sbr.rel (!%p11_p4) target bundleno = 1 (0x1), region = 69 }

// kernel: rendering_net_forward.7
= control target key start
LH: loop header
LB: loop body
LE: loop exit
PB: predicated region body
PF: predicated region fallthrough
CT: control target
= control target key end

     0   :  { %s11970_s30 = smov 0   ;;  %s14850_s0 = inlined_call_operand.vmem [shape: f32[2,256,64], index: 0, kind: input, shape index: {}]   ;;  %s14851_s1 = inlined_call_operand.vmem [shape: bf16[2,256,32], index: 1, kind: input, shape index: {}]   ;;  %s14852_s2 = inlined_call_operand.vmem [shape: bf16[2,256,32], index: 2, kind: input, shape index: {}]   ;;  %s14853_s3 = inlined_call_operand.vmem [shape: bf16[4,32,32], index: 3, kind: input, shape index: {}]   ;;  %s14854_s4 = inlined_call_operand.vmem [shape: f32[4,32], index: 4, kind: input, shape index: {}]   ;;  %s14855_s5 = inlined_call_operand.vmem [shape: bf16[4,32,64], index: 5, kind: input, shape index: {}]   ;;  %s14856_s6 = inlined_call_operand.vmem [shape: f32[4,64], index: 6, kind: input, shape index: {}]   ;;  %s14857_s7 = inlined_call_operand.vmem [shape: bf16[18,64,64], index: 7, kind: input, shape index: {}]   ;;  %s14858_s8 = inlined_call_operand.vmem [shape: f32[2,64], index: 8, kind: input, shape index: {}]   ;;  %s14859_s9 = inlined_call_operand.vmem [shape: f32[2,256,64], index: 9, kind: output, shape index: {}]  }
   0x1 LB: > { %s8985_s10 = sadd.s32 4294967295, %s11917_s30   ;;  %p8989_p0 = scmp.ge.s32.totalorder %s11917_s30, 1  ;;  %s11917_s30 = sphi %s11970_s30, %s19_s30  }
   0x2   : > { %p307_p1 = scmp.lt.s32.totalorder %s11917_s30, 3 }
   0x4   : > { %p308_p2 = pnand %p8989_p0, %p307_p1 }
   0x6   : > { %311 = sbr.rel (%p308_p2) target bundleno = 2326 (0x916), region = 56 }
   0xd   : > { %v11743_v0 = vld [vmem:[%s14853_s3] sm:$0xff]   ;;  %p353_p3 = scmp.lt.s32.totalorder %s8985_s10, 1  ;;  %v11744_v1 = vld [vmem:[%s14853_s3 + $0x8] sm:$0xff]   ;;  %vm571_vm0 = vcmask 261120   ;;  %v11763_v20 = vld [vmem:[%s14853_s3 + $0x10] sm:$0xff]   ;;  %vm1681_vm1 = vcmask 523264  }
   0xe   : > { %10214 = vmatprep.subr.bf16.mxu0 %v11743_v0  ;;  %v11761_v2 = vld [vmem:[%s14855_s5] sm:$0xff]   ;;  %v11762_v4 = vld [vmem:[%s14855_s5 + $0x8] sm:$0xff]   ;;  %v11764_v48 = vld [vmem:[%s14853_s3 + $0x18] sm:$0xff]   ;;  %vm1684_vm2 = vcmask 517120  }
   0xf   : > { %s15164_s10 = smov (!%p353_p3, %s8985_s10), 1  ;;  %10215 = vmatpush3.bf16.msra.mxu0 %v11743_v0  ;;  %v12086_v21 = vld [vmem:[%s14854_s4] ss:$0 sm:$0xff] }
  0x10   : > { %10216 = vmatprep.subr.bf16.mxu0 %v11744_v1  ;;  %s9707_s15 = sshll.u32 %s15164_s10, 7  ;;  %s9706_s17 = sshll.u32 %s15164_s10, 8 }
  0x11   : > { %s11995_s20 = scalar_lea.vmem %s14851_s1, %s9707_s15  ;;  %s12429_s12 = scalar_lea.vmem %s14852_s2, %s9707_s15 }
  0x12   : > { %v11998_v3 = vld [vmem:[%s11995_s20] sm:$0xff]   ;;  %v12004_v5 = vld [vmem:[%s11995_s20 + $0x8] sm:$0xff]   ;;  %v12009_v6 = vld [vmem:[%s11995_s20 + $0x10] sm:$0xff]   ;;  %s14718_s13 = scalar_lea.vmem %s14859_s9, %s9706_s17 }
  0x13   : > { %10217 = vmatpush3.bf16.msra.mxu0 %v11744_v1  ;;  %10218 = vmatprep.mubr.msk.bf16.mxu0 %vm571_vm0, %v11998_v3  ;;  %v12016_v7 = vld [vmem:[%s11995_s20 + $0x18] sm:$0xff]   ;;  %v12019_v8 = vld [vmem:[%s11995_s20 + $0x20] sm:$0xff]   ;;  %v12026_v9 = vld [vmem:[%s11995_s20 + $0x28] sm:$0xff]  }
  0x14   : > { %10250 = vmatprep.subr.bf16.mxu0 %v11761_v2  ;;  %v12029_v10 = vld [vmem:[%s11995_s20 + $0x30] sm:$0xff]   ;;  %v12036_v11 = vld [vmem:[%s11995_s20 + $0x38] sm:$0xff]   ;;  %v12039_v12 = vld [vmem:[%s11995_s20 + $0x40] sm:$0xff]  }
  0x15   : > { %v12046_v13 = vld [vmem:[%s11995_s20 + $0x48] sm:$0xff]   ;;  %v12049_v14 = vld [vmem:[%s11995_s20 + $0x50] sm:$0xff]   ;;  %v12056_v15 = vld [vmem:[%s11995_s20 + $0x58] sm:$0xff]  }
  0x16   : > { %10219 = vmatmul.mubr.msk.bf16.vlgmr.msra.gmra.mrb[0].mxu0 %vm571_vm0, %v12004_v5  ;;  %v12059_v16 = vld [vmem:[%s11995_s20 + $0x60] sm:$0xff]   ;;  %v12066_v17 = vld [vmem:[%s11995_s20 + $0x68] sm:$0xff]   ;;  %v12069_v18 = vld [vmem:[%s11995_s20 + $0x70] sm:$0xff]  }
  0x17   : > { %10222 = vmatprep.mubr.msk.bf16.mxu0 %vm571_vm0, %v12009_v6  ;;  %10251 = vmatpush3.bf16.msra.mxu0 %v11761_v2  ;;  %v12076_v19 = vld [vmem:[%s11995_s20 + $0x78] sm:$0xff]   ;;  %s12485_s20 = scalar_lea.vmem %s14850_s0, %s9706_s17 }
  0x18   : > { %10252 = vmatprep.subr.bf16.mxu0 %v11762_v4 }
  0x1b   : > { %10253 = vmatpush3.bf16.msra.mxu0 %v11762_v4 }
  0x1c   : > { %10286 = vmatprep.subr.bf16.mxu0 %v11763_v20 }
  0x1e   : > { %10223 = vmatmul.mubr.msk.bf16.gmra.mrb[4].mxu0 %vm571_vm0, %v12016_v7 }
  0x1f   : > { %10226 = vmatprep.mubr.msk.bf16.mxu0 %vm571_vm0, %v12019_v8 }
  0x26   : > { %10227 = vmatmul.mubr.msk.bf16.gmra.mrb[8].mxu0 %vm571_vm0, %v12026_v9 }
  0x27   : > { %10230 = vmatprep.mubr.msk.bf16.mxu0 %vm571_vm0, %v12029_v10 }
  0x2e   : > { %10231 = vmatmul.mubr.msk.bf16.gmra.mrb[12].mxu0 %vm571_vm0, %v12036_v11 }
  0x2f   : > { %10234 = vmatprep.mubr.msk.bf16.mxu0 %vm571_vm0, %v12039_v12 }
  0x36   : > { %10235 = vmatmul.mubr.msk.bf16.gmra.mrb[16].mxu0 %vm571_vm0, %v12046_v13 }
  0x37   : > { %10238 = vmatprep.mubr.msk.bf16.mxu0 %vm571_vm0, %v12049_v14 }
  0x3e   : > { %10239 = vmatmul.mubr.msk.bf16.gmra.mrb[20].mxu0 %vm571_vm0, %v12056_v15 }
  0x3f   : > { %10242 = vmatprep.mubr.msk.bf16.mxu0 %vm571_vm0, %v12059_v16 }
  0x46   : > { %10243 = vmatmul.mubr.msk.bf16.gmra.mrb[24].mxu0 %vm571_vm0, %v12066_v17 }
  0x47   : > { %10246 = vmatprep.mubr.msk.bf16.mxu0 %vm571_vm0, %v12069_v18 }
  0x4e   : > { %10247 = vmatmul.mubr.msk.bf16.gmra.mrb[28].mxu0 %vm571_vm0, %v12076_v19 }
  0xe9   : > { %v10220_v22 = vpop.f32.mrb[0].mxu0 }
  0xea   : > { %v663_v23 = vadd.f32 %v10220_v22, %v12086_v21  ;;  %v654_v24 = vpop.f32.mrb[1].mxu0 }
  0xeb   : > { %v655_v25 = vadd.f32 %v12086_v21, %v654_v24  ;;  %v10221_v26 = vpop.f32.mrb[2].mxu0 }
  0xec   : > { %v783_v27 = vmul.f32 0.1, %v663_v23  ;;  %v666_v28 = vadd.f32 %v10221_v26, %v12086_v21  ;;  %v657_v29 = vpop.f32.mrb[3].mxu0 }
  0xed   : > { %v781_v30 = vmul.f32 0.1, %v655_v25  ;;  %v658_v31 = vadd.f32 %v12086_v21, %v657_v29 }
  0xee   : > { %v784_v32 = vmul.f32 0.1, %v666_v28  ;;  %v815_v34 = vmax.f32 %v663_v23, %v783_v27 }
  0xef   : > { %v782_v33 = vmul.f32 0.1, %v658_v31  ;;  %v813_v36 = vmax.f32 %v655_v25, %v781_v30 }
  0xf0   : > { %v816_v35 = vmax.f32 %v666_v28, %v784_v32 }
  0xf1   : > { %v814_v37 = vmax.f32 %v658_v31, %v782_v33  ;;  %v10224_v38 = vpop.f32.mrb[4].mxu0 }
  0xf2   : > { %v846_v39 = vpack.c.bf16 %v816_v35, %v815_v34  ;;  %v679_v40 = vadd.f32 %v10224_v38, %v12086_v21  ;;  %v670_v41 = vpop.f32.mrb[5].mxu0 }
  0xf3   : > { %v845_v42 = vpack.c.bf16 %v814_v37, %v813_v36  ;;  %v671_v43 = vadd.f32 %v12086_v21, %v670_v41  ;;  %v10225_v44 = vpop.f32.mrb[6].mxu0 }
  0xf4   : > { %v787_v45 = vmul.f32 0.1, %v679_v40  ;;  %v682_v46 = vadd.f32 %v10225_v44, %v12086_v21  ;;  %v673_v47 = vpop.f32.mrb[7].mxu0 }
  0xf5   : > { %v785_v49 = vmul.f32 0.1, %v671_v43  ;;  %v674_v50 = vadd.f32 %v12086_v21, %v673_v47  ;;  %10254 = vmatprep.mubr.msk.bf16.mxu0 %vm571_vm0, %v845_v42 }
  0xf6   : > { %v788_v51 = vmul.f32 0.1, %v682_v46  ;;  %10255 = vmatmul.mubr.msk.bf16.vlgmr.msra.gmra.mrb[32].mxu0 %vm571_vm0, %v846_v39  ;;  %v819_v53 = vmax.f32 %v679_v40, %v787_v45 }
  0xf7   : > { %v786_v52 = vmul.f32 0.1, %v674_v50  ;;  %10287 = vmatpush3.bf16.msra.mxu0 %v11763_v20  ;;  %v817_v55 = vmax.f32 %v671_v43, %v785_v49 }
  0xf8   : > { %v820_v54 = vmax.f32 %v682_v46, %v788_v51  ;;  %10288 = vmatprep.subr.bf16.mxu0 %v11764_v48 }
  0xf9   : > { %v818_v56 = vmax.f32 %v674_v50, %v786_v52  ;;  %v10228_v57 = vpop.f32.mrb[8].mxu0 }
  0xfa   : > { %v848_v58 = vpack.c.bf16 %v820_v54, %v819_v53  ;;  %v695_v59 = vadd.f32 %v10228_v57, %v12086_v21  ;;  %v686_v60 = vpop.f32.mrb[9].mxu0 }
  0xfb   : > { %v847_v61 = vpack.c.bf16 %v818_v56, %v817_v55  ;;  %v687_v62 = vadd.f32 %v12086_v21, %v686_v60  ;;  %v10229_v63 = vpop.f32.mrb[10].mxu0  ;;  %10289 = vmatpush3.bf16.msra.mxu0 %v11764_v48 }
  0xfc   : > { %v791_v0 = vmul.f32 0.1, %v695_v59  ;;  %v698_v1 = vadd.f32 %v10229_v63, %v12086_v21  ;;  %v689_v2 = vpop.f32.mrb[11].mxu0 }
  0xfd   : > { %v789_v4 = vmul.f32 0.1, %v687_v62  ;;  %v690_v20 = vadd.f32 %v12086_v21, %v689_v2  ;;  %10258 = vmatprep.mubr.msk.bf16.mxu0 %vm571_vm0, %v847_v61 }
  0xfe   : > { %v792_v22 = vmul.f32 0.1, %v698_v1  ;;  %10259 = vmatmul.mubr.msk.bf16.gmra.mrb[36].mxu0 %vm571_vm0, %v848_v58  ;;  %v823_v24 = vmax.f32 %v695_v59, %v791_v0 }
  0xff   : > { %v790_v23 = vmul.f32 0.1, %v690_v20  ;;  %v821_v26 = vmax.f32 %v687_v62, %v789_v4 }
 0x100   : > { %v824_v25 = vmax.f32 %v698_v1, %v792_v22 }
 0x101   : > { %v822_v27 = vmax.f32 %v690_v20, %v790_v23  ;;  %v10232_v28 = vpop.f32.mrb[12].mxu0 }
 0x102   : > { %v850_v29 = vpack.c.bf16 %v824_v25, %v823_v24  ;;  %v711_v30 = vadd.f32 %v10232_v28, %v12086_v21  ;;  %v702_v31 = vpop.f32.mrb[13].mxu0 }
 0x103   : > { %v849_v32 = vpack.c.bf16 %v822_v27, %v821_v26  ;;  %v703_v33 = vadd.f32 %v12086_v21, %v702_v31  ;;  %v10233_v34 = vpop.f32.mrb[14].mxu0 }
 0x104   : > { %v795_v35 = vmul.f32 0.1, %v711_v30  ;;  %v714_v36 = vadd.f32 %v10233_v34, %v12086_v21  ;;  %v705_v37 = vpop.f32.mrb[15].mxu0 }
 0x105   : > { %v793_v38 = vmul.f32 0.1, %v703_v33  ;;  %v706_v39 = vadd.f32 %v12086_v21, %v705_v37  ;;  %10262 = vmatprep.mubr.msk.bf16.mxu0 %vm571_vm0, %v849_v32 }
 0x106   : > { %v796_v40 = vmul.f32 0.1, %v714_v36  ;;  %10263 = vmatmul.mubr.msk.bf16.gmra.mrb[40].mxu0 %vm571_vm0, %v850_v29  ;;  %v827_v42 = vmax.f32 %v711_v30, %v795_v35 }
 0x107   : > { %v794_v41 = vmul.f32 0.1, %v706_v39  ;;  %v825_v44 = vmax.f32 %v703_v33, %v793_v38 }
 0x108   : > { %v828_v43 = vmax.f32 %v714_v36, %v796_v40 }
 0x109   : > { %v826_v45 = vmax.f32 %v706_v39, %v794_v41  ;;  %v10236_v46 = vpop.f32.mrb[16].mxu0 }
 0x10a   : > { %v852_v47 = vpack.c.bf16 %v828_v43, %v827_v42  ;;  %v727_v48 = vadd.f32 %v10236_v46, %v12086_v21  ;;  %v718_v49 = vpop.f32.mrb[17].mxu0 }
 0x10b   : > { %v851_v50 = vpack.c.bf16 %v826_v45, %v825_v44  ;;  %v719_v51 = vadd.f32 %v12086_v21, %v718_v49  ;;  %v10237_v52 = vpop.f32.mrb[18].mxu0 }
 0x10c   : > { %v799_v53 = vmul.f32 0.1, %v727_v48  ;;  %v730_v54 = vadd.f32 %v10237_v52, %v12086_v21  ;;  %v721_v55 = vpop.f32.mrb[19].mxu0 }
 0x10d   : > { %v797_v56 = vmul.f32 0.1, %v719_v51  ;;  %v722_v57 = vadd.f32 %v12086_v21, %v721_v55  ;;  %10266 = vmatprep.mubr.msk.bf16.mxu0 %vm571_vm0, %v851_v50 }
 0x10e   : > { %v800_v58 = vmul.f32 0.1, %v730_v54  ;;  %10267 = vmatmul.mubr.msk.bf16.gmra.mrb[44].mxu0 %vm571_vm0, %v852_v47  ;;  %v831_v60 = vmax.f32 %v727_v48, %v799_v53 }
 0x10f   : > { %v798_v59 = vmul.f32 0.1, %v722_v57  ;;  %v829_v62 = vmax.f32 %v719_v51, %v797_v56 }
 0x110   : > { %v832_v61 = vmax.f32 %v730_v54, %v800_v58 }
 0x111   : > { %v830_v63 = vmax.f32 %v722_v57, %v798_v59  ;;  %v10240_v0 = vpop.f32.mrb[20].mxu0 }
 0x112   : > { %v854_v1 = vpack.c.bf16 %v832_v61, %v831_v60  ;;  %v743_v2 = vadd.f32 %v10240_v0, %v12086_v21  ;;  %v734_v4 = vpop.f32.mrb[21].mxu0 }
 0x113   : > { %v853_v20 = vpack.c.bf16 %v830_v63, %v829_v62  ;;  %v735_v22 = vadd.f32 %v12086_v21, %v734_v4  ;;  %v10241_v23 = vpop.f32.mrb[22].mxu0 }
 0x114   : > { %v803_v24 = vmul.f32 0.1, %v743_v2  ;;  %v746_v25 = vadd.f32 %v10241_v23, %v12086_v21  ;;  %v737_v26 = vpop.f32.mrb[23].mxu0 }
 0x115   : > { %v801_v27 = vmul.f32 0.1, %v735_v22  ;;  %v738_v28 = vadd.f32 %v12086_v21, %v737_v26  ;;  %10270 = vmatprep.mubr.msk.bf16.mxu0 %vm571_vm0, %v853_v20 }
 0x116   : > { %v804_v29 = vmul.f32 0.1, %v746_v25  ;;  %10271 = vmatmul.mubr.msk.bf16.gmra.mrb[48].mxu0 %vm571_vm0, %v854_v1  ;;  %v835_v31 = vmax.f32 %v743_v2, %v803_v24 }
 0x117   : > { %v802_v30 = vmul.f32 0.1, %v738_v28  ;;  %v833_v33 = vmax.f32 %v735_v22, %v801_v27 }
 0x118   : > { %v836_v32 = vmax.f32 %v746_v25, %v804_v29 }
 0x119   : > { %v834_v34 = vmax.f32 %v738_v28, %v802_v30  ;;  %v10244_v35 = vpop.f32.mrb[24].mxu0 }
 0x11a   : > { %v856_v36 = vpack.c.bf16 %v836_v32, %v835_v31  ;;  %v759_v37 = vadd.f32 %v10244_v35, %v12086_v21  ;;  %v750_v38 = vpop.f32.mrb[25].mxu0 }
 0x11b   : > { %v855_v39 = vpack.c.bf16 %v834_v34, %v833_v33  ;;  %v751_v40 = vadd.f32 %v12086_v21, %v750_v38  ;;  %v10245_v41 = vpop.f32.mrb[26].mxu0 }
 0x11c   : > { %v807_v42 = vmul.f32 0.1, %v759_v37  ;;  %v762_v43 = vadd.f32 %v10245_v41, %v12086_v21  ;;  %v753_v44 = vpop.f32.mrb[27].mxu0 }
 0x11d   : > { %v805_v45 = vmul.f32 0.1, %v751_v40  ;;  %v754_v46 = vadd.f32 %v12086_v21, %v753_v44  ;;  %10274 = vmatprep.mubr.msk.bf16.mxu0 %vm571_vm0, %v855_v39  ;;  %v12250_v44 = vld [vmem:[%s14854_s4 + $0x1] ss:$0 sm:$0xff] }
 0x11e   : > { %v808_v47 = vmul.f32 0.1, %v762_v43  ;;  %10275 = vmatmul.mubr.msk.bf16.gmra.mrb[52].mxu0 %vm571_vm0, %v856_v36  ;;  %v839_v49 = vmax.f32 %v759_v37, %v807_v42 }
 0x11f   : > { %v806_v48 = vmul.f32 0.1, %v754_v46  ;;  %v837_v51 = vmax.f32 %v751_v40, %v805_v45 }
 0x120   : > { %v840_v50 = vmax.f32 %v762_v43, %v808_v47 }
 0x121   : > { %v838_v52 = vmax.f32 %v754_v46, %v806_v48  ;;  %v10248_v53 = vpop.f32.mrb[28].mxu0 }
 0x122   : > { %v858_v54 = vpack.c.bf16 %v840_v50, %v839_v49  ;;  %v775_v55 = vadd.f32 %v10248_v53, %v12086_v21  ;;  %v766_v56 = vpop.f32.mrb[29].mxu0 }
 0x123   : > { %v857_v57 = vpack.c.bf16 %v838_v52, %v837_v51  ;;  %v767_v58 = vadd.f32 %v12086_v21, %v766_v56  ;;  %v10249_v59 = vpop.f32.mrb[30].mxu0 }
 0x124   : > { %v811_v60 = vmul.f32 0.1, %v775_v55  ;;  %v778_v61 = vadd.f32 %v10249_v59, %v12086_v21  ;;  %v769_v62 = vpop.f32.mrb[31].mxu0 }
 0x125   : > { %v809_v63 = vmul.f32 0.1, %v767_v58  ;;  %v770_v0 = vadd.f32 %v12086_v21, %v769_v62  ;;  %10278 = vmatprep.mubr.msk.bf16.mxu0 %vm571_vm0, %v857_v57 }
 0x126   : > { %v812_v1 = vmul.f32 0.1, %v778_v61  ;;  %10279 = vmatmul.mubr.msk.bf16.gmra.mrb[56].mxu0 %vm571_vm0, %v858_v54  ;;  %v843_v4 = vmax.f32 %v775_v55, %v811_v60 }
 0x127   : > { %v810_v2 = vmul.f32 0.1, %v770_v0  ;;  %v841_v22 = vmax.f32 %v767_v58, %v809_v63 }
 0x128   : > { %v844_v20 = vmax.f32 %v778_v61, %v812_v1 }
 0x129   : > { %v842_v23 = vmax.f32 %v770_v0, %v810_v2 }
 0x12a   : > { %v860_v24 = vpack.c.bf16 %v844_v20, %v843_v4 }
 0x12b   : > { %v859_v25 = vpack.c.bf16 %v842_v23, %v841_v22 }
 0x12d   : > { %10282 = vmatprep.mubr.msk.bf16.mxu0 %vm571_vm0, %v859_v25 }
 0x12e   : > { %10283 = vmatmul.mubr.msk.bf16.gmra.mrb[60].mxu0 %vm571_vm0, %v860_v24  ;;  %v11768_v24 = vld [vmem:[%s14857_s7 + $0x28] sm:$0xff]  }
 0x12f   : > { %10290 = vmatprep.mubr.msk.bf16.mxu0 %vm571_vm0, %v11998_v3  ;;  %v11765_v3 = vld [vmem:[%s14855_s5 + $0x10] sm:$0xff]  }
 0x130   : > { %10322 = vmatprep.subr.bf16.mxu0 %v11765_v3 }
 0x136   : > { %10291 = vmatmul.mubr.msk.bf16.vlgmr.msra.gmra.mrb[64].mxu0 %vm571_vm0, %v12004_v5  ;;  %v11766_v5 = vld [vmem:[%s14855_s5 + $0x18] sm:$0xff]  }
 0x137   : > { %10294 = vmatprep.mubr.msk.bf16.mxu0 %vm571_vm0, %v12009_v6  ;;  %10323 = vmatpush3.bf16.msra.mxu0 %v11765_v3 }
 0x138   : > { %10324 = vmatprep.subr.bf16.mxu0 %v11766_v5 }
 0x13b   : > { %10325 = vmatpush3.bf16.msra.mxu0 %v11766_v5 }
 0x13e   : > { %10295 = vmatmul.mubr.msk.bf16.gmra.mrb[68].mxu0 %vm571_vm0, %v12016_v7 }
 0x13f   : > { %10298 = vmatprep.mubr.msk.bf16.mxu0 %vm571_vm0, %v12019_v8 }
 0x146   : > { %10299 = vmatmul.mubr.msk.bf16.gmra.mrb[72].mxu0 %vm571_vm0, %v12026_v9 }
 0x147   : > { %10302 = vmatprep.mubr.msk.bf16.mxu0 %vm571_vm0, %v12029_v10  ;;  %v12188_v10 = vld [vmem:[%s14857_s7 + $0x20] sm:$0xff]  }
 0x148   : > { %10358 = vmatprep.subr.bf16.mxu0 %v12188_v10 }
 0x14e   : > { %10303 = vmatmul.mubr.msk.bf16.gmra.mrb[76].mxu0 %vm571_vm0, %v12036_v11 }
 0x14f   : > { %10306 = vmatprep.mubr.msk.bf16.mxu0 %vm571_vm0, %v12039_v12 }
 0x156   : > { %10307 = vmatmul.mubr.msk.bf16.gmra.mrb[80].mxu0 %vm571_vm0, %v12046_v13 }
 0x157   : > { %10310 = vmatprep.mubr.msk.bf16.mxu0 %vm571_vm0, %v12049_v14 }
 0x15e   : > { %10311 = vmatmul.mubr.msk.bf16.gmra.mrb[84].mxu0 %vm571_vm0, %v12056_v15 }
 0x15f   : > { %10314 = vmatprep.mubr.msk.bf16.mxu0 %vm571_vm0, %v12059_v16 }
 0x166   : > { %10315 = vmatmul.mubr.msk.bf16.gmra.mrb[88].mxu0 %vm571_vm0, %v12066_v17 }
 0x167   : > { %10318 = vmatprep.mubr.msk.bf16.mxu0 %vm571_vm0, %v12069_v18 }
 0x16e   : > { %10319 = vmatmul.mubr.msk.bf16.gmra.mrb[92].mxu0 %vm571_vm0, %v12076_v19 }
 0x1c9   : > { %v12177_v6 = vpop.f32.mrb[32].mxu0 }
 0x1ca   : > { %v12179_v7 = vpop.f32.mrb[33].mxu0 }
 0x1cb   : > { %v12181_v8 = vpop.f32.mrb[34].mxu0 }
 0x1cc   : > { %v12183_v9 = vpop.f32.mrb[35].mxu0 }
 0x1d1   : > { %v12191_v11 = vpop.f32.mrb[36].mxu0 }
 0x1d2   : > { %v12193_v12 = vpop.f32.mrb[37].mxu0 }
 0x1d3   : > { %v12195_v13 = vpop.f32.mrb[38].mxu0 }
 0x1d4   : > { %v12197_v14 = vpop.f32.mrb[39].mxu0 }
 0x1d9   : > { %v12199_v15 = vpop.f32.mrb[40].mxu0 }
 0x1da   : > { %v12201_v16 = vpop.f32.mrb[41].mxu0 }
 0x1db   : > { %v12203_v17 = vpop.f32.mrb[42].mxu0 }
 0x1dc   : > { %v12205_v18 = vpop.f32.mrb[43].mxu0 }
 0x1e1   : > { %v12207_v19 = vpop.f32.mrb[44].mxu0 }
 0x1e2   : > { %v12209_v21 = vpop.f32.mrb[45].mxu0 }
 0x1e3   : > { %v12211_v26 = vpop.f32.mrb[46].mxu0 }
 0x1e4   : > { %v12213_v27 = vpop.f32.mrb[47].mxu0 }
 0x1e9   : > { %v12215_v28 = vpop.f32.mrb[48].mxu0 }
 0x1ea   : > { %v12217_v29 = vpop.f32.mrb[49].mxu0 }
 0x1eb   : > { %v12219_v30 = vpop.f32.mrb[50].mxu0 }
 0x1ec   : > { %v12221_v31 = vpop.f32.mrb[51].mxu0 }
 0x1f1   : > { %v12223_v32 = vpop.f32.mrb[52].mxu0 }
 0x1f2   : > { %v12225_v33 = vpop.f32.mrb[53].mxu0 }
 0x1f3   : > { %v12227_v34 = vpop.f32.mrb[54].mxu0 }
 0x1f4   : > { %v12229_v35 = vpop.f32.mrb[55].mxu0 }
 0x1f9   : > { %v12231_v36 = vpop.f32.mrb[56].mxu0 }
 0x1fa   : > { %v12233_v37 = vpop.f32.mrb[57].mxu0 }
 0x1fb   : > { %v12235_v38 = vpop.f32.mrb[58].mxu0 }
 0x1fc   : > { %v12237_v39 = vpop.f32.mrb[59].mxu0 }
 0x201   : > { %v12239_v40 = vpop.f32.mrb[60].mxu0 }
 0x202   : > { %v12241_v41 = vpop.f32.mrb[61].mxu0 }
 0x203   : > { %v12243_v42 = vpop.f32.mrb[62].mxu0 }
 0x204   : > { %v12245_v43 = vpop.f32.mrb[63].mxu0 }
 0x209   : > { %v10292_v45 = vpop.f32.mrb[64].mxu0 }
 0x20a   : > { %v1220_v46 = vadd.f32 %v10292_v45, %v12250_v44  ;;  %v1211_v47 = vpop.f32.mrb[65].mxu0 }
 0x20b   : > { %v1212_v48 = vadd.f32 %v12250_v44, %v1211_v47  ;;  %v10293_v49 = vpop.f32.mrb[66].mxu0 }
 0x20c   : > { %v1340_v50 = vmul.f32 0.1, %v1220_v46  ;;  %v1223_v51 = vadd.f32 %v10293_v49, %v12250_v44  ;;  %v1214_v52 = vpop.f32.mrb[67].mxu0 }
 0x20d   : > { %v1338_v53 = vmul.f32 0.1, %v1212_v48  ;;  %v1215_v54 = vadd.f32 %v12250_v44, %v1214_v52 }
 0x20e   : > { %v1341_v55 = vmul.f32 0.1, %v1223_v51  ;;  %v1372_v57 = vmax.f32 %v1220_v46, %v1340_v50 }
 0x20f   : > { %v1339_v56 = vmul.f32 0.1, %v1215_v54  ;;  %v1370_v59 = vmax.f32 %v1212_v48, %v1338_v53  ;;  %v11769_v48 = vld [vmem:[%s14857_s7 + $0x30] sm:$0xff]  }
 0x210   : > { %v1373_v58 = vmax.f32 %v1223_v51, %v1341_v55 }
 0x211   : > { %v1371_v60 = vmax.f32 %v1215_v54, %v1339_v56  ;;  %v10296_v61 = vpop.f32.mrb[68].mxu0 }
 0x212   : > { %v1403_v62 = vpack.c.bf16 %v1373_v58, %v1372_v57  ;;  %v1236_v63 = vadd.f32 %v10296_v61, %v12250_v44  ;;  %v1227_v0 = vpop.f32.mrb[69].mxu0 }
 0x213   : > { %v1402_v1 = vpack.c.bf16 %v1371_v60, %v1370_v59  ;;  %v1228_v2 = vadd.f32 %v12250_v44, %v1227_v0  ;;  %v10297_v4 = vpop.f32.mrb[70].mxu0 }
 0x214   : > { %v1344_v20 = vmul.f32 0.1, %v1236_v63  ;;  %v1239_v22 = vadd.f32 %v10297_v4, %v12250_v44  ;;  %v1230_v23 = vpop.f32.mrb[71].mxu0 }
 0x215   : > { %v1342_v25 = vmul.f32 0.1, %v1228_v2  ;;  %v1231_v3 = vadd.f32 %v12250_v44, %v1230_v23  ;;  %10326 = vmatprep.mubr.msk.bf16.mxu0 %vm571_vm0, %v1402_v1 }
 0x216   : > { %v1345_v5 = vmul.f32 0.1, %v1239_v22  ;;  %10327 = vmatmul.mubr.msk.bf16.vlgmr.msra.gmra.mrb[96].mxu0 %vm571_vm0, %v1403_v62  ;;  %v1376_v46 = vmax.f32 %v1236_v63, %v1344_v20 }
 0x217   : > { %v1343_v45 = vmul.f32 0.1, %v1231_v3  ;;  %10359 = vmatpush3.bf16.msra.mxu0 %v12188_v10  ;;  %v1374_v49 = vmax.f32 %v1228_v2, %v1342_v25 }
 0x218   : > { %v1377_v47 = vmax.f32 %v1239_v22, %v1345_v5  ;;  %10360 = vmatprep.subr.bf16.mxu0 %v11768_v24 }
 0x219   : > { %v1375_v50 = vmax.f32 %v1231_v3, %v1343_v45  ;;  %v10300_v51 = vpop.f32.mrb[72].mxu0 }
 0x21a   : > { %v1405_v52 = vpack.c.bf16 %v1377_v47, %v1376_v46  ;;  %v1252_v53 = vadd.f32 %v10300_v51, %v12250_v44  ;;  %v1243_v54 = vpop.f32.mrb[73].mxu0 }
 0x21b   : > { %v1404_v55 = vpack.c.bf16 %v1375_v50, %v1374_v49  ;;  %v1244_v56 = vadd.f32 %v12250_v44, %v1243_v54  ;;  %v10301_v57 = vpop.f32.mrb[74].mxu0  ;;  %10361 = vmatpush3.bf16.msra.mxu0 %v11768_v24 }
 0x21c   : > { %v1348_v10 = vmul.f32 0.1, %v1252_v53  ;;  %v1255_v58 = vadd.f32 %v10301_v57, %v12250_v44  ;;  %v1246_v59 = vpop.f32.mrb[75].mxu0  ;;  %10362 = vmatprep.subr.bf16.mxu0 %v11769_v48 }
 0x21d   : > { %v1346_v60 = vmul.f32 0.1, %v1244_v56  ;;  %v1247_v61 = vadd.f32 %v12250_v44, %v1246_v59  ;;  %10330 = vmatprep.mubr.msk.bf16.mxu0 %vm571_vm0, %v1404_v55 }
 0x21e   : > { %v1349_v62 = vmul.f32 0.1, %v1255_v58  ;;  %10331 = vmatmul.mubr.msk.bf16.gmra.mrb[100].mxu0 %vm571_vm0, %v1405_v52  ;;  %v1380_v0 = vmax.f32 %v1252_v53, %v1348_v10 }
 0x21f   : > { %v1347_v63 = vmul.f32 0.1, %v1247_v61  ;;  %10363 = vmatpush3.bf16.msra.mxu0 %v11769_v48  ;;  %v1378_v2 = vmax.f32 %v1244_v56, %v1346_v60 }
 0x220   : > { %v1381_v1 = vmax.f32 %v1255_v58, %v1349_v62 }
 0x221   : > { %v1379_v4 = vmax.f32 %v1247_v61, %v1347_v63  ;;  %v10304_v20 = vpop.f32.mrb[76].mxu0 }
 0x222   : > { %v1407_v22 = vpack.c.bf16 %v1381_v1, %v1380_v0  ;;  %v1268_v23 = vadd.f32 %v10304_v20, %v12250_v44  ;;  %v1259_v24 = vpop.f32.mrb[77].mxu0 }
 0x223   : > { %v1406_v25 = vpack.c.bf16 %v1379_v4, %v1378_v2  ;;  %v1260_v3 = vadd.f32 %v12250_v44, %v1259_v24  ;;  %v10305_v5 = vpop.f32.mrb[78].mxu0 }
 0x224   : > { %v1352_v45 = vmul.f32 0.1, %v1268_v23  ;;  %v1271_v46 = vadd.f32 %v10305_v5, %v12250_v44  ;;  %v1262_v47 = vpop.f32.mrb[79].mxu0 }
 0x225   : > { %v1350_v49 = vmul.f32 0.1, %v1260_v3  ;;  %v1263_v48 = vadd.f32 %v12250_v44, %v1262_v47  ;;  %10334 = vmatprep.mubr.msk.bf16.mxu0 %vm571_vm0, %v1406_v25 }
 0x226   : > { %v1353_v50 = vmul.f32 0.1, %v1271_v46  ;;  %10335 = vmatmul.mubr.msk.bf16.gmra.mrb[104].mxu0 %vm571_vm0, %v1407_v22  ;;  %v1384_v52 = vmax.f32 %v1268_v23, %v1352_v45 }
 0x227   : > { %v1351_v51 = vmul.f32 0.1, %v1263_v48  ;;  %v1382_v54 = vmax.f32 %v1260_v3, %v1350_v49 }
 0x228   : > { %v1385_v53 = vmax.f32 %v1271_v46, %v1353_v50 }
 0x229   : > { %v1383_v55 = vmax.f32 %v1263_v48, %v1351_v51  ;;  %v10308_v56 = vpop.f32.mrb[80].mxu0 }
 0x22a   : > { %v1409_v57 = vpack.c.bf16 %v1385_v53, %v1384_v52  ;;  %v1284_v10 = vadd.f32 %v10308_v56, %v12250_v44  ;;  %v1275_v58 = vpop.f32.mrb[81].mxu0 }
 0x22b   : > { %v1408_v59 = vpack.c.bf16 %v1383_v55, %v1382_v54  ;;  %v1276_v60 = vadd.f32 %v12250_v44, %v1275_v58  ;;  %v10309_v61 = vpop.f32.mrb[82].mxu0 }
 0x22c   : > { %v1356_v62 = vmul.f32 0.1, %v1284_v10  ;;  %v1287_v63 = vadd.f32 %v10309_v61, %v12250_v44  ;;  %v1278_v0 = vpop.f32.mrb[83].mxu0 }
 0x22d   : > { %v1354_v1 = vmul.f32 0.1, %v1276_v60  ;;  %v1279_v2 = vadd.f32 %v12250_v44, %v1278_v0  ;;  %10338 = vmatprep.mubr.msk.bf16.mxu0 %vm571_vm0, %v1408_v59 }
 0x22e   : > { %v1357_v4 = vmul.f32 0.1, %v1287_v63  ;;  %10339 = vmatmul.mubr.msk.bf16.gmra.mrb[108].mxu0 %vm571_vm0, %v1409_v57  ;;  %v1388_v22 = vmax.f32 %v1284_v10, %v1356_v62 }
 0x22f   : > { %v1355_v20 = vmul.f32 0.1, %v1279_v2  ;;  %v1386_v24 = vmax.f32 %v1276_v60, %v1354_v1 }
 0x230   : > { %v1389_v23 = vmax.f32 %v1287_v63, %v1357_v4 }
 0x231   : > { %v1387_v25 = vmax.f32 %v1279_v2, %v1355_v20  ;;  %v10312_v3 = vpop.f32.mrb[84].mxu0 }
 0x232   : > { %v1411_v5 = vpack.c.bf16 %v1389_v23, %v1388_v22  ;;  %v1300_v45 = vadd.f32 %v10312_v3, %v12250_v44  ;;  %v1291_v46 = vpop.f32.mrb[85].mxu0 }
 0x233   : > { %v1410_v47 = vpack.c.bf16 %v1387_v25, %v1386_v24  ;;  %v1292_v49 = vadd.f32 %v12250_v44, %v1291_v46  ;;  %v10313_v48 = vpop.f32.mrb[86].mxu0 }
 0x234   : > { %v1360_v50 = vmul.f32 0.1, %v1300_v45  ;;  %v1303_v51 = vadd.f32 %v10313_v48, %v12250_v44  ;;  %v1294_v52 = vpop.f32.mrb[87].mxu0 }
 0x235   : > { %v1358_v53 = vmul.f32 0.1, %v1292_v49  ;;  %v1295_v54 = vadd.f32 %v12250_v44, %v1294_v52  ;;  %10342 = vmatprep.mubr.msk.bf16.mxu0 %vm571_vm0, %v1410_v47 }
 0x236   : > { %v1361_v55 = vmul.f32 0.1, %v1303_v51  ;;  %10343 = vmatmul.mubr.msk.bf16.gmra.mrb[112].mxu0 %vm571_vm0, %v1411_v5  ;;  %v1392_v57 = vmax.f32 %v1300_v45, %v1360_v50 }
 0x237   : > { %v1359_v56 = vmul.f32 0.1, %v1295_v54  ;;  %v1390_v58 = vmax.f32 %v1292_v49, %v1358_v53 }
 0x238   : > { %v1393_v10 = vmax.f32 %v1303_v51, %v1361_v55 }
 0x239   : > { %v1391_v59 = vmax.f32 %v1295_v54, %v1359_v56  ;;  %v10316_v60 = vpop.f32.mrb[88].mxu0 }
 0x23a   : > { %v1413_v61 = vpack.c.bf16 %v1393_v10, %v1392_v57  ;;  %v1316_v62 = vadd.f32 %v10316_v60, %v12250_v44  ;;  %v1307_v63 = vpop.f32.mrb[89].mxu0 }
 0x23b   : > { %v1412_v0 = vpack.c.bf16 %v1391_v59, %v1390_v58  ;;  %v1308_v1 = vadd.f32 %v12250_v44, %v1307_v63  ;;  %v10317_v2 = vpop.f32.mrb[90].mxu0 }
 0x23c   : > { %v1364_v4 = vmul.f32 0.1, %v1316_v62  ;;  %v1319_v20 = vadd.f32 %v10317_v2, %v12250_v44  ;;  %v1310_v22 = vpop.f32.mrb[91].mxu0 }
 0x23d   : > { %v1362_v23 = vmul.f32 0.1, %v1308_v1  ;;  %v1311_v24 = vadd.f32 %v12250_v44, %v1310_v22  ;;  %10346 = vmatprep.mubr.msk.bf16.mxu0 %vm571_vm0, %v1412_v0  ;;  %v11772_v22 = vld [vmem:[%s14853_s3 + $0x28] sm:$0xff]  }
 0x23e   : > { %v1365_v25 = vmul.f32 0.1, %v1319_v20  ;;  %10347 = vmatmul.mubr.msk.bf16.gmra.mrb[116].mxu0 %vm571_vm0, %v1413_v61  ;;  %v1396_v5 = vmax.f32 %v1316_v62, %v1364_v4  ;;  %v14860_v4 = vmov 0.0  }
 0x23f   : > { %v1363_v3 = vmul.f32 0.1, %v1311_v24  ;;  %v1394_v46 = vmax.f32 %v1308_v1, %v1362_v23  ;;  %1689 = vst.msk [vmem:[#allocation2 + $0x30] sm:$0xff] %vm1681_vm1, %v14860_v4  ;;  %1690 = vst.msk [vmem:[#allocation2 + $0x38] sm:$0xff] %vm1681_vm1, %v14860_v4  ;;  %v11773_v23 = vld [vmem:[%s12429_s12] sm:$0xff]  }
 0x240   : > { %v1397_v45 = vmax.f32 %v1319_v20, %v1365_v25  ;;  %1682 = vst.msk [vmem:[#allocation2] sm:$0xff] %vm1681_vm1, %v14860_v4  ;;  %1683 = vst.msk [vmem:[#allocation2 + $0x8] sm:$0xff] %vm1681_vm1, %v14860_v4  ;;  %v11770_v20 = vld [vmem:[%s14857_s7 + $0x38] sm:$0xff]   ;;  %10722 = vmatprep.mubr.msk.bf16.mxu1 %vm571_vm0, %v11773_v23 }
 0x241   : > { %v1395_v47 = vmax.f32 %v1311_v24, %v1363_v3  ;;  %v10320_v49 = vpop.f32.mrb[92].mxu0  ;;  %1686 = vst.msk [vmem:[#allocation2 + $0x18] sm:$0xff] %vm1681_vm1, %v14860_v4  ;;  %1687 = vst.msk [vmem:[#allocation2 + $0x20] sm:$0xff] %vm1681_vm1, %v14860_v4  ;;  %10364 = vmatprep.subr.bf16.mxu0 %v11770_v20  ;;  %v11774_v24 = vld [vmem:[%s12429_s12 + $0x8] sm:$0xff]  }
 0x242   : > { %v1415_v48 = vpack.c.bf16 %v1397_v45, %v1396_v5  ;;  %v1332_v50 = vadd.f32 %v10320_v49, %v12250_v44  ;;  %v1323_v51 = vpop.f32.mrb[93].mxu0  ;;  %1692 = vst.msk [vmem:[#allocation2 + $0x48] sm:$0xff] %vm1681_vm1, %v14860_v4  ;;  %1693 = vst.msk [vmem:[#allocation2 + $0x50] sm:$0xff] %vm1681_vm1, %v14860_v4  ;;  %10365 = vmatpush3.bf16.msra.mxu0 %v11770_v20  ;;  %v11776_v45 = vld [vmem:[%s12429_s12 + $0x10] sm:$0xff]   ;;  %v11778_v49 = vld [vmem:[%s12429_s12 + $0x20] sm:$0xff]  }
 0x243   : > { %v1414_v52 = vpack.c.bf16 %v1395_v47, %v1394_v46  ;;  %v1324_v53 = vadd.f32 %v12250_v44, %v1323_v51  ;;  %v10321_v54 = vpop.f32.mrb[94].mxu0  ;;  %1695 = vst.msk [vmem:[#allocation2 + $0x60] sm:$0xff] %vm1681_vm1, %v14860_v4  ;;  %1696 = vst.msk [vmem:[#allocation2 + $0x68] sm:$0xff] %vm1681_vm1, %v14860_v4  ;;  %v11777_v46 = vld [vmem:[%s12429_s12 + $0x18] sm:$0xff]   ;;  %v12443_v47 = vld [vmem:[%s14857_s7] sm:$0xff]  }
 0x244   : > { %v1368_v55 = vmul.f32 0.1, %v1332_v50  ;;  %v1335_v56 = vadd.f32 %v10321_v54, %v12250_v44  ;;  %v1326_v57 = vpop.f32.mrb[95].mxu0  ;;  %1698 = vst.msk [vmem:[#allocation2 + $0x78] sm:$0xff] %vm1681_vm1, %v14860_v4  ;;  %1699 = vst.msk [vmem:[#allocation2 + $0x80] sm:$0xff] %vm1681_vm1, %v14860_v4  ;;  %10398 = vmatprep.subr.bf16.mxu0 %v12443_v47  ;;  %v11782_v51 = vld [vmem:[%s12429_s12 + $0x38] sm:$0xff]  }
 0x245   : > { %v1366_v10 = vmul.f32 0.1, %v1324_v53  ;;  %v1327_v58 = vadd.f32 %v12250_v44, %v1326_v57  ;;  %10350 = vmatprep.mubr.msk.bf16.mxu0 %vm571_vm0, %v1414_v52  ;;  %v11771_v44 = vld [vmem:[%s14853_s3 + $0x20] sm:$0xff]   ;;  %1701 = vst.msk [vmem:[#allocation2 + $0x90] sm:$0xff] %vm1681_vm1, %v14860_v4  ;;  %1702 = vst.msk [vmem:[#allocation2 + $0x98] sm:$0xff] %vm1681_vm1, %v14860_v4  ;;  %v11786_v54 = vld [vmem:[%s12429_s12 + $0x50] sm:$0xff]  }
 0x246   : > { %v1369_v59 = vmul.f32 0.1, %v1335_v56  ;;  %10351 = vmatmul.mubr.msk.bf16.gmra.mrb[120].mxu0 %vm571_vm0, %v1415_v48  ;;  %v1400_v61 = vmax.f32 %v1332_v50, %v1368_v55  ;;  %1704 = vst.msk [vmem:[#allocation2 + $0xa8] sm:$0xff] %vm1681_vm1, %v14860_v4  ;;  %1705 = vst.msk [vmem:[#allocation2 + $0xb0] sm:$0xff] %vm1681_vm1, %v14860_v4  ;;  %10718 = vmatprep.subr.bf16.mxu1 %v11771_v44  ;;  %v11779_v48 = vld [vmem:[%s12429_s12 + $0x28] sm:$0xff]   ;;  %v11781_v50 = vld [vmem:[%s12429_s12 + $0x30] sm:$0xff]  }
 0x247   : > { %v1367_v60 = vmul.f32 0.1, %v1327_v58  ;;  %v1398_v63 = vmax.f32 %v1324_v53, %v1366_v10  ;;  %1707 = vst.msk [vmem:[#allocation2 + $0xc0] sm:$0xff] %vm1681_vm1, %v14860_v4  ;;  %1708 = vst.msk [vmem:[#allocation2 + $0xc8] sm:$0xff] %vm1681_vm1, %v14860_v4  ;;  %10719 = vmatpush3.bf16.msra.mxu1 %v11771_v44  ;;  %v1826_v25 = vld [vmem:[#allocation2 + $0x1] sm:$0xff]  ;;  %v11787_v55 = vld [vmem:[%s12429_s12 + $0x58] sm:$0xff]  }
 0x248   : > { %v1401_v62 = vmax.f32 %v1335_v56, %v1369_v59  ;;  %1710 = vst.msk [vmem:[#allocation2 + $0xd8] sm:$0xff] %vm1681_vm1, %v14860_v4  ;;  %1711 = vst.msk [vmem:[#allocation2 + $0xe0] sm:$0xff] %vm1681_vm1, %v14860_v4  ;;  %10720 = vmatprep.subr.bf16.mxu1 %v11772_v22  ;;  %v11783_v52 = vld [vmem:[%s12429_s12 + $0x40] sm:$0xff]   ;;  %v11784_v53 = vld [vmem:[%s12429_s12 + $0x48] sm:$0xff]  }
 0x249   : > { %v1399_v0 = vmax.f32 %v1327_v58, %v1367_v60  ;;  %1713 = vst.msk [vmem:[#allocation2 + $0xf0] sm:$0xff] %vm1681_vm1, %v14860_v4  ;;  %1714 = vst.msk [vmem:[#allocation2 + $0xf8] sm:$0xff] %vm1681_vm1, %v14860_v4  ;;  %v11788_v56 = vld [vmem:[%s12429_s12 + $0x60] sm:$0xff]   ;;  %v11789_v57 = vld [vmem:[%s12429_s12 + $0x68] sm:$0xff]  }
 0x24a   : > { %v1417_v1 = vpack.c.bf16 %v1401_v62, %v1400_v61  ;;  %1716 = vst.msk [vmem:[#allocation2 + $0x108] sm:$0xff] %vm1681_vm1, %v14860_v4  ;;  %1717 = vst.msk [vmem:[#allocation2 + $0x110] sm:$0xff] %vm1681_vm1, %v14860_v4  ;;  %v11791_v10 = vld [vmem:[%s12429_s12 + $0x70] sm:$0xff]   ;;  %v11792_v58 = vld [vmem:[%s12429_s12 + $0x78] sm:$0xff]  }
 0x24b   : > { %v1416_v2 = vpack.c.bf16 %v1399_v0, %v1398_v63  ;;  %1719 = vst.msk [vmem:[#allocation2 + $0x120] sm:$0xff] %vm1681_vm1, %v14860_v4  ;;  %1720 = vst.msk [vmem:[#allocation2 + $0x128] sm:$0xff] %vm1681_vm1, %v14860_v4  ;;  %10721 = vmatpush3.bf16.msra.mxu1 %v11772_v22  ;;  %v12473_v59 = vld [vmem:[%s14856_s6] ss:$0 sm:$0xff]  ;;  %v376_v0 = vld [vmem:[%s12485_s20 + $0x10] sm:$0xff] }
 0x24c   : > { %1722 = vst.msk [vmem:[#allocation2 + $0x138] sm:$0xff] %vm1681_vm1, %v14860_v4  ;;  %1723 = vst.msk [vmem:[#allocation2 + $0x140] sm:$0xff] %vm1681_vm1, %v14860_v4  ;;  %v973_v60 = vadd.f32 %v12177_v6, %v12473_v59  ;;  %v965_v61 = vadd.f32 %v12473_v59, %v12179_v7  ;;  %v976_v62 = vadd.f32 %v12181_v8, %v12473_v59  ;;  %v12495_v7 = vld [vmem:[%s14856_s6 + $0x1] ss:$0 sm:$0xff]  ;;  %v377_v20 = vld [vmem:[%s12485_s20 + $0x18] sm:$0xff] }
 0x24d   : > { %10354 = vmatprep.mubr.msk.bf16.mxu0 %vm571_vm0, %v1416_v2  ;;  %1725 = vst.msk [vmem:[#allocation2 + $0x150] sm:$0xff] %vm1681_vm1, %v14860_v4  ;;  %1726 = vst.msk [vmem:[#allocation2 + $0x158] sm:$0xff] %vm1681_vm1, %v14860_v4  ;;  %v968_v63 = vadd.f32 %v12473_v59, %v12183_v9  ;;  %v374_v2 = vld [vmem:[%s12485_s20] sm:$0xff]  ;;  %v989_v8 = vadd.f32 %v12191_v11, %v12473_v59 }
 0x24e   : > { %10355 = vmatmul.mubr.msk.bf16.gmra.mrb[124].mxu0 %vm571_vm0, %v1417_v1  ;;  %1728 = vst.msk [vmem:[#allocation2 + $0x168] sm:$0xff] %vm1681_vm1, %v14860_v4  ;;  %1729 = vst.msk [vmem:[#allocation2 + $0x170] sm:$0xff] %vm1681_vm1, %v14860_v4  ;;  %10723 = vmatmul.mubr.msk.bf16.vlgmr.msra.gmra.mrb[0].mxu1 %vm571_vm0, %v11774_v24  ;;  %v1093_v6 = vadd.f32 1.0, %v973_v60  ;;  %v1091_v1 = vadd.f32 1.0, %v965_v61  ;;  %v1094_v44 = vadd.f32 1.0, %v976_v62  ;;  %v378_v61 = vld [vmem:[%s12485_s20 + $0x20] sm:$0xff] }
 0x24f   : > { %1731 = vst.msk [vmem:[#allocation2 + $0x180] sm:$0xff] %vm1681_vm1, %v14860_v4  ;;  %1732 = vst.msk [vmem:[#allocation2 + $0x188] sm:$0xff] %vm1681_vm1, %v14860_v4  ;;  %10726 = vmatprep.mubr.msk.bf16.mxu1 %vm571_vm0, %v11776_v45  ;;  %v1092_v22 = vadd.f32 1.0, %v968_v63  ;;  %v981_v45 = vadd.f32 %v12473_v59, %v12193_v12  ;;  %v381_v62 = vld [vmem:[%s12485_s20 + $0x38] sm:$0xff] }
 0x250   : > { %1734 = vst.msk [vmem:[#allocation2 + $0x198] sm:$0xff] %vm1681_vm1, %v14860_v4  ;;  %1735 = vst.msk [vmem:[#allocation2 + $0x1a0] sm:$0xff] %vm1681_vm1, %v14860_v4  ;;  %v1125_v24 = vmul.f32 %v1093_v6, %v376_v0 }
 0x251   : > { %1691 = vst.msk [vmem:[#allocation2 + $0x40] sm:$0x3] %vm1684_vm2, %v14860_v4  ;;  %1685 = vst.msk [vmem:[#allocation2 + $0x10] sm:$0x3] %vm1684_vm2, %v14860_v4 }
 0x252   : > { %1688 = vst.msk [vmem:[#allocation2 + $0x28] sm:$0x3] %vm1684_vm2, %v14860_v4  ;;  %1694 = vst.msk [vmem:[#allocation2 + $0x58] sm:$0x3] %vm1684_vm2, %v14860_v4 }
 0x253   : > { %1697 = vst.msk [vmem:[#allocation2 + $0x70] sm:$0x3] %vm1684_vm2, %v14860_v4  ;;  %1700 = vst.msk [vmem:[#allocation2 + $0x88] sm:$0x3] %vm1684_vm2, %v14860_v4 }
 0x254   : > { %1703 = vst.msk [vmem:[#allocation2 + $0xa0] sm:$0x3] %vm1684_vm2, %v14860_v4  ;;  %1706 = vst.msk [vmem:[#allocation2 + $0xb8] sm:$0x3] %vm1684_vm2, %v14860_v4 }
 0x255   : > { %1709 = vst.msk [vmem:[#allocation2 + $0xd0] sm:$0x3] %vm1684_vm2, %v14860_v4  ;;  %1712 = vst.msk [vmem:[#allocation2 + $0xe8] sm:$0x3] %vm1684_vm2, %v14860_v4 }
 0x256   : > { %1715 = vst.msk [vmem:[#allocation2 + $0x100] sm:$0x3] %vm1684_vm2, %v14860_v4  ;;  %1718 = vst.msk [vmem:[#allocation2 + $0x118] sm:$0x3] %vm1684_vm2, %v14860_v4  ;;  %10727 = vmatmul.mubr.msk.bf16.gmra.mrb[4].mxu1 %vm571_vm0, %v11777_v46  ;;  %v992_v46 = vadd.f32 %v12195_v13, %v12473_v59 }
 0x257   : > { %1721 = vst.msk [vmem:[#allocation2 + $0x130] sm:$0x3] %vm1684_vm2, %v14860_v4  ;;  %1724 = vst.msk [vmem:[#allocation2 + $0x148] sm:$0x3] %vm1684_vm2, %v14860_v4  ;;  %10730 = vmatprep.mubr.msk.bf16.mxu1 %vm571_vm0, %v11778_v49 }
 0x258   : > { %1727 = vst.msk [vmem:[#allocation2 + $0x160] sm:$0x3] %vm1684_vm2, %v14860_v4  ;;  %1730 = vst.msk [vmem:[#allocation2 + $0x178] sm:$0x3] %vm1684_vm2, %v14860_v4  ;;  %v1827_v3 = vld [vmem:[#allocation2 + $0x9] sm:$0xff] }
 0x259   : > { %1733 = vst.msk [vmem:[#allocation2 + $0x190] sm:$0x3] %vm1684_vm2, %v14860_v4  ;;  %1736 = vst.msk [vmem:[#allocation2 + $0x1a8] sm:$0x3] %vm1684_vm2, %v14860_v4  ;;  %v1858_v5 = vpack.c.bf16 %v1827_v3, %v1826_v25  ;;  %v375_v25 = vld [vmem:[%s12485_s20 + $0x8] sm:$0xff] }
 0x25b   : > { %10366 = vmatprep.mubr.msk.bf16.mxu0 %vm1681_vm1, %v1858_v5  ;;  %v1123_v5 = vmul.f32 %v1091_v1, %v374_v2  ;;  %v379_v1 = vld [vmem:[%s12485_s20 + $0x28] sm:$0xff]  ;;  %v997_v2 = vadd.f32 %v12473_v59, %v12201_v16 }
 0x25c   : > { %v12534_v16 = vld [vmem:[#allocation2 + $0xa] sm:$0xff] }
 0x25d   : > { %5887 = vst.msk [vmem:[#allocation2 + $0x10] sm:$0x3] %vm1684_vm2, %v14860_v4 }
 0x25e   : > { %10731 = vmatmul.mubr.msk.bf16.gmra.mrb[8].mxu1 %vm571_vm0, %v11779_v48 }
 0x25f   : > { %10734 = vmatprep.mubr.msk.bf16.mxu1 %vm571_vm0, %v11781_v50  ;;  %v1126_v50 = vmul.f32 %v1094_v44, %v377_v20 }
 0x266   : > { %10735 = vmatmul.mubr.msk.bf16.gmra.mrb[12].mxu1 %vm571_vm0, %v11782_v51 }
 0x267   : > { %10738 = vmatprep.mubr.msk.bf16.mxu1 %vm571_vm0, %v11783_v52 }
 0x26e   : > { %10739 = vmatmul.mubr.msk.bf16.gmra.mrb[16].mxu1 %vm571_vm0, %v11784_v53  ;;  %v1124_v53 = vmul.f32 %v1092_v22, %v375_v25  ;;  %v12525_v22 = vld [vmem:[#allocation2] sm:$0xff]  ;;  %v1008_v25 = vadd.f32 %v12203_v17, %v12473_v59 }
 0x26f   : > { %10742 = vmatprep.mubr.msk.bf16.mxu1 %vm571_vm0, %v11786_v54  ;;  %v984_v54 = vadd.f32 %v12473_v59, %v12197_v14  ;;  %v1005_v14 = vadd.f32 %v12199_v15, %v12473_v59 }
 0x271   : > { %v1096_v63 = vadd.f32 1.0, %v984_v54  ;;  %v385_v54 = vld [vmem:[%s12485_s20 + $0x58] sm:$0xff] }
 0x276   : > { %10743 = vmatmul.mubr.msk.bf16.gmra.mrb[20].mxu1 %vm571_vm0, %v11787_v55 }
 0x277   : > { %10746 = vmatprep.mubr.msk.bf16.mxu1 %vm571_vm0, %v11788_v56  ;;  %v1097_v56 = vadd.f32 1.0, %v989_v8 }
 0x27e   : > { %10747 = vmatmul.mubr.msk.bf16.gmra.mrb[24].mxu1 %vm571_vm0, %v11789_v57  ;;  %v380_v57 = vld [vmem:[%s12485_s20 + $0x30] sm:$0xff] }
 0x27f   : > { %10750 = vmatprep.mubr.msk.bf16.mxu1 %vm571_vm0, %v11791_v10  ;;  %v1095_v10 = vadd.f32 1.0, %v981_v45  ;;  %v1129_v0 = vmul.f32 %v1097_v56, %v380_v57  ;;  %v383_v56 = vld [vmem:[%s12485_s20 + $0x48] sm:$0xff] }
 0x286   : > { %10751 = vmatmul.mubr.msk.bf16.gmra.mrb[28].mxu1 %vm571_vm0, %v11792_v58  ;;  %v1098_v58 = vadd.f32 1.0, %v992_v46 }
 0x2e9   : > { %v10328_v23 = vpop.f32.mrb[96].mxu0 }
 0x2ea   : > { %v1531_v9 = vadd.f32 %v10328_v23, %v12495_v7  ;;  %v1522_v3 = vpop.f32.mrb[97].mxu0  ;;  %v1127_v23 = vmul.f32 %v1095_v10, %v378_v61 }
 0x2eb   : > { %v1523_v49 = vadd.f32 %v12495_v7, %v1522_v3  ;;  %v10329_v48 = vpop.f32.mrb[98].mxu0  ;;  %v12532_v3 = vld [vmem:[#allocation2 + $0x2] sm:$0xff] }
 0x2ec   : > { %v1651_v51 = vadd.f32 %v1531_v9, %v1125_v24  ;;  %v1534_v11 = vadd.f32 %v10329_v48, %v12495_v7  ;;  %v1525_v52 = vpop.f32.mrb[99].mxu0  ;;  %v1130_v24 = vmul.f32 %v1098_v58, %v381_v62  ;;  %v12530_v9 = vld [vmem:[#allocation2 + $0x8] sm:$0xff]  ;;  %5885 = vst.msk [vmem:[#allocation2] sm:$0xff] %vm1681_vm1, %v14860_v4  ;;  %v1128_v48 = vmul.f32 %v1096_v63, %v379_v1 }
 0x2ed   : > { %v1649_v55 = vadd.f32 %v1523_v49, %v1123_v5  ;;  %v1526_v12 = vadd.f32 %v12495_v7, %v1525_v52  ;;  %v1000_v5 = vadd.f32 %v12473_v59, %v12205_v18  ;;  %5886 = vst.msk [vmem:[#allocation2 + $0x8] sm:$0xff] %vm1681_vm1, %v14860_v4  ;;  %v382_v52 = vld [vmem:[%s12485_s20 + $0x40] sm:$0xff]  ;;  %v1021_v1 = vadd.f32 %v12207_v19, %v12473_v59 }
 0x2ee   : > { %1740 = vst.msk [vmem:[#allocation2 + $0x31] sm:$0xff] %vm1681_vm1, %v1651_v51  ;;  %v1652_v13 = vadd.f32 %v1534_v11, %v1126_v50  ;;  %v1101_v50 = vadd.f32 1.0, %v1005_v14  ;;  %v384_v11 = vld [vmem:[%s12485_s20 + $0x50] sm:$0xff] }
 0x2ef   : > { %1738 = vst.msk [vmem:[#allocation2 + $0x19] sm:$0xff] %vm1681_vm1, %v1649_v55  ;;  %v1650_v60 = vadd.f32 %v1526_v12, %v1124_v53  ;;  %v1099_v53 = vadd.f32 1.0, %v997_v2  ;;  %v1102_v12 = vadd.f32 1.0, %v1008_v25  ;;  %v1100_v62 = vadd.f32 1.0, %v1000_v5 }
 0x2f0   : > { %1741 = vst.msk [vmem:[#allocation2 + $0x39] sm:$0xff] %vm1681_vm1, %v1652_v13  ;;  %v1013_v2 = vadd.f32 %v12473_v59, %v12209_v21 }
 0x2f1   : > { %1739 = vst.msk [vmem:[#allocation2 + $0x21] sm:$0xff] %vm1681_vm1, %v1650_v60  ;;  %v10332_v6 = vpop.f32.mrb[100].mxu0  ;;  %v12557_v60 = vld [vmem:[%s14857_s7 + $0x8] sm:$0xff]   ;;  %v1131_v21 = vmul.f32 %v1099_v53, %v382_v52 }
 0x2f2   : > { %v1547_v44 = vadd.f32 %v10332_v6, %v12495_v7  ;;  %v1538_v20 = vpop.f32.mrb[101].mxu0 }
 0x2f3   : > { %v1539_v15 = vadd.f32 %v12495_v7, %v1538_v20  ;;  %v10333_v8 = vpop.f32.mrb[102].mxu0 }
 0x2f4   : > { %v1655_v45 = vadd.f32 %v1547_v44, %v1129_v0  ;;  %v1550_v46 = vadd.f32 %v10333_v8, %v12495_v7  ;;  %v1541_v49 = vpop.f32.mrb[103].mxu0  ;;  %v1133_v0 = vmul.f32 %v1101_v50, %v384_v11  ;;  %v1134_v11 = vmul.f32 %v1102_v12, %v385_v54 }
 0x2f5   : > { %v1653_v18 = vadd.f32 %v1539_v15, %v1127_v23  ;;  %v1542_v51 = vadd.f32 %v12495_v7, %v1541_v49  ;;  %v1830_v10 = vld [vmem:[#allocation2 + $0x31] sm:$0xff] }
 0x2f6   : > { %1744 = vst.msk [vmem:[#allocation2 + $0x61] sm:$0xff] %vm1681_vm1, %v1655_v45  ;;  %v1656_v55 = vadd.f32 %v1550_v46, %v1130_v24  ;;  %v1828_v57 = vld [vmem:[#allocation2 + $0x19] sm:$0xff]  ;;  %v12573_v24 = vld [vmem:[#allocation2 + $0x30] sm:$0xff]  ;;  %v1024_v45 = vadd.f32 %v12211_v26, %v12473_v59  ;;  %v1016_v26 = vadd.f32 %v12473_v59, %v12213_v27 }
 0x2f7   : > { %1742 = vst.msk [vmem:[#allocation2 + $0x49] sm:$0xff] %vm1681_vm1, %v1653_v18  ;;  %v1654_v13 = vadd.f32 %v1542_v51, %v1128_v48  ;;  %v1831_v58 = vld [vmem:[#allocation2 + $0x39] sm:$0xff]  ;;  %v12583_v19 = vld [vmem:[#allocation2 + $0x31] sm:$0xff] }
 0x2f8   : > { %v12559_v61 = vld [vmem:[#allocation2 + $0x18] sm:$0xff]  ;;  %1745 = vst.msk [vmem:[#allocation2 + $0x69] sm:$0xff] %vm1681_vm1, %v1656_v55  ;;  %v1829_v63 = vld [vmem:[#allocation2 + $0x21] sm:$0xff]  ;;  %14897 = vst [vmem:[#allocation5_spill] sm:$0xff] %v12583_v19  ;;  %v1860_v48 = vpack.c.bf16 %v1831_v58, %v1830_v10  ;;  %v1132_v58 = vmul.f32 %v1100_v62, %v383_v56  ;;  %v1105_v56 = vadd.f32 1.0, %v1021_v1  ;;  %v1103_v62 = vadd.f32 1.0, %v1013_v2 }
 0x2f9   : > { %v12562_v14 = vld [vmem:[#allocation2 + $0x1a] sm:$0xff]  ;;  %1743 = vst.msk [vmem:[#allocation2 + $0x51] sm:$0xff] %vm1681_vm1, %v1654_v13  ;;  %v10336_v44 = vpop.f32.mrb[104].mxu0  ;;  %v1859_v20 = vpack.c.bf16 %v1829_v63, %v1828_v57  ;;  %v12577_v15 = vld [vmem:[#allocation2 + $0x22] sm:$0xff]  ;;  %v12579_v8 = vld [vmem:[#allocation2 + $0x32] sm:$0xff]  ;;  %v1104_v13 = vadd.f32 1.0, %v1016_v26  ;;  %v1037_v26 = vadd.f32 %v12215_v28, %v12473_v59 }
 0x2fa   : > { %v12564_v6 = vld [vmem:[#allocation2 + $0x19] sm:$0xff]  ;;  %v12581_v5 = vld [vmem:[#allocation2 + $0x21] sm:$0xff]  ;;  %v1563_v46 = vadd.f32 %v10336_v44, %v12495_v7  ;;  %v1554_v49 = vpop.f32.mrb[105].mxu0  ;;  %v12596_v18 = vld [vmem:[#allocation2 + $0x30] sm:$0xff] }
 0x2fb   : > { %14895 = vst [vmem:[#allocation3_spill] sm:$0xff] %v12564_v6  ;;  %v12571_v23 = vld [vmem:[#allocation2 + $0x20] sm:$0xff]  ;;  %v12575_v25 = vld [vmem:[#allocation2 + $0x38] sm:$0xff]  ;;  %14896 = vst [vmem:[#allocation4_spill] sm:$0xff] %v12581_v5  ;;  %v1555_v52 = vadd.f32 %v12495_v7, %v1554_v49  ;;  %v10337_v53 = vpop.f32.mrb[106].mxu0  ;;  %10367 = vmatmul.mubr.msk.bf16.vlgmr.msra.gmra.mrb[128].mxu0 %vm1681_vm1, %v1859_v20  ;;  %v1106_v49 = vadd.f32 1.0, %v1024_v45 }
 0x2fc   : > { %5888 = vst.msk [vmem:[#allocation2 + $0x18] sm:$0xff] %vm1681_vm1, %v14860_v4  ;;  %v12590_v50 = vld [vmem:[#allocation2 + $0x3a] sm:$0xff]  ;;  %5889 = vst.msk [vmem:[#allocation2 + $0x20] sm:$0xff] %vm1681_vm1, %v14860_v4  ;;  %v12608_v57 = vld [vmem:[#allocation2 + $0x32] sm:$0xff]  ;;  %v1659_v54 = vadd.f32 %v1563_v46, %v1133_v0  ;;  %v1566_v27 = vadd.f32 %v10337_v53, %v12495_v7  ;;  %10399 = vmatpush3.bf16.msra.mxu0 %v12443_v47  ;;  %v1557_v12 = vpop.f32.mrb[107].mxu0  ;;  %10370 = vmatprep.mubr.msk.bf16.mxu0 %vm1681_vm1, %v1860_v48 }
 0x2fd   : > { %5890 = vst.msk [vmem:[#allocation2 + $0x28] sm:$0x3] %vm1684_vm2, %v14860_v4  ;;  %14898 = vst [vmem:[#allocation6_spill] sm:$0xff] %v12596_v18  ;;  %v12598_v51 = vld [vmem:[#allocation2 + $0x38] sm:$0xff]  ;;  %v1657_v63 = vadd.f32 %v1555_v52, %v1131_v21  ;;  %v1558_v0 = vadd.f32 %v12495_v7, %v1557_v12  ;;  %10400 = vmatprep.subr.bf16.mxu0 %v12557_v60  ;;  %v11785_v47 = vld [vmem:[%s14857_s7 + $0x10] sm:$0xff]  }
 0x2fe   : > { %14899 = vst [vmem:[#allocation7_spill] sm:$0xff] %v12598_v51  ;;  %v12604_v55 = vld [vmem:[#allocation2 + $0x39] sm:$0xff]  ;;  %14901 = vst [vmem:[#allocation9_spill] sm:$0xff] %v12608_v57  ;;  %v388_v44 = vld [vmem:[%s12485_s20 + $0x70] sm:$0xff]  ;;  %v1660_v48 = vadd.f32 %v1566_v27, %v1134_v11 }
 0x2ff   : > { %14900 = vst [vmem:[#allocation8_spill] sm:$0xff] %v12604_v55  ;;  %v12610_v10 = vld [vmem:[#allocation2 + $0x3a] sm:$0xff]  ;;  %5891 = vst.msk [vmem:[#allocation2 + $0x30] sm:$0xff] %vm1681_vm1, %v14860_v4  ;;  %v387_v53 = vld [vmem:[%s12485_s20 + $0x68] sm:$0xff]  ;;  %v1658_v1 = vadd.f32 %v1558_v0, %v1132_v58  ;;  %v1137_v45 = vmul.f32 %v1105_v56, %v388_v44 }
 0x300   : > { %14902 = vst [vmem:[#allocation10_spill] sm:$0xff] %v12610_v10  ;;  %5893 = vst.msk [vmem:[#allocation2 + $0x40] sm:$0x3] %vm1684_vm2, %v14860_v4  ;;  %v386_v20 = vld [vmem:[%s12485_s20 + $0x60] sm:$0xff]  ;;  %v389_v46 = vld [vmem:[%s12485_s20 + $0x78] sm:$0xff]  ;;  %10401 = vmatpush3.bf16.msra.mxu0 %v12557_v60  ;;  %v1029_v60 = vadd.f32 %v12473_v59, %v12217_v29  ;;  %v1040_v29 = vadd.f32 %v12219_v30, %v12473_v59 }
 0x301   : > { %5892 = vst.msk [vmem:[#allocation2 + $0x38] sm:$0xff] %vm1681_vm1, %v14860_v4  ;;  %1748 = vst.msk [vmem:[#allocation2 + $0x91] sm:$0xff] %vm1681_vm1, %v1659_v54  ;;  %v1835_v2 = vld [vmem:[#allocation2 + $0x69] sm:$0xff]  ;;  %v12635_v21 = vld [vmem:[%s14857_s7 + $0x18] sm:$0xff]   ;;  %v1135_v11 = vmul.f32 %v1103_v62, %v386_v20  ;;  %v10340_v58 = vpop.f32.mrb[108].mxu0  ;;  %10402 = vmatprep.subr.bf16.mxu0 %v11785_v47 }
 0x302   : > { %1746 = vst.msk [vmem:[#allocation2 + $0x79] sm:$0xff] %vm1681_vm1, %v1657_v63  ;;  %1749 = vst.msk [vmem:[#allocation2 + $0x99] sm:$0xff] %vm1681_vm1, %v1660_v48  ;;  %v1832_v52 = vld [vmem:[#allocation2 + $0x49] sm:$0xff]  ;;  %v1833_v12 = vld [vmem:[#allocation2 + $0x51] sm:$0xff]  ;;  %v1138_v48 = vmul.f32 %v1106_v49, %v389_v46  ;;  %v1579_v56 = vadd.f32 %v10340_v58, %v12495_v7  ;;  %v1570_v62 = vpop.f32.mrb[109].mxu0  ;;  %v1136_v49 = vmul.f32 %v1104_v13, %v387_v53  ;;  %v14912_v58 = vmov 0.0  }
 0x303   : > { %v1834_v17 = vld [vmem:[#allocation2 + $0x61] sm:$0xff]  ;;  %1747 = vst.msk [vmem:[#allocation2 + $0x81] sm:$0xff] %vm1681_vm1, %v1658_v1  ;;  %v1861_v54 = vpack.c.bf16 %v1833_v12, %v1832_v52  ;;  %v12644_v63 = vld [vmem:[#allocation2 + $0x4a] sm:$0xff]  ;;  %v12655_v1 = vld [vmem:[#allocation2 + $0x52] sm:$0xff] }
 0x304   : > { %v12642_v27 = vld [vmem:[#allocation2 + $0x48] sm:$0xff]  ;;  %v1862_v44 = vpack.c.bf16 %v1835_v2, %v1834_v17  ;;  %v12651_v28 = vld [vmem:[#allocation2 + $0x50] sm:$0xff]  ;;  %v12653_v20 = vld [vmem:[#allocation2 + $0x60] sm:$0xff]  ;;  %v1571_v17 = vadd.f32 %v12495_v7, %v1570_v62  ;;  %v10341_v2 = vpop.f32.mrb[110].mxu0  ;;  %v1663_v51 = vadd.f32 %v1579_v56, %v1137_v45  ;;  %10403 = vmatpush3.bf16.msra.mxu0 %v11785_v47  ;;  %v1109_v56 = vadd.f32 1.0, %v1037_v26 }
 0x305   : > { %v12646_v0 = vld [vmem:[#allocation2 + $0x49] sm:$0xff]  ;;  %v12659_v12 = vld [vmem:[#allocation2 + $0x61] sm:$0xff]  ;;  %10371 = vmatmul.mubr.msk.bf16.gmra.mrb[132].mxu0 %vm1681_vm1, %v1861_v54  ;;  %v1582_v13 = vadd.f32 %v10341_v2, %v12495_v7  ;;  %v1573_v53 = vpop.f32.mrb[111].mxu0  ;;  %v12679_v30 = vld [vmem:[#allocation2 + $0x51] sm:$0xff]  ;;  %10404 = vmatprep.subr.bf16.mxu0 %v12635_v21 }
 0x306   : > { %14903 = vst [vmem:[#allocation11_spill] sm:$0xff] %v12646_v0  ;;  %v12657_v52 = vld [vmem:[#allocation2 + $0x62] sm:$0xff]  ;;  %14904 = vst [vmem:[#allocation12_spill] sm:$0xff] %v12659_v12  ;;  %v12663_v46 = vld [vmem:[#allocation2 + $0x50] sm:$0xff]  ;;  %10374 = vmatprep.mubr.msk.bf16.mxu0 %vm1681_vm1, %v1862_v44  ;;  %v1032_v44 = vadd.f32 %v12473_v59, %v12221_v31  ;;  %v1661_v2 = vadd.f32 %v1571_v17, %v1135_v11  ;;  %v1574_v47 = vadd.f32 %v12495_v7, %v1573_v53 }
 0x307   : > { %v12661_v4 = vld [vmem:[#allocation2 + $0x48] sm:$0xff]  ;;  %14906 = vst [vmem:[#allocation14_spill] sm:$0xff] %v12663_v46  ;;  %v12671_v10 = vld [vmem:[#allocation2 + $0x60] sm:$0xff]  ;;  %14910 = vst [vmem:[#allocation18_spill] sm:$0xff] %v12679_v30  ;;  %v1107_v11 = vadd.f32 1.0, %v1029_v60  ;;  %v1664_v26 = vadd.f32 %v1582_v13, %v1138_v48 }
 0x308   : > { %14905 = vst [vmem:[#allocation13_spill] sm:$0xff] %v12661_v4  ;;  %14907 = vst [vmem:[#allocation15_spill] sm:$0xff] %v12671_v10  ;;  %v12673_v57 = vld [vmem:[#allocation2 + $0x68] sm:$0xff]  ;;  %v12683_v62 = vld [vmem:[#allocation2 + $0x52] sm:$0xff]  ;;  %10405 = vmatpush3.bf16.msra.mxu0 %v12635_v21  ;;  %v1108_v12 = vadd.f32 1.0, %v1032_v44  ;;  %v1045_v21 = vadd.f32 %v12473_v59, %v12225_v33 }
 0x309   : > { %14908 = vst [vmem:[#allocation16_spill] sm:$0xff] %v12673_v57  ;;  %v12675_v18 = vld [vmem:[#allocation2 + $0x4a] sm:$0xff]  ;;  %14911 = vst [vmem:[#allocation19_spill] sm:$0xff] %v12683_v62  ;;  %v12687_v45 = vld [vmem:[#allocation2 + $0x62] sm:$0xff]  ;;  %v1662_v62 = vadd.f32 %v1574_v47, %v1136_v49  ;;  %v10344_v48 = vpop.f32.mrb[112].mxu0 }
 0x30a   : > { %14909 = vst [vmem:[#allocation17_spill] sm:$0xff] %v12675_v18  ;;  %5894 = vst.msk [vmem:[#allocation2 + $0x48] sm:$0xff] %vm1681_vm1, %v14912_v58  ;;  %v12696_v54 = vld [vmem:[%s14857_s7 + $0x40] sm:$0xff]   ;;  %v392_v31 = vld [vmem:[%s12485_s20 + $0x90] sm:$0xff] }
 0x30b   : > { %14913 = vst [vmem:[#allocation20_spill] sm:$0xff] %v12687_v45  ;;  %5896 = vst.msk [vmem:[#allocation2 + $0x58] sm:$0x3] %vm1684_vm2, %v14912_v58  ;;  %v390_v17 = vld [vmem:[%s12485_s20 + $0x80] sm:$0xff]  ;;  %v393_v53 = vld [vmem:[%s12485_s20 + $0x98] sm:$0xff]  ;;  %v1110_v45 = vadd.f32 1.0, %v1040_v29  ;;  %v1141_v46 = vmul.f32 %v1109_v56, %v392_v31  ;;  %10438 = vmatprep.subr.bf16.mxu0 %v12696_v54  ;;  %v1595_v56 = vadd.f32 %v10344_v48, %v12495_v7 }
 0x30c   : > { %5895 = vst.msk [vmem:[#allocation2 + $0x50] sm:$0xff] %vm1681_vm1, %v14912_v58  ;;  %5897 = vst.msk [vmem:[#allocation2 + $0x60] sm:$0xff] %vm1681_vm1, %v14912_v58  ;;  %v1839_v18 = vld [vmem:[#allocation2 + $0x99] sm:$0xff]  ;;  %v391_v10 = vld [vmem:[%s12485_s20 + $0x88] sm:$0xff]  ;;  %v1139_v47 = vmul.f32 %v1107_v11, %v390_v17 }
 0x30d   : > { %1752 = vst.msk [vmem:[#allocation2 + $0xc1] sm:$0xff] %vm1681_vm1, %v1663_v51  ;;  %1750 = vst.msk [vmem:[#allocation2 + $0xa9] sm:$0xff] %vm1681_vm1, %v1661_v2  ;;  %v1836_v57 = vld [vmem:[#allocation2 + $0x79] sm:$0xff]  ;;  %v1837_v4 = vld [vmem:[#allocation2 + $0x81] sm:$0xff]  ;;  %v1053_v51 = vadd.f32 %v12223_v32, %v12473_v59  ;;  %v1586_v32 = vpop.f32.mrb[113].mxu0 }
 0x30e   : > { %1753 = vst.msk [vmem:[#allocation2 + $0xc9] sm:$0xff] %vm1681_vm1, %v1664_v26  ;;  %1751 = vst.msk [vmem:[#allocation2 + $0xb1] sm:$0xff] %vm1681_vm1, %v1662_v62  ;;  %v1863_v60 = vpack.c.bf16 %v1837_v4, %v1836_v57  ;;  %v1838_v29 = vld [vmem:[#allocation2 + $0x91] sm:$0xff]  ;;  %v12716_v49 = vld [vmem:[#allocation2 + $0x68] sm:$0xff]  ;;  %v1587_v0 = vadd.f32 %v12495_v7, %v1586_v32  ;;  %v10345_v55 = vpop.f32.mrb[114].mxu0 }
 0x30f   : > { %v12718_v13 = vld [vmem:[#allocation2 + $0x6a] sm:$0xff]  ;;  %v1864_v44 = vpack.c.bf16 %v1839_v18, %v1838_v29  ;;  %v12725_v62 = vld [vmem:[#allocation2 + $0x78] sm:$0xff]  ;;  %v12727_v4 = vld [vmem:[#allocation2 + $0x80] sm:$0xff]  ;;  %v1142_v29 = vmul.f32 %v1110_v45, %v393_v53  ;;  %v1048_v45 = vadd.f32 %v12473_v59, %v12229_v35  ;;  %v1667_v53 = vadd.f32 %v1595_v56, %v1141_v46  ;;  %v1589_v5 = vpop.f32.mrb[115].mxu0 }
 0x310   : > { %v12720_v2 = vld [vmem:[#allocation2 + $0x69] sm:$0xff]  ;;  %v12731_v31 = vld [vmem:[#allocation2 + $0x7a] sm:$0xff]  ;;  %v12735_v30 = vld [vmem:[#allocation2 + $0x92] sm:$0xff]  ;;  %10375 = vmatmul.mubr.msk.bf16.gmra.mrb[136].mxu0 %vm1681_vm1, %v1863_v60  ;;  %v1140_v46 = vmul.f32 %v1108_v12, %v391_v10  ;;  %v1113_v56 = vadd.f32 1.0, %v1053_v51  ;;  %v1590_v60 = vadd.f32 %v12495_v7, %v1589_v5 }
 0x311   : > { %14914 = vst [vmem:[#allocation21_spill] sm:$0xff] %v12720_v2  ;;  %v12729_v57 = vld [vmem:[#allocation2 + $0x90] sm:$0xff]  ;;  %v12733_v26 = vld [vmem:[#allocation2 + $0x82] sm:$0xff]  ;;  %v12737_v11 = vld [vmem:[#allocation2 + $0x79] sm:$0xff]  ;;  %v1056_v2 = vadd.f32 %v12227_v34, %v12473_v59  ;;  %v1598_v34 = vadd.f32 %v10345_v55, %v12495_v7  ;;  %10378 = vmatprep.mubr.msk.bf16.mxu0 %vm1681_vm1, %v1864_v44  ;;  %v1665_v44 = vadd.f32 %v1587_v0, %v1139_v47 }
 0x312   : > { %14915 = vst [vmem:[#allocation22_spill] sm:$0xff] %v12737_v11  ;;  %v12739_v17 = vld [vmem:[#allocation2 + $0x81] sm:$0xff]  ;;  %v12741_v33 = vld [vmem:[#allocation2 + $0x91] sm:$0xff]  ;;  %1756 = vst.msk [vmem:[#allocation2 + $0xf1] sm:$0xff] %vm1681_vm1, %v1667_v53  ;;  %v1666_v51 = vadd.f32 %v1590_v60, %v1140_v46  ;;  %v1061_v46 = vadd.f32 %v12473_v59, %v12233_v37  ;;  %v1072_v37 = vadd.f32 %v12235_v38, %v12473_v59 }
 0x313   : > { %14916 = vst [vmem:[#allocation23_spill] sm:$0xff] %v12739_v17  ;;  %14917 = vst [vmem:[#allocation24_spill] sm:$0xff] %v12741_v33  ;;  %v12743_v48 = vld [vmem:[#allocation2 + $0x78] sm:$0xff]  ;;  %v12745_v18 = vld [vmem:[#allocation2 + $0x80] sm:$0xff]  ;;  %v1668_v10 = vadd.f32 %v1598_v34, %v1142_v29  ;;  %v1114_v5 = vadd.f32 1.0, %v1056_v2  ;;  %v10348_v29 = vpop.f32.mrb[116].mxu0 }
 0x314   : > { %14918 = vst [vmem:[#allocation25_spill] sm:$0xff] %v12743_v48  ;;  %14919 = vst [vmem:[#allocation26_spill] sm:$0xff] %v12745_v18  ;;  %v12753_v19 = vld [vmem:[#allocation2 + $0x90] sm:$0xff]  ;;  %v12755_v17 = vld [vmem:[#allocation2 + $0x98] sm:$0xff] }
 0x315   : > { %14920 = vst [vmem:[#allocation27_spill] sm:$0xff] %v12753_v19  ;;  %14921 = vst [vmem:[#allocation28_spill] sm:$0xff] %v12755_v17  ;;  %v12757_v33 = vld [vmem:[#allocation2 + $0x6a] sm:$0xff]  ;;  %v12769_v32 = vld [vmem:[#allocation2 + $0x7a] sm:$0xff] }
 0x316   : > { %14922 = vst [vmem:[#allocation29_spill] sm:$0xff] %v12757_v33  ;;  %5899 = vst.msk [vmem:[#allocation2 + $0x70] sm:$0x3] %vm1684_vm2, %v14912_v58  ;;  %v12771_v35 = vld [vmem:[#allocation2 + $0x82] sm:$0xff]  ;;  %v12773_v55 = vld [vmem:[#allocation2 + $0x92] sm:$0xff] }
 0x317   : > { %5898 = vst.msk [vmem:[#allocation2 + $0x68] sm:$0xff] %vm1681_vm1, %v14912_v58  ;;  %14923 = vst [vmem:[#allocation30_spill] sm:$0xff] %v12769_v32  ;;  %v396_v11 = vld [vmem:[%s12485_s20 + $0xb0] sm:$0xff]  ;;  %v394_v0 = vld [vmem:[%s12485_s20 + $0xa0] sm:$0xff]  ;;  %v1112_v32 = vadd.f32 1.0, %v1048_v45 }
 0x318   : > { %14924 = vst [vmem:[#allocation31_spill] sm:$0xff] %v12771_v35  ;;  %14925 = vst [vmem:[#allocation32_spill] sm:$0xff] %v12773_v55  ;;  %v1111_v55 = vadd.f32 1.0, %v1045_v21  ;;  %v397_v12 = vld [vmem:[%s12485_s20 + $0xb8] sm:$0xff]  ;;  %v1843_v47 = vld [vmem:[#allocation2 + $0xc9] sm:$0xff]  ;;  %v1145_v17 = vmul.f32 %v1113_v56, %v396_v11  ;;  %v1069_v21 = vadd.f32 %v12231_v36, %v12473_v59  ;;  %v1611_v11 = vadd.f32 %v10348_v29, %v12495_v7  ;;  %v1602_v56 = vpop.f32.mrb[117].mxu0 }
 0x319   : > { %5900 = vst.msk [vmem:[#allocation2 + $0x78] sm:$0xff] %vm1681_vm1, %v14912_v58  ;;  %5901 = vst.msk [vmem:[#allocation2 + $0x80] sm:$0xff] %vm1681_vm1, %v14912_v58  ;;  %v395_v35 = vld [vmem:[%s12485_s20 + $0xa8] sm:$0xff]  ;;  %v1841_v19 = vld [vmem:[#allocation2 + $0xb1] sm:$0xff]  ;;  %v10349_v29 = vpop.f32.mrb[118].mxu0 }
 0x31a   : > { %5902 = vst.msk [vmem:[#allocation2 + $0x88] sm:$0x3] %vm1684_vm2, %v14912_v58  ;;  %v1840_v33 = vld [vmem:[#allocation2 + $0xa9] sm:$0xff]  ;;  %v1842_v34 = vld [vmem:[#allocation2 + $0xc1] sm:$0xff]  ;;  %v12794_v2 = vld [vmem:[#allocation2 + $0x98] sm:$0xff]  ;;  %v1143_v45 = vmul.f32 %v1111_v55, %v394_v0  ;;  %v1146_v0 = vmul.f32 %v1114_v5, %v397_v12  ;;  %v1614_v12 = vadd.f32 %v10349_v29, %v12495_v7  ;;  %v1605_v38 = vpop.f32.mrb[119].mxu0 }
 0x31b   : > { %5903 = vst.msk [vmem:[#allocation2 + $0x90] sm:$0xff] %vm1681_vm1, %v14912_v58  ;;  %1754 = vst.msk [vmem:[#allocation2 + $0xd9] sm:$0xff] %vm1681_vm1, %v1665_v44  ;;  %v1865_v53 = vpack.c.bf16 %v1841_v19, %v1840_v33  ;;  %v12796_v44 = vld [vmem:[#allocation2 + $0x9a] sm:$0xff]  ;;  %v12803_v36 = vld [vmem:[#allocation2 + $0xa8] sm:$0xff] }
 0x31c   : > { %1757 = vst.msk [vmem:[#allocation2 + $0xf9] sm:$0xff] %vm1681_vm1, %v1668_v10  ;;  %1755 = vst.msk [vmem:[#allocation2 + $0xe1] sm:$0xff] %vm1681_vm1, %v1666_v51  ;;  %v12798_v60 = vld [vmem:[#allocation2 + $0x99] sm:$0xff]  ;;  %v1866_v10 = vpack.c.bf16 %v1843_v47, %v1842_v34  ;;  %v12805_v51 = vld [vmem:[#allocation2 + $0xb0] sm:$0xff]  ;;  %v1603_v47 = vadd.f32 %v12495_v7, %v1602_v56 }
 0x31d   : > { %14926 = vst [vmem:[#allocation33_spill] sm:$0xff] %v12798_v60  ;;  %v12807_v19 = vld [vmem:[#allocation2 + $0xaa] sm:$0xff]  ;;  %v12809_v33 = vld [vmem:[#allocation2 + $0xb2] sm:$0xff]  ;;  %10379 = vmatmul.mubr.msk.bf16.gmra.mrb[140].mxu0 %vm1681_vm1, %v1865_v53  ;;  %v12823_v60 = vld [vmem:[#allocation2 + $0xc0] sm:$0xff]  ;;  %v1115_v53 = vadd.f32 1.0, %v1061_v46  ;;  %v10352_v46 = vpop.f32.mrb[120].mxu0 }
 0x31e   : > { %14927 = vst [vmem:[#allocation34_spill] sm:$0xff] %v12807_v19  ;;  %14928 = vst [vmem:[#allocation35_spill] sm:$0xff] %v12809_v33  ;;  %v12811_v48 = vld [vmem:[#allocation2 + $0xa9] sm:$0xff]  ;;  %v1144_v33 = vmul.f32 %v1112_v32, %v395_v35  ;;  %v1671_v19 = vadd.f32 %v1611_v11, %v1145_v17  ;;  %10382 = vmatprep.mubr.msk.bf16.mxu0 %vm1681_vm1, %v1866_v10  ;;  %v12831_v5 = vld [vmem:[#allocation2 + $0xb1] sm:$0xff]  ;;  %v1117_v35 = vadd.f32 1.0, %v1069_v21 }
 0x31f   : > { %14929 = vst [vmem:[#allocation36_spill] sm:$0xff] %v12811_v48  ;;  %v12813_v18 = vld [vmem:[#allocation2 + $0xa8] sm:$0xff]  ;;  %v12815_v55 = vld [vmem:[#allocation2 + $0xb0] sm:$0xff]  ;;  %14932 = vst [vmem:[#allocation39_spill] sm:$0xff] %v12823_v60  ;;  %v1064_v11 = vadd.f32 %v12473_v59, %v12237_v39  ;;  %v1669_v56 = vadd.f32 %v1603_v47, %v1143_v45  ;;  %v1606_v10 = vadd.f32 %v12495_v7, %v1605_v38 }
 0x320   : > { %14930 = vst [vmem:[#allocation37_spill] sm:$0xff] %v12813_v18  ;;  %14931 = vst [vmem:[#allocation38_spill] sm:$0xff] %v12815_v55  ;;  %v12825_v6 = vld [vmem:[#allocation2 + $0xc8] sm:$0xff]  ;;  %v12827_v48 = vld [vmem:[#allocation2 + $0x9a] sm:$0xff]  ;;  %v1672_v21 = vadd.f32 %v1614_v12, %v1146_v0 }
 0x321   : > { %14933 = vst [vmem:[#allocation40_spill] sm:$0xff] %v12825_v6  ;;  %14934 = vst [vmem:[#allocation41_spill] sm:$0xff] %v12827_v48  ;;  %v12839_v17 = vld [vmem:[#allocation2 + $0xaa] sm:$0xff]  ;;  %v12841_v32 = vld [vmem:[#allocation2 + $0xb2] sm:$0xff]  ;;  %v1670_v45 = vadd.f32 %v1606_v10, %v1144_v33  ;;  %v1116_v6 = vadd.f32 1.0, %v1064_v11  ;;  %v1627_v10 = vadd.f32 %v10352_v46, %v12495_v7 }
 0x322   : > { %14935 = vst [vmem:[#allocation42_spill] sm:$0xff] %v12831_v5  ;;  %5905 = vst.msk [vmem:[#allocation2 + $0xa0] sm:$0x3] %vm1684_vm2, %v14912_v58  ;;  %v400_v29 = vld [vmem:[%s12485_s20 + $0xd0] sm:$0xff]  ;;  %v398_v34 = vld [vmem:[%s12485_s20 + $0xc0] sm:$0xff] }
 0x323   : > { %5904 = vst.msk [vmem:[#allocation2 + $0x98] sm:$0xff] %vm1681_vm1, %v14912_v58  ;;  %14936 = vst [vmem:[#allocation43_spill] sm:$0xff] %v12839_v17  ;;  %v401_v39 = vld [vmem:[%s12485_s20 + $0xd8] sm:$0xff]  ;;  %v399_v38 = vld [vmem:[%s12485_s20 + $0xc8] sm:$0xff]  ;;  %v1149_v60 = vmul.f32 %v1117_v35, %v400_v29  ;;  %v1147_v33 = vmul.f32 %v1115_v53, %v398_v34 }
 0x324   : > { %14937 = vst [vmem:[#allocation44_spill] sm:$0xff] %v12841_v32  ;;  %5906 = vst.msk [vmem:[#allocation2 + $0xa8] sm:$0xff] %vm1681_vm1, %v14912_v58  ;;  %v1118_v32 = vadd.f32 1.0, %v1072_v37  ;;  %v1847_v47 = vld [vmem:[#allocation2 + $0xf9] sm:$0xff]  ;;  %v1845_v48 = vld [vmem:[#allocation2 + $0xe1] sm:$0xff] }
 0x325   : > { %5908 = vst.msk [vmem:[#allocation2 + $0xb8] sm:$0x3] %vm1684_vm2, %v14912_v58  ;;  %v1844_v17 = vld [vmem:[#allocation2 + $0xd9] sm:$0xff]  ;;  %v12862_v12 = vld [vmem:[#allocation2 + $0xc2] sm:$0xff]  ;;  %v12891_v5 = vld [vmem:[#allocation2 + $0xf0] sm:$0xff] }
 0x326   : > { %5907 = vst.msk [vmem:[#allocation2 + $0xb0] sm:$0xff] %vm1681_vm1, %v14912_v58  ;;  %1760 = vst.msk [vmem:[#allocation2 + $0x121] sm:$0xff] %vm1681_vm1, %v1671_v19  ;;  %v1867_v18 = vpack.c.bf16 %v1845_v48, %v1844_v17  ;;  %v1846_v19 = vld [vmem:[#allocation2 + $0xf1] sm:$0xff]  ;;  %v12860_v0 = vld [vmem:[#allocation2 + $0xc0] sm:$0xff] }
 0x327   : > { %1758 = vst.msk [vmem:[#allocation2 + $0x109] sm:$0xff] %vm1681_vm1, %v1669_v56  ;;  %1761 = vst.msk [vmem:[#allocation2 + $0x129] sm:$0xff] %vm1681_vm1, %v1672_v21  ;;  %v12864_v37 = vld [vmem:[#allocation2 + $0xc1] sm:$0xff]  ;;  %v1085_v56 = vadd.f32 %v12239_v40, %v12473_v59  ;;  %v1618_v21 = vpop.f32.mrb[121].mxu0  ;;  %v1868_v35 = vpack.c.bf16 %v1847_v47, %v1846_v19  ;;  %v12871_v29 = vld [vmem:[#allocation2 + $0xd8] sm:$0xff]  ;;  %v1150_v40 = vmul.f32 %v1118_v32, %v401_v39 }
 0x328   : > { %1759 = vst.msk [vmem:[#allocation2 + $0x111] sm:$0xff] %vm1681_vm1, %v1670_v45  ;;  %14938 = vst [vmem:[#allocation45_spill] sm:$0xff] %v12864_v37  ;;  %v12869_v11 = vld [vmem:[#allocation2 + $0xc8] sm:$0xff]  ;;  %v12875_v17 = vld [vmem:[#allocation2 + $0xda] sm:$0xff]  ;;  %v1077_v47 = vadd.f32 %v12473_v59, %v12241_v41  ;;  %v1619_v46 = vadd.f32 %v12495_v7, %v1618_v21  ;;  %v10353_v19 = vpop.f32.mrb[122].mxu0  ;;  %10383 = vmatmul.mubr.msk.bf16.gmra.mrb[144].mxu0 %vm1681_vm1, %v1867_v18  ;;  %v1088_v32 = vadd.f32 %v12243_v42, %v12473_v59 }
 0x329   : > { %v12873_v48 = vld [vmem:[#allocation2 + $0xca] sm:$0xff]  ;;  %14940 = vst [vmem:[#allocation47_spill] sm:$0xff] %v12875_v17  ;;  %v12879_v55 = vld [vmem:[#allocation2 + $0xd9] sm:$0xff]  ;;  %14945 = vst [vmem:[#allocation52_spill] sm:$0xff] %v12891_v5  ;;  %v1675_v39 = vadd.f32 %v1627_v10, %v1149_v60  ;;  %v1630_v41 = vadd.f32 %v10353_v19, %v12495_v7  ;;  %v1621_v21 = vpop.f32.mrb[123].mxu0  ;;  %10386 = vmatprep.mubr.msk.bf16.mxu0 %vm1681_vm1, %v1868_v35  ;;  %v1148_v60 = vmul.f32 %v1116_v6, %v399_v38 }
 0x32a   : > { %14939 = vst [vmem:[#allocation46_spill] sm:$0xff] %v12873_v48  ;;  %v12877_v45 = vld [vmem:[#allocation2 + $0xc9] sm:$0xff]  ;;  %14942 = vst [vmem:[#allocation49_spill] sm:$0xff] %v12879_v55  ;;  %v12881_v34 = vld [vmem:[#allocation2 + $0xd8] sm:$0xff]  ;;  %v1080_v10 = vadd.f32 %v12473_v59, %v12245_v43  ;;  %v1673_v35 = vadd.f32 %v1619_v46, %v1147_v33  ;;  %v1622_v19 = vadd.f32 %v12495_v7, %v1621_v21  ;;  %v1119_v59 = vadd.f32 1.0, %v1077_v47 }
 0x32b   : > { %14941 = vst [vmem:[#allocation48_spill] sm:$0xff] %v12877_v45  ;;  %14943 = vst [vmem:[#allocation50_spill] sm:$0xff] %v12881_v34  ;;  %v12883_v53 = vld [vmem:[#allocation2 + $0xe0] sm:$0xff]  ;;  %v12893_v45 = vld [vmem:[#allocation2 + $0xf8] sm:$0xff]  ;;  %v1676_v6 = vadd.f32 %v1630_v41, %v1150_v40  ;;  %v1122_v21 = vadd.f32 1.0, %v1088_v32 }
 0x32c   : > { %14944 = vst [vmem:[#allocation51_spill] sm:$0xff] %v12883_v53  ;;  %14946 = vst [vmem:[#allocation53_spill] sm:$0xff] %v12893_v45  ;;  %v12895_v55 = vld [vmem:[#allocation2 + $0xc2] sm:$0xff]  ;;  %v12906_v34 = vld [vmem:[#allocation2 + $0xca] sm:$0xff]  ;;  %v1674_v33 = vadd.f32 %v1622_v19, %v1148_v60  ;;  %v1120_v45 = vadd.f32 1.0, %v1080_v10 }
 0x32d   : > { %14947 = vst [vmem:[#allocation54_spill] sm:$0xff] %v12895_v55  ;;  %v11800_v18 = vld [vmem:[%s14855_s5 + $0x20] sm:$0xff]   ;;  %14948 = vst [vmem:[#allocation55_spill] sm:$0xff] %v12906_v34  ;;  %v404_v37 = vld [vmem:[%s12485_s20 + $0xf0] sm:$0xff]  ;;  %v1121_v34 = vadd.f32 1.0, %v1085_v56  ;;  %v10356_v56 = vpop.f32.mrb[124].mxu0 }
 0x32e   : > { %5909 = vst.msk [vmem:[#allocation2 + $0xc0] sm:$0xff] %vm1681_vm1, %v14912_v58  ;;  %v12910_v42 = vld [vmem:[#allocation2 + $0xda] sm:$0xff]  ;;  %5910 = vst.msk [vmem:[#allocation2 + $0xc8] sm:$0xff] %vm1681_vm1, %v14912_v58  ;;  %10754 = vmatprep.subr.bf16.mxu1 %v11800_v18  ;;  %v1851_v46 = vld [vmem:[#allocation2 + $0x129] sm:$0xff]  ;;  %v1643_v60 = vadd.f32 %v10356_v56, %v12495_v7 }
 0x32f   : > { %14949 = vst [vmem:[#allocation56_spill] sm:$0xff] %v12910_v42  ;;  %5911 = vst.msk [vmem:[#allocation2 + $0xd0] sm:$0x3] %vm1684_vm2, %v14912_v58  ;;  %v402_v43 = vld [vmem:[%s12485_s20 + $0xe0] sm:$0xff]  ;;  %v405_v38 = vld [vmem:[%s12485_s20 + $0xf8] sm:$0xff]  ;;  %10755 = vmatpush3.bf16.msra.mxu1 %v11800_v18  ;;  %v1634_v18 = vpop.f32.mrb[125].mxu0 }
 0x330   : > { %5912 = vst.msk [vmem:[#allocation2 + $0xd8] sm:$0xff] %vm1681_vm1, %v14912_v58  ;;  %1764 = vst.msk [vmem:[#allocation2 + $0x151] sm:$0xff] %vm1681_vm1, %v1675_v39  ;;  %v403_v42 = vld [vmem:[%s12485_s20 + $0xe8] sm:$0xff]  ;;  %v1849_v5 = vld [vmem:[#allocation2 + $0x111] sm:$0xff] }
 0x331   : > { %1762 = vst.msk [vmem:[#allocation2 + $0x139] sm:$0xff] %vm1681_vm1, %v1673_v35  ;;  %1765 = vst.msk [vmem:[#allocation2 + $0x159] sm:$0xff] %vm1681_vm1, %v1676_v6  ;;  %v1848_v55 = vld [vmem:[#allocation2 + $0x109] sm:$0xff]  ;;  %v1850_v39 = vld [vmem:[#allocation2 + $0x121] sm:$0xff]  ;;  %v1153_v35 = vmul.f32 %v1121_v34, %v404_v37  ;;  %v1151_v37 = vmul.f32 %v1119_v59, %v402_v43  ;;  %v1635_v34 = vadd.f32 %v12495_v7, %v1634_v18 }
 0x332   : > { %1763 = vst.msk [vmem:[#allocation2 + $0x141] sm:$0xff] %vm1681_vm1, %v1674_v33  ;;  %v1869_v40 = vpack.c.bf16 %v1849_v5, %v1848_v55  ;;  %v12929_v41 = vld [vmem:[#allocation2 + $0xe0] sm:$0xff]  ;;  %v1870_v32 = vpack.c.bf16 %v1851_v46, %v1850_v39  ;;  %v12934_v19 = vld [vmem:[#allocation2 + $0xf0] sm:$0xff]  ;;  %v12936_v6 = vld [vmem:[#allocation2 + $0xf8] sm:$0xff]  ;;  %v10357_v46 = vpop.f32.mrb[126].mxu0 }
 0x333   : > { %v12931_v47 = vld [vmem:[#allocation2 + $0xe2] sm:$0xff]  ;;  %v12938_v53 = vld [vmem:[#allocation2 + $0xf2] sm:$0xff]  ;;  %v12940_v10 = vld [vmem:[#allocation2 + $0xfa] sm:$0xff]  ;;  %v1646_v17 = vadd.f32 %v10357_v46, %v12495_v7  ;;  %v1637_v48 = vpop.f32.mrb[127].mxu0 }
 0x334   : > { %14950 = vst [vmem:[#allocation57_spill] sm:$0xff] %v12931_v47  ;;  %14951 = vst [vmem:[#allocation58_spill] sm:$0xff] %v12938_v53  ;;  %v12942_v33 = vld [vmem:[#allocation2 + $0xe1] sm:$0xff]  ;;  %v12944_v55 = vld [vmem:[#allocation2 + $0xf1] sm:$0xff]  ;;  %10387 = vmatmul.mubr.msk.bf16.gmra.mrb[148].mxu0 %vm1681_vm1, %v1869_v40  ;;  %v1679_v53 = vadd.f32 %v1643_v60, %v1153_v35  ;;  %v1677_v35 = vadd.f32 %v1635_v34, %v1151_v37  ;;  %v1638_v60 = vadd.f32 %v12495_v7, %v1637_v48 }
 0x335   : > { %14952 = vst [vmem:[#allocation59_spill] sm:$0xff] %v12940_v10  ;;  %14953 = vst [vmem:[#allocation60_spill] sm:$0xff] %v12942_v33  ;;  %v12946_v5 = vld [vmem:[#allocation2 + $0x108] sm:$0xff]  ;;  %v12948_v47 = vld [vmem:[#allocation2 + $0x110] sm:$0xff]  ;;  %10390 = vmatprep.mubr.msk.bf16.mxu0 %vm1681_vm1, %v1870_v32 }
 0x336   : > { %14954 = vst [vmem:[#allocation61_spill] sm:$0xff] %v12944_v55  ;;  %14955 = vst [vmem:[#allocation62_spill] sm:$0xff] %v12946_v5  ;;  %v12954_v39 = vld [vmem:[#allocation2 + $0x120] sm:$0xff]  ;;  %v12956_v10 = vld [vmem:[#allocation2 + $0x128] sm:$0xff]  ;;  %v1154_v55 = vmul.f32 %v1122_v21, %v405_v38  ;;  %v1152_v21 = vmul.f32 %v1120_v45, %v403_v42 }
 0x337   : > { %14956 = vst [vmem:[#allocation63_spill] sm:$0xff] %v12948_v47  ;;  %14957 = vst [vmem:[#allocation64_spill] sm:$0xff] %v12954_v39  ;;  %v12958_v33 = vld [vmem:[#allocation2 + $0xe2] sm:$0xff]  ;;  %v12962_v43 = vld [vmem:[#allocation2 + $0xf9] sm:$0xff] }
 0x338   : > { %14958 = vst [vmem:[#allocation65_spill] sm:$0xff] %v12956_v10  ;;  %14959 = vst [vmem:[#allocation66_spill] sm:$0xff] %v12958_v33  ;;  %v12970_v40 = vld [vmem:[#allocation2 + $0xf2] sm:$0xff]  ;;  %v12972_v38 = vld [vmem:[#allocation2 + $0xfa] sm:$0xff]  ;;  %v1680_v18 = vadd.f32 %v1646_v17, %v1154_v55  ;;  %v1678_v32 = vadd.f32 %v1638_v60, %v1152_v21 }
 0x339   : > { %14960 = vst [vmem:[#allocation67_spill] sm:$0xff] %v12962_v43  ;;  %5914 = vst.msk [vmem:[#allocation2 + $0xe8] sm:$0x3] %vm1684_vm2, %v14912_v58  ;;  %v1855_v46 = vld [vmem:[#allocation2 + $0x159] sm:$0xff]  ;;  %v1853_v7 = vld [vmem:[#allocation2 + $0x141] sm:$0xff] }
 0x33a   : > { %5913 = vst.msk [vmem:[#allocation2 + $0xe0] sm:$0xff] %vm1681_vm1, %v14912_v58  ;;  %14961 = vst [vmem:[#allocation68_spill] sm:$0xff] %v12970_v40  ;;  %v1852_v45 = vld [vmem:[#allocation2 + $0x139] sm:$0xff]  ;;  %v1854_v42 = vld [vmem:[#allocation2 + $0x151] sm:$0xff] }
 0x33b   : > { %14962 = vst [vmem:[#allocation69_spill] sm:$0xff] %v12972_v38  ;;  %5915 = vst.msk [vmem:[#allocation2 + $0xf0] sm:$0xff] %vm1681_vm1, %v14912_v58  ;;  %v1871_v48 = vpack.c.bf16 %v1853_v7, %v1852_v45  ;;  %v12985_v37 = vld [vmem:[#allocation2 + $0x108] sm:$0xff]  ;;  %v12991_v17 = vld [vmem:[#allocation2 + $0x110] sm:$0xff] }
 0x33c   : > { %5917 = vst.msk [vmem:[#allocation2 + $0x100] sm:$0x3] %vm1684_vm2, %v14912_v58  ;;  %v12987_v34 = vld [vmem:[#allocation2 + $0x10a] sm:$0xff]  ;;  %v12993_v55 = vld [vmem:[#allocation2 + $0x120] sm:$0xff]  ;;  %v13009_v56 = vld [vmem:[#allocation2 + $0x138] sm:$0xff] }
 0x33d   : > { %5916 = vst.msk [vmem:[#allocation2 + $0xf8] sm:$0xff] %vm1681_vm1, %v14912_v58  ;;  %1768 = vst.msk [vmem:[#allocation2 + $0x181] sm:$0xff] %vm1681_vm1, %v1679_v53  ;;  %v12989_v59 = vld [vmem:[#allocation2 + $0x109] sm:$0xff]  ;;  %v1872_v53 = vpack.c.bf16 %v1855_v46, %v1854_v42  ;;  %v13005_v45 = vld [vmem:[#allocation2 + $0x121] sm:$0xff]  ;;  %10391 = vmatmul.mubr.msk.bf16.gmra.mrb[152].mxu0 %vm1681_vm1, %v1871_v48 }
 0x33e   : > { %1766 = vst.msk [vmem:[#allocation2 + $0x169] sm:$0xff] %vm1681_vm1, %v1677_v35  ;;  %1769 = vst.msk [vmem:[#allocation2 + $0x189] sm:$0xff] %vm1681_vm1, %v1680_v18  ;;  %v12995_v21 = vld [vmem:[#allocation2 + $0x128] sm:$0xff]  ;;  %v12997_v35 = vld [vmem:[#allocation2 + $0x112] sm:$0xff] }
 0x33f   : > { %1767 = vst.msk [vmem:[#allocation2 + $0x171] sm:$0xff] %vm1681_vm1, %v1678_v32  ;;  %14963 = vst [vmem:[#allocation70_spill] sm:$0xff] %v12989_v59  ;;  %v12999_v60 = vld [vmem:[#allocation2 + $0x122] sm:$0xff]  ;;  %v13001_v18 = vld [vmem:[#allocation2 + $0x12a] sm:$0xff]  ;;  %10394 = vmatprep.mubr.msk.bf16.mxu0 %vm1681_vm1, %v1872_v53 }
 0x340   : > { %v13003_v32 = vld [vmem:[#allocation2 + $0x111] sm:$0xff]  ;;  %14965 = vst [vmem:[#allocation72_spill] sm:$0xff] %v13005_v45  ;;  %v13007_v7 = vld [vmem:[#allocation2 + $0x129] sm:$0xff]  ;;  %14967 = vst [vmem:[#allocation74_spill] sm:$0xff] %v13009_v56 }
 0x341   : > { %14964 = vst [vmem:[#allocation71_spill] sm:$0xff] %v13003_v32  ;;  %14966 = vst [vmem:[#allocation73_spill] sm:$0xff] %v13007_v7  ;;  %v13011_v46 = vld [vmem:[#allocation2 + $0x140] sm:$0xff]  ;;  %v13014_v42 = vld [vmem:[#allocation2 + $0x138] sm:$0xff] }
 0x342   : > { %14968 = vst [vmem:[#allocation75_spill] sm:$0xff] %v13011_v46  ;;  %v13018_v40 = vld [vmem:[#allocation2 + $0x150] sm:$0xff]  ;;  %v13020_v33 = vld [vmem:[#allocation2 + $0x158] sm:$0xff]  ;;  %v13031_v48 = vld [vmem:[#allocation2 + $0x122] sm:$0xff] }
 0x343   : > { %14969 = vst [vmem:[#allocation76_spill] sm:$0xff] %v13018_v40  ;;  %14970 = vst [vmem:[#allocation77_spill] sm:$0xff] %v13020_v33  ;;  %v13022_v39 = vld [vmem:[#allocation2 + $0x10a] sm:$0xff]  ;;  %v13027_v5 = vld [vmem:[#allocation2 + $0x112] sm:$0xff] }
 0x344   : > { %14971 = vst [vmem:[#allocation78_spill] sm:$0xff] %v13022_v39  ;;  %14972 = vst [vmem:[#allocation79_spill] sm:$0xff] %v13027_v5  ;;  %v13033_v47 = vld [vmem:[#allocation2 + $0x12a] sm:$0xff]  ;;  %v13035_v38 = vld [vmem:[#allocation2 + $0x13a] sm:$0xff]  ;;  %v1802_v39 = vpack.c.bf16 %v12530_v9, %v12525_v22 }
 0x345   : > { %5918 = vst.msk [vmem:[#allocation2 + $0x108] sm:$0xff] %vm1681_vm1, %v14912_v58  ;;  %14973 = vst [vmem:[#allocation80_spill] sm:$0xff] %v13031_v48  ;;  %v13037_v56 = vld [vmem:[#allocation2 + $0x139] sm:$0xff]  ;;  %v1856_v48 = vld [vmem:[#allocation2 + $0x169] sm:$0xff] }
 0x346   : > { %14974 = vst [vmem:[#allocation81_spill] sm:$0xff] %v13033_v47  ;;  %14975 = vst [vmem:[#allocation82_spill] sm:$0xff] %v13037_v56  ;;  %v13049_v53 = vld [vmem:[#allocation2 + $0x13a] sm:$0xff]  ;;  %v2702_v47 = vld [vmem:[#allocation2 + $0x188] sm:$0xff] }
 0x347   : > { %5920 = vst.msk [vmem:[#allocation2 + $0x118] sm:$0x3] %vm1684_vm2, %v14912_v58  ;;  %5923 = vst.msk [vmem:[#allocation2 + $0x130] sm:$0x3] %vm1684_vm2, %v14912_v58  ;;  %v2701_v10 = vld [vmem:[#allocation2 + $0x180] sm:$0xff]  ;;  %v1857_v5 = vld [vmem:[#allocation2 + $0x171] sm:$0xff] }
 0x348   : > { %5919 = vst.msk [vmem:[#allocation2 + $0x110] sm:$0xff] %vm1681_vm1, %v14912_v58  ;;  %5921 = vst.msk [vmem:[#allocation2 + $0x120] sm:$0xff] %vm1681_vm1, %v14912_v58  ;;  %v13055_v40 = vld [vmem:[#allocation2 + $0x140] sm:$0xff]  ;;  %v13059_v46 = vpack.c.bf16 %v2702_v47, %v2701_v10  ;;  %v1873_v7 = vpack.c.bf16 %v1857_v5, %v1856_v48  ;;  %v13065_v45 = vld [vmem:[#allocation2 + $0x158] sm:$0xff] }
 0x349   : > { %5922 = vst.msk [vmem:[#allocation2 + $0x128] sm:$0xff] %vm1681_vm1, %v14912_v58  ;;  %14976 = vst [vmem:[#allocation83_spill] sm:$0xff] %v13049_v53  ;;  %v13057_v33 = vld [vmem:[#allocation2 + $0x142] sm:$0xff]  ;;  %v13063_v53 = vld [vmem:[#allocation2 + $0x150] sm:$0xff] }
 0x34a   : > { %5924 = vst.msk [vmem:[#allocation2 + $0x138] sm:$0xff] %vm1681_vm1, %v14912_v58  ;;  %14977 = vst [vmem:[#allocation84_spill] sm:$0xff] %v13057_v33  ;;  %v13061_v56 = vld [vmem:[#allocation2 + $0x141] sm:$0xff]  ;;  %v13069_v59 = vld [vmem:[#allocation2 + $0x152] sm:$0xff]  ;;  %10395 = vmatmul.mubr.msk.bf16.gmra.mrb[156].mxu0 %vm1681_vm1, %v1873_v7 }
 0x34b   : > { %14978 = vst [vmem:[#allocation85_spill] sm:$0xff] %v13059_v46  ;;  %14979 = vst [vmem:[#allocation86_spill] sm:$0xff] %v13061_v56  ;;  %v13067_v32 = vld [vmem:[#allocation2 + $0x168] sm:$0xff]  ;;  %v13071_v43 = vld [vmem:[#allocation2 + $0x15a] sm:$0xff]  ;;  %10406 = vmatprep.mubr.msk.bf16.mxu0 %vm1681_vm1, %v1802_v39 }
 0x34c   : > { %14980 = vst [vmem:[#allocation87_spill] sm:$0xff] %v13069_v59  ;;  %14981 = vst [vmem:[#allocation88_spill] sm:$0xff] %v13071_v43  ;;  %v13073_v22 = vld [vmem:[#allocation2 + $0x16a] sm:$0xff]  ;;  %v13077_v33 = vld [vmem:[#allocation2 + $0x159] sm:$0xff] }
 0x34d   : > { %v13075_v9 = vld [vmem:[#allocation2 + $0x151] sm:$0xff]  ;;  %14983 = vst [vmem:[#allocation90_spill] sm:$0xff] %v13077_v33  ;;  %v13079_v47 = vld [vmem:[#allocation2 + $0x169] sm:$0xff]  ;;  %v13085_v48 = vld [vmem:[#allocation2 + $0x181] sm:$0xff] }
 0x34e   : > { %14982 = vst [vmem:[#allocation89_spill] sm:$0xff] %v13075_v9  ;;  %14984 = vst [vmem:[#allocation91_spill] sm:$0xff] %v13079_v47  ;;  %v13081_v10 = vld [vmem:[#allocation2 + $0x170] sm:$0xff]  ;;  %v13087_v56 = vld [vmem:[#allocation2 + $0x182] sm:$0xff] }
 0x34f   : > { %v13083_v5 = vld [vmem:[#allocation2 + $0x172] sm:$0xff]  ;;  %14985 = vst [vmem:[#allocation92_spill] sm:$0xff] %v13085_v48  ;;  %14986 = vst [vmem:[#allocation93_spill] sm:$0xff] %v13087_v56  ;;  %v13089_v46 = vld [vmem:[#allocation2 + $0x168] sm:$0xff] }
 0x350   : > { %14987 = vst [vmem:[#allocation94_spill] sm:$0xff] %v13089_v46  ;;  %v13091_v59 = vld [vmem:[#allocation2 + $0x170] sm:$0xff]  ;;  %v13093_v43 = vld [vmem:[#allocation2 + $0x142] sm:$0xff]  ;;  %v13104_v56 = vld [vmem:[#allocation2 + $0x15a] sm:$0xff] }
 0x351   : > { %14988 = vst [vmem:[#allocation95_spill] sm:$0xff] %v13091_v59  ;;  %14989 = vst [vmem:[#allocation96_spill] sm:$0xff] %v13093_v43  ;;  %v13102_v48 = vld [vmem:[#allocation2 + $0x152] sm:$0xff]  ;;  %v13106_v47 = vld [vmem:[#allocation2 + $0x16a] sm:$0xff] }
 0x352   : > { %5926 = vst.msk [vmem:[#allocation2 + $0x148] sm:$0x3] %vm1684_vm2, %v14912_v58  ;;  %14990 = vst [vmem:[#allocation97_spill] sm:$0xff] %v13102_v48  ;;  %v13109_v43 = vld [vmem:[#allocation2 + $0x171] sm:$0xff]  ;;  %v13121_v33 = vld [vmem:[#allocation2 + $0x182] sm:$0xff] }
 0x353   : > { %5925 = vst.msk [vmem:[#allocation2 + $0x140] sm:$0xff] %vm1681_vm1, %v14912_v58  ;;  %14991 = vst [vmem:[#allocation98_spill] sm:$0xff] %v13104_v56  ;;  %v13117_v7 = vld [vmem:[#allocation2 + $0x172] sm:$0xff]  ;;  %v13125_v39 = vld [vmem:[#allocation2 + $0x18a] sm:$0xff] }
 0x354   : > { %14992 = vst [vmem:[#allocation99_spill] sm:$0xff] %v13106_v47  ;;  %14993 = vst [vmem:[#allocation100_spill] sm:$0xff] %v13109_v43  ;;  %v13123_v47 = vld [vmem:[#allocation2 + $0x189] sm:$0xff]  ;;  %v13205_v43 = vpack.c.bf16 %v12805_v51, %v12803_v36 }
 0x355   : > { %5927 = vst.msk [vmem:[#allocation2 + $0x150] sm:$0xff] %vm1681_vm1, %v14912_v58  ;;  %5928 = vst.msk [vmem:[#allocation2 + $0x158] sm:$0xff] %vm1681_vm1, %v14912_v58  ;;  %v13131_v56 = vld [vmem:[#allocation2 + $0x18a] sm:$0xff] }
 0x356   : > { %5929 = vst.msk [vmem:[#allocation2 + $0x160] sm:$0x3] %vm1684_vm2, %v14912_v58  ;;  %14994 = vst [vmem:[#allocation101_spill] sm:$0xff] %v13117_v7  ;;  %v11794_v7 = vld [vmem:[%s14857_s7 + $0x48] sm:$0xff]  }
 0x357   : > { %5930 = vst.msk [vmem:[#allocation2 + $0x168] sm:$0xff] %vm1681_vm1, %v14912_v58  ;;  %14995 = vst [vmem:[#allocation102_spill] sm:$0xff] %v13121_v33  ;;  %v13141_v33 = vpack.c.bf16 %v12571_v23, %v12559_v61  ;;  %v11803_v61 = vld [vmem:[%s14855_s5 + $0x28] sm:$0xff]   ;;  %v11795_v23 = vld [vmem:[%s14857_s7 + $0x50] sm:$0xff]  }
 0x358   : > { %14996 = vst [vmem:[#allocation103_spill] sm:$0xff] %v13123_v47  ;;  %14997 = vst [vmem:[#allocation104_spill] sm:$0xff] %v13125_v39  ;;  %10756 = vmatprep.subr.bf16.mxu1 %v11803_v61 }
 0x359   : > { %5932 = vst.msk [vmem:[#allocation2 + $0x178] sm:$0x3] %vm1684_vm2, %v14912_v58  ;;  %14998 = vst [vmem:[#allocation105_spill] sm:$0xff] %v13131_v56  ;;  %v13148_v56 = vpack.c.bf16 %v12575_v25, %v12573_v24  ;;  %10407 = vmatmul.mubr.msk.bf16.vlgmr.msra.gmra.mrb[128].mxu0 %vm1681_vm1, %v13141_v33  ;;  %10757 = vmatpush3.bf16.msra.mxu1 %v11803_v61  ;;  %v13163_v24 = vpack.c.bf16 %v12651_v28, %v12642_v27  ;;  %v11796_v25 = vld [vmem:[%s14857_s7 + $0x58] sm:$0xff]   ;;  %v13179_v27 = vld [vmem:[%s14857_s7 + $0x60] sm:$0xff]  }
 0x35a   : > { %5931 = vst.msk [vmem:[#allocation2 + $0x170] sm:$0xff] %vm1681_vm1, %v14912_v58  ;;  %5933 = vst.msk [vmem:[#allocation2 + $0x180] sm:$0xff] %vm1681_vm1, %v14912_v58  ;;  %10439 = vmatpush3.bf16.msra.mxu0 %v12696_v54  ;;  %v13170_v54 = vpack.c.bf16 %v12716_v49, %v12653_v20  ;;  %v13184_v28 = vld [vmem:[%s14854_s4 + $0x2] ss:$0 sm:$0xff]  ;;  %v13188_v20 = vpack.c.bf16 %v12727_v4, %v12725_v62  ;;  %v10724_v49 = vpop.f32.mrb[0].mxu1 }
 0x35b   : > { %5935 = vst.msk [vmem:[#allocation2 + $0x190] sm:$0x3] %vm1684_vm2, %v14912_v58  ;;  %10410 = vmatprep.mubr.msk.bf16.mxu0 %vm1681_vm1, %v13148_v56  ;;  %10440 = vmatprep.subr.bf16.mxu0 %v11794_v7  ;;  %v4866_v61 = vadd.f32 %v10724_v49, %v13184_v28 }
 0x35c   : > { %5934 = vst.msk [vmem:[#allocation2 + $0x188] sm:$0xff] %vm1681_vm1, %v14912_v58  ;;  %14999 = vst [vmem:[#allocation106_spill] sm:$0xff] %v13170_v54 }
 0x35d   : > { %15000 = vst [vmem:[#allocation107_spill] sm:$0xff] %v13188_v20  ;;  %v4986_v62 = vmul.f32 0.1, %v4866_v61 }
 0x35e   : > { %10441 = vmatpush3.bf16.msra.mxu0 %v11794_v7  ;;  %v13193_v7 = vpack.c.bf16 %v12794_v2, %v12729_v57 }
 0x35f   : > { %10442 = vmatprep.subr.bf16.mxu0 %v11795_v23  ;;  %v5018_v2 = vmax.f32 %v4866_v61, %v4986_v62  ;;  %v13223_v62 = vpack.c.bf16 %v12929_v41, %v12871_v29 }
 0x360   : > { %15001 = vst [vmem:[#allocation108_spill] sm:$0xff] %v13193_v7 }
 0x361   : > { %10411 = vmatmul.mubr.msk.bf16.gmra.mrb[132].mxu0 %vm1681_vm1, %v13163_v24 }
 0x362   : > { %10414 = vmatprep.mubr.msk.bf16.mxu0 %vm1681_vm1, %v13170_v54  ;;  %10443 = vmatpush3.bf16.msra.mxu0 %v11795_v23  ;;  %v4857_v23 = vpop.f32.mrb[1].mxu1 }
 0x363   : > { %10444 = vmatprep.subr.bf16.mxu0 %v11796_v25  ;;  %v4858_v48 = vadd.f32 %v13184_v28, %v4857_v23 }
 0x365   : > { %v4984_v46 = vmul.f32 0.1, %v4858_v48 }
 0x366   : > { %10445 = vmatpush3.bf16.msra.mxu0 %v11796_v25  ;;  %v10725_v25 = vpop.f32.mrb[2].mxu1 }
 0x367   : > { %10478 = vmatprep.subr.bf16.mxu0 %v13179_v27  ;;  %v4869_v4 = vadd.f32 %v10725_v25, %v13184_v28  ;;  %v4860_v58 = vpop.f32.mrb[3].mxu1  ;;  %v5016_v49 = vmax.f32 %v4858_v48, %v4984_v46 }
 0x368   : > { %v4861_v57 = vadd.f32 %v13184_v28, %v4860_v58  ;;  %v10728_v9 = vpop.f32.mrb[4].mxu1 }
 0x369   : > { %10415 = vmatmul.mubr.msk.bf16.gmra.mrb[136].mxu0 %vm1681_vm1, %v13188_v20  ;;  %v4987_v59 = vmul.f32 0.1, %v4869_v4  ;;  %v4882_v20 = vadd.f32 %v10728_v9, %v13184_v28  ;;  %v4873_v54 = vpop.f32.mrb[5].mxu1 }
 0x36a   : > { %10418 = vmatprep.mubr.msk.bf16.mxu0 %vm1681_vm1, %v13193_v7  ;;  %v4985_v39 = vmul.f32 0.1, %v4861_v57  ;;  %v13209_v7 = vpack.c.bf16 %v12869_v11, %v12860_v0  ;;  %v10729_v46 = vpop.f32.mrb[6].mxu1 }
 0x36b   : > { %v5019_v47 = vmax.f32 %v4869_v4, %v4987_v59  ;;  %v4874_v59 = vadd.f32 %v13184_v28, %v4873_v54  ;;  %v4990_v36 = vmul.f32 0.1, %v4882_v20  ;;  %v4885_v51 = vadd.f32 %v10729_v46, %v13184_v28  ;;  %v4876_v48 = vpop.f32.mrb[7].mxu1 }
 0x36c   : > { %v5017_v23 = vmax.f32 %v4861_v57, %v4985_v39  ;;  %v4877_v11 = vadd.f32 %v13184_v28, %v4876_v48  ;;  %v10732_v57 = vpop.f32.mrb[8].mxu1 }
 0x36d   : > { %v5049_v25 = vpack.c.bf16 %v5019_v47, %v5018_v2  ;;  %v4988_v0 = vmul.f32 0.1, %v4874_v59  ;;  %v5022_v9 = vmax.f32 %v4882_v20, %v4990_v36  ;;  %v4991_v47 = vmul.f32 0.1, %v4885_v51  ;;  %v4889_v20 = vpop.f32.mrb[9].mxu1 }
 0x36e   : > { %v5048_v58 = vpack.c.bf16 %v5017_v23, %v5016_v49  ;;  %v4989_v61 = vmul.f32 0.1, %v4877_v11  ;;  %v13227_v2 = vpack.c.bf16 %v12936_v6, %v12934_v19  ;;  %v4898_v23 = vadd.f32 %v10732_v57, %v13184_v28  ;;  %v11806_v19 = vld [vmem:[%s14853_s3 + $0x30] sm:$0xff]  }
 0x36f   : > { %v5020_v39 = vmax.f32 %v4874_v59, %v4988_v0  ;;  %v5023_v54 = vmax.f32 %v4885_v51, %v4991_v47  ;;  %v10733_v59 = vpop.f32.mrb[10].mxu1  ;;  %10790 = vmatprep.subr.bf16.mxu1 %v11806_v19  ;;  %v13244_v47 = vpack.c.bf16 %v12991_v17, %v12985_v37 }
 0x370   : > { %10758 = vmatprep.mubr.msk.bf16.mxu1 %vm571_vm0, %v5048_v58  ;;  %v5021_v4 = vmax.f32 %v4877_v11, %v4989_v61  ;;  %v4890_v58 = vadd.f32 %v13184_v28, %v4889_v20  ;;  %v4994_v29 = vmul.f32 0.1, %v4898_v23  ;;  %v4901_v41 = vadd.f32 %v10733_v59, %v13184_v28  ;;  %v4892_v46 = vpop.f32.mrb[11].mxu1 }
 0x371   : > { %10419 = vmatmul.mubr.msk.bf16.gmra.mrb[140].mxu0 %vm1681_vm1, %v13205_v43  ;;  %10759 = vmatmul.mubr.msk.bf16.vlgmr.msra.gmra.mrb[32].mxu1 %vm571_vm0, %v5049_v25  ;;  %v5051_v49 = vpack.c.bf16 %v5023_v54, %v5022_v9  ;;  %v4893_v36 = vadd.f32 %v13184_v28, %v4892_v46  ;;  %v10736_v61 = vpop.f32.mrb[12].mxu1  ;;  %v13248_v54 = vpack.c.bf16 %v12995_v21, %v12993_v55 }
 0x372   : > { %10422 = vmatprep.mubr.msk.bf16.mxu0 %vm1681_vm1, %v13209_v7  ;;  %v5050_v25 = vpack.c.bf16 %v5021_v4, %v5020_v39  ;;  %v4992_v6 = vmul.f32 0.1, %v4890_v58  ;;  %v5026_v51 = vmax.f32 %v4898_v23, %v4994_v29  ;;  %v4995_v48 = vmul.f32 0.1, %v4901_v41  ;;  %10791 = vmatpush3.bf16.msra.mxu1 %v11806_v19  ;;  %v4905_v23 = vpop.f32.mrb[13].mxu1 }
 0x373   : > { %v4993_v11 = vmul.f32 0.1, %v4893_v36  ;;  %v4914_v57 = vadd.f32 %v10736_v61, %v13184_v28  ;;  %v4906_v20 = vadd.f32 %v13184_v28, %v4905_v23 }
 0x374   : > { %10762 = vmatprep.mubr.msk.bf16.mxu1 %vm571_vm0, %v5050_v25  ;;  %v5024_v0 = vmax.f32 %v4890_v58, %v4992_v6  ;;  %v5027_v9 = vmax.f32 %v4901_v41, %v4995_v48  ;;  %v10737_v25 = vpop.f32.mrb[14].mxu1  ;;  %v13262_v6 = vpack.c.bf16 %v13055_v40, %v13014_v42  ;;  %v13266_v48 = vpack.c.bf16 %v13065_v45, %v13063_v53 }
 0x375   : > { %v5025_v39 = vmax.f32 %v4893_v36, %v4993_v11  ;;  %v4998_v37 = vmul.f32 0.1, %v4914_v57  ;;  %v4917_v17 = vadd.f32 %v10737_v25, %v13184_v28  ;;  %v4908_v58 = vpop.f32.mrb[15].mxu1  ;;  %v4996_v55 = vmul.f32 0.1, %v4906_v20 }
 0x376   : > { %v5053_v4 = vpack.c.bf16 %v5027_v9, %v5026_v51  ;;  %v4909_v21 = vadd.f32 %v13184_v28, %v4908_v58  ;;  %v10740_v51 = vpop.f32.mrb[16].mxu1 }
 0x377   : > { %v5030_v59 = vmax.f32 %v4914_v57, %v4998_v37  ;;  %v4999_v29 = vmul.f32 0.1, %v4917_v17  ;;  %v5028_v41 = vmax.f32 %v4906_v20, %v4996_v55  ;;  %v4930_v11 = vadd.f32 %v10740_v51, %v13184_v28  ;;  %v4921_v9 = vpop.f32.mrb[17].mxu1 }
 0x378   : > { %v4997_v46 = vmul.f32 0.1, %v4909_v21  ;;  %v4922_v61 = vadd.f32 %v13184_v28, %v4921_v9 }
 0x379   : > { %10423 = vmatmul.mubr.msk.bf16.gmra.mrb[144].mxu0 %vm1681_vm1, %v13223_v62  ;;  %10763 = vmatmul.mubr.msk.bf16.gmra.mrb[36].mxu1 %vm571_vm0, %v5051_v49  ;;  %v5052_v49 = vpack.c.bf16 %v5025_v39, %v5024_v0  ;;  %v5031_v19 = vmax.f32 %v4917_v17, %v4999_v29  ;;  %v5002_v40 = vmul.f32 0.1, %v4930_v11  ;;  %v13280_v17 = vpack.c.bf16 %v13081_v10, %v13067_v32 }
 0x37a   : > { %10426 = vmatprep.mubr.msk.bf16.mxu0 %vm1681_vm1, %v13227_v2  ;;  %v5029_v36 = vmax.f32 %v4909_v21, %v4997_v46  ;;  %v5000_v45 = vmul.f32 0.1, %v4922_v61 }
 0x37b   : > { %10766 = vmatprep.mubr.msk.bf16.mxu1 %vm571_vm0, %v5052_v49  ;;  %v5055_v0 = vpack.c.bf16 %v5031_v19, %v5030_v59  ;;  %v5034_v23 = vmax.f32 %v4930_v11, %v5002_v40 }
 0x37c   : > { %v5054_v39 = vpack.c.bf16 %v5029_v36, %v5028_v41  ;;  %v5032_v20 = vmax.f32 %v4922_v61, %v5000_v45  ;;  %v15002_v36 = vpack.c.bf16 %v12534_v16, %v12532_v3  ;;  %v13296_v3 = vpack.c.bf16 %v12577_v15, %v12562_v14  ;;  %v11798_v16 = vld [vmem:[%s14857_s7 + $0x68] sm:$0xff]  }
 0x37d   : > { %v13303_v45 = vpack.c.bf16 %v12590_v50, %v12579_v8  ;;  %v11809_v8 = vld [vmem:[%s14853_s3 + $0x38] sm:$0xff]   ;;  %v11799_v50 = vld [vmem:[%s14857_s7 + $0x70] sm:$0xff]  }
 0x37e   : > { %10792 = vmatprep.subr.bf16.mxu1 %v11809_v8 }
 0x37f   : > { %10793 = vmatpush3.bf16.msra.mxu1 %v11809_v8  ;;  %v15005_v8 = vld [vmem:[#allocation46_spill] sm:$0xff] }
 0x381   : > { %10427 = vmatmul.mubr.msk.bf16.gmra.mrb[148].mxu0 %vm1681_vm1, %v13244_v47  ;;  %10767 = vmatmul.mubr.msk.bf16.gmra.mrb[40].mxu1 %vm571_vm0, %v5053_v4  ;;  %v10741_v4 = vpop.f32.mrb[18].mxu1 }
 0x382   : > { %10430 = vmatprep.mubr.msk.bf16.mxu0 %vm1681_vm1, %v13248_v54  ;;  %v4933_v42 = vadd.f32 %v10741_v4, %v13184_v28  ;;  %v4924_v57 = vpop.f32.mrb[19].mxu1  ;;  %10770 = vmatprep.mubr.msk.bf16.mxu1 %vm571_vm0, %v5054_v39 }
 0x383   : > { %v4925_v53 = vadd.f32 %v13184_v28, %v4924_v57  ;;  %v10744_v55 = vpop.f32.mrb[20].mxu1 }
 0x384   : > { %v5003_v49 = vmul.f32 0.1, %v4933_v42  ;;  %v4946_v59 = vadd.f32 %v10744_v55, %v13184_v28  ;;  %v4937_v29 = vpop.f32.mrb[21].mxu1 }
 0x385   : > { %v5001_v25 = vmul.f32 0.1, %v4925_v53  ;;  %v4938_v46 = vadd.f32 %v13184_v28, %v4937_v29  ;;  %v10745_v19 = vpop.f32.mrb[22].mxu1 }
 0x386   : > { %v5035_v37 = vmax.f32 %v4933_v42, %v5003_v49  ;;  %v5006_v32 = vmul.f32 0.1, %v4946_v59  ;;  %v4949_v10 = vadd.f32 %v10745_v19, %v13184_v28  ;;  %v4940_v51 = vpop.f32.mrb[23].mxu1  ;;  %v11801_v19 = vld [vmem:[%s14857_s7 + $0x78] sm:$0xff]  }
 0x387   : > { %v5033_v58 = vmax.f32 %v4925_v53, %v5001_v25  ;;  %v4941_v11 = vadd.f32 %v13184_v28, %v4940_v51  ;;  %v10748_v57 = vpop.f32.mrb[24].mxu1 }
 0x388   : > { %v5057_v21 = vpack.c.bf16 %v5035_v37, %v5034_v23  ;;  %v5038_v9 = vmax.f32 %v4946_v59, %v5006_v32  ;;  %v5007_v39 = vmul.f32 0.1, %v4949_v10  ;;  %v4962_v23 = vadd.f32 %v10748_v57, %v13184_v28  ;;  %v4953_v49 = vpop.f32.mrb[25].mxu1 }
 0x389   : > { %10431 = vmatmul.mubr.msk.bf16.gmra.mrb[152].mxu0 %vm1681_vm1, %v13262_v6  ;;  %10771 = vmatmul.mubr.msk.bf16.gmra.mrb[44].mxu1 %vm571_vm0, %v5055_v0  ;;  %v5056_v41 = vpack.c.bf16 %v5033_v58, %v5032_v20  ;;  %v5004_v0 = vmul.f32 0.1, %v4938_v46  ;;  %v5005_v4 = vmul.f32 0.1, %v4941_v11  ;;  %v4954_v14 = vadd.f32 %v13184_v28, %v4953_v49  ;;  %v10749_v25 = vpop.f32.mrb[26].mxu1 }
 0x38a   : > { %10434 = vmatprep.mubr.msk.bf16.mxu0 %vm1681_vm1, %v13266_v48  ;;  %v5039_v40 = vmax.f32 %v4949_v10, %v5007_v39  ;;  %v5010_v15 = vmul.f32 0.1, %v4962_v23  ;;  %v4965_v58 = vadd.f32 %v10749_v25, %v13184_v28  ;;  %v4956_v55 = vpop.f32.mrb[27].mxu1  ;;  %v13331_v10 = vpack.c.bf16 %v12718_v13, %v12657_v52 }
 0x38b   : > { %10774 = vmatprep.mubr.msk.bf16.mxu1 %vm571_vm0, %v5056_v41  ;;  %v5036_v61 = vmax.f32 %v4938_v46, %v5004_v0  ;;  %v5037_v42 = vmax.f32 %v4941_v11, %v5005_v4  ;;  %v5008_v37 = vmul.f32 0.1, %v4954_v14  ;;  %v13324_v46 = vpack.c.bf16 %v12655_v1, %v12644_v63  ;;  %v10752_v32 = vpop.f32.mrb[28].mxu1  ;;  %v13343_v4 = vld [vmem:[%s14857_s7 + $0x80] sm:$0xff]  }
 0x38c   : > { %v5059_v53 = vpack.c.bf16 %v5039_v40, %v5038_v9  ;;  %v5011_v59 = vmul.f32 0.1, %v4965_v58  ;;  %v4978_v0 = vadd.f32 %v10752_v32, %v13184_v28  ;;  %v4969_v11 = vpop.f32.mrb[29].mxu1  ;;  %v13403_v32 = vpack.c.bf16 %v13001_v18, %v12999_v60  ;;  %v15011_v60 = vld [vmem:[#allocation87_spill] sm:$0xff]  ;;  %v15012_v18 = vld [vmem:[#allocation88_spill] sm:$0xff] }
 0x38d   : > { %v5058_v20 = vpack.c.bf16 %v5037_v42, %v5036_v61  ;;  %v5040_v29 = vmax.f32 %v4954_v14, %v5008_v37  ;;  %v4970_v1 = vadd.f32 %v13184_v28, %v4969_v11  ;;  %v10753_v9 = vpop.f32.mrb[30].mxu1  ;;  %v11864_v37 = vld [vmem:[%s12429_s12 + $0x8] sm:$0xff]   ;;  %v13419_v11 = vpack.c.bf16 %v15012_v18, %v15011_v60  ;;  %v15035_v18 = vld [vmem:[#allocation61_spill] sm:$0xff] }
 0x38e   : > { %v5014_v61 = vmul.f32 0.1, %v4978_v0  ;;  %v4981_v52 = vadd.f32 %v10753_v9, %v13184_v28  ;;  %v4972_v13 = vpop.f32.mrb[31].mxu1  ;;  %v11872_v9 = vld [vmem:[%s12429_s12 + $0x48] sm:$0xff]  }
 0x38f   : > { %v5012_v40 = vmul.f32 0.1, %v4970_v1 }
 0x390   : > { %v5046_v42 = vmax.f32 %v4978_v0, %v5014_v61  ;;  %v5015_v57 = vmul.f32 0.1, %v4981_v52  ;;  %v11869_v0 = vld [vmem:[%s12429_s12 + $0x30] sm:$0xff]   ;;  %v11804_v61 = vld [vmem:[%s14857_s7 + $0x88] sm:$0xff]  }
 0x391   : > { %10435 = vmatmul.mubr.msk.bf16.gmra.mrb[156].mxu0 %vm1681_vm1, %v13280_v17  ;;  %10775 = vmatmul.mubr.msk.bf16.gmra.mrb[48].mxu1 %vm571_vm0, %v5057_v21  ;;  %v5042_v21 = vmax.f32 %v4962_v23, %v5010_v15 }
 0x392   : > { %10446 = vmatprep.mubr.msk.bf16.mxu0 %vm1681_vm1, %v15002_v36  ;;  %10778 = vmatprep.mubr.msk.bf16.mxu1 %vm571_vm0, %v5058_v20  ;;  %v5043_v36 = vmax.f32 %v4965_v58, %v5011_v59  ;;  %v5047_v49 = vmax.f32 %v4981_v52, %v5015_v57  ;;  %v13350_v20 = vpack.c.bf16 %v12733_v26, %v12731_v31  ;;  %v11863_v31 = vld [vmem:[%s12429_s12] sm:$0xff]   ;;  %v15003_v26 = vld [vmem:[#allocation34_spill] sm:$0xff]  ;;  %v11865_v58 = vld [vmem:[%s12429_s12 + $0x10] sm:$0xff]  }
 0x393   : > { %v15009_v59 = vld [vmem:[#allocation59_spill] sm:$0xff]  ;;  %v15018_v57 = vld [vmem:[#allocation85_spill] sm:$0xff] }
 0x394   : > { %v5061_v63 = vpack.c.bf16 %v5043_v36, %v5042_v21  ;;  %v5063_v15 = vpack.c.bf16 %v5047_v49, %v5046_v42  ;;  %v13399_v36 = vpack.c.bf16 %v12997_v35, %v12987_v34  ;;  %v15010_v34 = vld [vmem:[#allocation84_spill] sm:$0xff]  ;;  %v15014_v52 = vld [vmem:[#allocation107_spill] sm:$0xff] }
 0x395   : > { %v13415_v35 = vpack.c.bf16 %v15010_v34, %v13035_v38  ;;  %v13431_v38 = vpack.c.bf16 %v13083_v5, %v13073_v22  ;;  %v11874_v22 = vld [vmem:[%s12429_s12 + $0x58] sm:$0xff]   ;;  %v11875_v5 = vld [vmem:[%s12429_s12 + $0x60] sm:$0xff]  }
 0x396   : > { %v11878_v42 = vld [vmem:[%s12429_s12 + $0x78] sm:$0xff]  }
 0x397   : > { %v15023_v49 = vld [vmem:[#allocation12_spill] sm:$0xff] }
 0x398   : > { %v15034_v34 = vld [vmem:[#allocation60_spill] sm:$0xff] }
 0x399   : > { %10447 = vmatmul.mubr.msk.bf16.vlgmr.msra.gmra.mrb[128].mxu0 %vm1681_vm1, %v13296_v3  ;;  %10779 = vmatmul.mubr.msk.bf16.gmra.mrb[52].mxu1 %vm571_vm0, %v5059_v53  ;;  %v5044_v53 = vmax.f32 %v4970_v1, %v5012_v40  ;;  %v11871_v1 = vld [vmem:[%s12429_s12 + $0x40] sm:$0xff]   ;;  %v11877_v40 = vld [vmem:[%s12429_s12 + $0x70] sm:$0xff]  }
 0x39a   : > { %10479 = vmatpush3.bf16.msra.mxu0 %v13179_v27  ;;  %10450 = vmatprep.mubr.msk.bf16.mxu0 %vm1681_vm1, %v13303_v45  ;;  %v4957_v27 = vadd.f32 %v13184_v28, %v4956_v55  ;;  %v15006_v55 = vld [vmem:[#allocation47_spill] sm:$0xff] }
 0x39b   : > { %10480 = vmatprep.subr.bf16.mxu0 %v11798_v16 }
 0x39c   : > { %v5009_v41 = vmul.f32 0.1, %v4957_v27 }
 0x39e   : > { %10481 = vmatpush3.bf16.msra.mxu0 %v11798_v16  ;;  %v5041_v51 = vmax.f32 %v4957_v27, %v5009_v41  ;;  %v4973_v16 = vadd.f32 %v13184_v28, %v4972_v13  ;;  %v13355_v28 = vpack.c.bf16 %v12796_v44, %v12735_v30  ;;  %v15004_v30 = vld [vmem:[#allocation35_spill] sm:$0xff]  ;;  %v15007_v27 = vld [vmem:[#allocation57_spill] sm:$0xff]  ;;  %v11866_v41 = vld [vmem:[%s12429_s12 + $0x18] sm:$0xff]  }
 0x39f   : > { %10482 = vmatprep.subr.bf16.mxu0 %v11799_v50  ;;  %v13367_v44 = vpack.c.bf16 %v15004_v30, %v15003_v26  ;;  %v13383_v21 = vpack.c.bf16 %v15007_v27, %v15006_v55  ;;  %v11808_v13 = vld [vmem:[%s14857_s7 + $0xa0] sm:$0xff]   ;;  %v15026_v26 = vld [vmem:[#allocation23_spill] sm:$0xff]  ;;  %v15029_v27 = vld [vmem:[#allocation36_spill] sm:$0xff] }
 0x3a0   : > { %v5060_v39 = vpack.c.bf16 %v5041_v51, %v5040_v29  ;;  %v5013_v23 = vmul.f32 0.1, %v4973_v16  ;;  %v11868_v51 = vld [vmem:[%s12429_s12 + $0x28] sm:$0xff]  }
 0x3a1   : > { %10451 = vmatmul.mubr.msk.bf16.gmra.mrb[132].mxu0 %vm1681_vm1, %v13324_v46 }
 0x3a2   : > { %10454 = vmatprep.mubr.msk.bf16.mxu0 %vm1681_vm1, %v13331_v10  ;;  %10483 = vmatpush3.bf16.msra.mxu0 %v11799_v50  ;;  %v5045_v14 = vmax.f32 %v4973_v16, %v5013_v23  ;;  %v13371_v50 = vpack.c.bf16 %v15005_v8, %v12862_v12  ;;  %v15008_v12 = vld [vmem:[#allocation58_spill] sm:$0xff]  ;;  %v15015_v16 = vld [vmem:[#allocation108_spill] sm:$0xff]  ;;  %v11813_v8 = vld [vmem:[%s14857_s7 + $0xc0] sm:$0xff]  }
 0x3a3   : > { %10484 = vmatprep.subr.bf16.mxu0 %v11801_v19  ;;  %10782 = vmatprep.mubr.msk.bf16.mxu1 %vm571_vm0, %v5060_v39  ;;  %v13387_v29 = vpack.c.bf16 %v15009_v59, %v15008_v12  ;;  %v11873_v39 = vld [vmem:[%s12429_s12 + $0x50] sm:$0xff]   ;;  %v15030_v12 = vld [vmem:[#allocation42_spill] sm:$0xff] }
 0x3a4   : > { %10783 = vmatmul.mubr.msk.bf16.gmra.mrb[56].mxu1 %vm571_vm0, %v5061_v63  ;;  %v5062_v25 = vpack.c.bf16 %v5045_v14, %v5044_v53  ;;  %v11870_v63 = vld [vmem:[%s12429_s12 + $0x38] sm:$0xff]   ;;  %v15022_v53 = vld [vmem:[#allocation18_spill] sm:$0xff]  ;;  %v15024_v14 = vld [vmem:[#allocation21_spill] sm:$0xff]  ;;  %v13539_v59 = vpack.c.bf16 %v15030_v12, %v15029_v27 }
 0x3a5   : > { %v11815_v27 = vld [vmem:[%s14857_s7 + $0xd0] sm:$0xff]  }
 0x3a6   : > { %10485 = vmatpush3.bf16.msra.mxu0 %v11801_v19  ;;  %10786 = vmatprep.mubr.msk.bf16.mxu1 %vm571_vm0, %v5062_v25  ;;  %v11867_v19 = vld [vmem:[%s12429_s12 + $0x20] sm:$0xff]   ;;  %v11812_v25 = vld [vmem:[%s14857_s7 + $0xb8] sm:$0xff]  }
 0x3a7   : > { %10518 = vmatprep.subr.bf16.mxu0 %v13343_v4 }
 0x3a9   : > { %10455 = vmatmul.mubr.msk.bf16.gmra.mrb[136].mxu0 %vm1681_vm1, %v13350_v20 }
 0x3aa   : > { %10458 = vmatprep.mubr.msk.bf16.mxu0 %vm1681_vm1, %v13355_v28 }
 0x3ac   : > { %10787 = vmatmul.mubr.msk.bf16.gmra.mrb[60].mxu1 %vm571_vm0, %v5063_v15  ;;  %v13517_v15 = vpack.c.bf16 %v15024_v14, %v15023_v49 }
 0x3ad   : > { %10794 = vmatprep.mubr.msk.bf16.mxu1 %vm571_vm0, %v11863_v31  ;;  %v15025_v31 = vld [vmem:[#allocation22_spill] sm:$0xff] }
 0x3ae   : > { %v13524_v30 = vpack.c.bf16 %v15026_v26, %v15025_v31  ;;  %v11814_v31 = vld [vmem:[%s14857_s7 + $0xc8] sm:$0xff]  }
 0x3b1   : > { %10459 = vmatmul.mubr.msk.bf16.gmra.mrb[140].mxu0 %vm1681_vm1, %v13367_v44 }
 0x3b2   : > { %10462 = vmatprep.mubr.msk.bf16.mxu0 %vm1681_vm1, %v13371_v50 }
 0x3b4   : > { %10795 = vmatmul.mubr.msk.bf16.vlgmr.msra.gmra.mrb[64].mxu1 %vm571_vm0, %v11864_v37  ;;  %v15027_v37 = vld [vmem:[#allocation24_spill] sm:$0xff] }
 0x3b5   : > { %10798 = vmatprep.mubr.msk.bf16.mxu1 %vm571_vm0, %v11865_v58  ;;  %v15028_v58 = vld [vmem:[#allocation33_spill] sm:$0xff] }
 0x3b6   : > { %v13535_v55 = vpack.c.bf16 %v15028_v58, %v15027_v37 }
 0x3b9   : > { %10463 = vmatmul.mubr.msk.bf16.gmra.mrb[144].mxu0 %vm1681_vm1, %v13383_v21 }
 0x3ba   : > { %10466 = vmatprep.mubr.msk.bf16.mxu0 %vm1681_vm1, %v13387_v29 }
 0x3bc   : > { %10799 = vmatmul.mubr.msk.bf16.gmra.mrb[68].mxu1 %vm571_vm0, %v11866_v41  ;;  %v15031_v41 = vld [vmem:[#allocation45_spill] sm:$0xff] }
 0x3bd   : > { %10802 = vmatprep.mubr.msk.bf16.mxu1 %vm571_vm0, %v11867_v19  ;;  %v15032_v19 = vld [vmem:[#allocation48_spill] sm:$0xff] }
 0x3c1   : > { %10467 = vmatmul.mubr.msk.bf16.gmra.mrb[148].mxu0 %vm1681_vm1, %v13399_v36 }
 0x3c2   : > { %10470 = vmatprep.mubr.msk.bf16.mxu0 %vm1681_vm1, %v13403_v32 }
 0x3c4   : > { %10803 = vmatmul.mubr.msk.bf16.gmra.mrb[72].mxu1 %vm571_vm0, %v11868_v51  ;;  %v13547_v51 = vpack.c.bf16 %v15032_v19, %v15031_v41 }
 0x3c5   : > { %10806 = vmatprep.mubr.msk.bf16.mxu1 %vm571_vm0, %v11869_v0  ;;  %v15033_v0 = vld [vmem:[#allocation49_spill] sm:$0xff] }
 0x3c6   : > { %v13551_v60 = vpack.c.bf16 %v15034_v34, %v15033_v0  ;;  %v13656_v0 = vld [vmem:[%s14857_s7 + $0xe0] sm:$0xff]  }
 0x3c9   : > { %10471 = vmatmul.mubr.msk.bf16.gmra.mrb[152].mxu0 %vm1681_vm1, %v13415_v35 }
 0x3ca   : > { %10474 = vmatprep.mubr.msk.bf16.mxu0 %vm1681_vm1, %v13419_v11 }
 0x3cc   : > { %10807 = vmatmul.mubr.msk.bf16.gmra.mrb[76].mxu1 %vm571_vm0, %v11870_v63  ;;  %v15036_v63 = vld [vmem:[#allocation67_spill] sm:$0xff] }
 0x3cd   : > { %10810 = vmatprep.mubr.msk.bf16.mxu1 %vm571_vm0, %v11871_v1  ;;  %v13559_v1 = vpack.c.bf16 %v15036_v63, %v15035_v18 }
 0x3d1   : > { %10475 = vmatmul.mubr.msk.bf16.gmra.mrb[156].mxu0 %vm1681_vm1, %v13431_v38 }
 0x3d2   : > { %10486 = vmatprep.mubr.msk.bf16.mxu0 %vm1681_vm1, %v13141_v33  ;;  %v11805_v33 = vld [vmem:[%s14857_s7 + $0x90] sm:$0xff]  }
 0x3d4   : > { %10811 = vmatmul.mubr.msk.bf16.gmra.mrb[80].mxu1 %vm571_vm0, %v11872_v9  ;;  %v15037_v9 = vld [vmem:[#allocation70_spill] sm:$0xff] }
 0x3d5   : > { %10814 = vmatprep.mubr.msk.bf16.mxu1 %vm571_vm0, %v11873_v39  ;;  %v15038_v39 = vld [vmem:[#allocation71_spill] sm:$0xff] }
 0x3d9   : > { %10487 = vmatmul.mubr.msk.bf16.vlgmr.msra.gmra.mrb[128].mxu0 %vm1681_vm1, %v13148_v56  ;;  %v11807_v56 = vld [vmem:[%s14857_s7 + $0x98] sm:$0xff]  }
 0x3da   : > { %10519 = vmatpush3.bf16.msra.mxu0 %v13343_v4  ;;  %10490 = vmatprep.mubr.msk.bf16.mxu0 %vm1681_vm1, %v13163_v24  ;;  %v15013_v24 = vld [vmem:[#allocation106_spill] sm:$0xff] }
 0x3db   : > { %10520 = vmatprep.subr.bf16.mxu0 %v11804_v61  ;;  %v11876_v4 = vld [vmem:[%s12429_s12 + $0x68] sm:$0xff]  }
 0x3dc   : > { %10815 = vmatmul.mubr.msk.bf16.gmra.mrb[84].mxu1 %vm571_vm0, %v11874_v22  ;;  %v15040_v22 = vld [vmem:[#allocation73_spill] sm:$0xff] }
 0x3dd   : > { %10818 = vmatprep.mubr.msk.bf16.mxu1 %vm571_vm0, %v11875_v5 }
 0x3de   : > { %10521 = vmatpush3.bf16.msra.mxu0 %v11804_v61  ;;  %v13563_v61 = vpack.c.bf16 %v15038_v39, %v15037_v9 }
 0x3df   : > { %10522 = vmatprep.subr.bf16.mxu0 %v11805_v33 }
 0x3e1   : > { %10491 = vmatmul.mubr.msk.bf16.gmra.mrb[132].mxu0 %vm1681_vm1, %v15013_v24  ;;  %v15042_v24 = vld [vmem:[#allocation86_spill] sm:$0xff] }
 0x3e2   : > { %10494 = vmatprep.mubr.msk.bf16.mxu0 %vm1681_vm1, %v15014_v52  ;;  %10523 = vmatpush3.bf16.msra.mxu0 %v11805_v33  ;;  %v15039_v33 = vld [vmem:[#allocation72_spill] sm:$0xff] }
 0x3e3   : > { %10524 = vmatprep.subr.bf16.mxu0 %v11807_v56  ;;  %v13571_v5 = vpack.c.bf16 %v15040_v22, %v15039_v33 }
 0x3e4   : > { %10819 = vmatmul.mubr.msk.bf16.gmra.mrb[88].mxu1 %vm571_vm0, %v11876_v4  ;;  %v15044_v4 = vld [vmem:[#allocation90_spill] sm:$0xff] }
 0x3e5   : > { %10822 = vmatprep.mubr.msk.bf16.mxu1 %vm571_vm0, %v11877_v40 }
 0x3e6   : > { %10525 = vmatpush3.bf16.msra.mxu0 %v11807_v56  ;;  %v15041_v56 = vld [vmem:[#allocation82_spill] sm:$0xff] }
 0x3e7   : > { %10558 = vmatprep.subr.bf16.mxu0 %v11808_v13  ;;  %v13575_v52 = vpack.c.bf16 %v15042_v24, %v15041_v56 }
 0x3e9   : > { %10495 = vmatmul.mubr.msk.bf16.gmra.mrb[136].mxu0 %vm1681_vm1, %v15015_v16 }
 0x3ea   : > { %10498 = vmatprep.mubr.msk.bf16.mxu0 %vm1681_vm1, %v13205_v43  ;;  %v15016_v43 = vld [vmem:[#allocation3_spill] sm:$0xff] }
 0x3ec   : > { %10823 = vmatmul.mubr.msk.bf16.gmra.mrb[92].mxu1 %vm571_vm0, %v11878_v42  ;;  %v15045_v42 = vld [vmem:[#allocation91_spill] sm:$0xff] }
 0x3f1   : > { %10499 = vmatmul.mubr.msk.bf16.gmra.mrb[140].mxu0 %vm1681_vm1, %v13209_v7  ;;  %v15017_v7 = vld [vmem:[#allocation4_spill] sm:$0xff] }
 0x3f2   : > { %10502 = vmatprep.mubr.msk.bf16.mxu0 %vm1681_vm1, %v13223_v62  ;;  %v3025_v62 = vpack.c.bf16 %v15017_v7, %v15016_v43  ;;  %v15046_v43 = vld [vmem:[#allocation100_spill] sm:$0xff] }
 0x3f3   : > { %v13589_v7 = vpack.c.bf16 %v15046_v43, %v15045_v42 }
 0x3f9   : > { %10503 = vmatmul.mubr.msk.bf16.gmra.mrb[144].mxu0 %vm1681_vm1, %v13227_v2  ;;  %v15019_v2 = vld [vmem:[#allocation5_spill] sm:$0xff] }
 0x3fa   : > { %10506 = vmatprep.mubr.msk.bf16.mxu0 %vm1681_vm1, %v13244_v47  ;;  %v15020_v47 = vld [vmem:[#allocation8_spill] sm:$0xff] }
 0x401   : > { %10507 = vmatmul.mubr.msk.bf16.gmra.mrb[148].mxu0 %vm1681_vm1, %v13248_v54  ;;  %v13499_v54 = vpack.c.bf16 %v15020_v47, %v15019_v2 }
 0x402   : > { %10510 = vmatprep.mubr.msk.bf16.mxu0 %vm1681_vm1, %v13262_v6  ;;  %v11810_v6 = vld [vmem:[%s14857_s7 + $0xa8] sm:$0xff]  }
 0x409   : > { %10511 = vmatmul.mubr.msk.bf16.gmra.mrb[152].mxu0 %vm1681_vm1, %v13266_v48  ;;  %v15021_v48 = vld [vmem:[#allocation11_spill] sm:$0xff] }
 0x40a   : > { %10514 = vmatprep.mubr.msk.bf16.mxu0 %vm1681_vm1, %v13280_v17  ;;  %v13506_v23 = vpack.c.bf16 %v15022_v53, %v15021_v48  ;;  %v11811_v17 = vld [vmem:[%s14857_s7 + $0xb0] sm:$0xff]  }
 0x40b   : > { %v15048_v48 = vld [vmem:[#allocation103_spill] sm:$0xff] }
 0x411   : > { %10515 = vmatmul.mubr.msk.bf16.gmra.mrb[156].mxu0 %vm1681_vm1, %v15018_v57 }
 0x412   : > { %10526 = vmatprep.mubr.msk.bf16.mxu0 %vm1681_vm1, %v3025_v62 }
 0x419   : > { %10527 = vmatmul.mubr.msk.bf16.vlgmr.msra.gmra.mrb[128].mxu0 %vm1681_vm1, %v13499_v54 }
 0x41a   : > { %10559 = vmatpush3.bf16.msra.mxu0 %v11808_v13  ;;  %10530 = vmatprep.mubr.msk.bf16.mxu0 %vm1681_vm1, %v13506_v23  ;;  %v15043_v13 = vld [vmem:[#allocation89_spill] sm:$0xff] }
 0x41b   : > { %10560 = vmatprep.subr.bf16.mxu0 %v11810_v6  ;;  %v13583_v40 = vpack.c.bf16 %v15044_v4, %v15043_v13  ;;  %v13713_v13 = vld [vmem:[%s14854_s4 + $0x3] ss:$0 sm:$0xff] }
 0x41e   : > { %10561 = vmatpush3.bf16.msra.mxu0 %v11810_v6  ;;  %v15047_v6 = vld [vmem:[#allocation92_spill] sm:$0xff] }
 0x41f   : > { %10562 = vmatprep.subr.bf16.mxu0 %v11811_v17  ;;  %v13603_v53 = vpack.c.bf16 %v15048_v48, %v15047_v6  ;;  %v13721_v6 = vld [vmem:[#allocation2 + $0x199] sm:$0xff]  ;;  %v13723_v48 = vld [vmem:[#allocation2 + $0x1a1] sm:$0xff] }
 0x421   : > { %10531 = vmatmul.mubr.msk.bf16.gmra.mrb[132].mxu0 %vm1681_vm1, %v13517_v15 }
 0x422   : > { %10534 = vmatprep.mubr.msk.bf16.mxu0 %vm1681_vm1, %v13524_v30  ;;  %10563 = vmatpush3.bf16.msra.mxu0 %v11811_v17 }
 0x423   : > { %10564 = vmatprep.subr.bf16.mxu0 %v11812_v25 }
 0x426   : > { %10565 = vmatpush3.bf16.msra.mxu0 %v11812_v25 }
 0x427   : > { %10598 = vmatprep.subr.bf16.mxu0 %v11813_v8 }
 0x429   : > { %10535 = vmatmul.mubr.msk.bf16.gmra.mrb[136].mxu0 %vm1681_vm1, %v13535_v55 }
 0x42a   : > { %10538 = vmatprep.mubr.msk.bf16.mxu0 %vm1681_vm1, %v13539_v59 }
 0x431   : > { %10539 = vmatmul.mubr.msk.bf16.gmra.mrb[140].mxu0 %vm1681_vm1, %v13547_v51 }
 0x432   : > { %10542 = vmatprep.mubr.msk.bf16.mxu0 %vm1681_vm1, %v13551_v60 }
 0x439   : > { %10543 = vmatmul.mubr.msk.bf16.gmra.mrb[144].mxu0 %vm1681_vm1, %v13559_v1 }
 0x43a   : > { %10546 = vmatprep.mubr.msk.bf16.mxu0 %vm1681_vm1, %v13563_v61 }
 0x441   : > { %10547 = vmatmul.mubr.msk.bf16.gmra.mrb[148].mxu0 %vm1681_vm1, %v13571_v5 }
 0x442   : > { %10550 = vmatprep.mubr.msk.bf16.mxu0 %vm1681_vm1, %v13575_v52 }
 0x444   : > { %v13585_v16 = vpop.f32.mrb[32].mxu1 }
 0x445   : > { %v13591_v62 = vpop.f32.mrb[33].mxu1 }
 0x446   : > { %v13595_v2 = vpop.f32.mrb[34].mxu1 }
 0x447   : > { %v13599_v47 = vpop.f32.mrb[35].mxu1 }
 0x449   : > { %10551 = vmatmul.mubr.msk.bf16.gmra.mrb[152].mxu0 %vm1681_vm1, %v13583_v40 }
 0x44a   : > { %10554 = vmatprep.mubr.msk.bf16.mxu0 %vm1681_vm1, %v13589_v7 }
 0x44c   : > { %v13605_v17 = vpop.f32.mrb[36].mxu1 }
 0x44d   : > { %v13607_v49 = vpop.f32.mrb[37].mxu1 }
 0x44e   : > { %v13611_v14 = vpop.f32.mrb[38].mxu1 }
 0x44f   : > { %v13615_v25 = vpop.f32.mrb[39].mxu1 }
 0x451   : > { %10555 = vmatmul.mubr.msk.bf16.gmra.mrb[156].mxu0 %vm1681_vm1, %v13603_v53 }
 0x452   : > { %10566 = vmatprep.mubr.msk.bf16.mxu0 %vm1681_vm1, %v13296_v3  ;;  %v11822_v3 = vld [vmem:[%s14855_s5 + $0x30] sm:$0xff]  }
 0x453   : > { %10826 = vmatprep.subr.bf16.mxu1 %v11822_v3 }
 0x454   : > { %v13620_v26 = vpop.f32.mrb[40].mxu1  ;;  %10827 = vmatpush3.bf16.msra.mxu1 %v11822_v3 }
 0x455   : > { %v13622_v37 = vpop.f32.mrb[41].mxu1 }
 0x456   : > { %v13628_v58 = vpop.f32.mrb[42].mxu1 }
 0x457   : > { %v13636_v12 = vpop.f32.mrb[43].mxu1 }
 0x459   : > { %10567 = vmatmul.mubr.msk.bf16.vlgmr.msra.gmra.mrb[128].mxu0 %vm1681_vm1, %v13303_v45  ;;  %v11816_v45 = vld [vmem:[%s14857_s7 + $0xd8] sm:$0xff]  }
 0x45a   : > { %10599 = vmatpush3.bf16.msra.mxu0 %v11813_v8  ;;  %10570 = vmatprep.mubr.msk.bf16.mxu0 %vm1681_vm1, %v13324_v46 }
 0x45b   : > { %10600 = vmatprep.subr.bf16.mxu0 %v11814_v31 }
 0x45c   : > { %v13641_v46 = vpop.f32.mrb[44].mxu1 }
 0x45d   : > { %v13643_v8 = vpop.f32.mrb[45].mxu1 }
 0x45e   : > { %10601 = vmatpush3.bf16.msra.mxu0 %v11814_v31  ;;  %v13647_v41 = vpop.f32.mrb[46].mxu1 }
 0x45f   : > { %10602 = vmatprep.subr.bf16.mxu0 %v11815_v27  ;;  %v13651_v19 = vpop.f32.mrb[47].mxu1 }
 0x461   : > { %10571 = vmatmul.mubr.msk.bf16.gmra.mrb[132].mxu0 %vm1681_vm1, %v13331_v10 }
 0x462   : > { %10574 = vmatprep.mubr.msk.bf16.mxu0 %vm1681_vm1, %v13350_v20  ;;  %10603 = vmatpush3.bf16.msra.mxu0 %v11815_v27 }
 0x463   : > { %10604 = vmatprep.subr.bf16.mxu0 %v11816_v45 }
 0x464   : > { %v13659_v34 = vpop.f32.mrb[48].mxu1 }
 0x465   : > { %v13661_v10 = vpop.f32.mrb[49].mxu1 }
 0x466   : > { %10605 = vmatpush3.bf16.msra.mxu0 %v11816_v45  ;;  %v13665_v20 = vpop.f32.mrb[50].mxu1 }
 0x467   : > { %10638 = vmatprep.subr.bf16.mxu0 %v13656_v0  ;;  %v13669_v18 = vpop.f32.mrb[51].mxu1 }
 0x469   : > { %10575 = vmatmul.mubr.msk.bf16.gmra.mrb[136].mxu0 %vm1681_vm1, %v13355_v28 }
 0x46a   : > { %10578 = vmatprep.mubr.msk.bf16.mxu0 %vm1681_vm1, %v13367_v44 }
 0x46c   : > { %v13671_v63 = vpop.f32.mrb[52].mxu1 }
 0x46d   : > { %v13673_v9 = vpop.f32.mrb[53].mxu1 }
 0x46e   : > { %15049 = vst [vmem:[#allocation34_spill] sm:$0xff] %v13673_v9  ;;  %v13677_v39 = vpop.f32.mrb[54].mxu1 }
 0x46f   : > { %15050 = vst [vmem:[#allocation35_spill] sm:$0xff] %v13677_v39  ;;  %v13681_v28 = vpop.f32.mrb[55].mxu1  ;;  %v15063_v39 = vld [vmem:[#allocation6_spill] sm:$0xff] }
 0x470   : > { %15051 = vst [vmem:[#allocation46_spill] sm:$0xff] %v13681_v28 }
 0x471   : > { %10579 = vmatmul.mubr.msk.bf16.gmra.mrb[140].mxu0 %vm1681_vm1, %v13371_v50  ;;  %v11825_v50 = vld [vmem:[%s14855_s5 + $0x38] sm:$0xff]  }
 0x472   : > { %10582 = vmatprep.mubr.msk.bf16.mxu0 %vm1681_vm1, %v13383_v21  ;;  %10828 = vmatprep.subr.bf16.mxu1 %v11825_v50 }
 0x473   : > { %10829 = vmatpush3.bf16.msra.mxu1 %v11825_v50 }
 0x477   : > { %v13683_v33 = vpop.f32.mrb[56].mxu1 }
 0x478   : > { %15052 = vst [vmem:[#allocation47_spill] sm:$0xff] %v13683_v33  ;;  %v13687_v44 = vpop.f32.mrb[57].mxu1 }
 0x479   : > { %10583 = vmatmul.mubr.msk.bf16.gmra.mrb[144].mxu0 %vm1681_vm1, %v13387_v29  ;;  %15053 = vst [vmem:[#allocation57_spill] sm:$0xff] %v13687_v44  ;;  %v13691_v22 = vpop.f32.mrb[58].mxu1 }
 0x47a   : > { %10586 = vmatprep.mubr.msk.bf16.mxu0 %vm1681_vm1, %v13399_v36  ;;  %15054 = vst [vmem:[#allocation58_spill] sm:$0xff] %v13691_v22  ;;  %v13696_v56 = vpop.f32.mrb[59].mxu1 }
 0x47b   : > { %15055 = vst [vmem:[#allocation59_spill] sm:$0xff] %v13696_v56 }
 0x47f   : > { %v13698_v21 = vpop.f32.mrb[60].mxu1 }
 0x480   : > { %15056 = vst [vmem:[#allocation84_spill] sm:$0xff] %v13698_v21  ;;  %v13702_v29 = vpop.f32.mrb[61].mxu1 }
 0x481   : > { %10587 = vmatmul.mubr.msk.bf16.gmra.mrb[148].mxu0 %vm1681_vm1, %v13403_v32  ;;  %15057 = vst [vmem:[#allocation87_spill] sm:$0xff] %v13702_v29  ;;  %v13706_v36 = vpop.f32.mrb[62].mxu1  ;;  %v15061_v29 = vld [vmem:[#allocation104_spill] sm:$0xff] }
 0x482   : > { %10590 = vmatprep.mubr.msk.bf16.mxu0 %vm1681_vm1, %v13415_v35  ;;  %15058 = vst [vmem:[#allocation88_spill] sm:$0xff] %v13706_v36  ;;  %v13708_v24 = vpop.f32.mrb[63].mxu1 }
 0x483   : > { %15059 = vst [vmem:[#allocation106_spill] sm:$0xff] %v13708_v24 }
 0x487   : > { %v10796_v4 = vpop.f32.mrb[64].mxu1 }
 0x488   : > { %v5424_v32 = vadd.f32 %v10796_v4, %v13713_v13  ;;  %v5415_v42 = vpop.f32.mrb[65].mxu1 }
 0x489   : > { %10591 = vmatmul.mubr.msk.bf16.gmra.mrb[152].mxu0 %vm1681_vm1, %v13419_v11  ;;  %v5416_v35 = vadd.f32 %v13713_v13, %v5415_v42  ;;  %v10797_v43 = vpop.f32.mrb[66].mxu1  ;;  %v15060_v42 = vld [vmem:[#allocation93_spill] sm:$0xff]  ;;  %v15062_v11 = vld [vmem:[#allocation7_spill] sm:$0xff] }
 0x48a   : > { %10594 = vmatprep.mubr.msk.bf16.mxu0 %vm1681_vm1, %v13431_v38  ;;  %v5544_v31 = vmul.f32 0.1, %v5424_v32  ;;  %v5427_v3 = vadd.f32 %v10797_v43, %v13713_v13  ;;  %v5418_v27 = vpop.f32.mrb[67].mxu1  ;;  %v3362_v21 = vpack.c.bf16 %v15061_v29, %v15060_v42  ;;  %v15064_v9 = vpack.c.bf16 %v15062_v11, %v15063_v39 }
 0x48b   : > { %v5542_v45 = vmul.f32 0.1, %v5416_v35  ;;  %v5419_v50 = vadd.f32 %v13713_v13, %v5418_v27 }
 0x48c   : > { %v5576_v4 = vmax.f32 %v5424_v32, %v5544_v31  ;;  %v5545_v24 = vmul.f32 0.1, %v5427_v3 }
 0x48d   : > { %v5574_v38 = vmax.f32 %v5416_v35, %v5542_v45  ;;  %v5543_v36 = vmul.f32 0.1, %v5419_v50  ;;  %v15065_v45 = vld [vmem:[#allocation14_spill] sm:$0xff] }
 0x48e   : > { %v5577_v56 = vmax.f32 %v5427_v3, %v5545_v24 }
 0x48f   : > { %v5575_v22 = vmax.f32 %v5419_v50, %v5543_v36  ;;  %v10800_v44 = vpop.f32.mrb[68].mxu1  ;;  %v15066_v50 = vld [vmem:[#allocation13_spill] sm:$0xff] }
 0x490   : > { %v5607_v43 = vpack.c.bf16 %v5577_v56, %v5576_v4  ;;  %v5440_v33 = vadd.f32 %v10800_v44, %v13713_v13  ;;  %v5431_v28 = vpop.f32.mrb[69].mxu1  ;;  %v15067_v4 = vpack.c.bf16 %v15065_v45, %v15066_v50 }
 0x491   : > { %10595 = vmatmul.mubr.msk.bf16.gmra.mrb[156].mxu0 %vm1681_vm1, %v3362_v21  ;;  %v5606_v32 = vpack.c.bf16 %v5575_v22, %v5574_v38  ;;  %v5432_v35 = vadd.f32 %v13713_v13, %v5431_v28  ;;  %v10801_v31 = vpop.f32.mrb[70].mxu1 }
 0x492   : > { %10606 = vmatprep.mubr.msk.bf16.mxu0 %vm1681_vm1, %v15064_v9  ;;  %v5548_v27 = vmul.f32 0.1, %v5440_v33  ;;  %v5443_v29 = vadd.f32 %v10801_v31, %v13713_v13  ;;  %v5434_v36 = vpop.f32.mrb[71].mxu1  ;;  %v11818_v9 = vld [vmem:[%s14857_s7 + $0xe8] sm:$0xff]  }
 0x493   : > { %v5546_v24 = vmul.f32 0.1, %v5432_v35  ;;  %v5435_v21 = vadd.f32 %v13713_v13, %v5434_v36  ;;  %10830 = vmatprep.mubr.msk.bf16.mxu1 %vm571_vm0, %v5606_v32  ;;  %v15069_v32 = vld [vmem:[#allocation15_spill] sm:$0xff] }
 0x494   : > { %v5580_v44 = vmax.f32 %v5440_v33, %v5548_v27  ;;  %v5549_v56 = vmul.f32 0.1, %v5443_v29  ;;  %10831 = vmatmul.mubr.msk.bf16.vlgmr.msra.gmra.mrb[96].mxu1 %vm571_vm0, %v5607_v43  ;;  %v15068_v43 = vld [vmem:[#allocation16_spill] sm:$0xff]  ;;  %v11819_v36 = vld [vmem:[%s14857_s7 + $0xf0] sm:$0xff]  }
 0x495   : > { %v5578_v39 = vmax.f32 %v5432_v35, %v5546_v24  ;;  %v5547_v3 = vmul.f32 0.1, %v5435_v21  ;;  %v15070_v35 = vpack.c.bf16 %v15068_v43, %v15069_v32  ;;  %v15072_v43 = vld [vmem:[#allocation25_spill] sm:$0xff] }
 0x496   : > { %v5581_v28 = vmax.f32 %v5443_v29, %v5549_v56 }
 0x497   : > { %v5579_v22 = vmax.f32 %v5435_v21, %v5547_v3  ;;  %v10804_v11 = vpop.f32.mrb[72].mxu1 }
 0x498   : > { %v5609_v38 = vpack.c.bf16 %v5581_v28, %v5580_v44  ;;  %v5456_v33 = vadd.f32 %v10804_v11, %v13713_v13  ;;  %v5447_v42 = vpop.f32.mrb[73].mxu1  ;;  %v11820_v11 = vld [vmem:[%s14857_s7 + $0xf8] sm:$0xff]  }
 0x499   : > { %10607 = vmatmul.mubr.msk.bf16.vlgmr.msra.gmra.mrb[128].mxu0 %vm1681_vm1, %v15067_v4  ;;  %v5608_v31 = vpack.c.bf16 %v5579_v22, %v5578_v39  ;;  %v5448_v27 = vadd.f32 %v13713_v13, %v5447_v42  ;;  %v10805_v29 = vpop.f32.mrb[74].mxu1  ;;  %v15071_v42 = vld [vmem:[#allocation26_spill] sm:$0xff] }
 0x49a   : > { %10639 = vmatpush3.bf16.msra.mxu0 %v13656_v0  ;;  %10610 = vmatprep.mubr.msk.bf16.mxu0 %vm1681_vm1, %v15070_v35  ;;  %v5552_v24 = vmul.f32 0.1, %v5456_v33  ;;  %v5459_v21 = vadd.f32 %v10805_v29, %v13713_v13  ;;  %v5450_v44 = vpop.f32.mrb[75].mxu1  ;;  %v15073_v32 = vpack.c.bf16 %v15071_v42, %v15072_v43 }
 0x49b   : > { %10640 = vmatprep.subr.bf16.mxu0 %v11818_v9  ;;  %v5550_v56 = vmul.f32 0.1, %v5448_v27  ;;  %v5451_v0 = vadd.f32 %v13713_v13, %v5450_v44  ;;  %10834 = vmatprep.mubr.msk.bf16.mxu1 %vm571_vm0, %v5608_v31  ;;  %v15075_v31 = vld [vmem:[#allocation27_spill] sm:$0xff]  ;;  %v13779_v44 = vld [vmem:[%s14857_s7 + $0x100] sm:$0xff]  }
 0x49c   : > { %v5584_v3 = vmax.f32 %v5456_v33, %v5552_v24  ;;  %v5553_v28 = vmul.f32 0.1, %v5459_v21  ;;  %10835 = vmatmul.mubr.msk.bf16.gmra.mrb[100].mxu1 %vm571_vm0, %v5609_v38 }
 0x49d   : > { %v5582_v39 = vmax.f32 %v5448_v27, %v5550_v56  ;;  %v5551_v22 = vmul.f32 0.1, %v5451_v0 }
 0x49e   : > { %10641 = vmatpush3.bf16.msra.mxu0 %v11818_v9  ;;  %v5585_v45 = vmax.f32 %v5459_v21, %v5553_v28  ;;  %v15074_v9 = vld [vmem:[#allocation28_spill] sm:$0xff] }
 0x49f   : > { %10642 = vmatprep.subr.bf16.mxu0 %v11819_v36  ;;  %v5583_v50 = vmax.f32 %v5451_v0, %v5551_v22  ;;  %v10808_v4 = vpop.f32.mrb[76].mxu1  ;;  %v15076_v27 = vpack.c.bf16 %v15074_v9, %v15075_v31 }
 0x4a0   : > { %v5611_v33 = vpack.c.bf16 %v5585_v45, %v5584_v3  ;;  %v5472_v35 = vadd.f32 %v10808_v4, %v13713_v13  ;;  %v5463_v38 = vpop.f32.mrb[77].mxu1 }
 0x4a1   : > { %10611 = vmatmul.mubr.msk.bf16.gmra.mrb[132].mxu0 %vm1681_vm1, %v15073_v32  ;;  %v5610_v29 = vpack.c.bf16 %v5583_v50, %v5582_v39  ;;  %v5464_v24 = vadd.f32 %v13713_v13, %v5463_v38  ;;  %v10809_v21 = vpop.f32.mrb[78].mxu1  ;;  %v15077_v32 = vld [vmem:[#allocation38_spill] sm:$0xff]  ;;  %v15078_v38 = vld [vmem:[#allocation37_spill] sm:$0xff] }
 0x4a2   : > { %10614 = vmatprep.mubr.msk.bf16.mxu0 %vm1681_vm1, %v15076_v27  ;;  %10643 = vmatpush3.bf16.msra.mxu0 %v11819_v36  ;;  %v5556_v56 = vmul.f32 0.1, %v5472_v35  ;;  %v5475_v0 = vadd.f32 %v10809_v21, %v13713_v13  ;;  %v5466_v3 = vpop.f32.mrb[79].mxu1  ;;  %v15079_v9 = vpack.c.bf16 %v15077_v32, %v15078_v38  ;;  %v15081_v21 = vld [vmem:[#allocation39_spill] sm:$0xff] }
 0x4a3   : > { %10644 = vmatprep.subr.bf16.mxu0 %v11820_v11  ;;  %v5554_v28 = vmul.f32 0.1, %v5464_v24  ;;  %v5467_v22 = vadd.f32 %v13713_v13, %v5466_v3  ;;  %10838 = vmatprep.mubr.msk.bf16.mxu1 %vm571_vm0, %v5610_v29  ;;  %v15080_v29 = vld [vmem:[#allocation40_spill] sm:$0xff]  ;;  %v15083_v38 = vld [vmem:[#allocation51_spill] sm:$0xff] }
 0x4a4   : > { %v5588_v36 = vmax.f32 %v5472_v35, %v5556_v56  ;;  %v5557_v39 = vmul.f32 0.1, %v5475_v0  ;;  %10839 = vmatmul.mubr.msk.bf16.gmra.mrb[104].mxu1 %vm571_vm0, %v5611_v33  ;;  %v15082_v33 = vpack.c.bf16 %v15080_v29, %v15081_v21 }
 0x4a5   : > { %v5586_v45 = vmax.f32 %v5464_v24, %v5554_v28  ;;  %v5555_v50 = vmul.f32 0.1, %v5467_v22 }
 0x4a6   : > { %10645 = vmatpush3.bf16.msra.mxu0 %v11820_v11  ;;  %v5589_v4 = vmax.f32 %v5475_v0, %v5557_v39 }
 0x4a7   : > { %10678 = vmatprep.subr.bf16.mxu0 %v13779_v44  ;;  %v5587_v42 = vmax.f32 %v5467_v22, %v5555_v50  ;;  %v10812_v43 = vpop.f32.mrb[80].mxu1 }
 0x4a8   : > { %v5613_v31 = vpack.c.bf16 %v5589_v4, %v5588_v36  ;;  %v5488_v27 = vadd.f32 %v10812_v43, %v13713_v13  ;;  %v5479_v35 = vpop.f32.mrb[81].mxu1 }
 0x4a9   : > { %10615 = vmatmul.mubr.msk.bf16.gmra.mrb[136].mxu0 %vm1681_vm1, %v15079_v9  ;;  %v5612_v11 = vpack.c.bf16 %v5587_v42, %v5586_v45  ;;  %v5480_v24 = vadd.f32 %v13713_v13, %v5479_v35  ;;  %v10813_v56 = vpop.f32.mrb[82].mxu1  ;;  %v15084_v9 = vld [vmem:[#allocation50_spill] sm:$0xff] }
 0x4aa   : > { %10618 = vmatprep.mubr.msk.bf16.mxu0 %vm1681_vm1, %v15082_v33  ;;  %v5560_v0 = vmul.f32 0.1, %v5488_v27  ;;  %v5491_v3 = vadd.f32 %v10813_v56, %v13713_v13  ;;  %v5482_v28 = vpop.f32.mrb[83].mxu1  ;;  %v15085_v35 = vpack.c.bf16 %v15083_v38, %v15084_v9  ;;  %v15086_v56 = vld [vmem:[#allocation53_spill] sm:$0xff]  ;;  %v15089_v9 = vld [vmem:[#allocation63_spill] sm:$0xff] }
 0x4ab   : > { %v5558_v22 = vmul.f32 0.1, %v5480_v24  ;;  %v5483_v39 = vadd.f32 %v13713_v13, %v5482_v28  ;;  %10842 = vmatprep.mubr.msk.bf16.mxu1 %vm571_vm0, %v5612_v11  ;;  %v15087_v11 = vld [vmem:[#allocation52_spill] sm:$0xff] }
 0x4ac   : > { %v5592_v36 = vmax.f32 %v5488_v27, %v5560_v0  ;;  %v5561_v50 = vmul.f32 0.1, %v5491_v3  ;;  %10843 = vmatmul.mubr.msk.bf16.gmra.mrb[108].mxu1 %vm571_vm0, %v5613_v31  ;;  %v15088_v27 = vpack.c.bf16 %v15086_v56, %v15087_v11 }
 0x4ad   : > { %v5590_v4 = vmax.f32 %v5480_v24, %v5558_v22  ;;  %v5559_v43 = vmul.f32 0.1, %v5483_v39 }
 0x4ae   : > { %v5593_v32 = vmax.f32 %v5491_v3, %v5561_v50 }
 0x4af   : > { %v5591_v45 = vmax.f32 %v5483_v39, %v5559_v43  ;;  %v10816_v42 = vpop.f32.mrb[84].mxu1 }
 0x4b0   : > { %v5615_v29 = vpack.c.bf16 %v5593_v32, %v5592_v36  ;;  %v5504_v21 = vadd.f32 %v10816_v42, %v13713_v13  ;;  %v5495_v33 = vpop.f32.mrb[85].mxu1 }
 0x4b1   : > { %10619 = vmatmul.mubr.msk.bf16.gmra.mrb[140].mxu0 %vm1681_vm1, %v15085_v35  ;;  %v5614_v31 = vpack.c.bf16 %v5591_v45, %v5590_v4  ;;  %v5496_v24 = vadd.f32 %v13713_v13, %v5495_v33  ;;  %v10817_v0 = vpop.f32.mrb[86].mxu1  ;;  %v15090_v35 = vld [vmem:[#allocation62_spill] sm:$0xff] }
 0x4b2   : > { %10622 = vmatprep.mubr.msk.bf16.mxu0 %vm1681_vm1, %v15088_v27  ;;  %v5564_v3 = vmul.f32 0.1, %v5504_v21  ;;  %v5507_v28 = vadd.f32 %v10817_v0, %v13713_v13  ;;  %v5498_v22 = vpop.f32.mrb[87].mxu1  ;;  %v15091_v33 = vpack.c.bf16 %v15089_v9, %v15090_v35  ;;  %v15092_v0 = vld [vmem:[#allocation65_spill] sm:$0xff]  ;;  %v15095_v35 = vld [vmem:[#allocation75_spill] sm:$0xff] }
 0x4b3   : > { %v5562_v39 = vmul.f32 0.1, %v5496_v24  ;;  %v5499_v50 = vadd.f32 %v13713_v13, %v5498_v22  ;;  %10846 = vmatprep.mubr.msk.bf16.mxu1 %vm571_vm0, %v5614_v31  ;;  %v15093_v31 = vld [vmem:[#allocation64_spill] sm:$0xff] }
 0x4b4   : > { %v5596_v36 = vmax.f32 %v5504_v21, %v5564_v3  ;;  %v5565_v43 = vmul.f32 0.1, %v5507_v28  ;;  %10847 = vmatmul.mubr.msk.bf16.gmra.mrb[112].mxu1 %vm571_vm0, %v5615_v29  ;;  %v15094_v21 = vpack.c.bf16 %v15092_v0, %v15093_v31 }
 0x4b5   : > { %v5594_v32 = vmax.f32 %v5496_v24, %v5562_v39  ;;  %v5563_v42 = vmul.f32 0.1, %v5499_v50 }
 0x4b6   : > { %v5597_v38 = vmax.f32 %v5507_v28, %v5565_v43 }
 0x4b7   : > { %v5595_v4 = vmax.f32 %v5499_v50, %v5563_v42  ;;  %v10820_v45 = vpop.f32.mrb[88].mxu1 }
 0x4b8   : > { %v5617_v56 = vpack.c.bf16 %v5597_v38, %v5596_v36  ;;  %v5520_v11 = vadd.f32 %v10820_v45, %v13713_v13  ;;  %v5511_v27 = vpop.f32.mrb[89].mxu1 }
 0x4b9   : > { %10623 = vmatmul.mubr.msk.bf16.gmra.mrb[144].mxu0 %vm1681_vm1, %v15091_v33  ;;  %v5616_v29 = vpack.c.bf16 %v5595_v4, %v5594_v32  ;;  %v5512_v24 = vadd.f32 %v13713_v13, %v5511_v27  ;;  %v10821_v3 = vpop.f32.mrb[90].mxu1  ;;  %v15096_v33 = vld [vmem:[#allocation74_spill] sm:$0xff] }
 0x4ba   : > { %10626 = vmatprep.mubr.msk.bf16.mxu0 %vm1681_vm1, %v15094_v21  ;;  %v5568_v28 = vmul.f32 0.1, %v5520_v11  ;;  %v5523_v22 = vadd.f32 %v10821_v3, %v13713_v13  ;;  %v5514_v39 = vpop.f32.mrb[91].mxu1  ;;  %v15097_v27 = vpack.c.bf16 %v15095_v35, %v15096_v33  ;;  %v15098_v3 = vld [vmem:[#allocation77_spill] sm:$0xff]  ;;  %v15102_v33 = vld [vmem:[#allocation94_spill] sm:$0xff] }
 0x4bb   : > { %v5566_v50 = vmul.f32 0.1, %v5512_v24  ;;  %v5515_v43 = vadd.f32 %v13713_v13, %v5514_v39  ;;  %10850 = vmatprep.mubr.msk.bf16.mxu1 %vm571_vm0, %v5616_v29  ;;  %v15099_v29 = vld [vmem:[#allocation76_spill] sm:$0xff] }
 0x4bc   : > { %v5600_v36 = vmax.f32 %v5520_v11, %v5568_v28  ;;  %v5569_v42 = vmul.f32 0.1, %v5523_v22  ;;  %10851 = vmatmul.mubr.msk.bf16.gmra.mrb[116].mxu1 %vm571_vm0, %v5617_v56  ;;  %v15100_v11 = vpack.c.bf16 %v15098_v3, %v15099_v29 }
 0x4bd   : > { %v5598_v38 = vmax.f32 %v5512_v24, %v5566_v50  ;;  %v5567_v45 = vmul.f32 0.1, %v5515_v43 }
 0x4be   : > { %v5601_v9 = vmax.f32 %v5523_v22, %v5569_v42 }
 0x4bf   : > { %v5599_v32 = vmax.f32 %v5515_v43, %v5567_v45  ;;  %v10824_v4 = vpop.f32.mrb[92].mxu1 }
 0x4c0   : > { %v5619_v0 = vpack.c.bf16 %v5601_v9, %v5600_v36  ;;  %v5536_v31 = vadd.f32 %v10824_v4, %v13713_v13  ;;  %v5527_v21 = vpop.f32.mrb[93].mxu1 }
 0x4c1   : > { %10627 = vmatmul.mubr.msk.bf16.gmra.mrb[148].mxu0 %vm1681_vm1, %v15097_v27  ;;  %v5618_v56 = vpack.c.bf16 %v5599_v32, %v5598_v38  ;;  %v5528_v24 = vadd.f32 %v13713_v13, %v5527_v21  ;;  %v10825_v28 = vpop.f32.mrb[94].mxu1  ;;  %v15101_v32 = vld [vmem:[#allocation95_spill] sm:$0xff]  ;;  %v3668_v21 = vld [vmem:[#allocation2 + $0x198] sm:$0xff] }
 0x4c2   : > { %10630 = vmatprep.mubr.msk.bf16.mxu0 %vm1681_vm1, %v15100_v11  ;;  %v5572_v22 = vmul.f32 0.1, %v5536_v31  ;;  %v5539_v39 = vadd.f32 %v10825_v28, %v13713_v13  ;;  %v5530_v50 = vpop.f32.mrb[95].mxu1  ;;  %v15103_v27 = vpack.c.bf16 %v15101_v32, %v15102_v33  ;;  %v13850_v11 = vld [vmem:[#allocation2 + $0x1a2] sm:$0xff]  ;;  %v15122_v32 = vld [vmem:[#allocation68_spill] sm:$0xff] }
 0x4c3   : > { %v5570_v43 = vmul.f32 0.1, %v5528_v24  ;;  %v5531_v42 = vadd.f32 %v13713_v13, %v5530_v50  ;;  %10854 = vmatprep.mubr.msk.bf16.mxu1 %vm571_vm0, %v5618_v56  ;;  %v3669_v13 = vld [vmem:[#allocation2 + $0x1a0] sm:$0xff]  ;;  %v15104_v56 = vmov 0.0   ;;  %v11828_v28 = vld [vmem:[%s14857_s7 + $0x148] sm:$0xff]   ;;  %v11826_v50 = vld [vmem:[%s14857_s7 + $0x118] sm:$0xff]  }
 0x4c4   : > { %v5604_v36 = vmax.f32 %v5536_v31, %v5572_v22  ;;  %v5573_v45 = vmul.f32 0.1, %v5539_v39  ;;  %10855 = vmatmul.mubr.msk.bf16.gmra.mrb[120].mxu1 %vm571_vm0, %v5619_v0  ;;  %v13848_v31 = vld [vmem:[#allocation2 + $0x19a] sm:$0xff]  ;;  %5938 = vst.msk [vmem:[#allocation2 + $0x1a8] sm:$0x3] %vm1684_vm2, %v15104_v56  ;;  %v11829_v22 = vld [vmem:[%s14857_s7 + $0x150] sm:$0xff]  }
 0x4c5   : > { %v5602_v9 = vmax.f32 %v5528_v24, %v5570_v43  ;;  %v5571_v4 = vmul.f32 0.1, %v5531_v42  ;;  %v4329_v0 = vpack.c.bf16 %v13850_v11, %v13848_v31  ;;  %5936 = vst.msk [vmem:[#allocation2 + $0x198] sm:$0xff] %vm1681_vm1, %v15104_v56  ;;  %5937 = vst.msk [vmem:[#allocation2 + $0x1a0] sm:$0xff] %vm1681_vm1, %v15104_v56  ;;  %v11827_v24 = vld [vmem:[%s14857_s7 + $0x140] sm:$0xff]   ;;  %v15117_v43 = vld [vmem:[#allocation44_spill] sm:$0xff] }
 0x4c6   : > { %v5605_v35 = vmax.f32 %v5539_v39, %v5573_v45  ;;  %10862 = vmatprep.subr.bf16.mxu1 %v11827_v24  ;;  %v11823_v39 = vld [vmem:[%s14857_s7 + $0x108] sm:$0xff]   ;;  %v15119_v45 = vld [vmem:[#allocation55_spill] sm:$0xff]  ;;  %v15123_v33 = vld [vmem:[#allocation69_spill] sm:$0xff] }
 0x4c7   : > { %v5603_v38 = vmax.f32 %v5531_v42, %v5571_v4  ;;  %10863 = vmatpush3.bf16.msra.mxu1 %v11827_v24  ;;  %v15120_v4 = vld [vmem:[#allocation56_spill] sm:$0xff]  ;;  %v15127_v56 = vld [vmem:[#allocation81_spill] sm:$0xff]  ;;  %v15128_v24 = vld [vmem:[#allocation83_spill] sm:$0xff] }
 0x4c8   : > { %v5621_v3 = vpack.c.bf16 %v5605_v35, %v5604_v36  ;;  %10864 = vmatprep.subr.bf16.mxu1 %v11828_v28  ;;  %v15118_v36 = vld [vmem:[#allocation54_spill] sm:$0xff] }
 0x4c9   : > { %10631 = vmatmul.mubr.msk.bf16.gmra.mrb[152].mxu0 %vm1681_vm1, %v15103_v27  ;;  %v5620_v29 = vpack.c.bf16 %v5603_v38, %v5602_v9  ;;  %v4320_v9 = vpack.c.bf16 %v15119_v45, %v15118_v36  ;;  %v15121_v35 = vld [vmem:[#allocation66_spill] sm:$0xff]  ;;  %v4322_v27 = vpack.c.bf16 %v15123_v33, %v15122_v32  ;;  %v13997_v36 = vld [vmem:[%s14857_s7 + $0x120] sm:$0xff]  }
 0x4ca   : > { %10634 = vmatprep.mubr.msk.bf16.mxu0 %vm1681_vm1, %v15018_v57  ;;  %v3685_v57 = vpack.c.bf16 %v3669_v13, %v3668_v21  ;;  %v4321_v38 = vpack.c.bf16 %v15121_v35, %v15120_v4  ;;  %v15124_v21 = vld [vmem:[#allocation78_spill] sm:$0xff] }
 0x4cb   : > { %10858 = vmatprep.mubr.msk.bf16.mxu1 %vm571_vm0, %v5620_v29  ;;  %10865 = vmatpush3.bf16.msra.mxu1 %v11828_v28  ;;  %v15126_v29 = vld [vmem:[#allocation80_spill] sm:$0xff] }
 0x4cc   : > { %10859 = vmatmul.mubr.msk.bf16.gmra.mrb[124].mxu1 %vm571_vm0, %v5621_v3  ;;  %10866 = vmatprep.subr.bf16.mxu1 %v11829_v22  ;;  %v15125_v3 = vld [vmem:[#allocation79_spill] sm:$0xff]  ;;  %v15129_v28 = vld [vmem:[#allocation96_spill] sm:$0xff] }
 0x4cd   : > { %v4323_v13 = vpack.c.bf16 %v15125_v3, %v15124_v21 }
 0x4cf   : > { %10867 = vmatpush3.bf16.msra.mxu1 %v11829_v22  ;;  %v4325_v22 = vpack.c.bf16 %v15129_v28, %v15128_v24 }
 0x4d1   : > { %10635 = vmatmul.mubr.msk.bf16.gmra.mrb[156].mxu0 %vm1681_vm1, %v3685_v57  ;;  %v4324_v57 = vpack.c.bf16 %v15127_v56, %v15126_v29 }
 0x4d2   : > { %10646 = vmatprep.mubr.msk.bf16.mxu0 %vm1681_vm1, %v13499_v54  ;;  %v11824_v54 = vld [vmem:[%s14857_s7 + $0x110] sm:$0xff]  }
 0x4d9   : > { %10647 = vmatmul.mubr.msk.bf16.vlgmr.msra.gmra.mrb[128].mxu0 %vm1681_vm1, %v13506_v23  ;;  %v15105_v23 = vld [vmem:[#allocation9_spill] sm:$0xff] }
 0x4da   : > { %10679 = vmatpush3.bf16.msra.mxu0 %v13779_v44  ;;  %10650 = vmatprep.mubr.msk.bf16.mxu0 %vm1681_vm1, %v13517_v15  ;;  %v15106_v15 = vld [vmem:[#allocation10_spill] sm:$0xff]  ;;  %v15115_v44 = vld [vmem:[#allocation41_spill] sm:$0xff] }
 0x4db   : > { %10680 = vmatprep.subr.bf16.mxu0 %v11823_v39 }
 0x4de   : > { %10681 = vmatpush3.bf16.msra.mxu0 %v11823_v39  ;;  %v15130_v39 = vld [vmem:[#allocation97_spill] sm:$0xff] }
 0x4df   : > { %10682 = vmatprep.subr.bf16.mxu0 %v11824_v54 }
 0x4e1   : > { %10651 = vmatmul.mubr.msk.bf16.gmra.mrb[132].mxu0 %vm1681_vm1, %v13524_v30  ;;  %v4314_v30 = vpack.c.bf16 %v15106_v15, %v15105_v23  ;;  %v15132_v23 = vld [vmem:[#allocation99_spill] sm:$0xff]  ;;  %v15133_v15 = vld [vmem:[#allocation101_spill] sm:$0xff] }
 0x4e2   : > { %10654 = vmatprep.mubr.msk.bf16.mxu0 %vm1681_vm1, %v13535_v55  ;;  %10683 = vmatpush3.bf16.msra.mxu0 %v11824_v54  ;;  %v15107_v55 = vpack.c.bf16 %v13723_v48, %v13721_v6  ;;  %v15116_v48 = vld [vmem:[#allocation43_spill] sm:$0xff]  ;;  %v15131_v54 = vld [vmem:[#allocation98_spill] sm:$0xff] }
 0x4e3   : > { %10684 = vmatprep.subr.bf16.mxu0 %v11826_v50  ;;  %v4319_v42 = vpack.c.bf16 %v15117_v43, %v15116_v48  ;;  %v6028_v43 = vld [vmem:[#allocation2 + $0x1] sm:$0xff] }
 0x4e6   : > { %10685 = vmatpush3.bf16.msra.mxu0 %v11826_v50  ;;  %v4326_v50 = vpack.c.bf16 %v15131_v54, %v15130_v39 }
 0x4e9   : > { %10655 = vmatmul.mubr.msk.bf16.gmra.mrb[136].mxu0 %vm1681_vm1, %v13539_v59  ;;  %v15108_v59 = vld [vmem:[#allocation17_spill] sm:$0xff] }
 0x4ea   : > { %10658 = vmatprep.mubr.msk.bf16.mxu0 %vm1681_vm1, %v13547_v51  ;;  %v15109_v51 = vld [vmem:[#allocation19_spill] sm:$0xff] }
 0x4f1   : > { %10659 = vmatmul.mubr.msk.bf16.gmra.mrb[140].mxu0 %vm1681_vm1, %v13551_v60  ;;  %v4315_v60 = vpack.c.bf16 %v15109_v51, %v15108_v59  ;;  %v15135_v59 = vld [vmem:[#allocation105_spill] sm:$0xff] }
 0x4f2   : > { %10662 = vmatprep.mubr.msk.bf16.mxu0 %vm1681_vm1, %v13559_v1  ;;  %v15110_v1 = vld [vmem:[#allocation20_spill] sm:$0xff] }
 0x4f9   : > { %10663 = vmatmul.mubr.msk.bf16.gmra.mrb[144].mxu0 %vm1681_vm1, %v13563_v61  ;;  %v15111_v61 = vld [vmem:[#allocation29_spill] sm:$0xff] }
 0x4fa   : > { %10666 = vmatprep.mubr.msk.bf16.mxu0 %vm1681_vm1, %v13571_v5  ;;  %v4316_v5 = vpack.c.bf16 %v15111_v61, %v15110_v1 }
 0x501   : > { %10667 = vmatmul.mubr.msk.bf16.gmra.mrb[148].mxu0 %vm1681_vm1, %v13575_v52  ;;  %v15112_v52 = vld [vmem:[#allocation30_spill] sm:$0xff] }
 0x502   : > { %10670 = vmatprep.mubr.msk.bf16.mxu0 %vm1681_vm1, %v13583_v40  ;;  %v15113_v40 = vld [vmem:[#allocation31_spill] sm:$0xff] }
 0x509   : > { %10671 = vmatmul.mubr.msk.bf16.gmra.mrb[152].mxu0 %vm1681_vm1, %v13589_v7  ;;  %v4317_v7 = vpack.c.bf16 %v15113_v40, %v15112_v52  ;;  %v11830_v40 = vld [vmem:[%s14857_s7 + $0x158] sm:$0xff]  }
 0x50a   : > { %10674 = vmatprep.mubr.msk.bf16.mxu0 %vm1681_vm1, %v13603_v53  ;;  %v15114_v53 = vld [vmem:[#allocation32_spill] sm:$0xff]  ;;  %10868 = vmatprep.subr.bf16.mxu1 %v11830_v40 }
 0x50b   : > { %v4318_v6 = vpack.c.bf16 %v15115_v44, %v15114_v53  ;;  %10869 = vmatpush3.bf16.msra.mxu1 %v11830_v40 }
 0x50c   : > { %10902 = vmatprep.subr.bf16.mxu1 %v13997_v36 }
 0x511   : > { %10675 = vmatmul.mubr.msk.bf16.gmra.mrb[156].mxu0 %vm1681_vm1, %v15107_v55  ;;  %v15134_v55 = vld [vmem:[#allocation102_spill] sm:$0xff] }
 0x512   : > { %10686 = vmatprep.mubr.msk.bf16.mxu0 %vm1681_vm1, %v4314_v30  ;;  %v4327_v30 = vpack.c.bf16 %v15133_v15, %v15132_v23  ;;  %v4328_v51 = vpack.c.bf16 %v15135_v59, %v15134_v55  ;;  %v14042_v23 = vld [vmem:[%s14856_s6 + $0x2] ss:$0 sm:$0xff] }
 0x513   : > { %v5177_v15 = vadd.f32 %v13585_v16, %v14042_v23  ;;  %v5169_v55 = vadd.f32 %v14042_v23, %v13591_v62  ;;  %v5180_v59 = vadd.f32 %v13595_v2, %v14042_v23  ;;  %v14061_v16 = vld [vmem:[%s14856_s6 + $0x3] ss:$0 sm:$0xff] }
 0x515   : > { %v5295_v62 = vadd.f32 1.0, %v5169_v55 }
 0x519   : > { %10687 = vmatmul.mubr.msk.bf16.vlgmr.msra.gmra.mrb[128].mxu0 %vm1681_vm1, %v4315_v60 }
 0x51a   : > { %10690 = vmatprep.mubr.msk.bf16.mxu0 %vm1681_vm1, %v4316_v5 }
 0x521   : > { %10691 = vmatmul.mubr.msk.bf16.gmra.mrb[132].mxu0 %vm1681_vm1, %v4317_v7 }
 0x522   : > { %10694 = vmatprep.mubr.msk.bf16.mxu0 %vm1681_vm1, %v4318_v6 }
 0x529   : > { %10695 = vmatmul.mubr.msk.bf16.gmra.mrb[136].mxu0 %vm1681_vm1, %v4319_v42  ;;  %v6029_v42 = vld [vmem:[#allocation2 + $0x9] sm:$0xff] }
 0x52a   : > { %10698 = vmatprep.mubr.msk.bf16.mxu0 %vm1681_vm1, %v4320_v9  ;;  %v6060_v9 = vpack.c.bf16 %v6029_v42, %v6028_v43 }
 0x52c   : > { %10870 = vmatprep.mubr.msk.bf16.mxu1 %vm1681_vm1, %v6060_v9  ;;  %v5297_v9 = vadd.f32 1.0, %v5177_v15 }
 0x531   : > { %10699 = vmatmul.mubr.msk.bf16.gmra.mrb[140].mxu0 %vm1681_vm1, %v4321_v38 }
 0x532   : > { %10702 = vmatprep.mubr.msk.bf16.mxu0 %vm1681_vm1, %v4322_v27 }
 0x539   : > { %10703 = vmatmul.mubr.msk.bf16.gmra.mrb[144].mxu0 %vm1681_vm1, %v4323_v13 }
 0x53a   : > { %10706 = vmatprep.mubr.msk.bf16.mxu0 %vm1681_vm1, %v4324_v57 }
 0x541   : > { %10707 = vmatmul.mubr.msk.bf16.gmra.mrb[148].mxu0 %vm1681_vm1, %v4325_v22 }
 0x542   : > { %10710 = vmatprep.mubr.msk.bf16.mxu0 %vm1681_vm1, %v4326_v50 }
 0x549   : > { %10711 = vmatmul.mubr.msk.bf16.gmra.mrb[152].mxu0 %vm1681_vm1, %v4327_v30  ;;  %v14049_v30 = vld [vmem:[%s14858_s8] ss:$0 sm:$0xff] }
 0x54a   : > { %10714 = vmatprep.mubr.msk.bf16.mxu0 %vm1681_vm1, %v4328_v51  ;;  %v5172_v51 = vadd.f32 %v14042_v23, %v13599_v47 }
 0x54c   : > { %v5296_v47 = vadd.f32 1.0, %v5172_v51 }
 0x551   : > { %10715 = vmatmul.mubr.msk.bf16.gmra.mrb[156].mxu0 %vm1681_vm1, %v4329_v0 }
 0x567   : > { %v13965_v60 = vpop.f32.mrb[96].mxu1 }
 0x568   : > { %v13967_v1 = vpop.f32.mrb[97].mxu1 }
 0x569   : > { %v13969_v61 = vpop.f32.mrb[98].mxu1 }
 0x56a   : > { %v13971_v5 = vpop.f32.mrb[99].mxu1 }
 0x56f   : > { %v13973_v52 = vpop.f32.mrb[100].mxu1 }
 0x570   : > { %v13978_v7 = vpop.f32.mrb[101].mxu1 }
 0x571   : > { %v13980_v53 = vpop.f32.mrb[102].mxu1 }
 0x572   : > { %v13982_v31 = vpop.f32.mrb[103].mxu1 }
 0x577   : > { %v13984_v11 = vpop.f32.mrb[104].mxu1 }
 0x578   : > { %v13986_v0 = vpop.f32.mrb[105].mxu1 }
 0x579   : > { %v13988_v44 = vpop.f32.mrb[106].mxu1 }
 0x57a   : > { %v13990_v6 = vpop.f32.mrb[107].mxu1 }
 0x57f   : > { %v13992_v48 = vpop.f32.mrb[108].mxu1 }
 0x580   : > { %v13999_v45 = vpop.f32.mrb[109].mxu1 }
 0x581   : > { %v14001_v4 = vpop.f32.mrb[110].mxu1 }
 0x582   : > { %v14005_v35 = vpop.f32.mrb[111].mxu1 }
 0x587   : > { %v14007_v38 = vpop.f32.mrb[112].mxu1 }
 0x588   : > { %v14009_v32 = vpop.f32.mrb[113].mxu1 }
 0x589   : > { %v14011_v33 = vpop.f32.mrb[114].mxu1 }
 0x58a   : > { %v14013_v27 = vpop.f32.mrb[115].mxu1 }
 0x58f   : > { %v14015_v21 = vpop.f32.mrb[116].mxu1 }
 0x590   : > { %v14017_v3 = vpop.f32.mrb[117].mxu1 }
 0x591   : > { %v14019_v13 = vpop.f32.mrb[118].mxu1 }
 0x592   : > { %v14021_v29 = vpop.f32.mrb[119].mxu1 }
 0x597   : > { %v14023_v56 = vpop.f32.mrb[120].mxu1 }
 0x598   : > { %15136 = vst [vmem:[#allocation107_spill] sm:$0xff] %v14023_v56  ;;  %v14025_v57 = vpop.f32.mrb[121].mxu1 }
 0x599   : > { %15137 = vst [vmem:[#allocation108_spill] sm:$0xff] %v14025_v57  ;;  %v14027_v24 = vpop.f32.mrb[122].mxu1  ;;  %v5185_v57 = vadd.f32 %v14042_v23, %v13607_v49 }
 0x59a   : > { %15138 = vst [vmem:[#allocation3_spill] sm:$0xff] %v14027_v24  ;;  %v14029_v28 = vpop.f32.mrb[123].mxu1 }
 0x59b   : > { %15139 = vst [vmem:[#allocation4_spill] sm:$0xff] %v14029_v28 }
 0x59f   : > { %v14031_v22 = vpop.f32.mrb[124].mxu1 }
 0x5a0   : > { %15140 = vst [vmem:[#allocation85_spill] sm:$0xff] %v14031_v22  ;;  %v14033_v39 = vpop.f32.mrb[125].mxu1 }
 0x5a1   : > { %15141 = vst [vmem:[#allocation5_spill] sm:$0xff] %v14033_v39  ;;  %v14035_v54 = vpop.f32.mrb[126].mxu1  ;;  %v5298_v39 = vadd.f32 1.0, %v5180_v59  ;;  %v5196_v59 = vadd.f32 %v13611_v14, %v14042_v23 }
 0x5a2   : > { %15142 = vst [vmem:[#allocation8_spill] sm:$0xff] %v14035_v54  ;;  %v14037_v50 = vpop.f32.mrb[127].mxu1 }
 0x5a3   : > { %15143 = vst [vmem:[#allocation11_spill] sm:$0xff] %v14037_v50 }
 0x5ec   : > { %v10688_v40 = vpop.f32.mrb[128].mxu0 }
 0x5ed   : > { %v4611_v43 = vadd.f32 %v10688_v40, %v14049_v30  ;;  %v4445_v42 = vpop.f32.mrb[129].mxu0  ;;  %v5193_v40 = vadd.f32 %v13605_v17, %v14042_v23  ;;  %v5188_v17 = vadd.f32 %v14042_v23, %v13615_v25 }
 0x5ee   : > { %v4609_v50 = vadd.f32 %v14049_v30, %v4445_v42  ;;  %v10689_v54 = vpop.f32.mrb[130].mxu0  ;;  %v5735_v42 = vadd.f32 %v13965_v60, %v14061_v16  ;;  %v5730_v60 = vadd.f32 %v14061_v16, %v13971_v5 }
 0x5ef   : > { %v4643_v22 = vmax.f32 %v4611_v43, 0.0  ;;  %v4612_v2 = vadd.f32 %v10689_v54, %v14049_v30  ;;  %v4448_v28 = vpop.f32.mrb[131].mxu0  ;;  %v5727_v54 = vadd.f32 %v14061_v16, %v13967_v1 }
 0x5f0   : > { %v4641_v24 = vmax.f32 %v4609_v50, 0.0  ;;  %v4610_v15 = vadd.f32 %v14049_v30, %v4448_v28  ;;  %v5738_v28 = vadd.f32 %v13969_v61, %v14061_v16 }
 0x5f1   : > { %v5329_v56 = vmul.f32 %v5297_v9, %v4643_v22  ;;  %v4644_v55 = vmax.f32 %v4612_v2, 0.0 }
 0x5f2   : > { %v5327_v51 = vmul.f32 %v5295_v62, %v4641_v24  ;;  %v4642_v43 = vmax.f32 %v4610_v15, 0.0  ;;  %v5301_v62 = vadd.f32 1.0, %v5193_v40  ;;  %v5299_v15 = vadd.f32 1.0, %v5185_v57 }
 0x5f3   : > { %v5855_v49 = vadd.f32 %v5735_v42, %v5329_v56  ;;  %v5330_v50 = vmul.f32 %v5298_v39, %v4644_v55  ;;  %v5302_v39 = vadd.f32 1.0, %v5196_v59  ;;  %v5300_v42 = vadd.f32 1.0, %v5188_v17 }
 0x5f4   : > { %v5853_v22 = vadd.f32 %v5727_v54, %v5327_v51  ;;  %v5328_v9 = vmul.f32 %v5296_v47, %v4642_v43  ;;  %v10692_v2 = vpop.f32.mrb[132].mxu0  ;;  %v5209_v54 = vadd.f32 %v13620_v26, %v14042_v23  ;;  %v5201_v57 = vadd.f32 %v14042_v23, %v13622_v37 }
 0x5f5   : > { %5941 = vst.msk [vmem:[#allocation2 + $0x31] sm:$0xff] %vm1681_vm1, %v5855_v49  ;;  %v5856_v14 = vadd.f32 %v5738_v28, %v5330_v50  ;;  %v4615_v1 = vadd.f32 %v10692_v2, %v14049_v30  ;;  %v4461_v24 = vpop.f32.mrb[133].mxu0  ;;  %v5212_v59 = vadd.f32 %v13628_v58, %v14042_v23  ;;  %v5751_v43 = vadd.f32 %v13973_v52, %v14061_v16 }
 0x5f6   : > { %5939 = vst.msk [vmem:[#allocation2 + $0x19] sm:$0xff] %vm1681_vm1, %v5853_v22  ;;  %v5854_v25 = vadd.f32 %v5730_v60, %v5328_v9  ;;  %v4613_v61 = vadd.f32 %v14049_v30, %v4461_v24  ;;  %v10693_v56 = vpop.f32.mrb[134].mxu0  ;;  %v5204_v49 = vadd.f32 %v14042_v23, %v13636_v12  ;;  %v5743_v26 = vadd.f32 %v14061_v16, %v13978_v7 }
 0x5f7   : > { %5942 = vst.msk [vmem:[#allocation2 + $0x39] sm:$0xff] %vm1681_vm1, %v5856_v14  ;;  %v4647_v5 = vmax.f32 %v4615_v1, 0.0  ;;  %v4616_v47 = vadd.f32 %v10693_v56, %v14049_v30  ;;  %v4464_v55 = vpop.f32.mrb[135].mxu0  ;;  %v5754_v60 = vadd.f32 %v13980_v53, %v14061_v16  ;;  %v5746_v58 = vadd.f32 %v14061_v16, %v13982_v31 }
 0x5f8   : > { %5940 = vst.msk [vmem:[#allocation2 + $0x21] sm:$0xff] %vm1681_vm1, %v5854_v25  ;;  %v4645_v40 = vmax.f32 %v4613_v61, 0.0  ;;  %v4614_v51 = vadd.f32 %v14049_v30, %v4464_v55  ;;  %v5305_v1 = vadd.f32 1.0, %v5209_v54  ;;  %v5303_v24 = vadd.f32 1.0, %v5201_v57 }
 0x5f9   : > { %v5333_v17 = vmul.f32 %v5301_v62, %v4647_v5  ;;  %v4648_v28 = vmax.f32 %v4616_v47, 0.0  ;;  %v5304_v25 = vadd.f32 1.0, %v5204_v49 }
 0x5fa   : > { %v5331_v37 = vmul.f32 %v5299_v15, %v4645_v40  ;;  %v4646_v50 = vmax.f32 %v4614_v51, 0.0  ;;  %v5306_v15 = vadd.f32 1.0, %v5212_v59  ;;  %v5228_v40 = vadd.f32 %v13647_v41, %v14042_v23 }
 0x5fb   : > { %v5859_v22 = vadd.f32 %v5751_v43, %v5333_v17  ;;  %v5334_v9 = vmul.f32 %v5302_v39, %v4648_v28  ;;  %v5225_v39 = vadd.f32 %v13641_v46, %v14042_v23  ;;  %v5767_v17 = vadd.f32 %v13984_v11, %v14061_v16 }
 0x5fc   : > { %v5857_v2 = vadd.f32 %v5743_v26, %v5331_v37  ;;  %v5332_v52 = vmul.f32 %v5300_v42, %v4646_v50  ;;  %v10696_v14 = vpop.f32.mrb[136].mxu0  ;;  %v5217_v42 = vadd.f32 %v14042_v23, %v13643_v8  ;;  %v6032_v43 = vld [vmem:[#allocation2 + $0x31] sm:$0xff]  ;;  %v11832_v8 = vld [vmem:[%s14857_s7 + $0x128] sm:$0xff]   ;;  %v5220_v41 = vadd.f32 %v14042_v23, %v13651_v19 }
 0x5fd   : > { %5945 = vst.msk [vmem:[#allocation2 + $0x61] sm:$0xff] %vm1681_vm1, %v5859_v22  ;;  %v5860_v12 = vadd.f32 %v5754_v60, %v5334_v9  ;;  %v4619_v7 = vadd.f32 %v10696_v14, %v14049_v30  ;;  %v4477_v62 = vpop.f32.mrb[137].mxu0  ;;  %v6030_v54 = vld [vmem:[#allocation2 + $0x19] sm:$0xff]  ;;  %v5759_v37 = vadd.f32 %v14061_v16, %v13986_v0  ;;  %v5770_v22 = vadd.f32 %v13988_v44, %v14061_v16 }
 0x5fe   : > { %5943 = vst.msk [vmem:[#allocation2 + $0x49] sm:$0xff] %vm1681_vm1, %v5857_v2  ;;  %v5858_v53 = vadd.f32 %v5746_v58, %v5332_v52  ;;  %v4617_v61 = vadd.f32 %v14049_v30, %v4477_v62  ;;  %v10697_v56 = vpop.f32.mrb[138].mxu0  ;;  %v6033_v31 = vld [vmem:[#allocation2 + $0x39] sm:$0xff]  ;;  %v5762_v19 = vadd.f32 %v14061_v16, %v13990_v6  ;;  %v11833_v52 = vld [vmem:[%s14857_s7 + $0x130] sm:$0xff]   ;;  %v5309_v14 = vadd.f32 1.0, %v5225_v39 }
 0x5ff   : > { %5946 = vst.msk [vmem:[#allocation2 + $0x69] sm:$0xff] %vm1681_vm1, %v5860_v12  ;;  %v4651_v5 = vmax.f32 %v4619_v7, 0.0  ;;  %v4620_v47 = vadd.f32 %v10697_v56, %v14049_v30  ;;  %v4480_v55 = vpop.f32.mrb[139].mxu0  ;;  %v6031_v57 = vld [vmem:[#allocation2 + $0x21] sm:$0xff]  ;;  %v14127_v26 = vpack.c.bf16 %v6033_v31, %v6032_v43  ;;  %v5307_v44 = vadd.f32 1.0, %v5217_v42 }
 0x600   : > { %5944 = vst.msk [vmem:[#allocation2 + $0x51] sm:$0xff] %vm1681_vm1, %v5858_v53  ;;  %v4649_v51 = vmax.f32 %v4617_v61, 0.0  ;;  %v4618_v59 = vadd.f32 %v14049_v30, %v4480_v55  ;;  %v14120_v46 = vpack.c.bf16 %v6031_v57, %v6030_v54  ;;  %v5310_v12 = vadd.f32 1.0, %v5228_v40  ;;  %v11834_v57 = vld [vmem:[%s14857_s7 + $0x138] sm:$0xff]  }
 0x601   : > { %v5337_v28 = vmul.f32 %v5305_v1, %v4651_v5  ;;  %v4652_v49 = vmax.f32 %v4620_v47, 0.0  ;;  %v5308_v7 = vadd.f32 1.0, %v5220_v41  ;;  %v5241_v53 = vadd.f32 %v13659_v34, %v14042_v23 }
 0x602   : > { %v5335_v50 = vmul.f32 %v5303_v24, %v4649_v51  ;;  %v4650_v60 = vmax.f32 %v4618_v59, 0.0  ;;  %10871 = vmatmul.mubr.msk.bf16.vlgmr.msra.gmra.mrb[128].mxu1 %vm1681_vm1, %v14120_v46  ;;  %v5233_v61 = vadd.f32 %v14042_v23, %v13661_v10  ;;  %v5244_v47 = vadd.f32 %v13665_v20, %v14042_v23 }
 0x603   : > { %v5863_v9 = vadd.f32 %v5767_v17, %v5337_v28  ;;  %v5338_v11 = vmul.f32 %v5306_v15, %v4652_v49  ;;  %10903 = vmatpush3.bf16.msra.mxu1 %v13997_v36  ;;  %10874 = vmatprep.mubr.msk.bf16.mxu1 %vm1681_vm1, %v14127_v26  ;;  %v5783_v40 = vadd.f32 %v13992_v48, %v14061_v16 }
 0x604   : > { %v5861_v58 = vadd.f32 %v5759_v37, %v5335_v50  ;;  %v5336_v0 = vmul.f32 %v5304_v25, %v4650_v60  ;;  %v10700_v2 = vpop.f32.mrb[140].mxu0  ;;  %10904 = vmatprep.subr.bf16.mxu1 %v11832_v8  ;;  %v6036_v10 = vld [vmem:[#allocation2 + $0x61] sm:$0xff]  ;;  %v5236_v20 = vadd.f32 %v14042_v23, %v13669_v18  ;;  %v5786_v49 = vadd.f32 %v14001_v4, %v14061_v16 }
 0x605   : > { %5949 = vst.msk [vmem:[#allocation2 + $0x91] sm:$0xff] %vm1681_vm1, %v5863_v9  ;;  %v5864_v1 = vadd.f32 %v5770_v22, %v5338_v11  ;;  %v4623_v36 = vadd.f32 %v10700_v2, %v14049_v30  ;;  %v4493_v24 = vpop.f32.mrb[141].mxu0  ;;  %v6034_v42 = vld [vmem:[#allocation2 + $0x49] sm:$0xff]  ;;  %v5778_v18 = vadd.f32 %v14061_v16, %v14005_v35  ;;  %v14183_v60 = vld [vmem:[%s14857_s7 + $0x160] sm:$0xff]   ;;  %v5313_v22 = vadd.f32 1.0, %v5241_v53 }
 0x606   : > { %5947 = vst.msk [vmem:[#allocation2 + $0x79] sm:$0xff] %vm1681_vm1, %v5861_v58  ;;  %v5862_v6 = vadd.f32 %v5762_v19, %v5336_v0  ;;  %v4621_v62 = vadd.f32 %v14049_v30, %v4493_v24  ;;  %v10701_v15 = vpop.f32.mrb[142].mxu0  ;;  %v6037_v25 = vld [vmem:[#allocation2 + $0x69] sm:$0xff]  ;;  %v5311_v19 = vadd.f32 1.0, %v5233_v61  ;;  %v5314_v58 = vadd.f32 1.0, %v5244_v47 }
 0x607   : > { %5950 = vst.msk [vmem:[#allocation2 + $0x99] sm:$0xff] %vm1681_vm1, %v5864_v1  ;;  %v4655_v56 = vmax.f32 %v4623_v36, 0.0  ;;  %v4624_v31 = vadd.f32 %v10701_v15, %v14049_v30  ;;  %v4496_v39 = vpop.f32.mrb[143].mxu0  ;;  %v6035_v5 = vld [vmem:[#allocation2 + $0x51] sm:$0xff]  ;;  %10905 = vmatpush3.bf16.msra.mxu1 %v11832_v8  ;;  %v14166_v43 = vpack.c.bf16 %v6037_v25, %v6036_v10  ;;  %v5775_v8 = vadd.f32 %v14061_v16, %v13999_v45  ;;  %v15146_v10 = vld [vmem:[#allocation46_spill] sm:$0xff] }
 0x608   : > { %5948 = vst.msk [vmem:[#allocation2 + $0x81] sm:$0xff] %vm1681_vm1, %v5862_v6  ;;  %v4653_v55 = vmax.f32 %v4621_v62, 0.0  ;;  %v4622_v34 = vadd.f32 %v14049_v30, %v4496_v39  ;;  %v14159_v54 = vpack.c.bf16 %v6035_v5, %v6034_v42  ;;  %10906 = vmatprep.subr.bf16.mxu1 %v11833_v52  ;;  %v15144_v6 = vld [vmem:[#allocation34_spill] sm:$0xff]  ;;  %v5799_v61 = vadd.f32 %v14007_v38, %v14061_v16  ;;  %v15145_v42 = vld [vmem:[#allocation35_spill] sm:$0xff] }
 0x609   : > { %v5341_v51 = vmul.f32 %v5309_v14, %v4655_v56  ;;  %v4656_v59 = vmax.f32 %v4624_v31, 0.0  ;;  %v5312_v14 = vadd.f32 1.0, %v5236_v20  ;;  %v5249_v62 = vadd.f32 %v14042_v23, %v15144_v6 }
 0x60a   : > { %v5339_v17 = vmul.f32 %v5307_v44, %v4653_v55  ;;  %v4654_v28 = vmax.f32 %v4622_v34, 0.0  ;;  %10875 = vmatmul.mubr.msk.bf16.gmra.mrb[132].mxu1 %vm1681_vm1, %v14159_v54  ;;  %v5257_v44 = vadd.f32 %v13671_v63, %v14042_v23  ;;  %v5260_v5 = vadd.f32 %v15145_v42, %v14042_v23 }
 0x60b   : > { %v5867_v41 = vadd.f32 %v5783_v40, %v5341_v51  ;;  %v5342_v48 = vmul.f32 %v5310_v12, %v4656_v59  ;;  %10878 = vmatprep.mubr.msk.bf16.mxu1 %vm1681_vm1, %v14166_v43  ;;  %10907 = vmatpush3.bf16.msra.mxu1 %v11833_v52  ;;  %v5791_v47 = vadd.f32 %v14061_v16, %v14009_v32 }
 0x60c   : > { %v5865_v37 = vadd.f32 %v5775_v8, %v5339_v17  ;;  %v5340_v50 = vmul.f32 %v5308_v7, %v4654_v28  ;;  %v10704_v45 = vpop.f32.mrb[144].mxu0  ;;  %10908 = vmatprep.subr.bf16.mxu1 %v11834_v57  ;;  %v6040_v63 = vld [vmem:[#allocation2 + $0x91] sm:$0xff]  ;;  %v5802_v38 = vadd.f32 %v14011_v33, %v14061_v16  ;;  %v5794_v59 = vadd.f32 %v14061_v16, %v14013_v27 }
 0x60d   : > { %5953 = vst.msk [vmem:[#allocation2 + $0xc1] sm:$0xff] %vm1681_vm1, %v5867_v41  ;;  %v5868_v4 = vadd.f32 %v5786_v49, %v5342_v48  ;;  %v4627_v9 = vadd.f32 %v10704_v45, %v14049_v30  ;;  %v4509_v11 = vpop.f32.mrb[145].mxu0  ;;  %v6038_v12 = vld [vmem:[#allocation2 + $0x79] sm:$0xff]  ;;  %v5317_v41 = vadd.f32 1.0, %v5257_v44  ;;  %v5315_v48 = vadd.f32 1.0, %v5249_v62 }
 0x60e   : > { %5951 = vst.msk [vmem:[#allocation2 + $0xa9] sm:$0xff] %vm1681_vm1, %v5865_v37  ;;  %v5866_v35 = vadd.f32 %v5778_v18, %v5340_v50  ;;  %v4625_v0 = vadd.f32 %v14049_v30, %v4509_v11  ;;  %v10705_v2 = vpop.f32.mrb[146].mxu0  ;;  %v6041_v52 = vld [vmem:[#allocation2 + $0x99] sm:$0xff]  ;;  %v5318_v45 = vadd.f32 1.0, %v5260_v5  ;;  %v5815_v44 = vadd.f32 %v14015_v21, %v14061_v16 }
 0x60f   : > { %5954 = vst.msk [vmem:[#allocation2 + $0xc9] sm:$0xff] %vm1681_vm1, %v5868_v4  ;;  %v4659_v1 = vmax.f32 %v4627_v9, 0.0  ;;  %v4628_v36 = vadd.f32 %v10705_v2, %v14049_v30  ;;  %v4512_v24 = vpop.f32.mrb[147].mxu0  ;;  %v6039_v7 = vld [vmem:[#allocation2 + $0x81] sm:$0xff]  ;;  %10909 = vmatpush3.bf16.msra.mxu1 %v11834_v57  ;;  %v14202_v39 = vpack.c.bf16 %v6041_v52, %v6040_v63  ;;  %v5252_v57 = vadd.f32 %v14042_v23, %v15146_v10 }
 0x610   : > { %5952 = vst.msk [vmem:[#allocation2 + $0xb1] sm:$0xff] %vm1681_vm1, %v5866_v35  ;;  %v4657_v15 = vmax.f32 %v4625_v0, 0.0  ;;  %v4626_v25 = vadd.f32 %v14049_v30, %v4512_v24  ;;  %v14197_v53 = vpack.c.bf16 %v6039_v7, %v6038_v12  ;;  %10942 = vmatprep.subr.bf16.mxu1 %v14183_v60  ;;  %v15148_v12 = vld [vmem:[#allocation57_spill] sm:$0xff]  ;;  %v5807_v6 = vadd.f32 %v14061_v16, %v14017_v3 }
 0x611   : > { %v5345_v56 = vmul.f32 %v5313_v22, %v4659_v1  ;;  %v4660_v31 = vmax.f32 %v4628_v36, 0.0  ;;  %v5316_v27 = vadd.f32 1.0, %v5252_v57  ;;  %v5265_v7 = vadd.f32 %v14042_v23, %v15148_v12 }
 0x612   : > { %v5343_v55 = vmul.f32 %v5311_v19, %v4657_v15  ;;  %v4658_v34 = vmax.f32 %v4626_v25, 0.0  ;;  %10879 = vmatmul.mubr.msk.bf16.gmra.mrb[136].mxu1 %vm1681_vm1, %v14197_v53  ;;  %v15149_v25 = vld [vmem:[#allocation58_spill] sm:$0xff]  ;;  %v5818_v21 = vadd.f32 %v14019_v13, %v14061_v16  ;;  %v5810_v3 = vadd.f32 %v14061_v16, %v14021_v29 }
 0x613   : > { %v5871_v40 = vadd.f32 %v5799_v61, %v5345_v56  ;;  %v5346_v51 = vmul.f32 %v5314_v58, %v4660_v31  ;;  %10882 = vmatprep.mubr.msk.bf16.mxu1 %vm1681_vm1, %v14202_v39  ;;  %v15147_v58 = vld [vmem:[#allocation47_spill] sm:$0xff]  ;;  %v5276_v63 = vadd.f32 %v15149_v25, %v14042_v23 }
 0x614   : > { %v5869_v32 = vadd.f32 %v5791_v47, %v5343_v55  ;;  %v5344_v20 = vmul.f32 %v5312_v14, %v4658_v34  ;;  %v10708_v8 = vpop.f32.mrb[148].mxu0  ;;  %v5273_v35 = vadd.f32 %v15147_v58, %v14042_v23  ;;  %v6044_v14 = vld [vmem:[#allocation2 + $0xc1] sm:$0xff]  ;;  %v15150_v31 = vld [vmem:[#allocation59_spill] sm:$0xff] }
 0x615   : > { %5957 = vst.msk [vmem:[#allocation2 + $0xf1] sm:$0xff] %vm1681_vm1, %v5871_v40  ;;  %v5872_v17 = vadd.f32 %v5802_v38, %v5346_v51  ;;  %v4631_v28 = vadd.f32 %v10708_v8, %v14049_v30  ;;  %v4525_v49 = vpop.f32.mrb[149].mxu0  ;;  %v6042_v11 = vld [vmem:[#allocation2 + $0xa9] sm:$0xff]  ;;  %v5268_v42 = vadd.f32 %v14042_v23, %v15150_v31 }
 0x616   : > { %5955 = vst.msk [vmem:[#allocation2 + $0xd9] sm:$0xff] %vm1681_vm1, %v5869_v32  ;;  %v5870_v33 = vadd.f32 %v5794_v59, %v5344_v20  ;;  %v4629_v18 = vadd.f32 %v14049_v30, %v4525_v49  ;;  %v10709_v37 = vpop.f32.mrb[150].mxu0  ;;  %v6045_v50 = vld [vmem:[#allocation2 + $0xc9] sm:$0xff]  ;;  %v5321_v57 = vadd.f32 1.0, %v5273_v35  ;;  %v5319_v32 = vadd.f32 1.0, %v5265_v7  ;;  %v15156_v7 = vld [vmem:[#allocation88_spill] sm:$0xff] }
 0x617   : > { %5958 = vst.msk [vmem:[#allocation2 + $0xf9] sm:$0xff] %vm1681_vm1, %v5872_v17  ;;  %v4663_v22 = vmax.f32 %v4631_v28, 0.0  ;;  %v4632_v4 = vadd.f32 %v10709_v37, %v14049_v30  ;;  %v4528_v9 = vpop.f32.mrb[151].mxu0  ;;  %v6043_v19 = vld [vmem:[#allocation2 + $0xb1] sm:$0xff]  ;;  %v14232_v24 = vpack.c.bf16 %v6045_v50, %v6044_v14  ;;  %v5322_v20 = vadd.f32 1.0, %v5276_v63 }
 0x618   : > { %5956 = vst.msk [vmem:[#allocation2 + $0xe1] sm:$0xff] %vm1681_vm1, %v5870_v33  ;;  %v4661_v0 = vmax.f32 %v4629_v18, 0.0  ;;  %v4630_v2 = vadd.f32 %v14049_v30, %v4528_v9  ;;  %v14228_v52 = vpack.c.bf16 %v6043_v19, %v6042_v11  ;;  %v15151_v50 = vld [vmem:[#allocation107_spill] sm:$0xff]  ;;  %v15152_v9 = vld [vmem:[#allocation84_spill] sm:$0xff] }
 0x619   : > { %v5349_v1 = vmul.f32 %v5317_v41, %v4663_v22  ;;  %v4664_v36 = vmax.f32 %v4632_v4, 0.0  ;;  %v5320_v41 = vadd.f32 1.0, %v5268_v42  ;;  %v5289_v11 = vadd.f32 %v15152_v9, %v14042_v23  ;;  %v15153_v19 = vld [vmem:[#allocation108_spill] sm:$0xff]  ;;  %v15158_v42 = vld [vmem:[#allocation106_spill] sm:$0xff] }
 0x61a   : > { %v5347_v62 = vmul.f32 %v5315_v48, %v4661_v0  ;;  %v4662_v15 = vmax.f32 %v4630_v2, 0.0  ;;  %10883 = vmatmul.mubr.msk.bf16.gmra.mrb[140].mxu1 %vm1681_vm1, %v14228_v52  ;;  %v5823_v58 = vadd.f32 %v14061_v16, %v15153_v19  ;;  %v15154_v2 = vld [vmem:[#allocation87_spill] sm:$0xff] }
 0x61b   : > { %v5875_v61 = vadd.f32 %v5815_v44, %v5349_v1  ;;  %v5350_v56 = vmul.f32 %v5318_v45, %v4664_v36  ;;  %10886 = vmatprep.mubr.msk.bf16.mxu1 %vm1681_vm1, %v14232_v24  ;;  %v5831_v45 = vadd.f32 %v15151_v50, %v14061_v16  ;;  %v5281_v14 = vadd.f32 %v14042_v23, %v15154_v2  ;;  %v15155_v44 = vld [vmem:[#allocation3_spill] sm:$0xff] }
 0x61c   : > { %v5873_v5 = vadd.f32 %v5807_v6, %v5347_v62  ;;  %v5348_v47 = vmul.f32 %v5316_v27, %v4662_v15  ;;  %v10712_v55 = vpop.f32.mrb[152].mxu0  ;;  %v6048_v37 = vld [vmem:[#allocation2 + $0xf1] sm:$0xff]  ;;  %v5834_v1 = vadd.f32 %v15155_v44, %v14061_v16  ;;  %v5292_v6 = vadd.f32 %v15156_v7, %v14042_v23 }
 0x61d   : > { %5961 = vst.msk [vmem:[#allocation2 + $0x121] sm:$0xff] %vm1681_vm1, %v5875_v61  ;;  %v5876_v34 = vadd.f32 %v5818_v21, %v5350_v56  ;;  %v4635_v10 = vadd.f32 %v10712_v55, %v14049_v30  ;;  %v4541_v13 = vpop.f32.mrb[153].mxu0  ;;  %v6046_v28 = vld [vmem:[#allocation2 + $0xd9] sm:$0xff]  ;;  %v15162_v19 = vld [vmem:[#allocation11_spill] sm:$0xff] }
 0x61e   : > { %5959 = vst.msk [vmem:[#allocation2 + $0x109] sm:$0xff] %vm1681_vm1, %v5873_v5  ;;  %v5874_v38 = vadd.f32 %v5810_v3, %v5348_v47  ;;  %v4633_v40 = vadd.f32 %v14049_v30, %v4541_v13  ;;  %v10713_v51 = vpop.f32.mrb[154].mxu0  ;;  %v6049_v59 = vld [vmem:[#allocation2 + $0xf9] sm:$0xff]  ;;  %v5284_v3 = vadd.f32 %v14042_v23, %v15158_v42  ;;  %v5323_v13 = vadd.f32 1.0, %v5281_v14 }
 0x61f   : > { %5962 = vst.msk [vmem:[#allocation2 + $0x129] sm:$0xff] %vm1681_vm1, %v5876_v34  ;;  %v4667_v29 = vmax.f32 %v4635_v10, 0.0  ;;  %v4636_v8 = vadd.f32 %v10713_v51, %v14049_v30  ;;  %v4544_v17 = vpop.f32.mrb[155].mxu0  ;;  %v6047_v49 = vld [vmem:[#allocation2 + $0xe1] sm:$0xff]  ;;  %v14262_v4 = vpack.c.bf16 %v6049_v59, %v6048_v37  ;;  %v15157_v62 = vld [vmem:[#allocation4_spill] sm:$0xff]  ;;  %v5325_v10 = vadd.f32 1.0, %v5289_v11 }
 0x620   : > { %5960 = vst.msk [vmem:[#allocation2 + $0x111] sm:$0xff] %vm1681_vm1, %v5874_v38  ;;  %v4665_v48 = vmax.f32 %v4633_v40, 0.0  ;;  %v4634_v33 = vadd.f32 %v14049_v30, %v4544_v17  ;;  %v14258_v18 = vpack.c.bf16 %v6047_v49, %v6046_v28  ;;  %v5826_v15 = vadd.f32 %v14061_v16, %v15157_v62  ;;  %v15159_v17 = vld [vmem:[#allocation85_spill] sm:$0xff]  ;;  %v5972_v62 = vld [vmem:[#allocation2 + $0x8] sm:$0xff] }
 0x621   : > { %v5353_v27 = vmul.f32 %v5321_v57, %v4667_v29  ;;  %v4668_v22 = vmax.f32 %v4636_v8, 0.0  ;;  %v5847_v28 = vadd.f32 %v15159_v17, %v14061_v16  ;;  %v15160_v37 = vld [vmem:[#allocation5_spill] sm:$0xff] }
 0x622   : > { %v5351_v35 = vmul.f32 %v5319_v32, %v4665_v48  ;;  %v4666_v0 = vmax.f32 %v4634_v33, 0.0  ;;  %10887 = vmatmul.mubr.msk.bf16.gmra.mrb[144].mxu1 %vm1681_vm1, %v14258_v18  ;;  %v5326_v32 = vadd.f32 1.0, %v5292_v6  ;;  %v5324_v33 = vadd.f32 1.0, %v5284_v3  ;;  %v5975_v3 = vld [vmem:[#allocation2 + $0x30] sm:$0xff] }
 0x623   : > { %v5879_v36 = vadd.f32 %v5831_v45, %v5353_v27  ;;  %v5354_v12 = vmul.f32 %v5322_v20, %v4668_v22  ;;  %10890 = vmatprep.mubr.msk.bf16.mxu1 %vm1681_vm1, %v14262_v4  ;;  %v5839_v50 = vadd.f32 %v14061_v16, %v15160_v37  ;;  %v5987_v37 = vld [vmem:[#allocation2 + $0xc0] sm:$0xff] }
 0x624   : > { %v5877_v25 = vadd.f32 %v5823_v58, %v5351_v35  ;;  %v5352_v63 = vmul.f32 %v5320_v41, %v4666_v0  ;;  %v10716_v21 = vpop.f32.mrb[156].mxu0  ;;  %v6052_v8 = vld [vmem:[#allocation2 + $0x121] sm:$0xff]  ;;  %v5842_v58 = vadd.f32 %v14061_v16, %v15162_v19 }
 0x625   : > { %5965 = vst.msk [vmem:[#allocation2 + $0x151] sm:$0xff] %vm1681_vm1, %v5879_v36  ;;  %v5880_v61 = vadd.f32 %v5834_v1, %v5354_v12  ;;  %v4639_v56 = vadd.f32 %v10716_v21, %v14049_v30  ;;  %v4557_v31 = vpop.f32.mrb[157].mxu0  ;;  %v6050_v51 = vld [vmem:[#allocation2 + $0x109] sm:$0xff] }
 0x626   : > { %5963 = vst.msk [vmem:[#allocation2 + $0x139] sm:$0xff] %vm1681_vm1, %v5877_v25  ;;  %v5878_v5 = vadd.f32 %v5826_v15, %v5352_v63  ;;  %v4637_v47 = vadd.f32 %v14049_v30, %v4557_v31  ;;  %v10717_v55 = vpop.f32.mrb[158].mxu0  ;;  %v6053_v34 = vld [vmem:[#allocation2 + $0x129] sm:$0xff]  ;;  %v5973_v31 = vld [vmem:[#allocation2 + $0x18] sm:$0xff] }
 0x627   : > { %5966 = vst.msk [vmem:[#allocation2 + $0x159] sm:$0xff] %vm1681_vm1, %v5880_v61  ;;  %v4671_v57 = vmax.f32 %v4639_v56, 0.0  ;;  %v4640_v38 = vadd.f32 %v10717_v55, %v14049_v30  ;;  %v4560_v40 = vpop.f32.mrb[159].mxu0  ;;  %v6051_v59 = vld [vmem:[#allocation2 + $0x111] sm:$0xff]  ;;  %v14294_v48 = vpack.c.bf16 %v6053_v34, %v6052_v8  ;;  %v5974_v61 = vld [vmem:[#allocation2 + $0x20] sm:$0xff] }
 0x628   : > { %5964 = vst.msk [vmem:[#allocation2 + $0x141] sm:$0xff] %vm1681_vm1, %v5878_v5  ;;  %v4669_v23 = vmax.f32 %v4637_v47, 0.0  ;;  %v4638_v20 = vadd.f32 %v14049_v30, %v4560_v40  ;;  %v14290_v29 = vpack.c.bf16 %v6051_v59, %v6050_v51  ;;  %v15161_v30 = vld [vmem:[#allocation8_spill] sm:$0xff]  ;;  %v14323_v42 = vpack.c.bf16 %v5974_v61, %v5973_v31  ;;  %v11836_v5 = vld [vmem:[%s14857_s7 + $0x168] sm:$0xff]   ;;  %v11837_v55 = vld [vmem:[%s14857_s7 + $0x170] sm:$0xff]  }
 0x629   : > { %v5357_v49 = vmul.f32 %v5325_v10, %v4671_v57  ;;  %v4672_v41 = vmax.f32 %v4640_v38, 0.0  ;;  %v5850_v22 = vadd.f32 %v15161_v30, %v14061_v16  ;;  %v5971_v16 = vld [vmem:[#allocation2] sm:$0xff]  ;;  %v5976_v56 = vld [vmem:[#allocation2 + $0x38] sm:$0xff]  ;;  %v5978_v34 = vld [vmem:[#allocation2 + $0x50] sm:$0xff] }
 0x62a   : > { %v5355_v45 = vmul.f32 %v5323_v13, %v4669_v23  ;;  %v4670_v27 = vmax.f32 %v4638_v20, 0.0  ;;  %10891 = vmatmul.mubr.msk.bf16.gmra.mrb[148].mxu1 %vm1681_vm1, %v14290_v29  ;;  %v6003_v63 = vpack.c.bf16 %v5972_v62, %v5971_v16  ;;  %v14328_v47 = vpack.c.bf16 %v5976_v56, %v5975_v3  ;;  %v5980_v10 = vld [vmem:[#allocation2 + $0x68] sm:$0xff]  ;;  %v5979_v38 = vld [vmem:[#allocation2 + $0x60] sm:$0xff]  ;;  %v5981_v23 = vld [vmem:[#allocation2 + $0x78] sm:$0xff] }
 0x62b   : > { %v5883_v9 = vadd.f32 %v5847_v28, %v5357_v49  ;;  %v5358_v11 = vmul.f32 %v5326_v32, %v4672_v41  ;;  %10894 = vmatprep.mubr.msk.bf16.mxu1 %vm1681_vm1, %v14294_v48  ;;  %v5977_v13 = vld [vmem:[#allocation2 + $0x48] sm:$0xff]  ;;  %v14343_v40 = vpack.c.bf16 %v5980_v10, %v5979_v38  ;;  %v11839_v51 = vld [vmem:[%s14857_s7 + $0x180] sm:$0xff]   ;;  %v5984_v32 = vld [vmem:[#allocation2 + $0x98] sm:$0xff] }
 0x62c   : > { %v5881_v35 = vadd.f32 %v5839_v50, %v5355_v45  ;;  %v5356_v0 = vmul.f32 %v5324_v33, %v4670_v27  ;;  %v6056_v7 = vld [vmem:[#allocation2 + $0x151] sm:$0xff]  ;;  %v14338_v57 = vpack.c.bf16 %v5978_v34, %v5977_v13  ;;  %v5982_v59 = vld [vmem:[#allocation2 + $0x80] sm:$0xff]  ;;  %v5988_v49 = vld [vmem:[#allocation2 + $0xc8] sm:$0xff] }
 0x62d   : > { %5969 = vst.msk [vmem:[#allocation2 + $0x181] sm:$0xff] %vm1681_vm1, %v5883_v9  ;;  %v5884_v2 = vadd.f32 %v5850_v22, %v5358_v11  ;;  %v6054_v1 = vld [vmem:[#allocation2 + $0x139] sm:$0xff]  ;;  %v14352_v20 = vpack.c.bf16 %v5982_v59, %v5981_v23  ;;  %v5983_v8 = vld [vmem:[#allocation2 + $0x90] sm:$0xff]  ;;  %v5985_v41 = vld [vmem:[#allocation2 + $0xa8] sm:$0xff]  ;;  %v14362_v50 = vpack.c.bf16 %v5988_v49, %v5987_v37 }
 0x62e   : > { %5967 = vst.msk [vmem:[#allocation2 + $0x169] sm:$0xff] %vm1681_vm1, %v5881_v35  ;;  %v5882_v14 = vadd.f32 %v5842_v58, %v5356_v0  ;;  %v6057_v44 = vld [vmem:[#allocation2 + $0x159] sm:$0xff]  ;;  %v14354_v17 = vpack.c.bf16 %v5984_v32, %v5983_v8  ;;  %v5986_v28 = vld [vmem:[#allocation2 + $0xb0] sm:$0xff]  ;;  %v5996_v58 = vld [vmem:[#allocation2 + $0x128] sm:$0xff] }
 0x62f   : > { %5970 = vst.msk [vmem:[#allocation2 + $0x189] sm:$0xff] %vm1681_vm1, %v5884_v2  ;;  %v6055_v36 = vld [vmem:[#allocation2 + $0x141] sm:$0xff]  ;;  %v14312_v6 = vpack.c.bf16 %v6057_v44, %v6056_v7  ;;  %v14360_v33 = vpack.c.bf16 %v5986_v28, %v5985_v41  ;;  %v5992_v27 = vld [vmem:[#allocation2 + $0xf8] sm:$0xff]  ;;  %v5991_v9 = vld [vmem:[#allocation2 + $0xf0] sm:$0xff] }
 0x630   : > { %5968 = vst.msk [vmem:[#allocation2 + $0x171] sm:$0xff] %vm1681_vm1, %v5882_v14  ;;  %v14310_v12 = vpack.c.bf16 %v6055_v36, %v6054_v1  ;;  %v5990_v45 = vld [vmem:[#allocation2 + $0xe0] sm:$0xff]  ;;  %v5989_v30 = vld [vmem:[#allocation2 + $0xd8] sm:$0xff]  ;;  %v14370_v11 = vpack.c.bf16 %v5992_v27, %v5991_v9  ;;  %v5994_v19 = vld [vmem:[#allocation2 + $0x110] sm:$0xff] }
 0x631   : > { %v14368_v22 = vpack.c.bf16 %v5990_v45, %v5989_v30  ;;  %v5993_v35 = vld [vmem:[#allocation2 + $0x108] sm:$0xff]  ;;  %v5995_v2 = vld [vmem:[#allocation2 + $0x120] sm:$0xff]  ;;  %v6000_v1 = vld [vmem:[#allocation2 + $0x158] sm:$0xff] }
 0x632   : > { %10895 = vmatmul.mubr.msk.bf16.gmra.mrb[152].mxu1 %vm1681_vm1, %v14310_v12  ;;  %v14376_v0 = vpack.c.bf16 %v5994_v19, %v5993_v35  ;;  %v14378_v14 = vpack.c.bf16 %v5996_v58, %v5995_v2  ;;  %v5998_v44 = vld [vmem:[#allocation2 + $0x140] sm:$0xff]  ;;  %v5997_v36 = vld [vmem:[#allocation2 + $0x138] sm:$0xff]  ;;  %v5999_v16 = vld [vmem:[#allocation2 + $0x150] sm:$0xff] }
 0x633   : > { %10898 = vmatprep.mubr.msk.bf16.mxu1 %vm1681_vm1, %v14312_v6  ;;  %v14384_v7 = vpack.c.bf16 %v5998_v44, %v5997_v36  ;;  %v14386_v62 = vpack.c.bf16 %v6000_v1, %v5999_v16  ;;  %v6553_v3 = vld [vmem:[#allocation2 + $0x1a] sm:$0xff]  ;;  %v11840_v13 = vld [vmem:[%s14857_s7 + $0x188] sm:$0xff]   ;;  %v6558_v32 = vld [vmem:[#allocation2 + $0x52] sm:$0xff] }
 0x634   : > { %v6556_v34 = vld [vmem:[#allocation2 + $0x3a] sm:$0xff]  ;;  %v6557_v59 = vld [vmem:[#allocation2 + $0x4a] sm:$0xff]  ;;  %v6559_v23 = vld [vmem:[#allocation2 + $0x62] sm:$0xff] }
 0x635   : > { %v6058_v15 = vld [vmem:[#allocation2 + $0x169] sm:$0xff]  ;;  %v14411_v28 = vpack.c.bf16 %v6558_v32, %v6557_v59  ;;  %v11843_v41 = vld [vmem:[%s14857_s7 + $0x1a0] sm:$0xff]   ;;  %v6563_v27 = vld [vmem:[#allocation2 + $0x92] sm:$0xff] }
 0x636   : > { %v6001_v61 = vld [vmem:[#allocation2 + $0x168] sm:$0xff]  ;;  %v6561_v37 = vld [vmem:[#allocation2 + $0x7a] sm:$0xff]  ;;  %v6566_v35 = vld [vmem:[#allocation2 + $0xb2] sm:$0xff] }
 0x637   : > { %v6059_v25 = vld [vmem:[#allocation2 + $0x171] sm:$0xff]  ;;  %v6562_v45 = vld [vmem:[#allocation2 + $0x82] sm:$0xff]  ;;  %v6564_v30 = vld [vmem:[#allocation2 + $0x9a] sm:$0xff] }
 0x638   : > { %v14318_v21 = vpack.c.bf16 %v6059_v25, %v6058_v15  ;;  %v6551_v15 = vld [vmem:[#allocation2 + $0x2] sm:$0xff]  ;;  %v6552_v25 = vld [vmem:[#allocation2 + $0xa] sm:$0xff]  ;;  %v14425_v9 = vpack.c.bf16 %v6562_v45, %v6561_v37  ;;  %v14427_v19 = vpack.c.bf16 %v6564_v30, %v6563_v27  ;;  %v6569_v16 = vld [vmem:[#allocation2 + $0xda] sm:$0xff] }
 0x639   : > { %v6583_v56 = vpack.c.bf16 %v6552_v25, %v6551_v15  ;;  %v6560_v8 = vld [vmem:[#allocation2 + $0x6a] sm:$0xff]  ;;  %v6567_v2 = vld [vmem:[#allocation2 + $0xc2] sm:$0xff]  ;;  %v6571_v25 = vld [vmem:[#allocation2 + $0xf2] sm:$0xff] }
 0x63a   : > { %10899 = vmatmul.mubr.msk.bf16.gmra.mrb[156].mxu1 %vm1681_vm1, %v14318_v21  ;;  %v14416_v49 = vpack.c.bf16 %v6560_v8, %v6559_v23  ;;  %v6565_v58 = vld [vmem:[#allocation2 + $0xaa] sm:$0xff]  ;;  %v6570_v15 = vld [vmem:[#allocation2 + $0xe2] sm:$0xff]  ;;  %v6577_v59 = vld [vmem:[#allocation2 + $0x13a] sm:$0xff] }
 0x63b   : > { %10910 = vmatprep.mubr.msk.bf16.mxu1 %vm1681_vm1, %v6003_v63  ;;  %v6002_v63 = vld [vmem:[#allocation2 + $0x170] sm:$0xff]  ;;  %v14433_v1 = vpack.c.bf16 %v6566_v35, %v6565_v58  ;;  %v6578_v32 = vld [vmem:[#allocation2 + $0x142] sm:$0xff]  ;;  %v6580_v8 = vld [vmem:[#allocation2 + $0x15a] sm:$0xff] }
 0x63c   : > { %v14392_v31 = vpack.c.bf16 %v6002_v63, %v6001_v61  ;;  %v6568_v44 = vld [vmem:[#allocation2 + $0xca] sm:$0xff]  ;;  %v6572_v63 = vld [vmem:[#allocation2 + $0xfa] sm:$0xff]  ;;  %v14441_v61 = vpack.c.bf16 %v6570_v15, %v6569_v16  ;;  %v6579_v23 = vld [vmem:[#allocation2 + $0x152] sm:$0xff] }
 0x63d   : > { %v14435_v36 = vpack.c.bf16 %v6568_v44, %v6567_v2  ;;  %v14459_v37 = vpack.c.bf16 %v6580_v8, %v6579_v23  ;;  %v6581_v45 = vld [vmem:[#allocation2 + $0x16a] sm:$0xff]  ;;  %v6582_v27 = vld [vmem:[#allocation2 + $0x172] sm:$0xff]  ;;  %v6903_v44 = vld [vmem:[#allocation2 + $0x180] sm:$0xff] }
 0x63e   : > { %v14465_v30 = vpack.c.bf16 %v6582_v27, %v6581_v45  ;;  %v11844_v58 = vld [vmem:[%s14857_s7 + $0x1a8] sm:$0xff]   ;;  %v11845_v35 = vld [vmem:[%s14857_s7 + $0x1b0] sm:$0xff]  }
 0x63f   : > { %v6904_v2 = vld [vmem:[#allocation2 + $0x188] sm:$0xff]  ;;  %v8172_v23 = vld [vmem:[#allocation2 + $0xb1] sm:$0xff] }
 0x640   : > { %v14511_v16 = vpack.c.bf16 %v6904_v2, %v6903_v44  ;;  %v11848_v15 = vld [vmem:[%s14857_s7 + $0x1c8] sm:$0xff]   ;;  %v8175_v2 = vld [vmem:[#allocation2 + $0xd9] sm:$0xff] }
 0x641   : > { %v8174_v8 = vld [vmem:[#allocation2 + $0xc9] sm:$0xff] }
 0x642   : > { %10911 = vmatmul.mubr.msk.bf16.vlgmr.msra.gmra.mrb[128].mxu1 %vm1681_vm1, %v14323_v42  ;;  %v8171_v45 = vld [vmem:[#allocation2 + $0xa9] sm:$0xff] }
 0x643   : > { %10943 = vmatpush3.bf16.msra.mxu1 %v14183_v60  ;;  %10914 = vmatprep.mubr.msk.bf16.mxu1 %vm1681_vm1, %v14328_v47  ;;  %v11838_v60 = vld [vmem:[%s14857_s7 + $0x178] sm:$0xff]   ;;  %v8198_v27 = vpack.c.bf16 %v8172_v23, %v8171_v45  ;;  %v11886_v23 = vld [vmem:[%s12485_s20 + $0x28] sm:$0xff] }
 0x644   : > { %10944 = vmatprep.subr.bf16.mxu1 %v11836_v5 }
 0x647   : > { %10945 = vmatpush3.bf16.msra.mxu1 %v11836_v5  ;;  %v6554_v5 = vld [vmem:[#allocation2 + $0x22] sm:$0xff] }
 0x648   : > { %10946 = vmatprep.subr.bf16.mxu1 %v11837_v55  ;;  %v14397_v10 = vpack.c.bf16 %v6554_v5, %v6553_v3  ;;  %v6573_v3 = vld [vmem:[#allocation2 + $0x10a] sm:$0xff]  ;;  %v6574_v5 = vld [vmem:[#allocation2 + $0x112] sm:$0xff] }
 0x64a   : > { %10915 = vmatmul.mubr.msk.bf16.gmra.mrb[132].mxu1 %vm1681_vm1, %v14338_v57 }
 0x64b   : > { %10918 = vmatprep.mubr.msk.bf16.mxu1 %vm1681_vm1, %v14343_v40  ;;  %10947 = vmatpush3.bf16.msra.mxu1 %v11837_v55  ;;  %v6555_v55 = vld [vmem:[#allocation2 + $0x32] sm:$0xff] }
 0x64c   : > { %10948 = vmatprep.subr.bf16.mxu1 %v11838_v60  ;;  %v14402_v38 = vpack.c.bf16 %v6556_v34, %v6555_v55  ;;  %v6575_v55 = vld [vmem:[#allocation2 + $0x122] sm:$0xff]  ;;  %v6576_v34 = vld [vmem:[#allocation2 + $0x12a] sm:$0xff] }
 0x64f   : > { %10949 = vmatpush3.bf16.msra.mxu1 %v11838_v60  ;;  %v11841_v60 = vld [vmem:[%s14857_s7 + $0x190] sm:$0xff]  }
 0x650   : > { %10982 = vmatprep.subr.bf16.mxu1 %v11839_v51 }
 0x652   : > { %10919 = vmatmul.mubr.msk.bf16.gmra.mrb[136].mxu1 %vm1681_vm1, %v14352_v20 }
 0x653   : > { %10922 = vmatprep.mubr.msk.bf16.mxu1 %vm1681_vm1, %v14354_v17 }
 0x65a   : > { %10923 = vmatmul.mubr.msk.bf16.gmra.mrb[140].mxu1 %vm1681_vm1, %v14360_v33 }
 0x65b   : > { %10926 = vmatprep.mubr.msk.bf16.mxu1 %vm1681_vm1, %v14362_v50 }
 0x662   : > { %10927 = vmatmul.mubr.msk.bf16.gmra.mrb[144].mxu1 %vm1681_vm1, %v14368_v22 }
 0x663   : > { %10930 = vmatprep.mubr.msk.bf16.mxu1 %vm1681_vm1, %v14370_v11 }
 0x66a   : > { %10931 = vmatmul.mubr.msk.bf16.gmra.mrb[148].mxu1 %vm1681_vm1, %v14376_v0 }
 0x66b   : > { %10934 = vmatprep.mubr.msk.bf16.mxu1 %vm1681_vm1, %v14378_v14 }
 0x672   : > { %10935 = vmatmul.mubr.msk.bf16.gmra.mrb[152].mxu1 %vm1681_vm1, %v14384_v7 }
 0x673   : > { %10938 = vmatprep.mubr.msk.bf16.mxu1 %vm1681_vm1, %v14386_v62 }
 0x67a   : > { %10939 = vmatmul.mubr.msk.bf16.gmra.mrb[156].mxu1 %vm1681_vm1, %v14392_v31 }
 0x67b   : > { %10950 = vmatprep.mubr.msk.bf16.mxu1 %vm1681_vm1, %v6583_v56  ;;  %v14443_v56 = vpack.c.bf16 %v6572_v63, %v6571_v25  ;;  %v11849_v25 = vld [vmem:[%s14857_s7 + $0x1d0] sm:$0xff]   ;;  %v8168_v63 = vld [vmem:[#allocation2 + $0x81] sm:$0xff] }
 0x682   : > { %10951 = vmatmul.mubr.msk.bf16.vlgmr.msra.gmra.mrb[128].mxu1 %vm1681_vm1, %v14397_v10 }
 0x683   : > { %10983 = vmatpush3.bf16.msra.mxu1 %v11839_v51  ;;  %10954 = vmatprep.mubr.msk.bf16.mxu1 %vm1681_vm1, %v14402_v38  ;;  %v11842_v51 = vld [vmem:[%s14857_s7 + $0x198] sm:$0xff]  }
 0x684   : > { %10984 = vmatprep.subr.bf16.mxu1 %v11840_v13 }
 0x687   : > { %10985 = vmatpush3.bf16.msra.mxu1 %v11840_v13  ;;  %v14449_v13 = vpack.c.bf16 %v6574_v5, %v6573_v3  ;;  %v8170_v3 = vld [vmem:[#allocation2 + $0x99] sm:$0xff] }
 0x688   : > { %10986 = vmatprep.subr.bf16.mxu1 %v11841_v60  ;;  %v8167_v5 = vld [vmem:[#allocation2 + $0x79] sm:$0xff] }
 0x68a   : > { %10955 = vmatmul.mubr.msk.bf16.gmra.mrb[132].mxu1 %vm1681_vm1, %v14411_v28 }
 0x68b   : > { %10958 = vmatprep.mubr.msk.bf16.mxu1 %vm1681_vm1, %v14416_v49  ;;  %10987 = vmatpush3.bf16.msra.mxu1 %v11841_v60  ;;  %v14451_v60 = vpack.c.bf16 %v6576_v34, %v6575_v55  ;;  %v8196_v55 = vpack.c.bf16 %v8168_v63, %v8167_v5  ;;  %v8169_v34 = vld [vmem:[#allocation2 + $0x91] sm:$0xff]  ;;  %v11884_v5 = vld [vmem:[%s12485_s20 + $0x20] sm:$0xff] }
 0x68c   : > { %10988 = vmatprep.subr.bf16.mxu1 %v11842_v51 }
 0x68f   : > { %10989 = vmatpush3.bf16.msra.mxu1 %v11842_v51  ;;  %v14457_v51 = vpack.c.bf16 %v6578_v32, %v6577_v59  ;;  %v11862_v59 = vld [vmem:[%s14857_s7 + $0x238] sm:$0xff]   ;;  %v8197_v32 = vpack.c.bf16 %v8170_v3, %v8169_v34 }
 0x690   : > { %11022 = vmatprep.subr.bf16.mxu1 %v11843_v41 }
 0x692   : > { %10959 = vmatmul.mubr.msk.bf16.gmra.mrb[136].mxu1 %vm1681_vm1, %v14425_v9 }
 0x693   : > { %10962 = vmatprep.mubr.msk.bf16.mxu1 %vm1681_vm1, %v14427_v19 }
 0x69a   : > { %10963 = vmatmul.mubr.msk.bf16.gmra.mrb[140].mxu1 %vm1681_vm1, %v14433_v1 }
 0x69b   : > { %10966 = vmatprep.mubr.msk.bf16.mxu1 %vm1681_vm1, %v14435_v36 }
 0x6a2   : > { %10967 = vmatmul.mubr.msk.bf16.gmra.mrb[144].mxu1 %vm1681_vm1, %v14441_v61 }
 0x6a3   : > { %10970 = vmatprep.mubr.msk.bf16.mxu1 %vm1681_vm1, %v14443_v56 }
 0x6aa   : > { %10971 = vmatmul.mubr.msk.bf16.gmra.mrb[148].mxu1 %vm1681_vm1, %v14449_v13 }
 0x6ab   : > { %10974 = vmatprep.mubr.msk.bf16.mxu1 %vm1681_vm1, %v14451_v60 }
 0x6b2   : > { %10975 = vmatmul.mubr.msk.bf16.gmra.mrb[152].mxu1 %vm1681_vm1, %v14457_v51 }
 0x6b3   : > { %10978 = vmatprep.mubr.msk.bf16.mxu1 %vm1681_vm1, %v14459_v37 }
 0x6ba   : > { %10979 = vmatmul.mubr.msk.bf16.gmra.mrb[156].mxu1 %vm1681_vm1, %v14465_v30 }
 0x6bb   : > { %10990 = vmatprep.mubr.msk.bf16.mxu1 %vm1681_vm1, %v14323_v42  ;;  %v11846_v42 = vld [vmem:[%s14857_s7 + $0x1b8] sm:$0xff]  }
 0x6c2   : > { %10991 = vmatmul.mubr.msk.bf16.vlgmr.msra.gmra.mrb[128].mxu1 %vm1681_vm1, %v14328_v47 }
 0x6c3   : > { %11023 = vmatpush3.bf16.msra.mxu1 %v11843_v41  ;;  %10994 = vmatprep.mubr.msk.bf16.mxu1 %vm1681_vm1, %v14338_v57  ;;  %v11847_v41 = vld [vmem:[%s14857_s7 + $0x1c0] sm:$0xff]  }
 0x6c4   : > { %11024 = vmatprep.subr.bf16.mxu1 %v11844_v58 }
 0x6c7   : > { %11025 = vmatpush3.bf16.msra.mxu1 %v11844_v58  ;;  %v8173_v58 = vld [vmem:[#allocation2 + $0xc1] sm:$0xff] }
 0x6c8   : > { %11026 = vmatprep.subr.bf16.mxu1 %v11845_v35 }
 0x6ca   : > { %10995 = vmatmul.mubr.msk.bf16.gmra.mrb[132].mxu1 %vm1681_vm1, %v14343_v40 }
 0x6cb   : > { %10998 = vmatprep.mubr.msk.bf16.mxu1 %vm1681_vm1, %v14352_v20  ;;  %11027 = vmatpush3.bf16.msra.mxu1 %v11845_v35  ;;  %v8199_v35 = vpack.c.bf16 %v8174_v8, %v8173_v58 }
 0x6cc   : > { %11028 = vmatprep.subr.bf16.mxu1 %v11846_v42 }
 0x6cf   : > { %11029 = vmatpush3.bf16.msra.mxu1 %v11846_v42  ;;  %v8176_v42 = vld [vmem:[#allocation2 + $0xe1] sm:$0xff] }
 0x6d0   : > { %11062 = vmatprep.subr.bf16.mxu1 %v11847_v41  ;;  %v8200_v44 = vpack.c.bf16 %v8176_v42, %v8175_v2 }
 0x6d2   : > { %10999 = vmatmul.mubr.msk.bf16.gmra.mrb[136].mxu1 %vm1681_vm1, %v14354_v17 }
 0x6d3   : > { %11002 = vmatprep.mubr.msk.bf16.mxu1 %vm1681_vm1, %v14360_v33 }
 0x6da   : > { %11003 = vmatmul.mubr.msk.bf16.gmra.mrb[140].mxu1 %vm1681_vm1, %v14362_v50 }
 0x6db   : > { %11006 = vmatprep.mubr.msk.bf16.mxu1 %vm1681_vm1, %v14368_v22 }
 0x6e2   : > { %11007 = vmatmul.mubr.msk.bf16.gmra.mrb[144].mxu1 %vm1681_vm1, %v14370_v11 }
 0x6e3   : > { %11010 = vmatprep.mubr.msk.bf16.mxu1 %vm1681_vm1, %v14376_v0 }
 0x6ea   : > { %11011 = vmatmul.mubr.msk.bf16.gmra.mrb[148].mxu1 %vm1681_vm1, %v14378_v14 }
 0x6eb   : > { %11014 = vmatprep.mubr.msk.bf16.mxu1 %vm1681_vm1, %v14384_v7 }
 0x6f2   : > { %11015 = vmatmul.mubr.msk.bf16.gmra.mrb[152].mxu1 %vm1681_vm1, %v14386_v62 }
 0x6f3   : > { %11018 = vmatprep.mubr.msk.bf16.mxu1 %vm1681_vm1, %v14392_v31 }
 0x6fa   : > { %11019 = vmatmul.mubr.msk.bf16.gmra.mrb[156].mxu1 %vm1681_vm1, %v14511_v16 }
 0x6fb   : > { %11030 = vmatprep.mubr.msk.bf16.mxu1 %vm1681_vm1, %v14120_v46  ;;  %v11850_v46 = vld [vmem:[%s14857_s7 + $0x1d8] sm:$0xff]  }
 0x702   : > { %11031 = vmatmul.mubr.msk.bf16.vlgmr.msra.gmra.mrb[128].mxu1 %vm1681_vm1, %v14127_v26  ;;  %v11851_v26 = vld [vmem:[%s14857_s7 + $0x1e0] sm:$0xff]  }
 0x703   : > { %11063 = vmatpush3.bf16.msra.mxu1 %v11847_v41  ;;  %11034 = vmatprep.mubr.msk.bf16.mxu1 %vm1681_vm1, %v14159_v54  ;;  %v7226_v54 = vld [vmem:[#allocation2 + $0x189] sm:$0xff]  ;;  %v8178_v41 = vld [vmem:[#allocation2 + $0xf9] sm:$0xff] }
 0x704   : > { %11064 = vmatprep.subr.bf16.mxu1 %v11848_v15 }
 0x707   : > { %11065 = vmatpush3.bf16.msra.mxu1 %v11848_v15 }
 0x708   : > { %11066 = vmatprep.subr.bf16.mxu1 %v11849_v25 }
 0x70a   : > { %11035 = vmatmul.mubr.msk.bf16.gmra.mrb[132].mxu1 %vm1681_vm1, %v14166_v43  ;;  %v7225_v43 = vld [vmem:[#allocation2 + $0x181] sm:$0xff] }
 0x70b   : > { %11038 = vmatprep.mubr.msk.bf16.mxu1 %vm1681_vm1, %v14197_v53  ;;  %11067 = vmatpush3.bf16.msra.mxu1 %v11849_v25  ;;  %v14557_v53 = vpack.c.bf16 %v7226_v54, %v7225_v43  ;;  %v8180_v25 = vld [vmem:[#allocation2 + $0x111] sm:$0xff]  ;;  %v8181_v43 = vld [vmem:[#allocation2 + $0x121] sm:$0xff] }
 0x70c   : > { %11068 = vmatprep.subr.bf16.mxu1 %v11850_v46 }
 0x70f   : > { %11069 = vmatpush3.bf16.msra.mxu1 %v11850_v46  ;;  %v8182_v46 = vld [vmem:[#allocation2 + $0x129] sm:$0xff] }
 0x710   : > { %11102 = vmatprep.subr.bf16.mxu1 %v11851_v26 }
 0x712   : > { %11039 = vmatmul.mubr.msk.bf16.gmra.mrb[136].mxu1 %vm1681_vm1, %v14202_v39  ;;  %v11852_v39 = vld [vmem:[%s14857_s7 + $0x1e8] sm:$0xff]  }
 0x713   : > { %11042 = vmatprep.mubr.msk.bf16.mxu1 %vm1681_vm1, %v14228_v52  ;;  %v11853_v52 = vld [vmem:[%s14857_s7 + $0x1f0] sm:$0xff]  }
 0x71a   : > { %11043 = vmatmul.mubr.msk.bf16.gmra.mrb[140].mxu1 %vm1681_vm1, %v14232_v24  ;;  %v11854_v24 = vld [vmem:[%s14857_s7 + $0x1f8] sm:$0xff]  }
 0x71b   : > { %11046 = vmatprep.mubr.msk.bf16.mxu1 %vm1681_vm1, %v14258_v18  ;;  %v11855_v18 = vld [vmem:[%s14857_s7 + $0x200] sm:$0xff]  }
 0x722   : > { %11047 = vmatmul.mubr.msk.bf16.gmra.mrb[144].mxu1 %vm1681_vm1, %v14262_v4  ;;  %v7547_v4 = vld [vmem:[#allocation2 + $0x182] sm:$0xff] }
 0x723   : > { %11050 = vmatprep.mubr.msk.bf16.mxu1 %vm1681_vm1, %v14290_v29  ;;  %v7548_v29 = vld [vmem:[#allocation2 + $0x18a] sm:$0xff] }
 0x72a   : > { %11051 = vmatmul.mubr.msk.bf16.gmra.mrb[148].mxu1 %vm1681_vm1, %v14294_v48  ;;  %v14603_v48 = vpack.c.bf16 %v7548_v29, %v7547_v4  ;;  %v8185_v29 = vld [vmem:[#allocation2 + $0x151] sm:$0xff] }
 0x72b   : > { %11054 = vmatprep.mubr.msk.bf16.mxu1 %vm1681_vm1, %v14310_v12  ;;  %v11856_v12 = vld [vmem:[%s14857_s7 + $0x208] sm:$0xff]  }
 0x732   : > { %11055 = vmatmul.mubr.msk.bf16.gmra.mrb[152].mxu1 %vm1681_vm1, %v14312_v6  ;;  %v11857_v6 = vld [vmem:[%s14857_s7 + $0x210] sm:$0xff]  }
 0x733   : > { %11058 = vmatprep.mubr.msk.bf16.mxu1 %vm1681_vm1, %v14318_v21  ;;  %v11858_v21 = vld [vmem:[%s14857_s7 + $0x218] sm:$0xff]  }
 0x73a   : > { %11059 = vmatmul.mubr.msk.bf16.gmra.mrb[156].mxu1 %vm1681_vm1, %v14557_v53 }
 0x73b   : > { %11070 = vmatprep.mubr.msk.bf16.mxu1 %vm1681_vm1, %v14397_v10  ;;  %v11861_v10 = vld [vmem:[%s14857_s7 + $0x230] sm:$0xff]  }
 0x742   : > { %11071 = vmatmul.mubr.msk.bf16.vlgmr.msra.gmra.mrb[128].mxu1 %vm1681_vm1, %v14402_v38 }
 0x743   : > { %11103 = vmatpush3.bf16.msra.mxu1 %v11851_v26  ;;  %11074 = vmatprep.mubr.msk.bf16.mxu1 %vm1681_vm1, %v14411_v28  ;;  %v8179_v26 = vld [vmem:[#allocation2 + $0x109] sm:$0xff] }
 0x744   : > { %11104 = vmatprep.subr.bf16.mxu1 %v11852_v39  ;;  %v8202_v54 = vpack.c.bf16 %v8180_v25, %v8179_v26  ;;  %v11889_v26 = vld [vmem:[%s12485_s20 + $0x58] sm:$0xff] }
 0x747   : > { %11105 = vmatpush3.bf16.msra.mxu1 %v11852_v39  ;;  %v8203_v39 = vpack.c.bf16 %v8182_v46, %v8181_v43  ;;  %v11890_v43 = vld [vmem:[%s12485_s20 + $0x48] sm:$0xff] }
 0x748   : > { %11106 = vmatprep.subr.bf16.mxu1 %v11853_v52 }
 0x74a   : > { %11075 = vmatmul.mubr.msk.bf16.gmra.mrb[132].mxu1 %vm1681_vm1, %v14416_v49 }
 0x74b   : > { %11078 = vmatprep.mubr.msk.bf16.mxu1 %vm1681_vm1, %v14425_v9  ;;  %11107 = vmatpush3.bf16.msra.mxu1 %v11853_v52  ;;  %v8184_v52 = vld [vmem:[#allocation2 + $0x141] sm:$0xff] }
 0x74c   : > { %11108 = vmatprep.subr.bf16.mxu1 %v11854_v24 }
 0x74f   : > { %11109 = vmatpush3.bf16.msra.mxu1 %v11854_v24  ;;  %v8186_v24 = vld [vmem:[#allocation2 + $0x159] sm:$0xff] }
 0x750   : > { %11142 = vmatprep.subr.bf16.mxu1 %v11855_v18 }
 0x752   : > { %11079 = vmatmul.mubr.msk.bf16.gmra.mrb[136].mxu1 %vm1681_vm1, %v14427_v19 }
 0x753   : > { %11082 = vmatprep.mubr.msk.bf16.mxu1 %vm1681_vm1, %v14433_v1 }
 0x75a   : > { %11083 = vmatmul.mubr.msk.bf16.gmra.mrb[140].mxu1 %vm1681_vm1, %v14435_v36 }
 0x75b   : > { %11086 = vmatprep.mubr.msk.bf16.mxu1 %vm1681_vm1, %v14441_v61 }
 0x762   : > { %11087 = vmatmul.mubr.msk.bf16.gmra.mrb[144].mxu1 %vm1681_vm1, %v14443_v56 }
 0x763   : > { %11090 = vmatprep.mubr.msk.bf16.mxu1 %vm1681_vm1, %v14449_v13 }
 0x76a   : > { %11091 = vmatmul.mubr.msk.bf16.gmra.mrb[148].mxu1 %vm1681_vm1, %v14451_v60 }
 0x76b   : > { %11094 = vmatprep.mubr.msk.bf16.mxu1 %vm1681_vm1, %v14457_v51 }
 0x772   : > { %11095 = vmatmul.mubr.msk.bf16.gmra.mrb[152].mxu1 %vm1681_vm1, %v14459_v37 }
 0x773   : > { %11098 = vmatprep.mubr.msk.bf16.mxu1 %vm1681_vm1, %v14465_v30 }
 0x77a   : > { %11099 = vmatmul.mubr.msk.bf16.gmra.mrb[156].mxu1 %vm1681_vm1, %v14603_v48 }
 0x77b   : > { %11110 = vmatprep.mubr.msk.bf16.mxu1 %vm1681_vm1, %v14328_v47  ;;  %v11859_v47 = vld [vmem:[%s14857_s7 + $0x220] sm:$0xff]  }
 0x782   : > { %11111 = vmatmul.mubr.msk.bf16.vlgmr.msra.gmra.mrb[128].mxu1 %vm1681_vm1, %v14338_v57  ;;  %v7869_v57 = vld [vmem:[#allocation2 + $0x198] sm:$0xff] }
 0x783   : > { %11143 = vmatpush3.bf16.msra.mxu1 %v11855_v18  ;;  %11114 = vmatprep.mubr.msk.bf16.mxu1 %vm1681_vm1, %v14343_v40  ;;  %v7870_v40 = vld [vmem:[#allocation2 + $0x1a0] sm:$0xff] }
 0x784   : > { %11144 = vmatprep.subr.bf16.mxu1 %v11856_v12  ;;  %v8183_v18 = vld [vmem:[#allocation2 + $0x139] sm:$0xff] }
 0x785   : > { %v8204_v4 = vpack.c.bf16 %v8184_v52, %v8183_v18 }
 0x787   : > { %11145 = vmatpush3.bf16.msra.mxu1 %v11856_v12  ;;  %v8205_v12 = vpack.c.bf16 %v8186_v24, %v8185_v29 }
 0x788   : > { %11146 = vmatprep.subr.bf16.mxu1 %v11857_v6 }
 0x78a   : > { %11115 = vmatmul.mubr.msk.bf16.gmra.mrb[132].mxu1 %vm1681_vm1, %v14352_v20  ;;  %v7886_v20 = vpack.c.bf16 %v7870_v40, %v7869_v57  ;;  %v8191_v57 = vld [vmem:[#allocation2 + $0x199] sm:$0xff]  ;;  %v8192_v40 = vld [vmem:[#allocation2 + $0x1a1] sm:$0xff] }
 0x78b   : > { %11118 = vmatprep.mubr.msk.bf16.mxu1 %vm1681_vm1, %v14354_v17  ;;  %11147 = vmatpush3.bf16.msra.mxu1 %v11857_v6  ;;  %v8162_v17 = vld [vmem:[#allocation2 + $0x39] sm:$0xff]  ;;  %v8188_v6 = vld [vmem:[#allocation2 + $0x171] sm:$0xff] }
 0x78c   : > { %11148 = vmatprep.subr.bf16.mxu1 %v11858_v21 }
 0x78f   : > { %11149 = vmatpush3.bf16.msra.mxu1 %v11858_v21  ;;  %v8187_v21 = vld [vmem:[#allocation2 + $0x169] sm:$0xff] }
 0x790   : > { %11182 = vmatprep.subr.bf16.mxu1 %v11859_v47 }
 0x792   : > { %11119 = vmatmul.mubr.msk.bf16.gmra.mrb[136].mxu1 %vm1681_vm1, %v14360_v33  ;;  %v8161_v33 = vld [vmem:[#allocation2 + $0x31] sm:$0xff] }
 0x793   : > { %11122 = vmatprep.mubr.msk.bf16.mxu1 %vm1681_vm1, %v14362_v50  ;;  %v8193_v50 = vpack.c.bf16 %v8162_v17, %v8161_v33  ;;  %v11881_v17 = vld [vmem:[%s12485_s20 + $0x18] sm:$0xff] }
 0x79a   : > { %11123 = vmatmul.mubr.msk.bf16.gmra.mrb[140].mxu1 %vm1681_vm1, %v14368_v22  ;;  %v8164_v22 = vld [vmem:[#allocation2 + $0x51] sm:$0xff] }
 0x79b   : > { %11126 = vmatprep.mubr.msk.bf16.mxu1 %vm1681_vm1, %v14370_v11  ;;  %v8166_v11 = vld [vmem:[#allocation2 + $0x69] sm:$0xff] }
 0x7a2   : > { %11127 = vmatmul.mubr.msk.bf16.gmra.mrb[144].mxu1 %vm1681_vm1, %v14376_v0  ;;  %v8163_v0 = vld [vmem:[#allocation2 + $0x49] sm:$0xff] }
 0x7a3   : > { %11130 = vmatprep.mubr.msk.bf16.mxu1 %vm1681_vm1, %v14378_v14  ;;  %v8194_v14 = vpack.c.bf16 %v8164_v22, %v8163_v0 }
 0x7aa   : > { %11131 = vmatmul.mubr.msk.bf16.gmra.mrb[148].mxu1 %vm1681_vm1, %v14384_v7  ;;  %v8165_v7 = vld [vmem:[#allocation2 + $0x61] sm:$0xff] }
 0x7ab   : > { %11134 = vmatprep.mubr.msk.bf16.mxu1 %vm1681_vm1, %v14386_v62  ;;  %v11860_v62 = vld [vmem:[%s14857_s7 + $0x228] sm:$0xff]  }
 0x7b2   : > { %11135 = vmatmul.mubr.msk.bf16.gmra.mrb[152].mxu1 %vm1681_vm1, %v14392_v31  ;;  %v8195_v31 = vpack.c.bf16 %v8166_v11, %v8165_v7 }
 0x7b3   : > { %11138 = vmatprep.mubr.msk.bf16.mxu1 %vm1681_vm1, %v14511_v16  ;;  %v8177_v16 = vld [vmem:[#allocation2 + $0xf1] sm:$0xff] }
 0x7b4   : > { %v8201_v15 = vpack.c.bf16 %v8178_v41, %v8177_v16  ;;  %v11887_v41 = vld [vmem:[%s12485_s20 + $0x50] sm:$0xff] }
 0x7ba   : > { %11139 = vmatmul.mubr.msk.bf16.gmra.mrb[156].mxu1 %vm1681_vm1, %v7886_v20  ;;  %v8208_v20 = vpack.c.bf16 %v8192_v40, %v8191_v57  ;;  %v11892_v57 = vld [vmem:[%s12485_s20 + $0x60] sm:$0xff] }
 0x7bb   : > { %11150 = vmatprep.mubr.msk.bf16.mxu1 %vm1681_vm1, %v8193_v50  ;;  %v11882_v50 = vld [vmem:[%s12485_s20 + $0x8] sm:$0xff] }
 0x7c2   : > { %11151 = vmatmul.mubr.msk.bf16.vlgmr.msra.gmra.mrb[128].mxu1 %vm1681_vm1, %v8194_v14 }
 0x7c3   : > { %11183 = vmatpush3.bf16.msra.mxu1 %v11859_v47  ;;  %11154 = vmatprep.mubr.msk.bf16.mxu1 %vm1681_vm1, %v8195_v31  ;;  %v8206_v47 = vpack.c.bf16 %v8188_v6, %v8187_v21  ;;  %v11883_v31 = vld [vmem:[%s12485_s20 + $0x30] sm:$0xff] }
 0x7c4   : > { %11184 = vmatprep.subr.bf16.mxu1 %v11860_v62 }
 0x7c7   : > { %11185 = vmatpush3.bf16.msra.mxu1 %v11860_v62 }
 0x7c8   : > { %11186 = vmatprep.subr.bf16.mxu1 %v11861_v10 }
 0x7ca   : > { %11155 = vmatmul.mubr.msk.bf16.gmra.mrb[132].mxu1 %vm1681_vm1, %v8196_v55 }
 0x7cb   : > { %11158 = vmatprep.mubr.msk.bf16.mxu1 %vm1681_vm1, %v8197_v32  ;;  %11187 = vmatpush3.bf16.msra.mxu1 %v11861_v10 }
 0x7cc   : > { %11188 = vmatprep.subr.bf16.mxu1 %v11862_v59 }
 0x7cf   : > { %11189 = vmatpush3.bf16.msra.mxu1 %v11862_v59  ;;  %v11885_v59 = vld [vmem:[%s12485_s20 + $0x38] sm:$0xff] }
 0x7d2   : > { %11159 = vmatmul.mubr.msk.bf16.gmra.mrb[136].mxu1 %vm1681_vm1, %v8198_v27 }
 0x7d3   : > { %11162 = vmatprep.mubr.msk.bf16.mxu1 %vm1681_vm1, %v8199_v35 }
 0x7da   : > { %11163 = vmatmul.mubr.msk.bf16.gmra.mrb[140].mxu1 %vm1681_vm1, %v8200_v44 }
 0x7db   : > { %11166 = vmatprep.mubr.msk.bf16.mxu1 %vm1681_vm1, %v8201_v15  ;;  %v11888_v15 = vld [vmem:[%s12485_s20 + $0x40] sm:$0xff] }
 0x7e2   : > { %11167 = vmatmul.mubr.msk.bf16.gmra.mrb[144].mxu1 %vm1681_vm1, %v8202_v54 }
 0x7e3   : > { %11170 = vmatprep.mubr.msk.bf16.mxu1 %vm1681_vm1, %v8203_v39 }
 0x7ea   : > { %11171 = vmatmul.mubr.msk.bf16.gmra.mrb[148].mxu1 %vm1681_vm1, %v8204_v4 }
 0x7eb   : > { %11174 = vmatprep.mubr.msk.bf16.mxu1 %vm1681_vm1, %v8205_v12  ;;  %v11891_v12 = vld [vmem:[%s12485_s20 + $0x70] sm:$0xff] }
 0x7f2   : > { %11175 = vmatmul.mubr.msk.bf16.gmra.mrb[152].mxu1 %vm1681_vm1, %v8206_v47 }
 0x7f3   : > { %11178 = vmatprep.mubr.msk.bf16.mxu1 %vm1681_vm1, %v14557_v53 }
 0x7fa   : > { %11179 = vmatmul.mubr.msk.bf16.gmra.mrb[156].mxu1 %vm1681_vm1, %v8208_v20 }
 0x7fb   : > { %11190 = vmatprep.mubr.msk.bf16.mxu1 %vm1681_vm1, %v14402_v38  ;;  %v8513_v38 = vld [vmem:[#allocation2 + $0x19a] sm:$0xff] }
 0x802   : > { %11191 = vmatmul.mubr.msk.bf16.vlgmr.msra.gmra.mrb[128].mxu1 %vm1681_vm1, %v14411_v28  ;;  %v8514_v28 = vld [vmem:[#allocation2 + $0x1a2] sm:$0xff] }
 0x803   : > { %11194 = vmatprep.mubr.msk.bf16.mxu1 %vm1681_vm1, %v14416_v49  ;;  %v8530_v49 = vpack.c.bf16 %v8514_v28, %v8513_v38  ;;  %v11893_v38 = vld [vmem:[%s12485_s20 + $0x78] sm:$0xff] }
 0x80a   : > { %11195 = vmatmul.mubr.msk.bf16.gmra.mrb[132].mxu1 %vm1681_vm1, %v14425_v9  ;;  %v14710_v9 = vld [vmem:[%s14858_s8 + $0x1] ss:$0 sm:$0xff] }
 0x80b   : > { %11198 = vmatprep.mubr.msk.bf16.mxu1 %vm1681_vm1, %v14427_v19 }
 0x812   : > { %11199 = vmatmul.mubr.msk.bf16.gmra.mrb[136].mxu1 %vm1681_vm1, %v14433_v1 }
 0x813   : > { %11202 = vmatprep.mubr.msk.bf16.mxu1 %vm1681_vm1, %v14435_v36 }
 0x81a   : > { %11203 = vmatmul.mubr.msk.bf16.gmra.mrb[140].mxu1 %vm1681_vm1, %v14441_v61 }
 0x81b   : > { %11206 = vmatprep.mubr.msk.bf16.mxu1 %vm1681_vm1, %v14443_v56 }
 0x822   : > { %11207 = vmatmul.mubr.msk.bf16.gmra.mrb[144].mxu1 %vm1681_vm1, %v14449_v13  ;;  %v11879_v13 = vld [vmem:[%s12485_s20 + $0x10] sm:$0xff] }
 0x823   : > { %11210 = vmatprep.mubr.msk.bf16.mxu1 %vm1681_vm1, %v14451_v60 }
 0x82a   : > { %11211 = vmatmul.mubr.msk.bf16.gmra.mrb[148].mxu1 %vm1681_vm1, %v14457_v51 }
 0x82b   : > { %11214 = vmatprep.mubr.msk.bf16.mxu1 %vm1681_vm1, %v14459_v37 }
 0x832   : > { %11215 = vmatmul.mubr.msk.bf16.gmra.mrb[152].mxu1 %vm1681_vm1, %v14465_v30  ;;  %v11880_v30 = vld [vmem:[%s12485_s20] sm:$0xff] }
 0x833   : > { %11218 = vmatprep.mubr.msk.bf16.mxu1 %vm1681_vm1, %v14603_v48 }
 0x83a   : > { %11219 = vmatmul.mubr.msk.bf16.gmra.mrb[156].mxu1 %vm1681_vm1, %v8530_v49  ;;  %v11894_v49 = vld [vmem:[%s12485_s20 + $0x68] sm:$0xff] }
 0x8d5   : > { %v11192_v19 = vpop.f32.mrb[128].mxu1 }
 0x8d6   : > { %v8812_v1 = vadd.f32 %v11192_v19, %v14710_v9  ;;  %v8646_v36 = vpop.f32.mrb[129].mxu1 }
 0x8d7   : > { %v8810_v61 = vadd.f32 %v14710_v9, %v8646_v36  ;;  %v11193_v56 = vpop.f32.mrb[130].mxu1 }
 0x8d8   : > { %v8844_v60 = vadd.f32 %v11879_v13, %v8812_v1  ;;  %v8813_v51 = vadd.f32 %v11193_v56, %v14710_v9  ;;  %v8649_v37 = vpop.f32.mrb[131].mxu1 }
 0x8d9   : > { %v8842_v53 = vadd.f32 %v11880_v30, %v8810_v61  ;;  %v8811_v48 = vadd.f32 %v14710_v9, %v8649_v37 }
 0x8da   : > { %8876 = vst.msk [vmem:[%s14718_s13 + $0x10] sm:$0xff] %vm1681_vm1, %v8844_v60  ;;  %v8845_v33 = vadd.f32 %v11881_v17, %v8813_v51  ;;  %v11895_v60 = vld [vmem:[%s12485_s20 + $0x90] sm:$0xff] }
 0x8db   : > { %8874 = vst.msk [vmem:[%s14718_s13] sm:$0xff] %vm1681_vm1, %v8842_v53  ;;  %v8843_v22 = vadd.f32 %v11882_v50, %v8811_v48  ;;  %v11896_v53 = vld [vmem:[%s12485_s20 + $0x80] sm:$0xff] }
 0x8dc   : > { %8877 = vst.msk [vmem:[%s14718_s13 + $0x18] sm:$0xff] %vm1681_vm1, %v8845_v33  ;;  %v11897_v33 = vld [vmem:[%s12485_s20 + $0x98] sm:$0xff] }
 0x8dd   : > { %8875 = vst.msk [vmem:[%s14718_s13 + $0x8] sm:$0xff] %vm1681_vm1, %v8843_v22  ;;  %v11196_v11 = vpop.f32.mrb[132].mxu1  ;;  %v11898_v22 = vld [vmem:[%s12485_s20 + $0x88] sm:$0xff] }
 0x8de   : > { %v8816_v0 = vadd.f32 %v11196_v11, %v14710_v9  ;;  %v8662_v14 = vpop.f32.mrb[133].mxu1 }
 0x8df   : > { %v8814_v7 = vadd.f32 %v14710_v9, %v8662_v14  ;;  %v11197_v62 = vpop.f32.mrb[134].mxu1 }
 0x8e0   : > { %v8848_v10 = vadd.f32 %v11883_v31, %v8816_v0  ;;  %v8817_v63 = vadd.f32 %v11197_v62, %v14710_v9  ;;  %v8665_v3 = vpop.f32.mrb[135].mxu1 }
 0x8e1   : > { %v8846_v55 = vadd.f32 %v11884_v5, %v8814_v7  ;;  %v8815_v34 = vadd.f32 %v14710_v9, %v8665_v3 }
 0x8e2   : > { %8880 = vst.msk [vmem:[%s14718_s13 + $0x30] sm:$0xff] %vm1681_vm1, %v8848_v10  ;;  %v8849_v32 = vadd.f32 %v11885_v59, %v8817_v63  ;;  %v11899_v10 = vld [vmem:[%s12485_s20 + $0xb0] sm:$0xff] }
 0x8e3   : > { %8878 = vst.msk [vmem:[%s14718_s13 + $0x20] sm:$0xff] %vm1681_vm1, %v8846_v55  ;;  %v8847_v8 = vadd.f32 %v11886_v23, %v8815_v34  ;;  %v11900_v55 = vld [vmem:[%s12485_s20 + $0xa0] sm:$0xff] }
 0x8e4   : > { %8881 = vst.msk [vmem:[%s14718_s13 + $0x38] sm:$0xff] %vm1681_vm1, %v8849_v32  ;;  %v11901_v32 = vld [vmem:[%s12485_s20 + $0xb8] sm:$0xff] }
 0x8e5   : > { %8879 = vst.msk [vmem:[%s14718_s13 + $0x28] sm:$0xff] %vm1681_vm1, %v8847_v8  ;;  %v11200_v45 = vpop.f32.mrb[136].mxu1  ;;  %v11902_v8 = vld [vmem:[%s12485_s20 + $0xa8] sm:$0xff] }
 0x8e6   : > { %v8820_v27 = vadd.f32 %v11200_v45, %v14710_v9  ;;  %v8678_v58 = vpop.f32.mrb[137].mxu1 }
 0x8e7   : > { %v8818_v35 = vadd.f32 %v14710_v9, %v8678_v58  ;;  %v11201_v42 = vpop.f32.mrb[138].mxu1 }
 0x8e8   : > { %v8852_v2 = vadd.f32 %v11887_v41, %v8820_v27  ;;  %v8821_v44 = vadd.f32 %v11201_v42, %v14710_v9  ;;  %v8681_v16 = vpop.f32.mrb[139].mxu1 }
 0x8e9   : > { %v8850_v25 = vadd.f32 %v11888_v15, %v8818_v35  ;;  %v8819_v46 = vadd.f32 %v14710_v9, %v8681_v16 }
 0x8ea   : > { %8884 = vst.msk [vmem:[%s14718_s13 + $0x50] sm:$0xff] %vm1681_vm1, %v8852_v2  ;;  %v8853_v54 = vadd.f32 %v11889_v26, %v8821_v44  ;;  %v11903_v2 = vld [vmem:[%s12485_s20 + $0xd0] sm:$0xff] }
 0x8eb   : > { %8882 = vst.msk [vmem:[%s14718_s13 + $0x40] sm:$0xff] %vm1681_vm1, %v8850_v25  ;;  %v8851_v39 = vadd.f32 %v11890_v43, %v8819_v46  ;;  %v11904_v25 = vld [vmem:[%s12485_s20 + $0xc0] sm:$0xff] }
 0x8ec   : > { %8885 = vst.msk [vmem:[%s14718_s13 + $0x58] sm:$0xff] %vm1681_vm1, %v8853_v54  ;;  %v11905_v54 = vld [vmem:[%s12485_s20 + $0xd8] sm:$0xff] }
 0x8ed   : > { %8883 = vst.msk [vmem:[%s14718_s13 + $0x48] sm:$0xff] %vm1681_vm1, %v8851_v39  ;;  %v11204_v52 = vpop.f32.mrb[140].mxu1  ;;  %v11906_v39 = vld [vmem:[%s12485_s20 + $0xc8] sm:$0xff] }
 0x8ee   : > { %v8824_v24 = vadd.f32 %v11204_v52, %v14710_v9  ;;  %v8694_v18 = vpop.f32.mrb[141].mxu1 }
 0x8ef   : > { %v8822_v4 = vadd.f32 %v14710_v9, %v8694_v18  ;;  %v11205_v29 = vpop.f32.mrb[142].mxu1 }
 0x8f0   : > { %v8856_v6 = vadd.f32 %v11891_v12, %v8824_v24  ;;  %v8825_v21 = vadd.f32 %v11205_v29, %v14710_v9  ;;  %v8697_v47 = vpop.f32.mrb[143].mxu1 }
 0x8f1   : > { %v8854_v40 = vadd.f32 %v11892_v57, %v8822_v4  ;;  %v8823_v20 = vadd.f32 %v14710_v9, %v8697_v47 }
 0x8f2   : > { %8888 = vst.msk [vmem:[%s14718_s13 + $0x70] sm:$0xff] %vm1681_vm1, %v8856_v6  ;;  %v8857_v28 = vadd.f32 %v11893_v38, %v8825_v21  ;;  %v11907_v6 = vld [vmem:[%s12485_s20 + $0xf0] sm:$0xff] }
 0x8f3   : > { %8886 = vst.msk [vmem:[%s14718_s13 + $0x60] sm:$0xff] %vm1681_vm1, %v8854_v40  ;;  %v8855_v19 = vadd.f32 %v11894_v49, %v8823_v20  ;;  %v11908_v40 = vld [vmem:[%s12485_s20 + $0xe0] sm:$0xff] }
 0x8f4   : > { %8889 = vst.msk [vmem:[%s14718_s13 + $0x78] sm:$0xff] %vm1681_vm1, %v8857_v28  ;;  %v11909_v28 = vld [vmem:[%s12485_s20 + $0xf8] sm:$0xff] }
 0x8f5   : > { %8887 = vst.msk [vmem:[%s14718_s13 + $0x68] sm:$0xff] %vm1681_vm1, %v8855_v19  ;;  %v11208_v1 = vpop.f32.mrb[144].mxu1  ;;  %v11910_v19 = vld [vmem:[%s12485_s20 + $0xe8] sm:$0xff] }
 0x8f6   : > { %v8828_v36 = vadd.f32 %v11208_v1, %v14710_v9  ;;  %v8710_v61 = vpop.f32.mrb[145].mxu1 }
 0x8f7   : > { %v8826_v56 = vadd.f32 %v14710_v9, %v8710_v61  ;;  %v11209_v13 = vpop.f32.mrb[146].mxu1 }
 0x8f8   : > { %v8860_v51 = vadd.f32 %v11895_v60, %v8828_v36  ;;  %v8829_v37 = vadd.f32 %v11209_v13, %v14710_v9  ;;  %v8713_v30 = vpop.f32.mrb[147].mxu1 }
 0x8f9   : > { %v8858_v48 = vadd.f32 %v11896_v53, %v8826_v56  ;;  %v8827_v17 = vadd.f32 %v14710_v9, %v8713_v30 }
 0x8fa   : > { %8892 = vst.msk [vmem:[%s14718_s13 + $0x90] sm:$0xff] %vm1681_vm1, %v8860_v51  ;;  %v8861_v50 = vadd.f32 %v11897_v33, %v8829_v37 }
 0x8fb   : > { %8890 = vst.msk [vmem:[%s14718_s13 + $0x80] sm:$0xff] %vm1681_vm1, %v8858_v48  ;;  %v8859_v11 = vadd.f32 %v11898_v22, %v8827_v17 }
 0x8fc   : > { %8893 = vst.msk [vmem:[%s14718_s13 + $0x98] sm:$0xff] %vm1681_vm1, %v8861_v50 }
 0x8fd   : > { %8891 = vst.msk [vmem:[%s14718_s13 + $0x88] sm:$0xff] %vm1681_vm1, %v8859_v11  ;;  %v11212_v0 = vpop.f32.mrb[148].mxu1 }
 0x8fe   : > { %v8832_v14 = vadd.f32 %v11212_v0, %v14710_v9  ;;  %v8726_v7 = vpop.f32.mrb[149].mxu1 }
 0x8ff   : > { %v8830_v62 = vadd.f32 %v14710_v9, %v8726_v7  ;;  %v11213_v31 = vpop.f32.mrb[150].mxu1 }
 0x900   : > { %v8864_v63 = vadd.f32 %v11899_v10, %v8832_v14  ;;  %v8833_v3 = vadd.f32 %v11213_v31, %v14710_v9  ;;  %v8729_v5 = vpop.f32.mrb[151].mxu1 }
 0x901   : > { %v8862_v34 = vadd.f32 %v11900_v55, %v8830_v62  ;;  %v8831_v59 = vadd.f32 %v14710_v9, %v8729_v5 }
 0x902   : > { %8896 = vst.msk [vmem:[%s14718_s13 + $0xb0] sm:$0xff] %vm1681_vm1, %v8864_v63  ;;  %v8865_v23 = vadd.f32 %v11901_v32, %v8833_v3 }
 0x903   : > { %8894 = vst.msk [vmem:[%s14718_s13 + $0xa0] sm:$0xff] %vm1681_vm1, %v8862_v34  ;;  %v8863_v45 = vadd.f32 %v11902_v8, %v8831_v59 }
 0x904   : > { %8897 = vst.msk [vmem:[%s14718_s13 + $0xb8] sm:$0xff] %vm1681_vm1, %v8865_v23 }
 0x905   : > { %8895 = vst.msk [vmem:[%s14718_s13 + $0xa8] sm:$0xff] %vm1681_vm1, %v8863_v45  ;;  %v11216_v27 = vpop.f32.mrb[152].mxu1 }
 0x906   : > { %v8836_v58 = vadd.f32 %v11216_v27, %v14710_v9  ;;  %v8742_v35 = vpop.f32.mrb[153].mxu1 }
 0x907   : > { %v8834_v42 = vadd.f32 %v14710_v9, %v8742_v35  ;;  %v11217_v41 = vpop.f32.mrb[154].mxu1 }
 0x908   : > { %v8868_v44 = vadd.f32 %v11903_v2, %v8836_v58  ;;  %v8837_v16 = vadd.f32 %v11217_v41, %v14710_v9  ;;  %v8745_v15 = vpop.f32.mrb[155].mxu1 }
 0x909   : > { %v8866_v46 = vadd.f32 %v11904_v25, %v8834_v42  ;;  %v8835_v26 = vadd.f32 %v14710_v9, %v8745_v15 }
 0x90a   : > { %8900 = vst.msk [vmem:[%s14718_s13 + $0xd0] sm:$0xff] %vm1681_vm1, %v8868_v44  ;;  %v8869_v43 = vadd.f32 %v11905_v54, %v8837_v16 }
 0x90b   : > { %8898 = vst.msk [vmem:[%s14718_s13 + $0xc0] sm:$0xff] %vm1681_vm1, %v8866_v46  ;;  %v8867_v52 = vadd.f32 %v11906_v39, %v8835_v26 }
 0x90c   : > { %8901 = vst.msk [vmem:[%s14718_s13 + $0xd8] sm:$0xff] %vm1681_vm1, %v8869_v43 }
 0x90d   : > { %8899 = vst.msk [vmem:[%s14718_s13 + $0xc8] sm:$0xff] %vm1681_vm1, %v8867_v52  ;;  %v11220_v24 = vpop.f32.mrb[156].mxu1 }
 0x90e   : > { %v8840_v18 = vadd.f32 %v11220_v24, %v14710_v9  ;;  %v8758_v4 = vpop.f32.mrb[157].mxu1 }
 0x90f   : > { %v8838_v29 = vadd.f32 %v14710_v9, %v8758_v4  ;;  %v11221_v12 = vpop.f32.mrb[158].mxu1 }
 0x910   : > { %v8872_v21 = vadd.f32 %v11907_v6, %v8840_v18  ;;  %v8841_v47 = vadd.f32 %v11221_v12, %v14710_v9  ;;  %v8761_v57 = vpop.f32.mrb[159].mxu1 }
 0x911   : > { %v8870_v20 = vadd.f32 %v11908_v40, %v8838_v29  ;;  %v8839_v38 = vadd.f32 %v14710_v9, %v8761_v57 }
 0x912   : > { %8904 = vst.msk [vmem:[%s14718_s13 + $0xf0] sm:$0xff] %vm1681_vm1, %v8872_v21  ;;  %v8873_v49 = vadd.f32 %v11909_v28, %v8841_v47 }
 0x913   : > { %8902 = vst.msk [vmem:[%s14718_s13 + $0xe0] sm:$0xff] %vm1681_vm1, %v8870_v20  ;;  %v8871_v1 = vadd.f32 %v11910_v19, %v8839_v38 }
 0x914   : > { %8905 = vst.msk [vmem:[%s14718_s13 + $0xf8] sm:$0xff] %vm1681_vm1, %v8873_v49 }
 0x915   : > { %8903 = vst.msk [vmem:[%s14718_s13 + $0xe8] sm:$0xff] %vm1681_vm1, %v8871_v1 }
 0x916 PF: > { %s19_s30 = sadd.s32 1, %s11917_s30  }
 0x917   : > { %p16_p4 = scmp.ge.s32.totalorder %s19_s30, 4  }
 0x919   :  { %18 = sbr.rel (!%p16_p4) target bundleno = 1 (0x1), region = 117 }

</bundles_post_ra>
